<compile_context>
chip_gen: v7x
topology: tpu7x:2x2x1
jax: 0.10.0
libtpu: 0.0.40
codegen_flags: <defaults>
</compile_context>

<pallas_src>
import functools

import jax
import jax.numpy as jnp
from jax.experimental import pallas as pl
from jax.experimental.pallas import tpu as pltpu


def _downblock_kernel(norm, pool, fold_all, alpha, eps, KH, KW, Cin, W, OH, OW, *refs):
    # refs = x, w, b, [gamma, beta], out
    if norm:
        x_ref, w_ref, b_ref, g_ref, bt_ref, o_ref = refs
    else:
        x_ref, w_ref, b_ref, o_ref = refs

    Cp = w_ref.shape[-1]
    R = OH * W                       # flat rows: r = oh*W + ow ; ow >= OW columns are scrap
    KC = KW * Cin

    # ---- conv: taps folded into the MXU contraction dimension ----
    if fold_all:
        # (R, KH*KW*Cin) LHS built in VMEM from flat-shifted windows; single MXU dot.
        lhs = jnp.concatenate(
            [x_ref[0, kh * W + kw:kh * W + kw + R, :]
             for kh in range(KH) for kw in range(KW)], axis=-1)
        acc = jnp.dot(lhs, w_ref[...], preferred_element_type=jnp.float32)
    else:
        # Fold kw only: KH dots with K = KW*Cin; accumulator initialized by the first dot.
        acc = None
        for kh in range(KH):
            lhs = jnp.concatenate(
                [x_ref[0, kh * W + kw:kh * W + kw + R, :] for kw in range(KW)], axis=-1)
            part = jnp.dot(lhs, w_ref[kh * KC:(kh + 1) * KC, :],
                           preferred_element_type=jnp.float32)
            acc = part if acc is None else acc + part

    y = acc + b_ref[...]                                           # (R, Cp) f32

    if norm:
        # InstanceNorm2d over the OH*OW valid positions; single-pass sum / sum-of-squares.
        col = jax.lax.broadcasted_iota(jnp.int32, (R, 1), 0) % W
        mask = jnp.where(col < OW, 1.0, 0.0)                       # zero the ow >= OW scrap cols
        inv_n = 1.0 / float(OH * OW)
        ym = y * mask
        s1 = jnp.sum(ym, axis=0, keepdims=True)                    # (1, Cp)
        s2 = jnp.sum(ym * y, axis=0, keepdims=True)                # (1, Cp)
        mu = s1 * inv_n
        var = s2 * inv_n - mu * mu                                 # biased variance
        y = (y - mu) * jax.lax.rsqrt(var + eps)                    # rsqrt -> EUP slot
        y = y * g_ref[...] + bt_ref[...]

    # LeakyReLU(0.2), f32 on the VPU.
    y = jnp.where(y >= 0.0, y, alpha * y)

    if pool:
        # 2x2 average pool, no full-size scratch:
        #   vertical pairs -> contiguous sublane-slice add
        #   horizontal pairs -> fold adjacent columns into lanes (2*Cp) and add lane halves.
        PH, PW = OH // 2, OW // 2
        y3 = y[0:PH * 2 * W, :].reshape(PH, 2 * W, Cp)
        vs = y3[:, 0:W, :] + y3[:, W:2 * W, :]                     # (PH, W, Cp): oh=2p + oh=2p+1
        hs = vs[:, 0:2 * PW, :].reshape(PH, PW, 2 * Cp)            # pair ow=2q / 2q+1 along lanes
        pooled = (hs[:, :, 0:Cp] + hs[:, :, Cp:2 * Cp]) * 0.25     # (PH, PW, Cp)
        o_ref[0] = pooled.astype(o_ref.dtype)                      # one aligned full-block store
    else:
        o_ref[0] = y.astype(o_ref.dtype)


def down_block_2d(x, w, b, gamma, beta, *, norm=False, pool=False, alpha=0.2, eps=1e-5,
                  compute_dtype=jnp.bfloat16, out_dtype=None):
    """x: (N, Cin, H, W) NCHW, w: (Cout, Cin, KH, KW) (PyTorch layouts)."""
    N, Cin, H, W = x.shape
    Cout, Cin_w, KH, KW = w.shape
    assert Cin_w == Cin
    OH, OW = H - KH + 1, W - KW + 1
    assert OH >= 1 and OW >= 1
    if pool:
        # AvgPool2d(2, 2) drops odd trailing rows/cols; requires at least a 2x2 conv output.
        assert OH >= 2 and OW >= 2, "avg_pool2d(2,2) needs OH, OW >= 2"
    out_dtype = compute_dtype if out_dtype is None else out_dtype

    LANE = 128
    Cp = ((Cout + LANE - 1) // LANE) * LANE                       # lane-dense channel padding

    R = OH * W
    K = KH * KW * Cin
    cd_size = jnp.dtype(compute_dtype).itemsize
    row_align = 16 if cd_size == 2 else 8                         # bf16 packs 16 rows / sublane grp
    rpad = ((H * W + KW - 1 + row_align - 1) // row_align) * row_align

    # ---- glue: NHWC flatten (no im2col in HBM), pad tail rows for the flat-shift windows ----
    x_flat = jnp.transpose(x, (0, 2, 3, 1)).reshape(N, H * W, Cin)
    x_flat = jnp.pad(x_flat, ((0, 0), (0, rpad - H * W), (0, 0))).astype(compute_dtype)

    # Weight as (KH*KW*Cin, Cp); per-channel params padded to Cp.
    wmat = jnp.transpose(w, (2, 3, 1, 0)).reshape(K, Cout)
    wmat = jnp.pad(wmat, ((0, 0), (0, Cp - Cout))).astype(compute_dtype)
    b2 = jnp.pad(b.reshape(1, Cout), ((0, 0), (0, Cp - Cout))).astype(jnp.float32)
    args = [x_flat, wmat, b2]
    if norm:
        g2 = jnp.pad(gamma.reshape(1, Cout), ((0, 0), (0, Cp - Cout))).astype(jnp.float32)
        bt2 = jnp.pad(beta.reshape(1, Cout), ((0, 0), (0, Cp - Cout))).astype(jnp.float32)
        args += [g2, bt2]

    if pool:
        PH, PW = OH // 2, OW // 2
        out_shape = jax.ShapeDtypeStruct((N, PH, PW, Cp), out_dtype)
        out_spec = pl.BlockSpec((1, PH, PW, Cp), lambda n: (n, 0, 0, 0))
        out_rows = PH * PW
    else:
        out_shape = jax.ShapeDtypeStruct((N, R, Cp), out_dtype)
        out_spec = pl.BlockSpec((1, R, Cp), lambda n: (n, 0, 0))
        out_rows = R

    # Fold all taps into one dot when the in-VMEM LHS stays small; otherwise fold kw only.
    fold_all = (R * K * cd_size) <= (8 << 20)

    # VMEM limit: size from the actual per-step working set, clamped to the chip's capacity.
    need = (2 * rpad * Cin * cd_size                              # input block (double-buffered)
            + K * Cp * cd_size + 3 * Cp * 4                       # resident weights / params
            + 2 * out_rows * Cp * jnp.dtype(out_dtype).itemsize   # output block
            + R * (K if fold_all else KW * Cin) * cd_size         # in-VMEM folded LHS
            + 6 * R * Cp * 4                                      # f32 acc / activation temps
            + (2 << 20))
    try:
        cap = int(pltpu.get_tpu_info().vmem_capacity_bytes)
    except Exception:
        cap = 64 * 1024 * 1024
    vmem_limit = int(min(max(need, 32 << 20), int(cap * 0.9)))

    kernel = functools.partial(_downblock_kernel, norm, pool, fold_all,
                               alpha, eps, KH, KW, Cin, W, OH, OW)

    def _in_specs(single_buffer):
        kw_res = {"pipeline_mode": pl.Buffered(1)} if single_buffer else {}
        specs = [
            pl.BlockSpec((1, rpad, Cin), lambda n: (n, 0, 0)),
            pl.BlockSpec((K, Cp), lambda n: (0, 0), **kw_res),     # weights resident across grid
            pl.BlockSpec((1, Cp), lambda n: (0, 0), **kw_res),     # bias
        ]
        if norm:
            specs.append(pl.BlockSpec((1, Cp), lambda n: (0, 0), **kw_res))   # gamma
            specs.append(pl.BlockSpec((1, Cp), lambda n: (0, 0), **kw_res))   # beta
        return specs

    def _run(single_buffer):
        return pl.pallas_call(
            kernel,
            out_shape=out_shape,
            grid=(N,),
            in_specs=_in_specs(single_buffer),
            out_specs=out_spec,
            compiler_params=pltpu.CompilerParams(
                dimension_semantics=("parallel",),
                vmem_limit_bytes=vmem_limit),
        )(*args)

    try:
        out = _run(True)          # grid-constant operands single-buffered (saves VMEM)
    except Exception:
        out = _run(False)         # fallback if pl.Buffered(1) is unsupported in this jax

    # ---- glue: strip channel/width padding, back to NCHW ----
    if pool:
        out = out[:, :, :, :Cout]
    else:
        out = out.reshape(N, OH, W, Cp)[:, :, :OW, :Cout]
    return jnp.transpose(out, (0, 3, 1, 2))


def reference(x, w, b, gamma, beta, *, norm=False, pool=False, alpha=0.2, eps=1e-5):
    """Pure-JAX reference matching PyTorch semantics (f32, HIGHEST-precision conv)."""
    y = jax.lax.conv_general_dilated(
        x, w, window_strides=(1, 1), padding="VALID",
        dimension_numbers=("NCHW", "OIHW", "NCHW"),
        precision=jax.lax.Precision.HIGHEST)
    y = y + b[None, :, None, None]
    if norm:
        mu = jnp.mean(y, axis=(2, 3), keepdims=True)
        var = jnp.var(y, axis=(2, 3), keepdims=True)
        y = (y - mu) / jnp.sqrt(var + eps)
        y = y * gamma[None, :, None, None] + beta[None, :, None, None]
    y = jnp.where(y >= 0.0, y, alpha * y)
    if pool:
        n, c, h, ww = y.shape
        ph, pw = h // 2, ww // 2
        y = y[:, :, :ph * 2, :pw * 2].reshape(n, c, ph, 2, pw, 2).mean(axis=(3, 5))
    return y


if __name__ == "__main__":
    key = jax.random.PRNGKey(0)
    kx, kw_, kb, kg, kbt = jax.random.split(key, 5)

    N, Cin, H, W = 2, 4, 16, 16
    Cout, KS = 8, 4

    x = jax.random.normal(kx, (N, Cin, H, W), jnp.float32)
    w = 0.1 * jax.random.normal(kw_, (Cout, Cin, KS, KS), jnp.float32)
    b = 0.1 * jax.random.normal(kb, (Cout,), jnp.float32)
    gamma = 1.0 + 0.1 * jax.random.normal(kg, (Cout,), jnp.float32)
    beta = 0.1 * jax.random.normal(kbt, (Cout,), jnp.float32)

    ok = True

    # f32 operands + f32 output: structural check of conv/norm/pool indexing.
    for norm, pool in [(False, False), (False, True), (True, False), (True, True)]:
        out = down_block_2d(x, w, b, gamma, beta, norm=norm, pool=pool,
                            compute_dtype=jnp.float32)
        out = jax.block_until_ready(out)
        ref = reference(x, w, b, gamma, beta, norm=norm, pool=pool)
        ok = ok and bool(jnp.allclose(out, ref, rtol=1e-2, atol=1e-2))

    # bf16 fast path (bf16 MXU operands, f32 accumulation/stats, bf16 output): compare against a
    # reference fed with bf16-rounded x/w so only the kernel's f32-accumulated path is checked.
    xq = x.astype(jnp.bfloat16).astype(jnp.float32)
    wq = w.astype(jnp.bfloat16).astype(jnp.float32)
    for norm, pool in [(False, False), (True, True)]:
        out = down_block_2d(x, w, b, gamma, beta, norm=norm, pool=pool)
        out = jax.block_until_ready(out).astype(jnp.float32)
        ref = reference(xq, wq, b, gamma, beta, norm=norm, pool=pool)
        ok = ok and bool(jnp.allclose(out, ref, rtol=2e-2, atol=2e-2))

    print("KERNEL_OK" if ok else "MISMATCH")
</pallas_src>

<mosaic_0001>
module attributes {stable_mosaic.version = 11 : i64} {
  func.func @_downblock_kernel(%arg0: i32, %arg1: memref<1x264x4xf32, #tpu.memory_space<vmem>>, %arg2: memref<64x128xf32, #tpu.memory_space<vmem>>, %arg3: memref<1x128xf32, #tpu.memory_space<vmem>>, %arg4: memref<1x208x128xf32, #tpu.memory_space<vmem>>) attributes {dimension_semantics = [#tpu.dimension_semantics<parallel>], iteration_bounds = array<i64: 2>, scalar_prefetch = 0 : i64, scratch_operands = 0 : i64, tpu.core_type = #tpu.core_type<tc>, window_params = [{transform_indices = @transform_0, window_bounds = array<i64: 1, 264, 4>}, {pipeline_mode = #tpu.pipeline_mode<synchronous>, transform_indices = @transform_1, window_bounds = array<i64: 64, 128>}, {pipeline_mode = #tpu.pipeline_mode<synchronous>, transform_indices = @transform_2, window_bounds = array<i64: 1, 128>}, {transform_indices = @transform_3, window_bounds = array<i64: 1, 208, 128>}]} {
    %c0 = arith.constant 0 : index
    %c0_0 = arith.constant 0 : index
    %c0_1 = arith.constant 0 : index
    %0 = vector.load %arg1[%c0, %c0_0, %c0_1] : memref<1x264x4xf32, #tpu.memory_space<vmem>>, vector<1x208x4xf32>
    %1 = vector.shape_cast %0 : vector<1x208x4xf32> to vector<208x4xf32>
    %c0_2 = arith.constant 0 : index
    %c1 = arith.constant 1 : index
    %c0_3 = arith.constant 0 : index
    %2 = vector.load %arg1[%c0_2, %c1, %c0_3] : memref<1x264x4xf32, #tpu.memory_space<vmem>>, vector<1x208x4xf32>
    %3 = vector.shape_cast %2 : vector<1x208x4xf32> to vector<208x4xf32>
    %c0_4 = arith.constant 0 : index
    %c2 = arith.constant 2 : index
    %c0_5 = arith.constant 0 : index
    %4 = vector.load %arg1[%c0_4, %c2, %c0_5] : memref<1x264x4xf32, #tpu.memory_space<vmem>>, vector<1x208x4xf32>
    %5 = vector.shape_cast %4 : vector<1x208x4xf32> to vector<208x4xf32>
    %c0_6 = arith.constant 0 : index
    %c3 = arith.constant 3 : index
    %c0_7 = arith.constant 0 : index
    %6 = vector.load %arg1[%c0_6, %c3, %c0_7] : memref<1x264x4xf32, #tpu.memory_space<vmem>>, vector<1x208x4xf32>
    %7 = vector.shape_cast %6 : vector<1x208x4xf32> to vector<208x4xf32>
    %c0_8 = arith.constant 0 : index
    %c16 = arith.constant 16 : index
    %c0_9 = arith.constant 0 : index
    %8 = vector.load %arg1[%c0_8, %c16, %c0_9] : memref<1x264x4xf32, #tpu.memory_space<vmem>>, vector<1x208x4xf32>
    %9 = vector.shape_cast %8 : vector<1x208x4xf32> to vector<208x4xf32>
    %c0_10 = arith.constant 0 : index
    %c17 = arith.constant 17 : index
    %c0_11 = arith.constant 0 : index
    %10 = vector.load %arg1[%c0_10, %c17, %c0_11] : memref<1x264x4xf32, #tpu.memory_space<vmem>>, vector<1x208x4xf32>
    %11 = vector.shape_cast %10 : vector<1x208x4xf32> to vector<208x4xf32>
    %c0_12 = arith.constant 0 : index
    %c18 = arith.constant 18 : index
    %c0_13 = arith.constant 0 : index
    %12 = vector.load %arg1[%c0_12, %c18, %c0_13] : memref<1x264x4xf32, #tpu.memory_space<vmem>>, vector<1x208x4xf32>
    %13 = vector.shape_cast %12 : vector<1x208x4xf32> to vector<208x4xf32>
    %c0_14 = arith.constant 0 : index
    %c19 = arith.constant 19 : index
    %c0_15 = arith.constant 0 : index
    %14 = vector.load %arg1[%c0_14, %c19, %c0_15] : memref<1x264x4xf32, #tpu.memory_space<vmem>>, vector<1x208x4xf32>
    %15 = vector.shape_cast %14 : vector<1x208x4xf32> to vector<208x4xf32>
    %c0_16 = arith.constant 0 : index
    %c32 = arith.constant 32 : index
    %c0_17 = arith.constant 0 : index
    %16 = vector.load %arg1[%c0_16, %c32, %c0_17] : memref<1x264x4xf32, #tpu.memory_space<vmem>>, vector<1x208x4xf32>
    %17 = vector.shape_cast %16 : vector<1x208x4xf32> to vector<208x4xf32>
    %c0_18 = arith.constant 0 : index
    %c33 = arith.constant 33 : index
    %c0_19 = arith.constant 0 : index
    %18 = vector.load %arg1[%c0_18, %c33, %c0_19] : memref<1x264x4xf32, #tpu.memory_space<vmem>>, vector<1x208x4xf32>
    %19 = vector.shape_cast %18 : vector<1x208x4xf32> to vector<208x4xf32>
    %c0_20 = arith.constant 0 : index
    %c34 = arith.constant 34 : index
    %c0_21 = arith.constant 0 : index
    %20 = vector.load %arg1[%c0_20, %c34, %c0_21] : memref<1x264x4xf32, #tpu.memory_space<vmem>>, vector<1x208x4xf32>
    %21 = vector.shape_cast %20 : vector<1x208x4xf32> to vector<208x4xf32>
    %c0_22 = arith.constant 0 : index
    %c35 = arith.constant 35 : index
    %c0_23 = arith.constant 0 : index
    %22 = vector.load %arg1[%c0_22, %c35, %c0_23] : memref<1x264x4xf32, #tpu.memory_space<vmem>>, vector<1x208x4xf32>
    %23 = vector.shape_cast %22 : vector<1x208x4xf32> to vector<208x4xf32>
    %c0_24 = arith.constant 0 : index
    %c48 = arith.constant 48 : index
    %c0_25 = arith.constant 0 : index
    %24 = vector.load %arg1[%c0_24, %c48, %c0_25] : memref<1x264x4xf32, #tpu.memory_space<vmem>>, vector<1x208x4xf32>
    %25 = vector.shape_cast %24 : vector<1x208x4xf32> to vector<208x4xf32>
    %c0_26 = arith.constant 0 : index
    %c49 = arith.constant 49 : index
    %c0_27 = arith.constant 0 : index
    %26 = vector.load %arg1[%c0_26, %c49, %c0_27] : memref<1x264x4xf32, #tpu.memory_space<vmem>>, vector<1x208x4xf32>
    %27 = vector.shape_cast %26 : vector<1x208x4xf32> to vector<208x4xf32>
    %c0_28 = arith.constant 0 : index
    %c50 = arith.constant 50 : index
    %c0_29 = arith.constant 0 : index
    %28 = vector.load %arg1[%c0_28, %c50, %c0_29] : memref<1x264x4xf32, #tpu.memory_space<vmem>>, vector<1x208x4xf32>
    %29 = vector.shape_cast %28 : vector<1x208x4xf32> to vector<208x4xf32>
    %c0_30 = arith.constant 0 : index
    %c51 = arith.constant 51 : index
    %c0_31 = arith.constant 0 : index
    %30 = vector.load %arg1[%c0_30, %c51, %c0_31] : memref<1x264x4xf32, #tpu.memory_space<vmem>>, vector<1x208x4xf32>
    %31 = vector.shape_cast %30 : vector<1x208x4xf32> to vector<208x4xf32>
    %32 = tpu.concatenate %1, %3, %5, %7, %9, %11, %13, %15, %17, %19, %21, %23, %25, %27, %29, %31 in 1 : vector<208x4xf32>, vector<208x4xf32>, vector<208x4xf32>, vector<208x4xf32>, vector<208x4xf32>, vector<208x4xf32>, vector<208x4xf32>, vector<208x4xf32>, vector<208x4xf32>, vector<208x4xf32>, vector<208x4xf32>, vector<208x4xf32>, vector<208x4xf32>, vector<208x4xf32>, vector<208x4xf32>, vector<208x4xf32> -> vector<208x64xf32>
    %c0_32 = arith.constant 0 : index
    %c0_33 = arith.constant 0 : index
    %33 = vector.load %arg2[%c0_32, %c0_33] : memref<64x128xf32, #tpu.memory_space<vmem>>, vector<64x128xf32>
    %cst = arith.constant dense<0.000000e+00> : vector<208x128xf32>
    %34 = tpu.matmul %32, %33, %cst {dimension_numbers = #tpu.dot_dimension_numbers<[1], [0], [0], [1], [0, 0, 1, 1], [], []>} : vector<208x64xf32>, vector<64x128xf32>, vector<208x128xf32> -> vector<208x128xf32>
    %c0_34 = arith.constant 0 : index
    %c0_35 = arith.constant 0 : index
    %35 = vector.load %arg3[%c0_34, %c0_35] : memref<1x128xf32, #tpu.memory_space<vmem>>, vector<1x128xf32>
    %36 = vector.broadcast %35 : vector<1x128xf32> to vector<208x128xf32>
    %37 = arith.addf %34, %36 : vector<208x128xf32>
    %cst_36 = arith.constant 0.000000e+00 : f32
    %38 = vector.broadcast %cst_36 : f32 to vector<208x128xf32>
    %39 = arith.cmpf oge, %37, %38 : vector<208x128xf32>
    %cst_37 = arith.constant 2.000000e-01 : f32
    %40 = vector.broadcast %cst_37 : f32 to vector<208x128xf32>
    %41 = arith.mulf %40, %37 : vector<208x128xf32>
    %42 = arith.select %39, %37, %41 : vector<208x128xi1>, vector<208x128xf32>
    %c0_38 = arith.constant 0 : index
    %c0_39 = arith.constant 0 : index
    %c0_40 = arith.constant 0 : index
    %43 = vector.load %arg4[%c0_38, %c0_39, %c0_40] : memref<1x208x128xf32, #tpu.memory_space<vmem>>, vector<1x208x128xf32>
    %44 = vector.shape_cast %43 : vector<1x208x128xf32> to vector<208x128xf32>
    %45 = vector.shape_cast %42 : vector<208x128xf32> to vector<1x208x128xf32>
    tpu.vector_store %arg4[%c0_38, %c0_39, %c0_40], %45 {strides = array<i32>} : memref<1x208x128xf32, #tpu.memory_space<vmem>>, vector<1x208x128xf32>,
    return
  }
  func.func @transform_0(%arg0: i32) -> (i32, i32, i32) {
    %c0_i32 = arith.constant 0 : i32
    %c0_i32_0 = arith.constant 0 : i32
    %c0_i32_1 = arith.constant 0 : i32
    return %arg0, %c0_i32, %c0_i32_0 : i32, i32, i32
  }
  func.func @transform_1(%arg0: i32) -> (i32, i32) {
    %c0_i32 = arith.constant 0 : i32
    %c0_i32_0 = arith.constant 0 : i32
    %c0_i32_1 = arith.constant 0 : i32
    return %c0_i32, %c0_i32_0 : i32, i32
  }
  func.func @transform_2(%arg0: i32) -> (i32, i32) {
    %c0_i32 = arith.constant 0 : i32
    %c0_i32_0 = arith.constant 0 : i32
    %c0_i32_1 = arith.constant 0 : i32
    return %c0_i32, %c0_i32_0 : i32, i32
  }
  func.func @transform_3(%arg0: i32) -> (i32, i32, i32) {
    %c0_i32 = arith.constant 0 : i32
    %c0_i32_0 = arith.constant 0 : i32
    %c0_i32_1 = arith.constant 0 : i32
    return %arg0, %c0_i32, %c0_i32_0 : i32, i32, i32
  }
}

module attributes {stable_mosaic.version = 11 : i64} {
  func.func @_downblock_kernel(%arg0: i32, %arg1: memref<1x264x4xf32, #tpu.memory_space<vmem>>, %arg2: memref<64x128xf32, #tpu.memory_space<vmem>>, %arg3: memref<1x128xf32, #tpu.memory_space<vmem>>, %arg4: memref<1x208x128xf32, #tpu.memory_space<vmem>>) attributes {dimension_semantics = [#tpu.dimension_semantics<parallel>], iteration_bounds = array<i64: 2>, scalar_prefetch = 0 : i64, scratch_operands = 0 : i64, tpu.core_type = #tpu.core_type<tc>, window_params = [{transform_indices = @transform_0, window_bounds = array<i64: 1, 264, 4>}, {pipeline_mode = #tpu.pipeline_mode<synchronous>, transform_indices = @transform_1, window_bounds = array<i64: 64, 128>}, {pipeline_mode = #tpu.pipeline_mode<synchronous>, transform_indices = @transform_2, window_bounds = array<i64: 1, 128>}, {transform_indices = @transform_3, window_bounds = array<i64: 1, 208, 128>}]} {
    %c0 = arith.constant 0 : index
    %c0_0 = arith.constant 0 : index
    %c0_1 = arith.constant 0 : index
    %0 = vector.load %arg1[%c0, %c0_0, %c0_1] : memref<1x264x4xf32, #tpu.memory_space<vmem>>, vector<1x208x4xf32>
    %1 = vector.shape_cast %0 : vector<1x208x4xf32> to vector<208x4xf32>
    %c0_2 = arith.constant 0 : index
    %c1 = arith.constant 1 : index
    %c0_3 = arith.constant 0 : index
    %2 = vector.load %arg1[%c0_2, %c1, %c0_3] : memref<1x264x4xf32, #tpu.memory_space<vmem>>, vector<1x208x4xf32>
    %3 = vector.shape_cast %2 : vector<1x208x4xf32> to vector<208x4xf32>
    %c0_4 = arith.constant 0 : index
    %c2 = arith.constant 2 : index
    %c0_5 = arith.constant 0 : index
    %4 = vector.load %arg1[%c0_4, %c2, %c0_5] : memref<1x264x4xf32, #tpu.memory_space<vmem>>, vector<1x208x4xf32>
    %5 = vector.shape_cast %4 : vector<1x208x4xf32> to vector<208x4xf32>
    %c0_6 = arith.constant 0 : index
    %c3 = arith.constant 3 : index
    %c0_7 = arith.constant 0 : index
    %6 = vector.load %arg1[%c0_6, %c3, %c0_7] : memref<1x264x4xf32, #tpu.memory_space<vmem>>, vector<1x208x4xf32>
    %7 = vector.shape_cast %6 : vector<1x208x4xf32> to vector<208x4xf32>
    %c0_8 = arith.constant 0 : index
    %c16 = arith.constant 16 : index
    %c0_9 = arith.constant 0 : index
    %8 = vector.load %arg1[%c0_8, %c16, %c0_9] : memref<1x264x4xf32, #tpu.memory_space<vmem>>, vector<1x208x4xf32>
    %9 = vector.shape_cast %8 : vector<1x208x4xf32> to vector<208x4xf32>
    %c0_10 = arith.constant 0 : index
    %c17 = arith.constant 17 : index
    %c0_11 = arith.constant 0 : index
    %10 = vector.load %arg1[%c0_10, %c17, %c0_11] : memref<1x264x4xf32, #tpu.memory_space<vmem>>, vector<1x208x4xf32>
    %11 = vector.shape_cast %10 : vector<1x208x4xf32> to vector<208x4xf32>
    %c0_12 = arith.constant 0 : index
    %c18 = arith.constant 18 : index
    %c0_13 = arith.constant 0 : index
    %12 = vector.load %arg1[%c0_12, %c18, %c0_13] : memref<1x264x4xf32, #tpu.memory_space<vmem>>, vector<1x208x4xf32>
    %13 = vector.shape_cast %12 : vector<1x208x4xf32> to vector<208x4xf32>
    %c0_14 = arith.constant 0 : index
    %c19 = arith.constant 19 : index
    %c0_15 = arith.constant 0 : index
    %14 = vector.load %arg1[%c0_14, %c19, %c0_15] : memref<1x264x4xf32, #tpu.memory_space<vmem>>, vector<1x208x4xf32>
    %15 = vector.shape_cast %14 : vector<1x208x4xf32> to vector<208x4xf32>
    %c0_16 = arith.constant 0 : index
    %c32 = arith.constant 32 : index
    %c0_17 = arith.constant 0 : index
    %16 = vector.load %arg1[%c0_16, %c32, %c0_17] : memref<1x264x4xf32, #tpu.memory_space<vmem>>, vector<1x208x4xf32>
    %17 = vector.shape_cast %16 : vector<1x208x4xf32> to vector<208x4xf32>
    %c0_18 = arith.constant 0 : index
    %c33 = arith.constant 33 : index
    %c0_19 = arith.constant 0 : index
    %18 = vector.load %arg1[%c0_18, %c33, %c0_19] : memref<1x264x4xf32, #tpu.memory_space<vmem>>, vector<1x208x4xf32>
    %19 = vector.shape_cast %18 : vector<1x208x4xf32> to vector<208x4xf32>
    %c0_20 = arith.constant 0 : index
    %c34 = arith.constant 34 : index
    %c0_21 = arith.constant 0 : index
    %20 = vector.load %arg1[%c0_20, %c34, %c0_21] : memref<1x264x4xf32, #tpu.memory_space<vmem>>, vector<1x208x4xf32>
    %21 = vector.shape_cast %20 : vector<1x208x4xf32> to vector<208x4xf32>
    %c0_22 = arith.constant 0 : index
    %c35 = arith.constant 35 : index
    %c0_23 = arith.constant 0 : index
    %22 = vector.load %arg1[%c0_22, %c35, %c0_23] : memref<1x264x4xf32, #tpu.memory_space<vmem>>, vector<1x208x4xf32>
    %23 = vector.shape_cast %22 : vector<1x208x4xf32> to vector<208x4xf32>
    %c0_24 = arith.constant 0 : index
    %c48 = arith.constant 48 : index
    %c0_25 = arith.constant 0 : index
    %24 = vector.load %arg1[%c0_24, %c48, %c0_25] : memref<1x264x4xf32, #tpu.memory_space<vmem>>, vector<1x208x4xf32>
    %25 = vector.shape_cast %24 : vector<1x208x4xf32> to vector<208x4xf32>
    %c0_26 = arith.constant 0 : index
    %c49 = arith.constant 49 : index
    %c0_27 = arith.constant 0 : index
    %26 = vector.load %arg1[%c0_26, %c49, %c0_27] : memref<1x264x4xf32, #tpu.memory_space<vmem>>, vector<1x208x4xf32>
    %27 = vector.shape_cast %26 : vector<1x208x4xf32> to vector<208x4xf32>
    %c0_28 = arith.constant 0 : index
    %c50 = arith.constant 50 : index
    %c0_29 = arith.constant 0 : index
    %28 = vector.load %arg1[%c0_28, %c50, %c0_29] : memref<1x264x4xf32, #tpu.memory_space<vmem>>, vector<1x208x4xf32>
    %29 = vector.shape_cast %28 : vector<1x208x4xf32> to vector<208x4xf32>
    %c0_30 = arith.constant 0 : index
    %c51 = arith.constant 51 : index
    %c0_31 = arith.constant 0 : index
    %30 = vector.load %arg1[%c0_30, %c51, %c0_31] : memref<1x264x4xf32, #tpu.memory_space<vmem>>, vector<1x208x4xf32>
    %31 = vector.shape_cast %30 : vector<1x208x4xf32> to vector<208x4xf32>
    %32 = tpu.concatenate %1, %3, %5, %7, %9, %11, %13, %15, %17, %19, %21, %23, %25, %27, %29, %31 in 1 : vector<208x4xf32>, vector<208x4xf32>, vector<208x4xf32>, vector<208x4xf32>, vector<208x4xf32>, vector<208x4xf32>, vector<208x4xf32>, vector<208x4xf32>, vector<208x4xf32>, vector<208x4xf32>, vector<208x4xf32>, vector<208x4xf32>, vector<208x4xf32>, vector<208x4xf32>, vector<208x4xf32>, vector<208x4xf32> -> vector<208x64xf32>
    %c0_32 = arith.constant 0 : index
    %c0_33 = arith.constant 0 : index
    %33 = vector.load %arg2[%c0_32, %c0_33] : memref<64x128xf32, #tpu.memory_space<vmem>>, vector<64x128xf32>
    %cst = arith.constant dense<0.000000e+00> : vector<208x128xf32>
    %34 = tpu.matmul %32, %33, %cst {dimension_numbers = #tpu.dot_dimension_numbers<[1], [0], [0], [1], [0, 0, 1, 1], [], []>} : vector<208x64xf32>, vector<64x128xf32>, vector<208x128xf32> -> vector<208x128xf32>
    %c0_34 = arith.constant 0 : index
    %c0_35 = arith.constant 0 : index
    %35 = vector.load %arg3[%c0_34, %c0_35] : memref<1x128xf32, #tpu.memory_space<vmem>>, vector<1x128xf32>
    %36 = vector.broadcast %35 : vector<1x128xf32> to vector<208x128xf32>
    %37 = arith.addf %34, %36 : vector<208x128xf32>
    %cst_36 = arith.constant 0.000000e+00 : f32
    %38 = vector.broadcast %cst_36 : f32 to vector<208x128xf32>
    %39 = arith.cmpf oge, %37, %38 : vector<208x128xf32>
    %cst_37 = arith.constant 2.000000e-01 : f32
    %40 = vector.broadcast %cst_37 : f32 to vector<208x128xf32>
    %41 = arith.mulf %40, %37 : vector<208x128xf32>
    %42 = arith.select %39, %37, %41 : vector<208x128xi1>, vector<208x128xf32>
    %c0_38 = arith.constant 0 : index
    %c0_39 = arith.constant 0 : index
    %c0_40 = arith.constant 0 : index
    %43 = vector.load %arg4[%c0_38, %c0_39, %c0_40] : memref<1x208x128xf32, #tpu.memory_space<vmem>>, vector<1x208x128xf32>
    %44 = vector.shape_cast %43 : vector<1x208x128xf32> to vector<208x128xf32>
    %45 = vector.shape_cast %42 : vector<208x128xf32> to vector<1x208x128xf32>
    tpu.vector_store %arg4[%c0_38, %c0_39, %c0_40], %45 {strides = array<i32>} : memref<1x208x128xf32, #tpu.memory_space<vmem>>, vector<1x208x128xf32>,
    return
  }
  func.func @transform_0(%arg0: i32) -> (i32, i32, i32) {
    %c0_i32 = arith.constant 0 : i32
    %c0_i32_0 = arith.constant 0 : i32
    %c0_i32_1 = arith.constant 0 : i32
    return %arg0, %c0_i32, %c0_i32_0 : i32, i32, i32
  }
  func.func @transform_1(%arg0: i32) -> (i32, i32) {
    %c0_i32 = arith.constant 0 : i32
    %c0_i32_0 = arith.constant 0 : i32
    %c0_i32_1 = arith.constant 0 : i32
    return %c0_i32, %c0_i32_0 : i32, i32
  }
  func.func @transform_2(%arg0: i32) -> (i32, i32) {
    %c0_i32 = arith.constant 0 : i32
    %c0_i32_0 = arith.constant 0 : i32
    %c0_i32_1 = arith.constant 0 : i32
    return %c0_i32, %c0_i32_0 : i32, i32
  }
  func.func @transform_3(%arg0: i32) -> (i32, i32, i32) {
    %c0_i32 = arith.constant 0 : i32
    %c0_i32_0 = arith.constant 0 : i32
    %c0_i32_1 = arith.constant 0 : i32
    return %arg0, %c0_i32, %c0_i32_0 : i32, i32, i32
  }
}

</mosaic_0001>

<bundles_post_ra>
// kernel: tpu_custom_call.1
= control target key start
LH: loop header
LB: loop body
LE: loop exit
PB: predicated region body
PF: predicated region fallthrough
CT: control target
= control target key end

     0   :  { %8 = vsyncpa [#allocation3], 0  ;;  %s5503_s0 = inlined_call_operand.vmem [shape: f32[2,264,4], index: 0, kind: input, shape index: {}]   ;;  %s5504_s1 = inlined_call_operand.vmem [shape: f32[64,128], index: 1, kind: input, shape index: {}]   ;;  %s5505_s2 = inlined_call_operand.vmem [shape: f32[1,128], index: 2, kind: input, shape index: {}]   ;;  %s5506_s3 = inlined_call_operand.hbm [shape: f32[2,208,128], index: 3, kind: output, shape index: {}]  }
   0x1   :  { %10 = vsyncpa [#allocation3 + $0x1], 0  ;;  %s2870_s12 = smov 0   ;;  %s2872_s13 = smov 0  }
   0x2   :  { %s2874_s14 = smov 0   ;;  %s2876_s15 = smov 0  }
   0x3 LB: > { %s2891_s16 = sadd.s32 4294967295, %s2831_s15   ;;  %s2467_s17 = sadd.s32 4294967294, %s2831_s15   ;;  %s2831_s15 = sphi %s2876_s15, %s5796_s15   ;;  %s2827_s14 = sphi %s2874_s14, %s5795_s14   ;;  %s2823_s13 = sphi %s2872_s13, %s5794_s13   ;;  %s2819_s12 = sphi %s2870_s12, %s5793_s12  }
   0x4   : > { %s2895_s18 = sadd.s32 1, %s2831_s15   ;;  %s91_s19 = sadd.s32 1, %s2827_s14 }
   0x5   : > { %s88_s20 = ssub.s32 %s2831_s15, %s2895_s18  ;;  %p101_p0 = scmp.ne.s32.totalorder %s2827_s14, %s2823_s13 }
   0x6   : > { %p89_p1 = scmp.eq.s32.totalorder %s88_s20, 0  ;;  %p102_p2 = scmp.eq.s32.totalorder %s2891_s16, 1 }
   0x7   : > { %p107_p3 = scmp.ne.s32.totalorder %s2823_s13, %s2819_s12  ;;  %p108_p4 = scmp.eq.s32.totalorder %s2467_s17, 1 }
   0x8   : > { %s2906_s21 = scalar_select %p89_p1, %s2827_s14, %s91_s19  }
   0x9   : > { %p2908_p5 = por %p102_p2, %p101_p0  ;;  %p2912_p6 = por %p108_p4, %p107_p3 }
   0xa   : > { %p2470_p7 = scmp.ge.s32.totalorder %s2831_s15, 1  ;;  %p140_p8 = scmp.lt.s32.totalorder %s2831_s15, 3 }
   0xc   : > { %p141_p9 = pnand %p2470_p7, %p140_p8 }
   0xe   : > { %144 = sbr.rel (%p141_p9) target bundleno = 1155 (0x483), region = 32 }
  0x15   : > { %p164_p10 = scmp.lt.s32.totalorder %s2891_s16, 1  ;;  %s2833_s29 = smov 4   ;;  %vm1593_vm0 = vcmask 31744   ;;  %vm1620_vm1 = vcmask 64512   ;;  %vm1647_vm2 = vcmask 97280   ;;  %vm1674_vm3 = vcmask 130048  }
  0x16   : > { %s2834_s30 = smov 8   ;;  %s2835_s4 = smov 12   ;;  %vm1701_vm4 = vcmask 162816   ;;  %vm1728_vm5 = vcmask 195584   ;;  %vm1755_vm6 = vcmask 228352   ;;  %vm1782_vm7 = vcmask 261120  }
  0x17   : > { %s165_s24 = scalar_select %p164_p10, %s2891_s16, 1  ;;  %vm1809_vm8 = vcmask 293888   ;;  %vm1836_vm9 = vcmask 326656   ;;  %vm1863_vm10 = vcmask 359424   ;;  %vm1890_vm11 = vcmask 392192  }
  0x18   : > { %s2836_s5 = smov 16   ;;  %s2837_s6 = smov 20   ;;  %vm1917_vm12 = vcmask 424960   ;;  %vm1944_vm13 = vcmask 457728   ;;  %vm1971_vm14 = vcmask 490496   ;;  %vm2013_vm15 = vcmask 523264  }
  0x19   : > { %s2616_s25 = smul.u32 264, %s165_s24  ;;  %s2838_s7 = smov 24  }
  0x1a   : > { %s2839_s8 = smov 28   ;;  %s2840_s9 = smov 32  }
  0x1b   : > { %s2923_s28 = scalar_lea.vmem %s5503_s0, %s2616_s25  ;;  %s2841_s10 = smov 36  }
  0x1c   : > { %v2926_v0 = vld [vmem:[%s2923_s28 + $0x11] sm:$0xff]  ;;  %v195_v1 = vld [vmem:[%s2923_s28 + $0x1] sm:$0xff]  ;;  %v2933_v2 = vld [vmem:[%s2923_s28 + $0x19] sm:$0xff]  ;;  %s2842_s11 = smov 40   ;;  %s2843_s17 = smov 44  }
  0x1d   : > { %327 = vrot.lane.b32.xlu1 %v2926_v0, %s2833_s29  ;;  %323 = vrot.lane.b32.xlu0 %v195_v1, %s2833_s29  ;;  %v196_v3 = vld [vmem:[%s2923_s28 + $0x9] sm:$0xff]  ;;  %v2943_v5 = vld [vmem:[%s2923_s28 + $0x21] sm:$0xff]  ;;  %s2844_s19 = smov 48   ;;  %s2845_s27 = smov 52  }
  0x1e   : > { %v2940_v4 = vld [vmem:[%s2923_s28 + $0x29] sm:$0xff]  ;;  %v2950_v6 = vld [vmem:[%s2923_s28 + $0x39] sm:$0xff]  ;;  %v2953_v7 = vld [vmem:[%s2923_s28 + $0x31] sm:$0xff]  ;;  %s2846_s20 = smov 56  }
  0x1f   : > { %v2960_v8 = vld [vmem:[%s2923_s28 + $0x49] sm:$0xff]  ;;  %v2963_v9 = vld [vmem:[%s2923_s28 + $0x41] sm:$0xff]  ;;  %v2970_v10 = vld [vmem:[%s2923_s28 + $0x59] sm:$0xff] }
  0x20   : > { %v2973_v11 = vld [vmem:[%s2923_s28 + $0x51] sm:$0xff]  ;;  %v2980_v12 = vld [vmem:[%s2923_s28 + $0x69] sm:$0xff]  ;;  %v2983_v13 = vld [vmem:[%s2923_s28 + $0x61] sm:$0xff] }
  0x21   : > { %329 = vrot.lane.b32.xlu1 %v2933_v2, %s2833_s29  ;;  %325 = vrot.lane.b32.xlu0 %v196_v3, %s2833_s29  ;;  %v2990_v14 = vld [vmem:[%s2923_s28 + $0x79] sm:$0xff]  ;;  %v2993_v15 = vld [vmem:[%s2923_s28 + $0x71] sm:$0xff] }
  0x22   : > { %v3000_v16 = vld [vmem:[%s2923_s28 + $0x89] sm:$0xff]  ;;  %v3003_v17 = vld [vmem:[%s2923_s28 + $0x81] sm:$0xff]  ;;  %v3010_v18 = vld [vmem:[%s2923_s28 + $0x99] sm:$0xff] }
  0x23   : > { %v3013_v19 = vld [vmem:[%s2923_s28 + $0x91] sm:$0xff]  ;;  %v3020_v20 = vld [vmem:[%s2923_s28 + $0xa9] sm:$0xff]  ;;  %v3023_v21 = vld [vmem:[%s2923_s28 + $0xa1] sm:$0xff] }
  0x24   : > { %v3030_v22 = vld [vmem:[%s2923_s28 + $0xb9] sm:$0xff]  ;;  %v3033_v23 = vld [vmem:[%s2923_s28 + $0xb1] sm:$0xff]  ;;  %v3040_v24 = vld [vmem:[%s2923_s28 + $0xc9] sm:$0xff] }
  0x25   : > { %333 = vrot.lane.b32.xlu1 %v2940_v4, %s2833_s29  ;;  %331 = vrot.lane.b32.xlu0 %v2943_v5, %s2833_s29  ;;  %v3043_v25 = vld [vmem:[%s2923_s28 + $0xc1] sm:$0xff]  ;;  %v222_v26 = vld [vmem:[%s2923_s28 + $0xa] sm:$0xff] }
  0x26   : > { %v221_v27 = vld [vmem:[%s2923_s28 + $0x2] sm:$0xff]  ;;  %v3054_v28 = vld [vmem:[%s2923_s28 + $0x1a] sm:$0xff]  ;;  %v3057_v29 = vld [vmem:[%s2923_s28 + $0x12] sm:$0xff] }
  0x27   : > { %v3064_v30 = vld [vmem:[%s2923_s28 + $0x2a] sm:$0xff]  ;;  %v3067_v31 = vld [vmem:[%s2923_s28 + $0x22] sm:$0xff]  ;;  %v3074_v32 = vld [vmem:[%s2923_s28 + $0x3a] sm:$0xff] }
  0x28   : > { %5581 = vst [vmem:[#allocation5_spill] sm:$0xff] %v3074_v32  ;;  %v3077_v33 = vld [vmem:[%s2923_s28 + $0x32] sm:$0xff]  ;;  %v3084_v34 = vld [vmem:[%s2923_s28 + $0x4a] sm:$0xff]  ;;  %v3087_v35 = vld [vmem:[%s2923_s28 + $0x42] sm:$0xff] }
  0x29   : > { %337 = vrot.lane.b32.xlu1 %v2950_v6, %s2833_s29  ;;  %335 = vrot.lane.b32.xlu0 %v2953_v7, %s2833_s29  ;;  %5582 = vst [vmem:[#allocation6_spill] sm:$0xff] %v3077_v33  ;;  %5583 = vst [vmem:[#allocation7_spill] sm:$0xff] %v3084_v34  ;;  %v3094_v36 = vld [vmem:[%s2923_s28 + $0x5a] sm:$0xff]  ;;  %v3097_v37 = vld [vmem:[%s2923_s28 + $0x52] sm:$0xff] }
  0x2a   : > { %5584 = vst [vmem:[#allocation8_spill] sm:$0xff] %v3087_v35  ;;  %5585 = vst [vmem:[#allocation9_spill] sm:$0xff] %v3094_v36  ;;  %v3104_v38 = vld [vmem:[%s2923_s28 + $0x6a] sm:$0xff]  ;;  %v3107_v39 = vld [vmem:[%s2923_s28 + $0x62] sm:$0xff] }
  0x2b   : > { %5586 = vst [vmem:[#allocation10_spill] sm:$0xff] %v3097_v37  ;;  %5587 = vst [vmem:[#allocation11_spill] sm:$0xff] %v3104_v38  ;;  %v3114_v40 = vld [vmem:[%s2923_s28 + $0x7a] sm:$0xff]  ;;  %v3117_v41 = vld [vmem:[%s2923_s28 + $0x72] sm:$0xff] }
  0x2c   : > { %5588 = vst [vmem:[#allocation12_spill] sm:$0xff] %v3107_v39  ;;  %5589 = vst [vmem:[#allocation13_spill] sm:$0xff] %v3114_v40  ;;  %v3124_v42 = vld [vmem:[%s2923_s28 + $0x8a] sm:$0xff]  ;;  %v3127_v43 = vld [vmem:[%s2923_s28 + $0x82] sm:$0xff] }
  0x2d   : > { %341 = vrot.lane.b32.xlu1 %v2960_v8, %s2833_s29  ;;  %339 = vrot.lane.b32.xlu0 %v2963_v9, %s2833_s29  ;;  %5590 = vst [vmem:[#allocation14_spill] sm:$0xff] %v3117_v41  ;;  %5591 = vst [vmem:[#allocation15_spill] sm:$0xff] %v3124_v42  ;;  %v3134_v44 = vld [vmem:[%s2923_s28 + $0x9a] sm:$0xff]  ;;  %v3137_v45 = vld [vmem:[%s2923_s28 + $0x92] sm:$0xff] }
  0x2e   : > { %5592 = vst [vmem:[#allocation16_spill] sm:$0xff] %v3127_v43  ;;  %5593 = vst [vmem:[#allocation17_spill] sm:$0xff] %v3134_v44  ;;  %v3144_v46 = vld [vmem:[%s2923_s28 + $0xaa] sm:$0xff]  ;;  %v3147_v47 = vld [vmem:[%s2923_s28 + $0xa2] sm:$0xff] }
  0x2f   : > { %5594 = vst [vmem:[#allocation18_spill] sm:$0xff] %v3137_v45  ;;  %5595 = vst [vmem:[#allocation19_spill] sm:$0xff] %v3144_v46  ;;  %v3154_v48 = vld [vmem:[%s2923_s28 + $0xba] sm:$0xff]  ;;  %v3157_v49 = vld [vmem:[%s2923_s28 + $0xb2] sm:$0xff] }
  0x30   : > { %5596 = vst [vmem:[#allocation20_spill] sm:$0xff] %v3147_v47  ;;  %5597 = vst [vmem:[#allocation21_spill] sm:$0xff] %v3154_v48  ;;  %v3164_v50 = vld [vmem:[%s2923_s28 + $0xca] sm:$0xff]  ;;  %v3167_v51 = vld [vmem:[%s2923_s28 + $0xc2] sm:$0xff] }
  0x31   : > { %345 = vrot.lane.b32.xlu1 %v2970_v10, %s2833_s29  ;;  %343 = vrot.lane.b32.xlu0 %v2973_v11, %s2833_s29  ;;  %5598 = vst [vmem:[#allocation22_spill] sm:$0xff] %v3157_v49  ;;  %5599 = vst [vmem:[#allocation23_spill] sm:$0xff] %v3164_v50  ;;  %v248_v52 = vld [vmem:[%s2923_s28 + $0xb] sm:$0xff]  ;;  %v247_v53 = vld [vmem:[%s2923_s28 + $0x3] sm:$0xff] }
  0x32   : > { %5600 = vst [vmem:[#allocation24_spill] sm:$0xff] %v3167_v51  ;;  %v3178_v54 = vld [vmem:[%s2923_s28 + $0x1b] sm:$0xff]  ;;  %v3181_v55 = vld [vmem:[%s2923_s28 + $0x13] sm:$0xff]  ;;  %v3188_v56 = vld [vmem:[%s2923_s28 + $0x2b] sm:$0xff] }
  0x33   : > { %5601 = vst [vmem:[#allocation25_spill] sm:$0xff] %v3178_v54  ;;  %5602 = vst [vmem:[#allocation26_spill] sm:$0xff] %v3181_v55  ;;  %v3191_v57 = vld [vmem:[%s2923_s28 + $0x23] sm:$0xff]  ;;  %v3198_v58 = vld [vmem:[%s2923_s28 + $0x3b] sm:$0xff] }
  0x34   : > { %5603 = vst [vmem:[#allocation27_spill] sm:$0xff] %v3188_v56  ;;  %5604 = vst [vmem:[#allocation28_spill] sm:$0xff] %v3191_v57  ;;  %v3201_v59 = vld [vmem:[%s2923_s28 + $0x33] sm:$0xff]  ;;  %v3212_v62 = vld [vmem:[%s2923_s28 + $0x4b] sm:$0xff] }
  0x35   : > { %349 = vrot.lane.b32.xlu1 %v2980_v12, %s2833_s29  ;;  %347 = vrot.lane.b32.xlu0 %v2983_v13, %s2833_s29  ;;  %5605 = vst [vmem:[#allocation29_spill] sm:$0xff] %v3198_v58  ;;  %5606 = vst [vmem:[#allocation30_spill] sm:$0xff] %v3201_v59  ;;  %v3215_v63 = vld [vmem:[%s2923_s28 + $0x43] sm:$0xff] }
  0x36   : > { %5609 = vst [vmem:[#allocation33_spill] sm:$0xff] %v3212_v62  ;;  %5610 = vst [vmem:[#allocation34_spill] sm:$0xff] %v3215_v63 }
  0x39   : > { %353 = vrot.lane.b32.xlu1 %v2990_v14, %s2833_s29  ;;  %351 = vrot.lane.b32.xlu0 %v2993_v15, %s2833_s29 }
  0x3d   : > { %357 = vrot.lane.b32.xlu1 %v3000_v16, %s2833_s29  ;;  %355 = vrot.lane.b32.xlu0 %v3003_v17, %s2833_s29 }
  0x41   : > { %361 = vrot.lane.b32.xlu1 %v3010_v18, %s2833_s29  ;;  %359 = vrot.lane.b32.xlu0 %v3013_v19, %s2833_s29 }
  0x45   : > { %365 = vrot.lane.b32.xlu1 %v3020_v20, %s2833_s29  ;;  %363 = vrot.lane.b32.xlu0 %v3023_v21, %s2833_s29 }
  0x49   : > { %369 = vrot.lane.b32.xlu1 %v3030_v22, %s2833_s29  ;;  %367 = vrot.lane.b32.xlu0 %v3033_v23, %s2833_s29 }
  0x4d   : > { %373 = vrot.lane.b32.xlu1 %v3040_v24, %s2833_s29  ;;  %371 = vrot.lane.b32.xlu0 %v3043_v25, %s2833_s29 }
  0x51   : > { %429 = vrot.lane.b32.xlu1 %v222_v26, %s2834_s30  ;;  %427 = vrot.lane.b32.xlu0 %v221_v27, %s2834_s30  ;;  %v3226_v26 = vld [vmem:[%s2923_s28 + $0x5b] sm:$0xff]  ;;  %v3229_v27 = vld [vmem:[%s2923_s28 + $0x53] sm:$0xff] }
  0x52   : > { %5613 = vst [vmem:[#allocation37_spill] sm:$0xff] %v3226_v26  ;;  %5614 = vst [vmem:[#allocation38_spill] sm:$0xff] %v3229_v27 }
  0x55   : > { %433 = vrot.lane.b32.xlu1 %v3054_v28, %s2834_s30  ;;  %431 = vrot.lane.b32.xlu0 %v3057_v29, %s2834_s30 }
  0x59   : > { %437 = vrot.lane.b32.xlu1 %v3064_v30, %s2834_s30  ;;  %435 = vrot.lane.b32.xlu0 %v3067_v31, %s2834_s30 }
  0x5d   : > { %441 = vrot.lane.b32.xlu1 %v3074_v32, %s2834_s30  ;;  %439 = vrot.lane.b32.xlu0 %v3077_v33, %s2834_s30 }
  0x61   : > { %445 = vrot.lane.b32.xlu1 %v3084_v34, %s2834_s30  ;;  %443 = vrot.lane.b32.xlu0 %v3087_v35, %s2834_s30  ;;  %v3408_v35 = vld [vmem:[%s2923_s28 + $0x68] sm:$0xff]  ;;  %v3411_v34 = vld [vmem:[%s2923_s28 + $0x60] sm:$0xff] }
  0x62   : > { %5643 = vst [vmem:[#allocation67_spill] sm:$0xff] %v3408_v35  ;;  %5644 = vst [vmem:[#allocation68_spill] sm:$0xff] %v3411_v34 }
  0x65   : > { %449 = vrot.lane.b32.xlu1 %v3094_v36, %s2834_s30  ;;  %447 = vrot.lane.b32.xlu0 %v3097_v37, %s2834_s30  ;;  %v3392_v37 = vld [vmem:[%s2923_s28 + $0x58] sm:$0xff] }
  0x66   : > { %5641 = vst [vmem:[#allocation65_spill] sm:$0xff] %v3392_v37 }
  0x69   : > { %453 = vrot.lane.b32.xlu1 %v3104_v38, %s2834_s30  ;;  %451 = vrot.lane.b32.xlu0 %v3107_v39, %s2834_s30 }
  0x6d   : > { %457 = vrot.lane.b32.xlu1 %v3114_v40, %s2834_s30  ;;  %455 = vrot.lane.b32.xlu0 %v3117_v41, %s2834_s30  ;;  %v3378_v41 = vld [vmem:[%s2923_s28 + $0x48] sm:$0xff]  ;;  %v3381_v40 = vld [vmem:[%s2923_s28 + $0x40] sm:$0xff] }
  0x6e   : > { %5637 = vst [vmem:[#allocation61_spill] sm:$0xff] %v3378_v41  ;;  %5638 = vst [vmem:[#allocation62_spill] sm:$0xff] %v3381_v40 }
  0x71   : > { %461 = vrot.lane.b32.xlu1 %v3124_v42, %s2834_s30  ;;  %459 = vrot.lane.b32.xlu0 %v3127_v43, %s2834_s30 }
  0x75   : > { %465 = vrot.lane.b32.xlu1 %v3134_v44, %s2834_s30  ;;  %463 = vrot.lane.b32.xlu0 %v3137_v45, %s2834_s30  ;;  %v3364_v45 = vld [vmem:[%s2923_s28 + $0x38] sm:$0xff]  ;;  %v3367_v44 = vld [vmem:[%s2923_s28 + $0x30] sm:$0xff] }
  0x76   : > { %5633 = vst [vmem:[#allocation57_spill] sm:$0xff] %v3364_v45  ;;  %5634 = vst [vmem:[#allocation58_spill] sm:$0xff] %v3367_v44 }
  0x79   : > { %469 = vrot.lane.b32.xlu1 %v3144_v46, %s2834_s30  ;;  %467 = vrot.lane.b32.xlu0 %v3147_v47, %s2834_s30  ;;  %v3353_v46 = vld [vmem:[%s2923_s28 + $0x20] sm:$0xff] }
  0x7a   : > { %5632 = vst [vmem:[#allocation56_spill] sm:$0xff] %v3353_v46 }
  0x7d   : > { %473 = vrot.lane.b32.xlu1 %v3154_v48, %s2834_s30  ;;  %471 = vrot.lane.b32.xlu0 %v3157_v49, %s2834_s30  ;;  %v171_v49 = vld [vmem:[%s2923_s28 + $0x10] sm:$0xff]  ;;  %v172_v48 = vld [vmem:[%s2923_s28 + $0x18] sm:$0xff] }
  0x81   : > { %477 = vrot.lane.b32.xlu1 %v3164_v50, %s2834_s30  ;;  %475 = vrot.lane.b32.xlu0 %v3167_v51, %s2834_s30  ;;  %v3313_v51 = vld [vmem:[%s2923_s28 + $0xb3] sm:$0xff] }
  0x82   : > { %5628 = vst [vmem:[#allocation52_spill] sm:$0xff] %v3313_v51 }
  0x85   : > { %533 = vrot.lane.b32.xlu1 %v248_v52, %s2835_s4  ;;  %531 = vrot.lane.b32.xlu0 %v247_v53, %s2835_s4 }
  0x89   : > { %537 = vrot.lane.b32.xlu1 %v3178_v54, %s2835_s4  ;;  %535 = vrot.lane.b32.xlu0 %v3181_v55, %s2835_s4  ;;  %v3299_v55 = vld [vmem:[%s2923_s28 + $0xa3] sm:$0xff] }
  0x8a   : > { %5624 = vst [vmem:[#allocation48_spill] sm:$0xff] %v3299_v55 }
  0x8d   : > { %541 = vrot.lane.b32.xlu1 %v3188_v56, %s2835_s4  ;;  %539 = vrot.lane.b32.xlu0 %v3191_v57, %s2835_s4  ;;  %v3285_v57 = vld [vmem:[%s2923_s28 + $0x93] sm:$0xff] }
  0x8e   : > { %5622 = vst [vmem:[#allocation46_spill] sm:$0xff] %v3285_v57 }
  0x8f   : > { %v3203_v60 = vpop.permute.xlu1 %327  ;;  %v3205_v61 = vpop.permute.xlu0 %323 }
  0x90   : > { %5607 = vst [vmem:[#allocation31_spill] sm:$0xff] %v3203_v60  ;;  %5608 = vst [vmem:[#allocation32_spill] sm:$0xff] %v3205_v61  ;;  %v3243_v60 = vld [vmem:[%s2923_s28 + $0x63] sm:$0xff] }
  0x91   : > { %545 = vrot.lane.b32.xlu1 %v3198_v58, %s2835_s4  ;;  %543 = vrot.lane.b32.xlu0 %v3201_v59, %s2835_s4  ;;  %5616 = vst [vmem:[#allocation40_spill] sm:$0xff] %v3243_v60  ;;  %v3271_v59 = vld [vmem:[%s2923_s28 + $0x83] sm:$0xff] }
  0x92   : > { %5620 = vst [vmem:[#allocation44_spill] sm:$0xff] %v3271_v59 }
  0x93   : > { %v3217_v1 = vpop.permute.xlu1 %329  ;;  %v3219_v3 = vpop.permute.xlu0 %325 }
  0x94   : > { %5611 = vst [vmem:[#allocation35_spill] sm:$0xff] %v3217_v1  ;;  %5612 = vst [vmem:[#allocation36_spill] sm:$0xff] %v3219_v3  ;;  %v3240_v1 = vld [vmem:[%s2923_s28 + $0x6b] sm:$0xff] }
  0x95   : > { %549 = vrot.lane.b32.xlu1 %v3212_v62, %s2835_s4  ;;  %547 = vrot.lane.b32.xlu0 %v3215_v63, %s2835_s4  ;;  %5615 = vst [vmem:[#allocation39_spill] sm:$0xff] %v3240_v1  ;;  %v3257_v63 = vld [vmem:[%s2923_s28 + $0x73] sm:$0xff] }
  0x96   : > { %5618 = vst [vmem:[#allocation42_spill] sm:$0xff] %v3257_v63 }
  0x97   : > { %v3231_v52 = vpop.permute.xlu1 %333  ;;  %v3233_v53 = vpop.permute.xlu0 %331 }
  0x99   : > { %553 = vrot.lane.b32.xlu1 %v3226_v26, %s2835_s4  ;;  %551 = vrot.lane.b32.xlu0 %v3229_v27, %s2835_s4  ;;  %v3254_v26 = vld [vmem:[%s2923_s28 + $0x7b] sm:$0xff] }
  0x9a   : > { %5617 = vst [vmem:[#allocation41_spill] sm:$0xff] %v3254_v26 }
  0x9b   : > { %v3245_v3 = vpop.permute.xlu1 %337  ;;  %v3247_v61 = vpop.permute.xlu0 %335 }
  0x9d   : > { %557 = vrot.lane.b32.xlu1 %v3240_v1, %s2835_s4  ;;  %555 = vrot.lane.b32.xlu0 %v3243_v60, %s2835_s4  ;;  %v3268_v1 = vld [vmem:[%s2923_s28 + $0x8b] sm:$0xff] }
  0x9e   : > { %5619 = vst [vmem:[#allocation43_spill] sm:$0xff] %v3268_v1 }
  0x9f   : > { %v3259_v27 = vpop.permute.xlu1 %341  ;;  %v3261_v62 = vpop.permute.xlu0 %339 }
  0xa1   : > { %561 = vrot.lane.b32.xlu1 %v3254_v26, %s2835_s4  ;;  %559 = vrot.lane.b32.xlu0 %v3257_v63, %s2835_s4  ;;  %v3282_v26 = vld [vmem:[%s2923_s28 + $0x9b] sm:$0xff] }
  0xa2   : > { %5621 = vst [vmem:[#allocation45_spill] sm:$0xff] %v3282_v26 }
  0xa3   : > { %v3273_v60 = vpop.permute.xlu1 %345  ;;  %v3275_v58 = vpop.permute.xlu0 %343 }
  0xa5   : > { %565 = vrot.lane.b32.xlu1 %v3268_v1, %s2835_s4  ;;  %563 = vrot.lane.b32.xlu0 %v3271_v59, %s2835_s4  ;;  %v3296_v1 = vld [vmem:[%s2923_s28 + $0xab] sm:$0xff] }
  0xa6   : > { %5623 = vst [vmem:[#allocation47_spill] sm:$0xff] %v3296_v1 }
  0xa7   : > { %v3287_v63 = vpop.permute.xlu1 %349  ;;  %v3289_v56 = vpop.permute.xlu0 %347 }
  0xa9   : > { %569 = vrot.lane.b32.xlu1 %v3282_v26, %s2835_s4  ;;  %567 = vrot.lane.b32.xlu0 %v3285_v57, %s2835_s4  ;;  %v3310_v26 = vld [vmem:[%s2923_s28 + $0xbb] sm:$0xff] }
  0xaa   : > { %5627 = vst [vmem:[#allocation51_spill] sm:$0xff] %v3310_v26 }
  0xab   : > { %v3301_v59 = vpop.permute.xlu1 %353  ;;  %v3303_v54 = vpop.permute.xlu0 %351 }
  0xac   : > { %5625 = vst [vmem:[#allocation49_spill] sm:$0xff] %v3301_v59  ;;  %5626 = vst [vmem:[#allocation50_spill] sm:$0xff] %v3303_v54  ;;  %v3324_v59 = vld [vmem:[%s2923_s28 + $0xcb] sm:$0xff]  ;;  %v3327_v54 = vld [vmem:[%s2923_s28 + $0xc3] sm:$0xff] }
  0xad   : > { %573 = vrot.lane.b32.xlu1 %v3296_v1, %s2835_s4  ;;  %571 = vrot.lane.b32.xlu0 %v3299_v55, %s2835_s4  ;;  %5629 = vst [vmem:[#allocation53_spill] sm:$0xff] %v3324_v59  ;;  %5630 = vst [vmem:[#allocation54_spill] sm:$0xff] %v3327_v54 }
  0xaf   : > { %v3315_v57 = vpop.permute.xlu1 %357  ;;  %v3317_v50 = vpop.permute.xlu0 %355 }
  0xb1   : > { %577 = vrot.lane.b32.xlu1 %v3310_v26, %s2835_s4  ;;  %575 = vrot.lane.b32.xlu0 %v3313_v51, %s2835_s4 }
  0xb3   : > { %v3329_v55 = vpop.permute.xlu1 %361  ;;  %v3331_v1 = vpop.permute.xlu0 %359 }
  0xb5   : > { %581 = vrot.lane.b32.xlu1 %v3324_v59, %s2835_s4  ;;  %579 = vrot.lane.b32.xlu0 %v3327_v54, %s2835_s4  ;;  %v3350_v54 = vld [vmem:[%s2923_s28 + $0x28] sm:$0xff]  ;;  %s2847_s4 = smov 60  }
  0xb6   : > { %5631 = vst [vmem:[#allocation55_spill] sm:$0xff] %v3350_v54 }
  0xb7   : > { %v3337_v26 = vpop.permute.xlu1 %365  ;;  %v3339_v51 = vpop.permute.xlu0 %363 }
  0xb9   : > { %637 = vrot.lane.b32.xlu1 %v172_v48, %s2836_s5  ;;  %635 = vrot.lane.b32.xlu0 %v171_v49, %s2836_s5 }
  0xbb   : > { %v3345_v47 = vpop.permute.xlu1 %369  ;;  %v3347_v59 = vpop.permute.xlu0 %367 }
  0xbd   : > { %641 = vrot.lane.b32.xlu1 %v3350_v54, %s2836_s5  ;;  %639 = vrot.lane.b32.xlu0 %v3353_v46, %s2836_s5 }
  0xbf   : > { %v3359_v48 = vpop.permute.xlu1 %373  ;;  %v3361_v49 = vpop.permute.xlu0 %371 }
  0xc1   : > { %645 = vrot.lane.b32.xlu1 %v3364_v45, %s2836_s5  ;;  %643 = vrot.lane.b32.xlu0 %v3367_v44, %s2836_s5 }
  0xc3   : > { %v3373_v43 = vpop.permute.xlu1 %429  ;;  %v3375_v42 = vpop.permute.xlu0 %427 }
  0xc4   : > { %5635 = vst [vmem:[#allocation59_spill] sm:$0xff] %v3373_v43  ;;  %5636 = vst [vmem:[#allocation60_spill] sm:$0xff] %v3375_v42  ;;  %v3395_v43 = vld [vmem:[%s2923_s28 + $0x50] sm:$0xff]  ;;  %v1599_v42 = vsel %vm1593_vm0, %v3350_v54, %v3231_v52  ;;  %v1601_v52 = vsel %vm1593_vm0, %v3364_v45, %v3245_v3  ;;  %v1602_v3 = vsel %vm1593_vm0, %v3381_v40, %v3261_v62 }
  0xc5   : > { %649 = vrot.lane.b32.xlu1 %v3378_v41, %s2836_s5  ;;  %647 = vrot.lane.b32.xlu0 %v3381_v40, %s2836_s5  ;;  %5642 = vst [vmem:[#allocation66_spill] sm:$0xff] %v3395_v43  ;;  %v1605_v62 = vsel %vm1593_vm0, %v3392_v37, %v3273_v60  ;;  %v1606_v60 = vsel %vm1593_vm0, %v3411_v34, %v3289_v56 }
  0xc7   : > { %v3387_v39 = vpop.permute.xlu1 %433  ;;  %v3389_v38 = vpop.permute.xlu0 %431 }
  0xc8   : > { %5639 = vst [vmem:[#allocation63_spill] sm:$0xff] %v3387_v39  ;;  %5640 = vst [vmem:[#allocation64_spill] sm:$0xff] %v3389_v38  ;;  %v1598_v39 = vsel %vm1593_vm0, %v3353_v46, %v3233_v53 }
  0xc9   : > { %653 = vrot.lane.b32.xlu1 %v3392_v37, %s2836_s5  ;;  %651 = vrot.lane.b32.xlu0 %v3395_v43, %s2836_s5 }
  0xcb   : > { %v438_v38 = vpop.permute.xlu1 %437  ;;  %v436_v36 = vpop.permute.xlu0 %435 }
  0xcc   : > { %v3414_v33 = vsel %vm1620_vm1, %v1599_v42, %v438_v38  ;;  %v3417_v32 = vsel %vm1620_vm1, %v1598_v39, %v436_v36  ;;  %v1600_v38 = vsel %vm1593_vm0, %v3367_v44, %v3247_v61  ;;  %v3430_v36 = vld [vmem:[%s2923_s28 + $0x78] sm:$0xff]  ;;  %v3433_v39 = vld [vmem:[%s2923_s28 + $0x70] sm:$0xff]  ;;  %v1603_v61 = vsel %vm1593_vm0, %v3378_v41, %v3259_v27 }
  0xcd   : > { %657 = vrot.lane.b32.xlu1 %v3408_v35, %s2836_s5  ;;  %655 = vrot.lane.b32.xlu0 %v3411_v34, %s2836_s5  ;;  %5645 = vst [vmem:[#allocation69_spill] sm:$0xff] %v3430_v36  ;;  %5646 = vst [vmem:[#allocation70_spill] sm:$0xff] %v3433_v39  ;;  %v1604_v27 = vsel %vm1593_vm0, %v3395_v43, %v3275_v58  ;;  %v1607_v58 = vsel %vm1593_vm0, %v3408_v35, %v3287_v63  ;;  %v3496_v43 = vld [vmem:[%s2923_s28 + $0xa8] sm:$0xff]  ;;  %v3516_v34 = vld [vmem:[%s2923_s28 + $0xb8] sm:$0xff] }
  0xce   : > { %v3519_v35 = vld [vmem:[%s2923_s28 + $0xb0] sm:$0xff] }
  0xcf   : > { %v442_v42 = vpop.permute.xlu1 %441  ;;  %v440_v53 = vpop.permute.xlu0 %439 }
  0xd0   : > { %v3436_v46 = vsel %vm1620_vm1, %v1601_v52, %v442_v42  ;;  %v3439_v54 = vsel %vm1620_vm1, %v1600_v38, %v440_v53  ;;  %v3452_v38 = vld [vmem:[%s2923_s28 + $0x88] sm:$0xff]  ;;  %v3455_v53 = vld [vmem:[%s2923_s28 + $0x80] sm:$0xff] }
  0xd1   : > { %661 = vrot.lane.b32.xlu1 %v3430_v36, %s2836_s5  ;;  %659 = vrot.lane.b32.xlu0 %v3433_v39, %s2836_s5  ;;  %5647 = vst [vmem:[#allocation71_spill] sm:$0xff] %v3452_v38  ;;  %5648 = vst [vmem:[#allocation72_spill] sm:$0xff] %v3455_v53 }
  0xd3   : > { %v446_v52 = vpop.permute.xlu1 %445  ;;  %v444_v42 = vpop.permute.xlu0 %443 }
  0xd4   : > { %v3458_v36 = vsel %vm1620_vm1, %v1603_v61, %v446_v52  ;;  %v3461_v39 = vsel %vm1620_vm1, %v1602_v3, %v444_v42  ;;  %v3474_v3 = vld [vmem:[%s2923_s28 + $0x98] sm:$0xff]  ;;  %v3477_v42 = vld [vmem:[%s2923_s28 + $0x90] sm:$0xff] }
  0xd5   : > { %665 = vrot.lane.b32.xlu1 %v3452_v38, %s2836_s5  ;;  %663 = vrot.lane.b32.xlu0 %v3455_v53, %s2836_s5  ;;  %5649 = vst [vmem:[#allocation73_spill] sm:$0xff] %v3477_v42 }
  0xd7   : > { %v450_v61 = vpop.permute.xlu1 %449  ;;  %v448_v52 = vpop.permute.xlu0 %447 }
  0xd8   : > { %v3480_v40 = vsel %vm1620_vm1, %v1605_v62, %v450_v61  ;;  %v3483_v41 = vsel %vm1620_vm1, %v1604_v27, %v448_v52  ;;  %v3499_v27 = vld [vmem:[%s2923_s28 + $0xa0] sm:$0xff] }
  0xd9   : > { %669 = vrot.lane.b32.xlu1 %v3474_v3, %s2836_s5  ;;  %667 = vrot.lane.b32.xlu0 %v3477_v42, %s2836_s5 }
  0xdb   : > { %v454_v62 = vpop.permute.xlu1 %453  ;;  %v452_v61 = vpop.permute.xlu0 %451 }
  0xdc   : > { %v3502_v52 = vsel %vm1620_vm1, %v1607_v58, %v454_v62  ;;  %v3505_v37 = vsel %vm1620_vm1, %v1606_v60, %v452_v61  ;;  %v1611_v58 = vsel %vm1593_vm0, %v3452_v38, %v3315_v57  ;;  %v1610_v60 = vsel %vm1593_vm0, %v3455_v53, %v3317_v50  ;;  %v3548_v57 = vld [vmem:[%s2923_s28 + $0xd8] sm:$0xff]  ;;  %v3551_v50 = vld [vmem:[%s2923_s28 + $0xd0] sm:$0xff] }
  0xdd   : > { %673 = vrot.lane.b32.xlu1 %v3496_v43, %s2836_s5  ;;  %671 = vrot.lane.b32.xlu0 %v3499_v27, %s2836_s5  ;;  %v1613_v53 = vsel %vm1593_vm0, %v3474_v3, %v3329_v55  ;;  %v1615_v55 = vsel %vm1593_vm0, %v3496_v43, %v3337_v26  ;;  %v1617_v26 = vsel %vm1593_vm0, %v3516_v34, %v3345_v47 }
  0xdf   : > { %v3511_v56 = vpop.permute.xlu1 %457  ;;  %v3513_v63 = vpop.permute.xlu0 %455 }
  0xe0   : > { %5650 = vst [vmem:[#allocation74_spill] sm:$0xff] %v3511_v56  ;;  %5651 = vst [vmem:[#allocation75_spill] sm:$0xff] %v3513_v63  ;;  %v3532_v56 = vld [vmem:[%s2923_s28 + $0xc8] sm:$0xff]  ;;  %v3535_v63 = vld [vmem:[%s2923_s28 + $0xc0] sm:$0xff] }
  0xe1   : > { %677 = vrot.lane.b32.xlu1 %v3516_v34, %s2836_s5  ;;  %675 = vrot.lane.b32.xlu0 %v3519_v35, %s2836_s5 }
  0xe3   : > { %v462_v62 = vpop.permute.xlu1 %461  ;;  %v460_v61 = vpop.permute.xlu0 %459 }
  0xe4   : > { %v3538_v44 = vsel %vm1620_vm1, %v1611_v58, %v462_v62  ;;  %v3541_v45 = vsel %vm1620_vm1, %v1610_v60, %v460_v61  ;;  %v1612_v58 = vsel %vm1593_vm0, %v3477_v42, %v3331_v1  ;;  %v1614_v1 = vsel %vm1593_vm0, %v3499_v27, %v3339_v51 }
  0xe5   : > { %681 = vrot.lane.b32.xlu1 %v3532_v56, %s2836_s5  ;;  %679 = vrot.lane.b32.xlu0 %v3535_v63, %s2836_s5  ;;  %v1616_v51 = vsel %vm1593_vm0, %v3519_v35, %v3347_v59 }
  0xe7   : > { %v466_v60 = vpop.permute.xlu1 %465  ;;  %v464_v62 = vpop.permute.xlu0 %463 }
  0xe8   : > { %v3560_v61 = vsel %vm1620_vm1, %v1613_v53, %v466_v60  ;;  %v3563_v38 = vsel %vm1620_vm1, %v1612_v58, %v464_v62 }
  0xe9   : > { %685 = vrot.lane.b32.xlu1 %v3548_v57, %s2836_s5  ;;  %683 = vrot.lane.b32.xlu0 %v3551_v50, %s2836_s5  ;;  %s2617_s5 = smul.u32 3328, %s2891_s16 }
  0xeb   : > { %v470_v42 = vpop.permute.xlu1 %469  ;;  %v468_v53 = vpop.permute.xlu0 %467 }
  0xec   : > { %v3576_v60 = vsel %vm1620_vm1, %v1615_v55, %v470_v42  ;;  %v3579_v58 = vsel %vm1620_vm1, %v1614_v1, %v468_v53 }
  0xed   : > { %717 = vrot.lane.b32.xlu1 %v2933_v2, %s2837_s6  ;;  %715 = vrot.lane.b32.xlu0 %v2926_v0, %s2837_s6  ;;  %v1619_v0 = vsel %vm1593_vm0, %v3532_v56, %v3359_v48  ;;  %v1618_v2 = vsel %vm1593_vm0, %v3535_v63, %v3361_v49 }
  0xef   : > { %v474_v42 = vpop.permute.xlu1 %473  ;;  %v472_v62 = vpop.permute.xlu0 %471 }
  0xf0   : > { %v3592_v55 = vsel %vm1620_vm1, %v1617_v26, %v474_v42  ;;  %v3595_v1 = vsel %vm1620_vm1, %v1616_v51, %v472_v62 }
  0xf1   : > { %721 = vrot.lane.b32.xlu1 %v2940_v4, %s2837_s6  ;;  %719 = vrot.lane.b32.xlu0 %v2943_v5, %s2837_s6 }
  0xf3   : > { %v478_v47 = vpop.permute.xlu1 %477  ;;  %v476_v59 = vpop.permute.xlu0 %475 }
  0xf4   : > { %v3608_v53 = vsel %vm1620_vm1, %v1619_v0, %v478_v47  ;;  %v3611_v26 = vsel %vm1620_vm1, %v1618_v2, %v476_v59  ;;  %v5654_v47 = vld [vmem:[#allocation5_spill] sm:$0xff] }
  0xf5   : > { %725 = vrot.lane.b32.xlu1 %v2950_v6, %s2837_s6  ;;  %723 = vrot.lane.b32.xlu0 %v2953_v7, %s2837_s6 }
  0xf7   : > { %v3617_v4 = vpop.permute.xlu1 %533  ;;  %v3619_v5 = vpop.permute.xlu0 %531 }
  0xf9   : > { %729 = vrot.lane.b32.xlu1 %v2960_v8, %s2837_s6  ;;  %727 = vrot.lane.b32.xlu0 %v2963_v9, %s2837_s6 }
  0xfb   : > { %v3625_v48 = vpop.permute.xlu1 %537  ;;  %v3627_v49 = vpop.permute.xlu0 %535 }
  0xfc   : > { %5652 = vst [vmem:[#allocation76_spill] sm:$0xff] %v3625_v48  ;;  %v4353_v48 = vld [vmem:[%s2923_s28 + $0xe9] sm:$0xff] }
  0xfd   : > { %733 = vrot.lane.b32.xlu1 %v2970_v10, %s2837_s6  ;;  %731 = vrot.lane.b32.xlu0 %v2973_v11, %s2837_s6 }
  0xff   : > { %v542_v6 = vpop.permute.xlu1 %541  ;;  %v540_v7 = vpop.permute.xlu0 %539 }
 0x100   : > { %v3635_v51 = vsel %vm1647_vm2, %v3414_v33, %v542_v6  ;;  %v3639_v8 = vsel %vm1647_vm2, %v3417_v32, %v540_v7  ;;  %v5659_v7 = vld [vmem:[#allocation9_spill] sm:$0xff] }
 0x101   : > { %737 = vrot.lane.b32.xlu1 %v2980_v12, %s2837_s6  ;;  %735 = vrot.lane.b32.xlu0 %v2983_v13, %s2837_s6 }
 0x103   : > { %v546_v9 = vpop.permute.xlu1 %545  ;;  %v544_v10 = vpop.permute.xlu0 %543 }
 0x104   : > { %v3647_v11 = vsel %vm1647_vm2, %v3436_v46, %v546_v9  ;;  %v3651_v33 = vsel %vm1647_vm2, %v3439_v54, %v544_v10  ;;  %v5660_v9 = vld [vmem:[#allocation10_spill] sm:$0xff] }
 0x105   : > { %741 = vrot.lane.b32.xlu1 %v2990_v14, %s2837_s6  ;;  %739 = vrot.lane.b32.xlu0 %v2993_v15, %s2837_s6 }
 0x107   : > { %v550_v12 = vpop.permute.xlu1 %549  ;;  %v548_v32 = vpop.permute.xlu0 %547 }
 0x108   : > { %v3659_v13 = vsel %vm1647_vm2, %v3458_v36, %v550_v12  ;;  %v3663_v46 = vsel %vm1647_vm2, %v3461_v39, %v548_v32 }
 0x109   : > { %745 = vrot.lane.b32.xlu1 %v3000_v16, %s2837_s6  ;;  %743 = vrot.lane.b32.xlu0 %v3003_v17, %s2837_s6 }
 0x10b   : > { %v554_v14 = vpop.permute.xlu1 %553  ;;  %v552_v54 = vpop.permute.xlu0 %551 }
 0x10c   : > { %v3671_v15 = vsel %vm1647_vm2, %v3480_v40, %v554_v14  ;;  %v3675_v36 = vsel %vm1647_vm2, %v3483_v41, %v552_v54  ;;  %v5661_v54 = vld [vmem:[#allocation11_spill] sm:$0xff] }
 0x10d   : > { %749 = vrot.lane.b32.xlu1 %v3010_v18, %s2837_s6  ;;  %747 = vrot.lane.b32.xlu0 %v3013_v19, %s2837_s6 }
 0x10f   : > { %v558_v16 = vpop.permute.xlu1 %557  ;;  %v556_v39 = vpop.permute.xlu0 %555 }
 0x110   : > { %v3683_v17 = vsel %vm1647_vm2, %v3502_v52, %v558_v16  ;;  %v3687_v40 = vsel %vm1647_vm2, %v3505_v37, %v556_v39  ;;  %v5662_v16 = vld [vmem:[#allocation12_spill] sm:$0xff] }
 0x111   : > { %753 = vrot.lane.b32.xlu1 %v3020_v20, %s2837_s6  ;;  %751 = vrot.lane.b32.xlu0 %v3023_v21, %s2837_s6  ;;  %v3714_v21 = vld [vmem:[%s2923_s28 + $0xd9] sm:$0xff] }
 0x113   : > { %v3693_v18 = vpop.permute.xlu1 %561  ;;  %v3695_v19 = vpop.permute.xlu0 %559 }
 0x114   : > { %5653 = vst [vmem:[#allocation77_spill] sm:$0xff] %v3693_v18 }
 0x115   : > { %757 = vrot.lane.b32.xlu1 %v3030_v22, %s2837_s6  ;;  %755 = vrot.lane.b32.xlu0 %v3033_v23, %s2837_s6  ;;  %v3717_v22 = vld [vmem:[%s2923_s28 + $0xd1] sm:$0xff] }
 0x117   : > { %v566_v41 = vpop.permute.xlu1 %565  ;;  %v564_v52 = vpop.permute.xlu0 %563 }
 0x118   : > { %v3703_v37 = vsel %vm1647_vm2, %v3538_v44, %v566_v41  ;;  %v3707_v20 = vsel %vm1647_vm2, %v3541_v45, %v564_v52 }
 0x119   : > { %761 = vrot.lane.b32.xlu1 %v3040_v24, %s2837_s6  ;;  %759 = vrot.lane.b32.xlu0 %v3043_v25, %s2837_s6 }
 0x11b   : > { %v570_v23 = vpop.permute.xlu1 %569  ;;  %v568_v42 = vpop.permute.xlu0 %567 }
 0x11c   : > { %v3721_v44 = vsel %vm1647_vm2, %v3560_v61, %v570_v23  ;;  %v3725_v45 = vsel %vm1647_vm2, %v3563_v38, %v568_v42  ;;  %v5663_v23 = vld [vmem:[#allocation13_spill] sm:$0xff] }
 0x11d   : > { %765 = vrot.lane.b32.xlu1 %v3714_v21, %s2837_s6  ;;  %763 = vrot.lane.b32.xlu0 %v3717_v22, %s2837_s6 }
 0x11f   : > { %v574_v24 = vpop.permute.xlu1 %573  ;;  %v572_v25 = vpop.permute.xlu0 %571 }
 0x120   : > { %v3733_v62 = vsel %vm1647_vm2, %v3576_v60, %v574_v24  ;;  %v3737_v61 = vsel %vm1647_vm2, %v3579_v58, %v572_v25 }
 0x121   : > { %797 = vrot.lane.b32.xlu1 %v3054_v28, %s2838_s7  ;;  %795 = vrot.lane.b32.xlu0 %v3057_v29, %s2838_s7 }
 0x123   : > { %v578_v38 = vpop.permute.xlu1 %577  ;;  %v576_v0 = vpop.permute.xlu0 %575 }
 0x124   : > { %v3745_v2 = vsel %vm1647_vm2, %v3592_v55, %v578_v38  ;;  %v3749_v60 = vsel %vm1647_vm2, %v3595_v1, %v576_v0  ;;  %v5655_v1 = vld [vmem:[#allocation6_spill] sm:$0xff]  ;;  %v5665_v38 = vld [vmem:[#allocation15_spill] sm:$0xff] }
 0x125   : > { %801 = vrot.lane.b32.xlu1 %v3064_v30, %s2838_s7  ;;  %799 = vrot.lane.b32.xlu0 %v3067_v31, %s2838_s7  ;;  %v5656_v31 = vld [vmem:[#allocation7_spill] sm:$0xff] }
 0x127   : > { %v582_v28 = vpop.permute.xlu1 %581  ;;  %v580_v58 = vpop.permute.xlu0 %579 }
 0x128   : > { %v3757_v29 = vsel %vm1647_vm2, %v3608_v53, %v582_v28  ;;  %v3761_v55 = vsel %vm1647_vm2, %v3611_v26, %v580_v58  ;;  %v5657_v53 = vld [vmem:[#allocation8_spill] sm:$0xff] }
 0x129   : > { %805 = vrot.lane.b32.xlu1 %v5654_v47, %s2838_s7  ;;  %803 = vrot.lane.b32.xlu0 %v5655_v1, %s2838_s7  ;;  %v5667_v47 = vld [vmem:[#allocation17_spill] sm:$0xff] }
 0x12b   : > { %v3767_v30 = vpop.permute.xlu1 %637  ;;  %v3769_v59 = vpop.permute.xlu0 %635 }
 0x12d   : > { %809 = vrot.lane.b32.xlu1 %v5656_v31, %s2838_s7  ;;  %807 = vrot.lane.b32.xlu0 %v5657_v53, %s2838_s7 }
 0x12f   : > { %v3775_v6 = vpop.permute.xlu1 %641  ;;  %v3777_v26 = vpop.permute.xlu0 %639 }
 0x130   : > { %5658 = vst [vmem:[#allocation5_spill] sm:$0xff] %v3775_v6 }
 0x131   : > { %813 = vrot.lane.b32.xlu1 %v5659_v7, %s2838_s7  ;;  %811 = vrot.lane.b32.xlu0 %v5660_v9, %s2838_s7  ;;  %v5670_v7 = vld [vmem:[#allocation20_spill] sm:$0xff] }
 0x133   : > { %v646_v10 = vpop.permute.xlu1 %645  ;;  %v644_v12 = vpop.permute.xlu0 %643 }
 0x134   : > { %v3785_v32 = vsel %vm1674_vm3, %v3635_v51, %v646_v10  ;;  %v3789_v14 = vsel %vm1674_vm3, %v3639_v8, %v644_v12  ;;  %v5664_v8 = vld [vmem:[#allocation14_spill] sm:$0xff]  ;;  %v5672_v12 = vld [vmem:[#allocation21_spill] sm:$0xff] }
 0x135   : > { %817 = vrot.lane.b32.xlu1 %v5661_v54, %s2838_s7  ;;  %815 = vrot.lane.b32.xlu0 %v5662_v16, %s2838_s7  ;;  %5729 = vst [vmem:[#allocation21_spill] sm:$0xff] %v4353_v48 }
 0x137   : > { %v650_v39 = vpop.permute.xlu1 %649  ;;  %v648_v41 = vpop.permute.xlu0 %647 }
 0x138   : > { %v3797_v52 = vsel %vm1674_vm3, %v3647_v11, %v650_v39  ;;  %v3801_v51 = vsel %vm1674_vm3, %v3651_v33, %v648_v41  ;;  %v5666_v33 = vld [vmem:[#allocation16_spill] sm:$0xff]  ;;  %v5674_v41 = vld [vmem:[#allocation23_spill] sm:$0xff] }
 0x139   : > { %821 = vrot.lane.b32.xlu1 %v5663_v23, %s2838_s7  ;;  %819 = vrot.lane.b32.xlu0 %v5664_v8, %s2838_s7  ;;  %v5675_v23 = vld [vmem:[#allocation24_spill] sm:$0xff]  ;;  %v278_v8 = vld [vmem:[%s2923_s28 + $0xda] sm:$0xff] }
 0x13b   : > { %v654_v42 = vpop.permute.xlu1 %653  ;;  %v652_v24 = vpop.permute.xlu0 %651 }
 0x13c   : > { %v3809_v25 = vsel %vm1674_vm3, %v3659_v13, %v654_v42  ;;  %v3813_v11 = vsel %vm1674_vm3, %v3663_v46, %v652_v24  ;;  %v5668_v46 = vld [vmem:[#allocation18_spill] sm:$0xff] }
 0x13d   : > { %825 = vrot.lane.b32.xlu1 %v5665_v38, %s2838_s7  ;;  %823 = vrot.lane.b32.xlu0 %v5666_v33, %s2838_s7  ;;  %v277_v42 = vld [vmem:[%s2923_s28 + $0xd2] sm:$0xff] }
 0x13f   : > { %v658_v0 = vpop.permute.xlu1 %657  ;;  %v656_v28 = vpop.permute.xlu0 %655 }
 0x140   : > { %v3821_v58 = vsel %vm1674_vm3, %v3671_v15, %v658_v0  ;;  %v3825_v13 = vsel %vm1674_vm3, %v3675_v36, %v656_v28  ;;  %v5669_v36 = vld [vmem:[#allocation19_spill] sm:$0xff] }
 0x141   : > { %829 = vrot.lane.b32.xlu1 %v5667_v47, %s2838_s7  ;;  %827 = vrot.lane.b32.xlu0 %v5668_v46, %s2838_s7 }
 0x143   : > { %v662_v1 = vpop.permute.xlu1 %661  ;;  %v660_v31 = vpop.permute.xlu0 %659 }
 0x144   : > { %v3833_v53 = vsel %vm1674_vm3, %v3683_v17, %v662_v1  ;;  %v3837_v15 = vsel %vm1674_vm3, %v3687_v40, %v660_v31  ;;  %v5673_v17 = vld [vmem:[#allocation22_spill] sm:$0xff] }
 0x145   : > { %833 = vrot.lane.b32.xlu1 %v5669_v36, %s2838_s7  ;;  %831 = vrot.lane.b32.xlu0 %v5670_v7, %s2838_s7  ;;  %v5679_v36 = vld [vmem:[#allocation28_spill] sm:$0xff] }
 0x147   : > { %v3843_v9 = vpop.permute.xlu1 %665  ;;  %v3845_v10 = vpop.permute.xlu0 %663 }
 0x148   : > { %5671 = vst [vmem:[#allocation6_spill] sm:$0xff] %v3843_v9 }
 0x149   : > { %837 = vrot.lane.b32.xlu1 %v5672_v12, %s2838_s7  ;;  %835 = vrot.lane.b32.xlu0 %v5673_v17, %s2838_s7 }
 0x14b   : > { %v670_v54 = vpop.permute.xlu1 %669  ;;  %v668_v16 = vpop.permute.xlu0 %667 }
 0x14c   : > { %v3853_v40 = vsel %vm1674_vm3, %v3703_v37, %v670_v54  ;;  %v3857_v39 = vsel %vm1674_vm3, %v3707_v20, %v668_v16  ;;  %v5680_v54 = vld [vmem:[#allocation29_spill] sm:$0xff] }
 0x14d   : > { %841 = vrot.lane.b32.xlu1 %v5674_v41, %s2838_s7  ;;  %839 = vrot.lane.b32.xlu0 %v5675_v23, %s2838_s7  ;;  %v5682_v23 = vld [vmem:[#allocation33_spill] sm:$0xff] }
 0x14f   : > { %v674_v24 = vpop.permute.xlu1 %673  ;;  %v672_v38 = vpop.permute.xlu0 %671 }
 0x150   : > { %v3867_v33 = vsel %vm1674_vm3, %v3721_v44, %v674_v24  ;;  %v3871_v37 = vsel %vm1674_vm3, %v3725_v45, %v672_v38  ;;  %v5676_v44 = vld [vmem:[#allocation25_spill] sm:$0xff]  ;;  %v5677_v45 = vld [vmem:[#allocation26_spill] sm:$0xff] }
 0x151   : > { %845 = vrot.lane.b32.xlu1 %v278_v8, %s2838_s7  ;;  %843 = vrot.lane.b32.xlu0 %v277_v42, %s2838_s7  ;;  %v5685_v42 = vld [vmem:[#allocation37_spill] sm:$0xff]  ;;  %v5686_v24 = vld [vmem:[#allocation38_spill] sm:$0xff] }
 0x153   : > { %v678_v20 = vpop.permute.xlu1 %677  ;;  %v676_v0 = vpop.permute.xlu0 %675 }
 0x154   : > { %v3877_v28 = vsel %vm1674_vm3, %v3733_v62, %v678_v20  ;;  %v3881_v47 = vsel %vm1674_vm3, %v3737_v61, %v676_v0  ;;  %v5678_v61 = vld [vmem:[#allocation27_spill] sm:$0xff] }
 0x155   : > { %877 = vrot.lane.b32.xlu1 %v5676_v44, %s2839_s8  ;;  %875 = vrot.lane.b32.xlu0 %v5677_v45, %s2839_s8  ;;  %v5687_v45 = vld [vmem:[#allocation39_spill] sm:$0xff] }
 0x157   : > { %v682_v46 = vpop.permute.xlu1 %681  ;;  %v680_v1 = vpop.permute.xlu0 %679 }
 0x158   : > { %v3889_v31 = vsel %vm1674_vm3, %v3745_v2, %v682_v46  ;;  %v3893_v62 = vsel %vm1674_vm3, %v3749_v60, %v680_v1  ;;  %v5681_v60 = vld [vmem:[#allocation30_spill] sm:$0xff]  ;;  %v5688_v46 = vld [vmem:[#allocation40_spill] sm:$0xff] }
 0x159   : > { %881 = vrot.lane.b32.xlu1 %v5678_v61, %s2839_s8  ;;  %879 = vrot.lane.b32.xlu0 %v5679_v36, %s2839_s8 }
 0x15b   : > { %v686_v7 = vpop.permute.xlu1 %685  ;;  %v684_v12 = vpop.permute.xlu0 %683 }
 0x15c   : > { %v3901_v17 = vsel %vm1674_vm3, %v3757_v29, %v686_v7  ;;  %v3905_v2 = vsel %vm1674_vm3, %v3761_v55, %v684_v12  ;;  %v5683_v29 = vld [vmem:[#allocation34_spill] sm:$0xff]  ;;  %v5689_v7 = vld [vmem:[#allocation41_spill] sm:$0xff] }
 0x15d   : > { %885 = vrot.lane.b32.xlu1 %v5680_v54, %s2839_s8  ;;  %883 = vrot.lane.b32.xlu0 %v5681_v60, %s2839_s8 }
 0x15f   : > { %v3911_v16 = vpop.permute.xlu1 %717  ;;  %v3913_v41 = vpop.permute.xlu0 %715 }
 0x161   : > { %889 = vrot.lane.b32.xlu1 %v5682_v23, %s2839_s8  ;;  %887 = vrot.lane.b32.xlu0 %v5683_v29, %s2839_s8  ;;  %v5691_v23 = vld [vmem:[#allocation43_spill] sm:$0xff] }
 0x163   : > { %v3919_v8 = vpop.permute.xlu1 %721  ;;  %v3921_v55 = vpop.permute.xlu0 %719 }
 0x164   : > { %5684 = vst [vmem:[#allocation7_spill] sm:$0xff] %v3919_v8 }
 0x165   : > { %893 = vrot.lane.b32.xlu1 %v5685_v42, %s2839_s8  ;;  %891 = vrot.lane.b32.xlu0 %v5686_v24, %s2839_s8 }
 0x167   : > { %v726_v38 = vpop.permute.xlu1 %725  ;;  %v724_v20 = vpop.permute.xlu0 %723 }
 0x168   : > { %v3929_v0 = vsel %vm1701_vm4, %v3785_v32, %v726_v38  ;;  %v3933_v44 = vsel %vm1701_vm4, %v3789_v14, %v724_v20  ;;  %v5690_v14 = vld [vmem:[#allocation42_spill] sm:$0xff]  ;;  %v5693_v38 = vld [vmem:[#allocation45_spill] sm:$0xff] }
 0x169   : > { %897 = vrot.lane.b32.xlu1 %v5687_v45, %s2839_s8  ;;  %895 = vrot.lane.b32.xlu0 %v5688_v46, %s2839_s8 }
 0x16b   : > { %v730_v1 = vpop.permute.xlu1 %729  ;;  %v728_v61 = vpop.permute.xlu0 %727 }
 0x16c   : > { %v3941_v36 = vsel %vm1701_vm4, %v3797_v52, %v730_v1  ;;  %v3945_v32 = vsel %vm1701_vm4, %v3801_v51, %v728_v61  ;;  %v5692_v51 = vld [vmem:[#allocation44_spill] sm:$0xff] }
 0x16d   : > { %901 = vrot.lane.b32.xlu1 %v5689_v7, %s2839_s8  ;;  %899 = vrot.lane.b32.xlu0 %v5690_v14, %s2839_s8  ;;  %v5696_v1 = vld [vmem:[#allocation48_spill] sm:$0xff]  ;;  %v5698_v14 = vld [vmem:[#allocation51_spill] sm:$0xff] }
 0x16f   : > { %v734_v12 = vpop.permute.xlu1 %733  ;;  %v732_v54 = vpop.permute.xlu0 %731 }
 0x170   : > { %v3953_v60 = vsel %vm1701_vm4, %v3809_v25, %v734_v12  ;;  %v3957_v52 = vsel %vm1701_vm4, %v3813_v11, %v732_v54  ;;  %v5694_v11 = vld [vmem:[#allocation46_spill] sm:$0xff] }
 0x171   : > { %905 = vrot.lane.b32.xlu1 %v5691_v23, %s2839_s8  ;;  %903 = vrot.lane.b32.xlu0 %v5692_v51, %s2839_s8  ;;  %v5700_v51 = vld [vmem:[#allocation53_spill] sm:$0xff] }
 0x173   : > { %v738_v29 = vpop.permute.xlu1 %737  ;;  %v736_v42 = vpop.permute.xlu0 %735 }
 0x174   : > { %v3965_v24 = vsel %vm1701_vm4, %v3821_v58, %v738_v29  ;;  %v3969_v25 = vsel %vm1701_vm4, %v3825_v13, %v736_v42  ;;  %v5695_v13 = vld [vmem:[#allocation47_spill] sm:$0xff]  ;;  %v5701_v29 = vld [vmem:[#allocation54_spill] sm:$0xff] }
 0x175   : > { %909 = vrot.lane.b32.xlu1 %v5693_v38, %s2839_s8  ;;  %907 = vrot.lane.b32.xlu0 %v5694_v11, %s2839_s8  ;;  %v280_v42 = vld [vmem:[%s2923_s28 + $0xdb] sm:$0xff]  ;;  %v279_v38 = vld [vmem:[%s2923_s28 + $0xd3] sm:$0xff] }
 0x177   : > { %v742_v20 = vpop.permute.xlu1 %741  ;;  %v740_v45 = vpop.permute.xlu0 %739 }
 0x178   : > { %v3977_v46 = vsel %vm1701_vm4, %v3833_v53, %v742_v20  ;;  %v3981_v58 = vsel %vm1701_vm4, %v3837_v15, %v740_v45  ;;  %v5699_v53 = vld [vmem:[#allocation52_spill] sm:$0xff] }
 0x179   : > { %913 = vrot.lane.b32.xlu1 %v5695_v13, %s2839_s8  ;;  %911 = vrot.lane.b32.xlu0 %v5696_v1, %s2839_s8 }
 0x17b   : > { %v3987_v61 = vpop.permute.xlu1 %745  ;;  %v3989_v7 = vpop.permute.xlu0 %743 }
 0x17c   : > { %5697 = vst [vmem:[#allocation8_spill] sm:$0xff] %v3987_v61 }
 0x17d   : > { %917 = vrot.lane.b32.xlu1 %v5698_v14, %s2839_s8  ;;  %915 = vrot.lane.b32.xlu0 %v5699_v53, %s2839_s8 }
 0x17f   : > { %v750_v12 = vpop.permute.xlu1 %749  ;;  %v748_v54 = vpop.permute.xlu0 %747 }
 0x180   : > { %v3997_v15 = vsel %vm1701_vm4, %v3853_v40, %v750_v12  ;;  %v4001_v23 = vsel %vm1701_vm4, %v3857_v39, %v748_v54 }
 0x181   : > { %921 = vrot.lane.b32.xlu1 %v5700_v51, %s2839_s8  ;;  %919 = vrot.lane.b32.xlu0 %v5701_v29, %s2839_s8  ;;  %v5705_v51 = vld [vmem:[#allocation58_spill] sm:$0xff] }
 0x183   : > { %v754_v11 = vpop.permute.xlu1 %753  ;;  %v752_v20 = vpop.permute.xlu0 %751 }
 0x184   : > { %v4011_v45 = vsel %vm1701_vm4, %v3867_v33, %v754_v11  ;;  %v4015_v40 = vsel %vm1701_vm4, %v3871_v37, %v752_v20  ;;  %v5702_v33 = vld [vmem:[#allocation55_spill] sm:$0xff]  ;;  %v5703_v37 = vld [vmem:[#allocation56_spill] sm:$0xff]  ;;  %v5706_v11 = vld [vmem:[#allocation61_spill] sm:$0xff] }
 0x185   : > { %925 = vrot.lane.b32.xlu1 %v280_v42, %s2839_s8  ;;  %923 = vrot.lane.b32.xlu0 %v279_v38, %s2839_s8  ;;  %s5451_s8 = scalar_lea.hbm %s5506_s3, %s2617_s5 }
 0x187   : > { %v758_v39 = vpop.permute.xlu1 %757  ;;  %v756_v13 = vpop.permute.xlu0 %755 }
 0x188   : > { %v4021_v1 = vsel %vm1701_vm4, %v3877_v28, %v758_v39  ;;  %v4025_v14 = vsel %vm1701_vm4, %v3881_v47, %v756_v13  ;;  %v5704_v47 = vld [vmem:[#allocation57_spill] sm:$0xff] }
 0x189   : > { %957 = vrot.lane.b32.xlu1 %v5702_v33, %s2840_s9  ;;  %955 = vrot.lane.b32.xlu0 %v5703_v37, %s2840_s9  ;;  %v5708_v13 = vld [vmem:[#allocation65_spill] sm:$0xff]  ;;  %v5711_v37 = vld [vmem:[#allocation67_spill] sm:$0xff] }
 0x18b   : > { %v762_v53 = vpop.permute.xlu1 %761  ;;  %v760_v12 = vpop.permute.xlu0 %759 }
 0x18c   : > { %v4033_v54 = vsel %vm1701_vm4, %v3889_v31, %v762_v53  ;;  %v4037_v28 = vsel %vm1701_vm4, %v3893_v62, %v760_v12  ;;  %v5707_v62 = vld [vmem:[#allocation62_spill] sm:$0xff]  ;;  %v5712_v53 = vld [vmem:[#allocation68_spill] sm:$0xff] }
 0x18d   : > { %961 = vrot.lane.b32.xlu1 %v5704_v47, %s2840_s9  ;;  %959 = vrot.lane.b32.xlu0 %v5705_v51, %s2840_s9 }
 0x18f   : > { %v766_v29 = vpop.permute.xlu1 %765  ;;  %v764_v42 = vpop.permute.xlu0 %763 }
 0x190   : > { %v4045_v38 = vsel %vm1701_vm4, %v3901_v17, %v766_v29  ;;  %v4049_v31 = vsel %vm1701_vm4, %v3905_v2, %v764_v42  ;;  %v5709_v17 = vld [vmem:[#allocation66_spill] sm:$0xff] }
 0x191   : > { %965 = vrot.lane.b32.xlu1 %v5706_v11, %s2840_s9  ;;  %963 = vrot.lane.b32.xlu0 %v5707_v62, %s2840_s9  ;;  %v5713_v62 = vld [vmem:[#allocation69_spill] sm:$0xff] }
 0x193   : > { %v4055_v20 = vpop.permute.xlu1 %797  ;;  %v4057_v39 = vpop.permute.xlu0 %795 }
 0x195   : > { %969 = vrot.lane.b32.xlu1 %v5708_v13, %s2840_s9  ;;  %967 = vrot.lane.b32.xlu0 %v5709_v17, %s2840_s9  ;;  %v5714_v13 = vld [vmem:[#allocation70_spill] sm:$0xff] }
 0x197   : > { %v4063_v33 = vpop.permute.xlu1 %801  ;;  %v4065_v2 = vpop.permute.xlu0 %799 }
 0x198   : > { %5710 = vst [vmem:[#allocation9_spill] sm:$0xff] %v4063_v33  ;;  %v4256_v33 = vld [vmem:[%s2923_s28 + $0x71] sm:$0xff] }
 0x199   : > { %973 = vrot.lane.b32.xlu1 %v5711_v37, %s2840_s9  ;;  %971 = vrot.lane.b32.xlu0 %v5712_v53, %s2840_s9  ;;  %5724 = vst [vmem:[#allocation16_spill] sm:$0xff] %v4256_v33 }
 0x19b   : > { %v806_v12 = vpop.permute.xlu1 %805  ;;  %v804_v29 = vpop.permute.xlu0 %803 }
 0x19c   : > { %v4073_v42 = vsel %vm1728_vm5, %v3929_v0, %v806_v12  ;;  %v4077_v11 = vsel %vm1728_vm5, %v3933_v44, %v804_v29  ;;  %v5715_v12 = vld [vmem:[#allocation71_spill] sm:$0xff]  ;;  %v5716_v44 = vld [vmem:[#allocation72_spill] sm:$0xff] }
 0x19d   : > { %977 = vrot.lane.b32.xlu1 %v5713_v62, %s2840_s9  ;;  %975 = vrot.lane.b32.xlu0 %v5714_v13, %s2840_s9 }
 0x19f   : > { %v810_v17 = vpop.permute.xlu1 %809  ;;  %v808_v37 = vpop.permute.xlu0 %807 }
 0x1a0   : > { %v4085_v53 = vsel %vm1728_vm5, %v3941_v36, %v810_v17  ;;  %v4089_v0 = vsel %vm1728_vm5, %v3945_v32, %v808_v37  ;;  %v5717_v32 = vld [vmem:[#allocation73_spill] sm:$0xff] }
 0x1a1   : > { %981 = vrot.lane.b32.xlu1 %v5715_v12, %s2840_s9  ;;  %979 = vrot.lane.b32.xlu0 %v5716_v44, %s2840_s9 }
 0x1a3   : > { %v814_v29 = vpop.permute.xlu1 %813  ;;  %v812_v62 = vpop.permute.xlu0 %811 }
 0x1a4   : > { %v4097_v13 = vsel %vm1728_vm5, %v3953_v60, %v814_v29  ;;  %v4101_v36 = vsel %vm1728_vm5, %v3957_v52, %v812_v62 }
 0x1a5   : > { %985 = vrot.lane.b32.xlu1 %v3474_v3, %s2840_s9  ;;  %983 = vrot.lane.b32.xlu0 %v5717_v32, %s2840_s9 }
 0x1a7   : > { %v818_v17 = vpop.permute.xlu1 %817  ;;  %v816_v37 = vpop.permute.xlu0 %815 }
 0x1a8   : > { %v4109_v12 = vsel %vm1728_vm5, %v3965_v24, %v818_v17  ;;  %v4113_v60 = vsel %vm1728_vm5, %v3969_v25, %v816_v37  ;;  %v2673_v17 = vld [vmem:[%s2923_s28 + $0x29] sm:$0xff] }
 0x1a9   : > { %989 = vrot.lane.b32.xlu1 %v3496_v43, %s2840_s9  ;;  %987 = vrot.lane.b32.xlu0 %v3499_v27, %s2840_s9 }
 0x1ab   : > { %v822_v3 = vpop.permute.xlu1 %821  ;;  %v820_v52 = vpop.permute.xlu0 %819 }
 0x1ac   : > { %v4121_v44 = vsel %vm1728_vm5, %v3977_v46, %v822_v3  ;;  %v4125_v24 = vsel %vm1728_vm5, %v3981_v58, %v820_v52 }
 0x1ad   : > { %993 = vrot.lane.b32.xlu1 %v3516_v34, %s2840_s9  ;;  %991 = vrot.lane.b32.xlu0 %v3519_v35, %s2840_s9  ;;  %v282_v35 = vld [vmem:[%s2923_s28 + $0xe8] sm:$0xff] }
 0x1af   : > { %v4131_v43 = vpop.permute.xlu1 %825  ;;  %v4133_v25 = vpop.permute.xlu0 %823 }
 0x1b0   : > { %5718 = vst [vmem:[#allocation10_spill] sm:$0xff] %v4131_v43  ;;  %5719 = vst [vmem:[#allocation11_spill] sm:$0xff] %v4133_v25  ;;  %v4251_v43 = vld [vmem:[%s2923_s28 + $0x79] sm:$0xff] }
 0x1b1   : > { %997 = vrot.lane.b32.xlu1 %v3532_v56, %s2840_s9  ;;  %995 = vrot.lane.b32.xlu0 %v3535_v63, %s2840_s9  ;;  %v4153_v56 = vld [vmem:[%s2923_s28 + $0xe0] sm:$0xff]  ;;  %5723 = vst [vmem:[#allocation15_spill] sm:$0xff] %v4251_v43 }
 0x1b2   : > { %5720 = vst [vmem:[#allocation12_spill] sm:$0xff] %v4153_v56 }
 0x1b3   : > { %v830_v46 = vpop.permute.xlu1 %829  ;;  %v828_v29 = vpop.permute.xlu0 %827 }
 0x1b4   : > { %v4141_v58 = vsel %vm1728_vm5, %v3997_v15, %v830_v46  ;;  %v4145_v34 = vsel %vm1728_vm5, %v4001_v23, %v828_v29  ;;  %v4192_v46 = vld [vmem:[%s2923_s28 + $0x31] sm:$0xff] }
 0x1b5   : > { %1001 = vrot.lane.b32.xlu1 %v3548_v57, %s2840_s9  ;;  %999 = vrot.lane.b32.xlu0 %v3551_v50, %s2840_s9 }
 0x1b7   : > { %v834_v63 = vpop.permute.xlu1 %833  ;;  %v832_v62 = vpop.permute.xlu0 %831 }
 0x1b8   : > { %v4157_v15 = vsel %vm1728_vm5, %v4011_v45, %v834_v63  ;;  %v4161_v23 = vsel %vm1728_vm5, %v4015_v40, %v832_v62  ;;  %v2674_v40 = vld [vmem:[%s2923_s28 + $0x21] sm:$0xff]  ;;  %v4205_v63 = vld [vmem:[%s2923_s28 + $0x49] sm:$0xff] }
 0x1b9   : > { %1005 = vrot.lane.b32.xlu1 %v282_v35, %s2840_s9  ;;  %1003 = vrot.lane.b32.xlu0 %v4153_v56, %s2840_s9  ;;  %v4210_v62 = vld [vmem:[%s2923_s28 + $0x41] sm:$0xff] }
 0x1bb   : > { %v838_v57 = vpop.permute.xlu1 %837  ;;  %v836_v50 = vpop.permute.xlu0 %835 }
 0x1bc   : > { %v4168_v32 = vsel %vm1728_vm5, %v4021_v1, %v838_v57  ;;  %v4172_v45 = vsel %vm1728_vm5, %v4025_v14, %v836_v50  ;;  %v4187_v14 = vld [vmem:[%s2923_s28 + $0x39] sm:$0xff] }
 0x1bd   : > { %1037 = vrot.lane.b32.xlu1 %v2673_v17, %s2841_s10  ;;  %1035 = vrot.lane.b32.xlu0 %v2674_v40, %s2841_s10 }
 0x1bf   : > { %v842_v37 = vpop.permute.xlu1 %841  ;;  %v840_v3 = vpop.permute.xlu0 %839 }
 0x1c0   : > { %v4180_v52 = vsel %vm1728_vm5, %v4033_v54, %v842_v37  ;;  %v4184_v1 = vsel %vm1728_vm5, %v4037_v28, %v840_v3  ;;  %v4233_v37 = vld [vmem:[%s2923_s28 + $0x69] sm:$0xff]  ;;  %v4238_v3 = vld [vmem:[%s2923_s28 + $0x61] sm:$0xff] }
 0x1c1   : > { %1041 = vrot.lane.b32.xlu1 %v4187_v14, %s2841_s10  ;;  %1039 = vrot.lane.b32.xlu0 %v4192_v46, %s2841_s10 }
 0x1c3   : > { %v846_v29 = vpop.permute.xlu1 %845  ;;  %v844_v54 = vpop.permute.xlu0 %843 }
 0x1c4   : > { %v4198_v35 = vsel %vm1728_vm5, %v4045_v38, %v846_v29  ;;  %v4202_v28 = vsel %vm1728_vm5, %v4049_v31, %v844_v54  ;;  %v4219_v38 = vld [vmem:[%s2923_s28 + $0x59] sm:$0xff]  ;;  %v4224_v31 = vld [vmem:[%s2923_s28 + $0x51] sm:$0xff] }
 0x1c5   : > { %1045 = vrot.lane.b32.xlu1 %v4205_v63, %s2841_s10  ;;  %1043 = vrot.lane.b32.xlu0 %v4210_v62, %s2841_s10 }
 0x1c7   : > { %v4214_v57 = vpop.permute.xlu1 %877  ;;  %v4216_v50 = vpop.permute.xlu0 %875 }
 0x1c9   : > { %1049 = vrot.lane.b32.xlu1 %v4219_v38, %s2841_s10  ;;  %1047 = vrot.lane.b32.xlu0 %v4224_v31, %s2841_s10 }
 0x1cb   : > { %v4228_v17 = vpop.permute.xlu1 %881  ;;  %v4230_v40 = vpop.permute.xlu0 %879 }
 0x1cc   : > { %5721 = vst [vmem:[#allocation13_spill] sm:$0xff] %v4228_v17  ;;  %5722 = vst [vmem:[#allocation14_spill] sm:$0xff] %v4230_v40 }
 0x1cd   : > { %1053 = vrot.lane.b32.xlu1 %v4233_v37, %s2841_s10  ;;  %1051 = vrot.lane.b32.xlu0 %v4238_v3, %s2841_s10 }
 0x1cf   : > { %v886_v29 = vpop.permute.xlu1 %885  ;;  %v884_v54 = vpop.permute.xlu0 %883 }
 0x1d0   : > { %v4244_v56 = vsel %vm1755_vm6, %v4073_v42, %v886_v29  ;;  %v4248_v17 = vsel %vm1755_vm6, %v4077_v11, %v884_v54  ;;  %v4269_v29 = vld [vmem:[%s2923_s28 + $0x89] sm:$0xff]  ;;  %v4274_v54 = vld [vmem:[%s2923_s28 + $0x81] sm:$0xff] }
 0x1d1   : > { %1057 = vrot.lane.b32.xlu1 %v4251_v43, %s2841_s10  ;;  %1055 = vrot.lane.b32.xlu0 %v4256_v33, %s2841_s10  ;;  %5725 = vst [vmem:[#allocation17_spill] sm:$0xff] %v4269_v29  ;;  %5726 = vst [vmem:[#allocation18_spill] sm:$0xff] %v4274_v54 }
 0x1d3   : > { %v890_v61 = vpop.permute.xlu1 %889  ;;  %v888_v8 = vpop.permute.xlu0 %887 }
 0x1d4   : > { %v4262_v42 = vsel %vm1755_vm6, %v4085_v53, %v890_v61  ;;  %v4266_v11 = vsel %vm1755_vm6, %v4089_v0, %v888_v8  ;;  %v2687_v53 = vld [vmem:[%s2923_s28 + $0x99] sm:$0xff]  ;;  %v2688_v0 = vld [vmem:[%s2923_s28 + $0x91] sm:$0xff] }
 0x1d5   : > { %1061 = vrot.lane.b32.xlu1 %v4269_v29, %s2841_s10  ;;  %1059 = vrot.lane.b32.xlu0 %v4274_v54, %s2841_s10 }
 0x1d7   : > { %v894_v43 = vpop.permute.xlu1 %893  ;;  %v892_v33 = vpop.permute.xlu0 %891 }
 0x1d8   : > { %v4280_v61 = vsel %vm1755_vm6, %v4097_v13, %v894_v43  ;;  %v4284_v8 = vsel %vm1755_vm6, %v4101_v36, %v892_v33  ;;  %v4299_v33 = vld [vmem:[%s2923_s28 + $0xa9] sm:$0xff]  ;;  %v4304_v36 = vld [vmem:[%s2923_s28 + $0xa1] sm:$0xff] }
 0x1d9   : > { %1065 = vrot.lane.b32.xlu1 %v2687_v53, %s2841_s10  ;;  %1063 = vrot.lane.b32.xlu0 %v2688_v0, %s2841_s10 }
 0x1db   : > { %v898_v29 = vpop.permute.xlu1 %897  ;;  %v896_v54 = vpop.permute.xlu0 %895 }
 0x1dc   : > { %v4292_v9 = vsel %vm1755_vm6, %v4109_v12, %v898_v29  ;;  %v4296_v13 = vsel %vm1755_vm6, %v4113_v60, %v896_v54  ;;  %v4317_v29 = vld [vmem:[%s2923_s28 + $0xb9] sm:$0xff]  ;;  %v4322_v54 = vld [vmem:[%s2923_s28 + $0xb1] sm:$0xff] }
 0x1dd   : > { %1069 = vrot.lane.b32.xlu1 %v4299_v33, %s2841_s10  ;;  %1067 = vrot.lane.b32.xlu0 %v4304_v36, %s2841_s10 }
 0x1df   : > { %v902_v43 = vpop.permute.xlu1 %901  ;;  %v900_v53 = vpop.permute.xlu0 %899 }
 0x1e0   : > { %v4310_v12 = vsel %vm1755_vm6, %v4121_v44, %v902_v43  ;;  %v4314_v60 = vsel %vm1755_vm6, %v4125_v24, %v900_v53  ;;  %v4331_v43 = vld [vmem:[%s2923_s28 + $0xc9] sm:$0xff]  ;;  %v4336_v24 = vld [vmem:[%s2923_s28 + $0xc1] sm:$0xff] }
 0x1e1   : > { %1073 = vrot.lane.b32.xlu1 %v4317_v29, %s2841_s10  ;;  %1071 = vrot.lane.b32.xlu0 %v4322_v54, %s2841_s10 }
 0x1e3   : > { %v4326_v0 = vpop.permute.xlu1 %905  ;;  %v4328_v44 = vpop.permute.xlu0 %903 }
 0x1e4   : > { %5727 = vst [vmem:[#allocation19_spill] sm:$0xff] %v4326_v0  ;;  %5728 = vst [vmem:[#allocation20_spill] sm:$0xff] %v4328_v44  ;;  %v4356_v44 = vld [vmem:[%s2923_s28 + $0xe1] sm:$0xff] }
 0x1e5   : > { %1077 = vrot.lane.b32.xlu1 %v4331_v43, %s2841_s10  ;;  %1075 = vrot.lane.b32.xlu0 %v4336_v24, %s2841_s10  ;;  %5730 = vst [vmem:[#allocation22_spill] sm:$0xff] %v4356_v44 }
 0x1e7   : > { %v910_v53 = vpop.permute.xlu1 %909  ;;  %v908_v6 = vpop.permute.xlu0 %907 }
 0x1e8   : > { %v4342_v18 = vsel %vm1755_vm6, %v4141_v58, %v910_v53  ;;  %v4346_v0 = vsel %vm1755_vm6, %v4145_v34, %v908_v6 }
 0x1e9   : > { %1081 = vrot.lane.b32.xlu1 %v3714_v21, %s2841_s10  ;;  %1079 = vrot.lane.b32.xlu0 %v3717_v22, %s2841_s10 }
 0x1eb   : > { %v914_v40 = vpop.permute.xlu1 %913  ;;  %v912_v25 = vpop.permute.xlu0 %911 }
 0x1ec   : > { %v4360_v58 = vsel %vm1755_vm6, %v4157_v15, %v914_v40  ;;  %v4364_v6 = vsel %vm1755_vm6, %v4161_v23, %v912_v25  ;;  %v2695_v25 = vld [vmem:[%s2923_s28 + $0x2a] sm:$0xff]  ;;  %v2696_v23 = vld [vmem:[%s2923_s28 + $0x22] sm:$0xff] }
 0x1ed   : > { %1085 = vrot.lane.b32.xlu1 %v4353_v48, %s2841_s10  ;;  %1083 = vrot.lane.b32.xlu0 %v4356_v44, %s2841_s10  ;;  %v2701_v44 = vld [vmem:[%s2923_s28 + $0x3a] sm:$0xff] }
 0x1ef   : > { %v918_v21 = vpop.permute.xlu1 %917  ;;  %v916_v22 = vpop.permute.xlu0 %915 }
 0x1f0   : > { %v4372_v34 = vsel %vm1755_vm6, %v4168_v32, %v918_v21  ;;  %v4376_v15 = vsel %vm1755_vm6, %v4172_v45, %v916_v22  ;;  %v2697_v45 = vld [vmem:[%s2923_s28 + $0x23] sm:$0xff]  ;;  %v2698_v21 = vld [vmem:[%s2923_s28 + $0x32] sm:$0xff] }
 0x1f1   : > { %1117 = vrot.lane.b32.xlu1 %v2695_v25, %s2842_s11  ;;  %1115 = vrot.lane.b32.xlu0 %v2696_v23, %s2842_s11 }
 0x1f3   : > { %v922_v40 = vpop.permute.xlu1 %921  ;;  %v920_v53 = vpop.permute.xlu0 %919 }
 0x1f4   : > { %v4384_v48 = vsel %vm1755_vm6, %v4180_v52, %v922_v40  ;;  %v4388_v32 = vsel %vm1755_vm6, %v4184_v1, %v920_v53  ;;  %v2699_v1 = vld [vmem:[%s2923_s28 + $0x2b] sm:$0xff]  ;;  %v1998_v40 = vld [vmem:[%s5504_s1] sm:$0xff] }
 0x1f5   : > { %1195 = vrot.lane.b32.xlu1 %v2697_v45, %s2843_s17  ;;  %1119 = vrot.lane.b32.xlu0 %v2698_v21, %s2842_s11 }
 0x1f7   : > { %v926_v22 = vpop.permute.xlu1 %925  ;;  %v924_v25 = vpop.permute.xlu0 %923 }
 0x1f8   : > { %v4396_v23 = vsel %vm1755_vm6, %v4198_v35, %v926_v22  ;;  %v4400_v52 = vsel %vm1755_vm6, %v4202_v28, %v924_v25  ;;  %v1999_v35 = vld [vmem:[%s5504_s1 + $0x8] sm:$0xff]  ;;  %v2001_v22 = vld [vmem:[%s5504_s1 + $0x18] sm:$0xff] }
 0x1f9   : > { %1275 = vrot.lane.b32.xlu1 %v5705_v51, %s2844_s19  ;;  %1197 = vrot.lane.b32.xlu0 %v2699_v1, %s2843_s17  ;;  %v2591_v45 = vpack.c.bf16 %v1999_v35, %v1998_v40  ;;  %v2000_v51 = vld [vmem:[%s5504_s1 + $0x10] sm:$0xff]  ;;  %v2003_v35 = vld [vmem:[%s5504_s1 + $0x28] sm:$0xff] }
 0x1fa   : > { %v2595_v40 = vpack.c.bf16 %v2001_v22, %v2000_v51 }
 0x1fb   : > { %v4412_v53 = vpop.permute.xlu1 %957  ;;  %v4414_v28 = vpop.permute.xlu0 %955  ;;  %2592 = vmatprep.subr.bf16.mxu0 %v2591_v45  ;;  %2607 = vmatprep.subr.bf16.mxu1 %v2591_v45 }
 0x1fc   : > { %2594 = vmatpush3.bf16.msra.mxu0 %v2591_v45  ;;  %2611 = vmatpush3.bf16.msra.mxu1 %v2591_v45 }
 0x1fd   : > { %1355 = vrot.lane.b32.xlu1 %v4192_v46, %s2845_s27  ;;  %1277 = vrot.lane.b32.xlu0 %v5704_v47, %s2844_s19  ;;  %v4433_v47 = vld [vmem:[%s2923_s28 + $0x92] sm:$0xff]  ;;  %v2002_v46 = vld [vmem:[%s5504_s1 + $0x20] sm:$0xff] }
 0x1fe   : > { %5732 = vst [vmem:[#allocation24_spill] sm:$0xff] %v4433_v47  ;;  %2596 = vmatprep.subr.bf16.mxu0 %v2595_v40  ;;  %2608 = vmatprep.subr.bf16.mxu1 %v2595_v40 }
 0x1ff   : > { %v4426_v25 = vpop.permute.xlu1 %961  ;;  %v4428_v1 = vpop.permute.xlu0 %959 }
 0x200   : > { %5731 = vst [vmem:[#allocation23_spill] sm:$0xff] %v4426_v25  ;;  %2598 = vmatpush3.bf16.msra.mxu0 %v2595_v40  ;;  %2612 = vmatpush3.bf16.msra.mxu1 %v2595_v40  ;;  %v4471_v25 = vld [vmem:[%s2923_s28 + $0x9a] sm:$0xff] }
 0x201   : > { %1357 = vrot.lane.b32.xlu1 %v4187_v14, %s2845_s27  ;;  %1143 = vrot.lane.b32.xlu0 %v4433_v47, %s2842_s11  ;;  %v2599_v14 = vpack.c.bf16 %v2003_v35, %v2002_v46  ;;  %5733 = vst [vmem:[#allocation25_spill] sm:$0xff] %v4471_v25 }
 0x203   : > { %v966_v45 = vpop.permute.xlu1 %965  ;;  %v964_v51 = vpop.permute.xlu0 %963  ;;  %2600 = vmatprep.subr.bf16.mxu0 %v2599_v14  ;;  %2609 = vmatprep.subr.bf16.mxu1 %v2599_v14 }
 0x204   : > { %v4445_v22 = vsel %vm1782_vm7, %v4244_v56, %v966_v45  ;;  %v4449_v47 = vsel %vm1782_vm7, %v4248_v17, %v964_v51  ;;  %2602 = vmatpush3.bf16.msra.mxu0 %v2599_v14  ;;  %v2004_v56 = vld [vmem:[%s5504_s1 + $0x30] sm:$0xff]  ;;  %v2005_v17 = vld [vmem:[%s5504_s1 + $0x38] sm:$0xff]  ;;  %2613 = vmatpush3.bf16.msra.mxu1 %v2599_v14 }
 0x205   : > { %1121 = vrot.lane.b32.xlu1 %v2701_v44, %s2842_s11  ;;  %1435 = vrot.lane.b32.xlu0 %v2698_v21, %s2846_s20  ;;  %v2603_v45 = vpack.c.bf16 %v2005_v17, %v2004_v56  ;;  %v2702_v51 = vld [vmem:[%s2923_s28 + $0x33] sm:$0xff] }
 0x207   : > { %v970_v46 = vpop.permute.xlu1 %969  ;;  %v968_v40 = vpop.permute.xlu0 %967  ;;  %2604 = vmatprep.subr.bf16.mxu0 %v2603_v45  ;;  %2610 = vmatprep.subr.bf16.mxu1 %v2603_v45 }
 0x208   : > { %v4462_v35 = vsel %vm1782_vm7, %v4262_v42, %v970_v46  ;;  %v4466_v21 = vsel %vm1782_vm7, %v4266_v11, %v968_v40  ;;  %2606 = vmatpush3.bf16.msra.mxu0 %v2603_v45  ;;  %2614 = vmatpush3.bf16.msra.mxu1 %v2603_v45  ;;  %v4485_v40 = vld [vmem:[%s2923_s28 + $0x93] sm:$0xff] }
 0x209   : > { %1199 = vrot.lane.b32.xlu1 %v2702_v51, %s2843_s17  ;;  %1145 = vrot.lane.b32.xlu0 %v4471_v25, %s2842_s11  ;;  %5734 = vst [vmem:[#allocation26_spill] sm:$0xff] %v4485_v40 }
 0x20b   : > { %v974_v14 = vpop.permute.xlu1 %973  ;;  %v972_v42 = vpop.permute.xlu0 %971 }
 0x20c   : > { %v4477_v11 = vsel %vm1782_vm7, %v4280_v61, %v974_v14  ;;  %v4481_v46 = vsel %vm1782_vm7, %v4284_v8, %v972_v42  ;;  %v2705_v8 = vld [vmem:[%s2923_s28 + $0x3b] sm:$0xff] }
 0x20d   : > { %1437 = vrot.lane.b32.xlu1 %v2701_v44, %s2846_s20  ;;  %1223 = vrot.lane.b32.xlu0 %v4485_v40, %s2843_s17 }
 0x20f   : > { %v978_v56 = vpop.permute.xlu1 %977  ;;  %v976_v17 = vpop.permute.xlu0 %975 }
 0x210   : > { %v4491_v45 = vsel %vm1782_vm7, %v4292_v9, %v978_v56  ;;  %v4495_v61 = vsel %vm1782_vm7, %v4296_v13, %v976_v17  ;;  %v2706_v13 = vld [vmem:[%s2923_s28 + $0x40] sm:$0xff] }
 0x211   : > { %1201 = vrot.lane.b32.xlu1 %v2705_v8, %s2843_s17  ;;  %1515 = vrot.lane.b32.xlu0 %v2702_v51, %s2847_s4  ;;  %v4511_v56 = vld [vmem:[%s2923_s28 + $0x9b] sm:$0xff] }
 0x212   : > { %5735 = vst [vmem:[#allocation27_spill] sm:$0xff] %v4511_v56 }
 0x213   : > { %v982_v44 = vpop.permute.xlu1 %981  ;;  %v980_v14 = vpop.permute.xlu0 %979 }
 0x214   : > { %v4502_v42 = vsel %vm1782_vm7, %v4310_v12, %v982_v44  ;;  %v4506_v9 = vsel %vm1782_vm7, %v4314_v60, %v980_v14 }
 0x215   : > { %1279 = vrot.lane.b32.xlu1 %v2706_v13, %s2844_s19  ;;  %1225 = vrot.lane.b32.xlu0 %v4511_v56, %s2843_s17  ;;  %v2708_v13 = vld [vmem:[%s2923_s28 + $0xa8] sm:$0xff] }
 0x216   : > { %v2709_v56 = vld [vmem:[%s2923_s28 + $0x48] sm:$0xff] }
 0x217   : > { %v4515_v51 = vpop.permute.xlu1 %985  ;;  %v4517_v17 = vpop.permute.xlu0 %983 }
 0x219   : > { %1517 = vrot.lane.b32.xlu1 %v2705_v8, %s2847_s4  ;;  %1303 = vrot.lane.b32.xlu0 %v3499_v27, %s2844_s19 }
 0x21b   : > { %v990_v12 = vpop.permute.xlu1 %989  ;;  %v988_v60 = vpop.permute.xlu0 %987 }
 0x21c   : > { %v4524_v44 = vsel %vm1782_vm7, %v4342_v18, %v990_v12  ;;  %v4528_v14 = vsel %vm1782_vm7, %v4346_v0, %v988_v60  ;;  %v2710_v60 = vld [vmem:[%s2923_s28 + $0xa2] sm:$0xff] }
 0x21d   : > { %1305 = vrot.lane.b32.xlu1 %v2708_v13, %s2844_s19  ;;  %1281 = vrot.lane.b32.xlu0 %v2709_v56, %s2844_s19 }
 0x21f   : > { %v994_v8 = vpop.permute.xlu1 %993  ;;  %v992_v27 = vpop.permute.xlu0 %991 }
 0x220   : > { %v4536_v40 = vsel %vm1782_vm7, %v4360_v58, %v994_v8  ;;  %v4540_v18 = vsel %vm1782_vm7, %v4364_v6, %v992_v27  ;;  %v2711_v6 = vld [vmem:[%s2923_s28 + $0x42] sm:$0xff] }
 0x221   : > { %1383 = vrot.lane.b32.xlu1 %v4304_v36, %s2845_s27  ;;  %1359 = vrot.lane.b32.xlu0 %v4210_v62, %s2845_s27 }
 0x223   : > { %v998_v0 = vpop.permute.xlu1 %997  ;;  %v996_v12 = vpop.permute.xlu0 %995 }
 0x224   : > { %v4548_v56 = vsel %vm1782_vm7, %v4372_v34, %v998_v0  ;;  %v4552_v58 = vsel %vm1782_vm7, %v4376_v15, %v996_v12  ;;  %v2713_v0 = vld [vmem:[%s2923_s28 + $0x4a] sm:$0xff] }
 0x225   : > { %1147 = vrot.lane.b32.xlu1 %v2710_v60, %s2842_s11  ;;  %1123 = vrot.lane.b32.xlu0 %v2711_v6, %s2842_s11 }
 0x227   : > { %v1002_v36 = vpop.permute.xlu1 %1001  ;;  %v1000_v62 = vpop.permute.xlu0 %999 }
 0x228   : > { %v4560_v13 = vsel %vm1782_vm7, %v4384_v48, %v1002_v36  ;;  %v4564_v34 = vsel %vm1782_vm7, %v4388_v32, %v1000_v62 }
 0x229   : > { %1385 = vrot.lane.b32.xlu1 %v4299_v33, %s2845_s27  ;;  %1361 = vrot.lane.b32.xlu0 %v4205_v63, %s2845_s27  ;;  %v2712_v63 = vld [vmem:[%s2923_s28 + $0xaa] sm:$0xff] }
 0x22b   : > { %v1006_v15 = vpop.permute.xlu1 %1005  ;;  %v1004_v8 = vpop.permute.xlu0 %1003 }
 0x22c   : > { %v4572_v27 = vsel %vm1782_vm7, %v4396_v23, %v1006_v15  ;;  %v4576_v48 = vsel %vm1782_vm7, %v4400_v52, %v1004_v8  ;;  %v2714_v52 = vld [vmem:[%s2923_s28 + $0xa3] sm:$0xff] }
 0x22d   : > { %1463 = vrot.lane.b32.xlu1 %v2710_v60, %s2846_s20  ;;  %1439 = vrot.lane.b32.xlu0 %v2711_v6, %s2846_s20  ;;  %v2715_v60 = vld [vmem:[%s2923_s28 + $0x43] sm:$0xff] }
 0x22f   : > { %v4580_v33 = vpop.permute.xlu1 %1037  ;;  %v4582_v32 = vpop.permute.xlu0 %1035 }
 0x231   : > { %1149 = vrot.lane.b32.xlu1 %v2712_v63, %s2842_s11  ;;  %1125 = vrot.lane.b32.xlu0 %v2713_v0, %s2842_s11 }
 0x233   : > { %v4588_v23 = vpop.permute.xlu1 %1041  ;;  %v4590_v12 = vpop.permute.xlu0 %1039 }
 0x234   : > { %5736 = vst [vmem:[#allocation28_spill] sm:$0xff] %v4588_v23 }
 0x235   : > { %1227 = vrot.lane.b32.xlu1 %v2714_v52, %s2843_s17  ;;  %1203 = vrot.lane.b32.xlu0 %v2715_v60, %s2843_s17 }
 0x237   : > { %v1046_v6 = vpop.permute.xlu1 %1045  ;;  %v1044_v36 = vpop.permute.xlu0 %1043 }
 0x238   : > { %v4598_v62 = vsel %vm1809_vm8, %v4445_v22, %v1046_v6  ;;  %v4602_v15 = vsel %vm1809_vm8, %v4449_v47, %v1044_v36  ;;  %v2716_v6 = vld [vmem:[%s2923_s28 + $0xab] sm:$0xff] }
 0x239   : > { %1465 = vrot.lane.b32.xlu1 %v2712_v63, %s2846_s20  ;;  %1441 = vrot.lane.b32.xlu0 %v2713_v0, %s2846_s20  ;;  %v2719_v36 = vld [vmem:[%s2923_s28 + $0x50] sm:$0xff] }
 0x23b   : > { %v1050_v8 = vpop.permute.xlu1 %1049  ;;  %v1048_v25 = vpop.permute.xlu0 %1047 }
 0x23c   : > { %v4608_v23 = vsel %vm1809_vm8, %v4462_v35, %v1050_v8  ;;  %v4612_v22 = vsel %vm1809_vm8, %v4466_v21, %v1048_v25  ;;  %v2717_v25 = vld [vmem:[%s2923_s28 + $0x4b] sm:$0xff] }
 0x23d   : > { %5737 = vst [vmem:[#allocation29_spill] sm:$0xff] %v4608_v23  ;;  %1543 = vrot.lane.b32.xlu1 %v2714_v52, %s2847_s4  ;;  %1519 = vrot.lane.b32.xlu0 %v2715_v60, %s2847_s4 }
 0x23f   : > { %v1054_v47 = vpop.permute.xlu1 %1053  ;;  %v1052_v63 = vpop.permute.xlu0 %1051 }
 0x240   : > { %v4618_v0 = vsel %vm1809_vm8, %v4477_v11, %v1054_v47  ;;  %v4622_v35 = vsel %vm1809_vm8, %v4481_v46, %v1052_v63  ;;  %v2718_v46 = vld [vmem:[%s2923_s28 + $0xb0] sm:$0xff] }
 0x241   : > { %1229 = vrot.lane.b32.xlu1 %v2716_v6, %s2843_s17  ;;  %1205 = vrot.lane.b32.xlu0 %v2717_v25, %s2843_s17 }
 0x243   : > { %v1058_v21 = vpop.permute.xlu1 %1057  ;;  %v1056_v52 = vpop.permute.xlu0 %1055 }
 0x244   : > { %v4630_v60 = vsel %vm1809_vm8, %v4491_v45, %v1058_v21  ;;  %v4634_v11 = vsel %vm1809_vm8, %v4495_v61, %v1056_v52  ;;  %v2720_v52 = vld [vmem:[%s2923_s28 + $0xb8] sm:$0xff] }
 0x245   : > { %5738 = vst [vmem:[#allocation30_spill] sm:$0xff] %v4630_v60  ;;  %5739 = vst [vmem:[#allocation33_spill] sm:$0xff] %v4634_v11  ;;  %1307 = vrot.lane.b32.xlu1 %v2718_v46, %s2844_s19  ;;  %1283 = vrot.lane.b32.xlu0 %v2719_v36, %s2844_s19  ;;  %v2721_v46 = vld [vmem:[%s2923_s28 + $0x58] sm:$0xff]  ;;  %v5747_v60 = vld [vmem:[#allocation60_spill] sm:$0xff] }
 0x247   : > { %v1062_v8 = vpop.permute.xlu1 %1061  ;;  %v1060_v47 = vpop.permute.xlu0 %1059 }
 0x248   : > { %v4642_v63 = vsel %vm1809_vm8, %v4502_v42, %v1062_v8  ;;  %v4646_v45 = vsel %vm1809_vm8, %v4506_v9, %v1060_v47 }
 0x249   : > { %5740 = vst [vmem:[#allocation34_spill] sm:$0xff] %v4642_v63  ;;  %5741 = vst [vmem:[#allocation37_spill] sm:$0xff] %v4646_v45  ;;  %1545 = vrot.lane.b32.xlu1 %v2716_v6, %s2847_s4  ;;  %1521 = vrot.lane.b32.xlu0 %v2717_v25, %s2847_s4  ;;  %v2729_v63 = vld [vmem:[%s2923_s28 + $0x5b] sm:$0xff] }
 0x24a   : > { %v2730_v45 = vld [vmem:[%s2923_s28 + $0xc0] sm:$0xff] }
 0x24b   : > { %v4650_v61 = vpop.permute.xlu1 %1065  ;;  %v4652_v21 = vpop.permute.xlu0 %1063 }
 0x24d   : > { %1309 = vrot.lane.b32.xlu1 %v2720_v52, %s2844_s19  ;;  %1285 = vrot.lane.b32.xlu0 %v2721_v46, %s2844_s19  ;;  %v2722_v52 = vld [vmem:[%s2923_s28 + $0xb2] sm:$0xff] }
 0x24f   : > { %v1070_v42 = vpop.permute.xlu1 %1069  ;;  %v1068_v36 = vpop.permute.xlu0 %1067 }
 0x250   : > { %v4660_v9 = vsel %vm1809_vm8, %v4524_v44, %v1070_v42  ;;  %v4664_v6 = vsel %vm1809_vm8, %v4528_v14, %v1068_v36  ;;  %v2723_v14 = vld [vmem:[%s2923_s28 + $0x52] sm:$0xff] }
 0x251   : > { %1387 = vrot.lane.b32.xlu1 %v4322_v54, %s2845_s27  ;;  %1363 = vrot.lane.b32.xlu0 %v4224_v31, %s2845_s27 }
 0x253   : > { %v1074_v25 = vpop.permute.xlu1 %1073  ;;  %v1072_v8 = vpop.permute.xlu0 %1071 }
 0x254   : > { %v4672_v47 = vsel %vm1809_vm8, %v4536_v40, %v1074_v25  ;;  %v4676_v44 = vsel %vm1809_vm8, %v4540_v18, %v1072_v8  ;;  %v2725_v8 = vld [vmem:[%s2923_s28 + $0x5a] sm:$0xff] }
 0x255   : > { %1151 = vrot.lane.b32.xlu1 %v2722_v52, %s2842_s11  ;;  %1127 = vrot.lane.b32.xlu0 %v2723_v14, %s2842_s11 }
 0x257   : > { %v1078_v54 = vpop.permute.xlu1 %1077  ;;  %v1076_v46 = vpop.permute.xlu0 %1075 }
 0x258   : > { %v4684_v31 = vsel %vm1809_vm8, %v4548_v56, %v1078_v54  ;;  %v4688_v40 = vsel %vm1809_vm8, %v4552_v58, %v1076_v46 }
 0x259   : > { %1389 = vrot.lane.b32.xlu1 %v4317_v29, %s2845_s27  ;;  %1365 = vrot.lane.b32.xlu0 %v4219_v38, %s2845_s27 }
 0x25b   : > { %v1082_v18 = vpop.permute.xlu1 %1081  ;;  %v1080_v42 = vpop.permute.xlu0 %1079 }
 0x25c   : > { %v4696_v36 = vsel %vm1809_vm8, %v4560_v13, %v1082_v18  ;;  %v4700_v56 = vsel %vm1809_vm8, %v4564_v34, %v1080_v42  ;;  %v2724_v13 = vld [vmem:[%s2923_s28 + $0xba] sm:$0xff] }
 0x25d   : > { %5742 = vst [vmem:[#allocation38_spill] sm:$0xff] %v4696_v36  ;;  %5743 = vst [vmem:[#allocation39_spill] sm:$0xff] %v4700_v56  ;;  %1467 = vrot.lane.b32.xlu1 %v2722_v52, %s2846_s20  ;;  %1443 = vrot.lane.b32.xlu0 %v2723_v14, %s2846_s20  ;;  %v2726_v14 = vld [vmem:[%s2923_s28 + $0xb3] sm:$0xff] }
 0x25f   : > { %v1086_v29 = vpop.permute.xlu1 %1085  ;;  %v1084_v58 = vpop.permute.xlu0 %1083 }
 0x260   : > { %v4706_v38 = vsel %vm1809_vm8, %v4572_v27, %v1086_v29  ;;  %v4710_v25 = vsel %vm1809_vm8, %v4576_v48, %v1084_v58  ;;  %v2727_v27 = vld [vmem:[%s2923_s28 + $0x53] sm:$0xff]  ;;  %v2728_v58 = vld [vmem:[%s2923_s28 + $0xbb] sm:$0xff] }
 0x261   : > { %5744 = vst [vmem:[#allocation40_spill] sm:$0xff] %v4706_v38  ;;  %5745 = vst [vmem:[#allocation41_spill] sm:$0xff] %v4710_v25  ;;  %1153 = vrot.lane.b32.xlu1 %v2724_v13, %s2842_s11  ;;  %1129 = vrot.lane.b32.xlu0 %v2725_v8, %s2842_s11 }
 0x263   : > { %v4716_v34 = vpop.permute.xlu1 %1117  ;;  %v1116_v52 = vpop.permute.xlu0 %1115 }
 0x265   : > { %1231 = vrot.lane.b32.xlu1 %v2726_v14, %s2843_s17  ;;  %1207 = vrot.lane.b32.xlu0 %v2727_v27, %s2843_s17 }
 0x267   : > { %v1196_v48 = vpop.permute.xlu1 %1195  ;;  %v4722_v54 = vpop.permute.xlu0 %1119 }
 0x269   : > { %1469 = vrot.lane.b32.xlu1 %v2724_v13, %s2846_s20  ;;  %1445 = vrot.lane.b32.xlu0 %v2725_v8, %s2846_s20  ;;  %v169_v13 = vld [vmem:[%s2923_s28] sm:$0xff] }
 0x26b   : > { %v1276_v46 = vpop.permute.xlu1 %1275  ;;  %v4726_v18 = vpop.permute.xlu0 %1197 }
 0x26d   : > { %1547 = vrot.lane.b32.xlu1 %v2726_v14, %s2847_s4  ;;  %1523 = vrot.lane.b32.xlu0 %v2727_v27, %s2847_s4  ;;  %v2731_v14 = vld [vmem:[%s2923_s28 + $0x60] sm:$0xff]  ;;  %v5746_v27 = vld [vmem:[#allocation32_spill] sm:$0xff] }
 0x26e   : > { %v1594_v25 = vsel %vm1593_vm0, %v169_v13, %v5746_v27 }
 0x26f   : > { %v1356_v42 = vpop.permute.xlu1 %1355  ;;  %v4730_v29 = vpop.permute.xlu0 %1277  ;;  %v1621_v36 = vsel %vm1620_vm1, %v1594_v25, %v5747_v60 }
 0x270   : > { %v1648_v23 = vsel %vm1647_vm2, %v1621_v36, %v3619_v5 }
 0x271   : > { %1233 = vrot.lane.b32.xlu1 %v2728_v58, %s2843_s17  ;;  %1209 = vrot.lane.b32.xlu0 %v2729_v63, %s2843_s17 }
 0x273   : > { %v4737_v8 = vpop.permute.xlu1 %1357  ;;  %v4739_v38 = vpop.permute.xlu0 %1143 }
 0x275   : > { %1311 = vrot.lane.b32.xlu1 %v2730_v45, %s2844_s19  ;;  %1287 = vrot.lane.b32.xlu0 %v2731_v14, %s2844_s19  ;;  %v1675_v45 = vsel %vm1674_vm3, %v1648_v23, %v3769_v59  ;;  %v170_v14 = vld [vmem:[%s2923_s28 + $0x8] sm:$0xff] }
 0x276   : > { %v1702_v13 = vsel %vm1701_vm4, %v1675_v45, %v3913_v41  ;;  %v2732_v23 = vld [vmem:[%s2923_s28 + $0xc8] sm:$0xff] }
 0x277   : > { %v4749_v11 = vpop.permute.xlu1 %1121  ;;  %v1436_v56 = vpop.permute.xlu0 %1435  ;;  %v1729_v60 = vsel %vm1728_vm5, %v1702_v13, %v4057_v39  ;;  %v2733_v41 = vld [vmem:[%s2923_s28 + $0x68] sm:$0xff] }
 0x278   : > { %v1756_v5 = vsel %vm1755_vm6, %v1729_v60, %v4216_v50 }
 0x279   : > { %1549 = vrot.lane.b32.xlu1 %v2728_v58, %s2847_s4  ;;  %1525 = vrot.lane.b32.xlu0 %v2729_v63, %s2847_s4  ;;  %v1783_v59 = vsel %vm1782_vm7, %v1756_v5, %v4414_v28  ;;  %v5748_v63 = vld [vmem:[#allocation36_spill] sm:$0xff]  ;;  %v5749_v58 = vld [vmem:[#allocation59_spill] sm:$0xff] }
 0x27a   : > { %v1595_v39 = vsel %vm1593_vm0, %v170_v14, %v5748_v63  ;;  %v1810_v36 = vsel %vm1809_vm8, %v1783_v59, %v4582_v32 }
 0x27b   : > { %v4762_v25 = vpop.permute.xlu1 %1199  ;;  %v4764_v27 = vpop.permute.xlu0 %1145  ;;  %v1622_v50 = vsel %vm1620_vm1, %v1595_v39, %v5749_v58  ;;  %v1837_v45 = vsel %vm1836_vm9, %v1810_v36, %v1116_v52 }
 0x27c   : > { %v1649_v60 = vsel %vm1647_vm2, %v1622_v50, %v3617_v4  ;;  %v1864_v5 = vsel %vm1863_vm10, %v1837_v45, %v1196_v48  ;;  %v2738_v45 = vld [vmem:[%s2923_s28 + $0xc3] sm:$0xff] }
 0x27d   : > { %1313 = vrot.lane.b32.xlu1 %v2732_v23, %s2844_s19  ;;  %1289 = vrot.lane.b32.xlu0 %v2733_v41, %s2844_s19  ;;  %v1676_v32 = vsel %vm1674_vm3, %v1649_v60, %v3767_v30  ;;  %v1891_v14 = vsel %vm1890_vm11, %v1864_v5, %v1276_v46 }
 0x27e   : > { %v1703_v4 = vsel %vm1701_vm4, %v1676_v32, %v3911_v16  ;;  %v1918_v52 = vsel %vm1917_vm12, %v1891_v14, %v1356_v42  ;;  %v2734_v16 = vld [vmem:[%s2923_s28 + $0xc2] sm:$0xff] }
 0x27f   : > { %v1438_v28 = vpop.permute.xlu1 %1437  ;;  %v4781_v13 = vpop.permute.xlu0 %1223  ;;  %v1730_v48 = vsel %vm1728_vm5, %v1703_v4, %v4055_v20  ;;  %v1945_v30 = vsel %vm1944_vm13, %v1918_v52, %v1436_v56  ;;  %v2735_v42 = vld [vmem:[%s2923_s28 + $0x62] sm:$0xff] }
 0x281   : > { %1391 = vrot.lane.b32.xlu1 %v4336_v24, %s2845_s27  ;;  %1367 = vrot.lane.b32.xlu0 %v4238_v3, %s2845_s27  ;;  %v1757_v24 = vsel %vm1755_vm6, %v1730_v48, %v4214_v57  ;;  %v2740_v48 = vld [vmem:[%s2923_s28 + $0xcb] sm:$0xff] }
 0x282   : > { %v1784_v23 = vsel %vm1782_vm7, %v1757_v24, %v4412_v53  ;;  %v5750_v24 = vld [vmem:[#allocation31_spill] sm:$0xff] }
 0x283   : > { %v4799_v59 = vpop.permute.xlu1 %1201  ;;  %v1516_v46 = vpop.permute.xlu0 %1515  ;;  %v1811_v20 = vsel %vm1809_vm8, %v1784_v23, %v4580_v33  ;;  %v2743_v23 = vld [vmem:[%s2923_s28 + $0x70] sm:$0xff] }
 0x284   : > { %v1972_v3 = vsel %vm1971_vm14, %v1945_v30, %v1516_v46  ;;  %v1838_v56 = vsel %vm1836_vm9, %v1811_v20, %v4716_v34  ;;  %v2741_v30 = vld [vmem:[%s2923_s28 + $0x6b] sm:$0xff] }
 0x285   : > { %1155 = vrot.lane.b32.xlu1 %v2734_v16, %s2842_s11  ;;  %1131 = vrot.lane.b32.xlu0 %v2735_v42, %s2842_s11  ;;  %v1865_v53 = vsel %vm1863_vm10, %v1838_v56, %v4726_v18  ;;  %v2742_v46 = vld [vmem:[%s2923_s28 + $0x10] sm:$0xff]  ;;  %v5752_v20 = vld [vmem:[#allocation64_spill] sm:$0xff] }
 0x286   : > { %2552 = vmatprep.mubr.msk.f32.mxu0 %vm2013_vm15, %v1972_v3  ;;  %v1892_v63 = vsel %vm1890_vm11, %v1865_v53, %v4730_v29  ;;  %v2736_v29 = vld [vmem:[%s2923_s28 + $0xca] sm:$0xff]  ;;  %v1596_v3 = vsel %vm1593_vm0, %v2742_v46, %v5750_v24  ;;  %v5753_v53 = vld [vmem:[#allocation75_spill] sm:$0xff] }
 0x287   : > { %v4815_v57 = vpop.permute.xlu1 %1279  ;;  %v4817_v41 = vpop.permute.xlu0 %1225  ;;  %v1919_v33 = vsel %vm1917_vm12, %v1892_v63, %v4737_v8  ;;  %v2737_v8 = vld [vmem:[%s2923_s28 + $0x6a] sm:$0xff]  ;;  %v1623_v56 = vsel %vm1620_vm1, %v1596_v3, %v5752_v20  ;;  %v5754_v46 = vld [vmem:[#allocation11_spill] sm:$0xff]  ;;  %v5755_v3 = vld [vmem:[#allocation14_spill] sm:$0xff] }
 0x288   : > { %v1946_v34 = vsel %vm1944_vm13, %v1919_v33, %v1438_v28  ;;  %v2739_v28 = vld [vmem:[%s2923_s28 + $0x63] sm:$0xff] }
 0x289   : > { %1393 = vrot.lane.b32.xlu1 %v4331_v43, %s2845_s27  ;;  %1369 = vrot.lane.b32.xlu0 %v4233_v37, %s2845_s27 }
 0x28b   : > { %v1518_v39 = vpop.permute.xlu1 %1517  ;;  %v4830_v36 = vpop.permute.xlu0 %1303 }
 0x28c   : > { %v1973_v18 = vsel %vm1971_vm14, %v1946_v34, %v1518_v39  ;;  %v1650_v39 = vsel %vm1647_vm2, %v1623_v56, %v3627_v49 }
 0x28d   : > { %1471 = vrot.lane.b32.xlu1 %v2734_v16, %s2846_s20  ;;  %1447 = vrot.lane.b32.xlu0 %v2735_v42, %s2846_s20  ;;  %v5751_v16 = vld [vmem:[#allocation50_spill] sm:$0xff] }
 0x28e   : > { %2553 = vmatmul.mubr.msk.f32.vlgmr.msra.gmra.mrb[0].mxu0 %vm2013_vm15, %v1973_v18  ;;  %v1608_v42 = vsel %vm1593_vm0, %v2743_v23, %v5751_v16 }
 0x28f   : > { %v4836_v43 = vpop.permute.xlu1 %1305  ;;  %v4838_v37 = vpop.permute.xlu0 %1281  ;;  %v1635_v63 = vsel %vm1620_vm1, %v1608_v42, %v5753_v53 }
 0x290   : > { %v1662_v18 = vsel %vm1647_vm2, %v1635_v63, %v3695_v19 }
 0x291   : > { %1157 = vrot.lane.b32.xlu1 %v2736_v29, %s2842_s11  ;;  %1133 = vrot.lane.b32.xlu0 %v2737_v8, %s2842_s11 }
 0x293   : > { %v4844_v58 = vpop.permute.xlu1 %1383  ;;  %v4846_v50 = vpop.permute.xlu0 %1359 }
 0x295   : > { %1235 = vrot.lane.b32.xlu1 %v2738_v45, %s2843_s17  ;;  %1211 = vrot.lane.b32.xlu0 %v2739_v28, %s2843_s17 }
 0x297   : > { %v4852_v60 = vpop.permute.xlu1 %1147  ;;  %v4854_v5 = vpop.permute.xlu0 %1123 }
 0x299   : > { %1473 = vrot.lane.b32.xlu1 %v2736_v29, %s2846_s20  ;;  %1449 = vrot.lane.b32.xlu0 %v2737_v8, %s2846_s20  ;;  %v1677_v29 = vsel %vm1674_vm3, %v1650_v39, %v3777_v26  ;;  %v1689_v8 = vsel %vm1674_vm3, %v1662_v18, %v3845_v10  ;;  %v5757_v39 = vld [vmem:[#allocation35_spill] sm:$0xff] }
 0x29a   : > { %v1716_v49 = vsel %vm1701_vm4, %v1689_v8, %v3989_v7 }
 0x29b   : > { %v4858_v32 = vpop.permute.xlu1 %1385  ;;  %v4860_v14 = vpop.permute.xlu0 %1361  ;;  %v1743_v26 = vsel %vm1728_vm5, %v1716_v49, %v5754_v46 }
 0x29d   : > { %1551 = vrot.lane.b32.xlu1 %v2738_v45, %s2847_s4  ;;  %1527 = vrot.lane.b32.xlu0 %v2739_v28, %s2847_s4  ;;  %v2744_v45 = vld [vmem:[%s2923_s28 + $0xd0] sm:$0xff]  ;;  %v1704_v28 = vsel %vm1701_vm4, %v1677_v29, %v3921_v55  ;;  %v5759_v29 = vld [vmem:[#allocation63_spill] sm:$0xff] }
 0x29e   : > { %v1731_v19 = vsel %vm1728_vm5, %v1704_v28, %v4065_v2 }
 0x29f   : > { %v1464_v4 = vpop.permute.xlu1 %1463  ;;  %v1440_v52 = vpop.permute.xlu0 %1439  ;;  %v1758_v16 = vsel %vm1755_vm6, %v1731_v19, %v5755_v3  ;;  %v5761_v3 = vld [vmem:[#allocation76_spill] sm:$0xff] }
 0x2a0   : > { %v1785_v7 = vsel %vm1782_vm7, %v1758_v16, %v4428_v1 }
 0x2a1   : > { %1237 = vrot.lane.b32.xlu1 %v2740_v48, %s2843_s17  ;;  %1213 = vrot.lane.b32.xlu0 %v2741_v30, %s2843_s17  ;;  %v1812_v42 = vsel %vm1809_vm8, %v1785_v7, %v4590_v12  ;;  %v5763_v7 = vld [vmem:[#allocation5_spill] sm:$0xff] }
 0x2a2   : > { %v1839_v56 = vsel %vm1836_vm9, %v1812_v42, %v4722_v54  ;;  %v2746_v54 = vld [vmem:[%s2923_s28 + $0x78] sm:$0xff] }
 0x2a3   : > { %v4878_v33 = vpop.permute.xlu1 %1149  ;;  %v4880_v34 = vpop.permute.xlu0 %1125  ;;  %v5764_v42 = vld [vmem:[#allocation6_spill] sm:$0xff] }
 0x2a5   : > { %1315 = vrot.lane.b32.xlu1 %v2744_v45, %s2844_s19  ;;  %1291 = vrot.lane.b32.xlu0 %v2743_v23, %s2844_s19  ;;  %v5756_v23 = vld [vmem:[#allocation20_spill] sm:$0xff]  ;;  %v5760_v45 = vld [vmem:[#allocation74_spill] sm:$0xff] }
 0x2a6   : > { %v1770_v55 = vsel %vm1755_vm6, %v1743_v26, %v5756_v23  ;;  %v5762_v23 = vld [vmem:[#allocation77_spill] sm:$0xff] }
 0x2a7   : > { %v4901_v24 = vpop.permute.xlu1 %1227  ;;  %v4903_v10 = vpop.permute.xlu0 %1203  ;;  %v1797_v2 = vsel %vm1782_vm7, %v1770_v55, %v4517_v17  ;;  %v1866_v17 = vsel %vm1863_vm10, %v1839_v56, %v4762_v25  ;;  %v5758_v25 = vld [vmem:[#allocation49_spill] sm:$0xff]  ;;  %v5766_v56 = vld [vmem:[#allocation7_spill] sm:$0xff] }
 0x2a8   : > { %v1824_v20 = vsel %vm1809_vm8, %v1797_v2, %v4652_v21  ;;  %v1893_v12 = vsel %vm1890_vm11, %v1866_v17, %v4815_v57  ;;  %v5767_v17 = vld [vmem:[#allocation8_spill] sm:$0xff] }
 0x2a9   : > { %1553 = vrot.lane.b32.xlu1 %v2740_v48, %s2847_s4  ;;  %1529 = vrot.lane.b32.xlu0 %v2741_v30, %s2847_s4  ;;  %v1851_v1 = vsel %vm1836_vm9, %v1824_v20, %v4739_v38  ;;  %v2745_v30 = vld [vmem:[%s2923_s28 + $0xd8] sm:$0xff]  ;;  %v5765_v20 = vld [vmem:[#allocation16_spill] sm:$0xff] }
 0x2aa   : > { %v1878_v48 = vsel %vm1863_vm10, %v1851_v1, %v4781_v13  ;;  %v2747_v38 = vld [vmem:[%s2923_s28 + $0x18] sm:$0xff]  ;;  %v1609_v13 = vsel %vm1593_vm0, %v2746_v54, %v5758_v25 }
 0x2ab   : > { %v1466_v53 = vpop.permute.xlu1 %1465  ;;  %v1442_v63 = vpop.permute.xlu0 %1441  ;;  %v1905_v21 = vsel %vm1890_vm11, %v1878_v48, %v4830_v36  ;;  %v1597_v18 = vsel %vm1593_vm0, %v2747_v38, %v5757_v39  ;;  %v1920_v36 = vsel %vm1917_vm12, %v1893_v12, %v4846_v50  ;;  %v1636_v28 = vsel %vm1620_vm1, %v1609_v13, %v5760_v45  ;;  %v5768_v12 = vld [vmem:[#allocation9_spill] sm:$0xff]  ;;  %v5771_v13 = vld [vmem:[#allocation19_spill] sm:$0xff] }
 0x2ac   : > { %v1932_v57 = vsel %vm1917_vm12, %v1905_v21, %v4844_v58  ;;  %v1624_v8 = vsel %vm1620_vm1, %v1597_v18, %v5759_v29  ;;  %v1947_v19 = vsel %vm1944_vm13, %v1920_v36, %v1440_v52  ;;  %v1663_v58 = vsel %vm1647_vm2, %v1636_v28, %v5762_v23  ;;  %v2748_v52 = vld [vmem:[%s2923_s28 + $0xd1] sm:$0xff]  ;;  %v5772_v36 = vld [vmem:[#allocation23_spill] sm:$0xff] }
 0x2ad   : > { %1317 = vrot.lane.b32.xlu1 %v2745_v30, %s2844_s19  ;;  %1293 = vrot.lane.b32.xlu0 %v2746_v54, %s2844_s19  ;;  %v1959_v49 = vsel %vm1944_vm13, %v1932_v57, %v1464_v4  ;;  %v1651_v16 = vsel %vm1647_vm2, %v1624_v8, %v5761_v3  ;;  %v1690_v4 = vsel %vm1674_vm3, %v1663_v58, %v5764_v42  ;;  %v5769_v30 = vld [vmem:[#allocation10_spill] sm:$0xff]  ;;  %v5770_v18 = vld [vmem:[#allocation13_spill] sm:$0xff] }
 0x2ae   : > { %v1678_v2 = vsel %vm1674_vm3, %v1651_v16, %v5763_v7  ;;  %v1717_v48 = vsel %vm1701_vm4, %v1690_v4, %v5767_v17  ;;  %v2749_v45 = vld [vmem:[%s2923_s28 + $0xd2] sm:$0xff] }
 0x2af   : > { %v1544_v46 = vpop.permute.xlu1 %1543  ;;  %v1520_v26 = vpop.permute.xlu0 %1519  ;;  %v1705_v1 = vsel %vm1701_vm4, %v1678_v2, %v5766_v56  ;;  %v1744_v54 = vsel %vm1728_vm5, %v1717_v48, %v5769_v30  ;;  %v2750_v28 = vld [vmem:[%s2923_s28 + $0x72] sm:$0xff] }
 0x2b0   : > { %v1974_v50 = vsel %vm1971_vm14, %v1947_v19, %v1520_v26  ;;  %v1986_v55 = vsel %vm1971_vm14, %v1959_v49, %v1544_v46  ;;  %v1732_v21 = vsel %vm1728_vm5, %v1705_v1, %v5768_v12  ;;  %v1771_v57 = vsel %vm1755_vm6, %v1744_v54, %v5771_v13  ;;  %v5773_v49 = vld [vmem:[#allocation28_spill] sm:$0xff]  ;;  %v2755_v56 = vld [vmem:[%s2923_s28 + $0x73] sm:$0xff]  ;;  %v2756_v54 = vld [vmem:[%s2923_s28 + $0xdb] sm:$0xff] }
 0x2b1   : > { %1395 = vrot.lane.b32.xlu1 %v2748_v52, %s2845_s27  ;;  %1371 = vrot.lane.b32.xlu0 %v5765_v20, %s2845_s27  ;;  %v1759_v25 = vsel %vm1755_vm6, %v1732_v21, %v5770_v18  ;;  %v1798_v8 = vsel %vm1782_vm7, %v1771_v57, %v4515_v51  ;;  %v2754_v20 = vld [vmem:[%s2923_s28 + $0xd3] sm:$0xff]  ;;  %v2757_v18 = vld [vmem:[%s2923_s28 + $0x7b] sm:$0xff]  ;;  %v5775_v57 = vld [vmem:[#allocation12_spill] sm:$0xff] }
 0x2b2   : > { %2555 = vmatprep.mubr.msk.f32.mxu0 %vm2013_vm15, %v1974_v50  ;;  %2573 = vmatprep.mubr.msk.f32.mxu1 %vm2013_vm15, %v1986_v55  ;;  %v1786_v29 = vsel %vm1782_vm7, %v1759_v25, %v5772_v36  ;;  %v1825_v46 = vsel %vm1809_vm8, %v1798_v8, %v4650_v61  ;;  %v2758_v36 = vld [vmem:[%s2923_s28 + $0x80] sm:$0xff] }
 0x2b3   : > { %v4974_v38 = vpop.permute.xlu1 %1229  ;;  %v4976_v39 = vpop.permute.xlu0 %1205  ;;  %v1813_v19 = vsel %vm1809_vm8, %v1786_v29, %v5773_v49  ;;  %v1852_v3 = vsel %vm1836_vm9, %v1825_v46, %v4764_v27  ;;  %v5774_v27 = vld [vmem:[#allocation15_spill] sm:$0xff] }
 0x2b4   : > { %v1840_v26 = vsel %vm1836_vm9, %v1813_v19, %v4749_v11  ;;  %v1879_v58 = vsel %vm1863_vm10, %v1852_v3, %v4817_v41  ;;  %v2751_v11 = vld [vmem:[%s2923_s28 + $0xd9] sm:$0xff] }
 0x2b5   : > { %1159 = vrot.lane.b32.xlu1 %v2749_v45, %s2842_s11  ;;  %1135 = vrot.lane.b32.xlu0 %v2750_v28, %s2842_s11  ;;  %v1867_v23 = vsel %vm1863_vm10, %v1840_v26, %v4799_v59  ;;  %v1906_v50 = vsel %vm1890_vm11, %v1879_v58, %v4836_v43  ;;  %v2759_v58 = vld [vmem:[%s2923_s28 + $0xe8] sm:$0xff] }
 0x2b6   : > { %v1894_v61 = vsel %vm1890_vm11, %v1867_v23, %v4838_v37  ;;  %v1933_v55 = vsel %vm1917_vm12, %v1906_v50, %v4858_v32 }
 0x2b7   : > { %v4998_v16 = vpop.permute.xlu1 %1307  ;;  %v5000_v51 = vpop.permute.xlu0 %1283  ;;  %v1921_v59 = vsel %vm1917_vm12, %v1894_v61, %v4860_v14  ;;  %v1960_v41 = vsel %vm1944_vm13, %v1933_v55, %v1466_v53  ;;  %v2752_v53 = vld [vmem:[%s2923_s28 + $0xda] sm:$0xff] }
 0x2b8   : > { %v1948_v43 = vsel %vm1944_vm13, %v1921_v59, %v1442_v63  ;;  %v2753_v63 = vld [vmem:[%s2923_s28 + $0x7a] sm:$0xff] }
 0x2b9   : > { %1397 = vrot.lane.b32.xlu1 %v2751_v11, %s2845_s27  ;;  %1373 = vrot.lane.b32.xlu0 %v5774_v27, %s2845_s27  ;;  %v5776_v61 = vld [vmem:[#allocation22_spill] sm:$0xff]  ;;  %v285_v27 = vld [vmem:[%s2923_s28 + $0xe2] sm:$0xff] }
 0x2ba   : > { %v5777_v11 = vld [vmem:[#allocation18_spill] sm:$0xff] }
 0x2bb   : > { %v1546_v7 = vpop.permute.xlu1 %1545  ;;  %v1522_v37 = vpop.permute.xlu0 %1521 }
 0x2bc   : > { %v1987_v2 = vsel %vm1971_vm14, %v1960_v41, %v1546_v7  ;;  %v1975_v42 = vsel %vm1971_vm14, %v1948_v43, %v1522_v37  ;;  %v2761_v41 = vld [vmem:[%s2923_s28 + $0x82] sm:$0xff]  ;;  %v1854_v43 = vsel %vm1836_vm9, %v4660_v9, %v4878_v33  ;;  %v1842_v7 = vsel %vm1836_vm9, %v4598_v62, %v4880_v34  ;;  %v5778_v33 = vld [vmem:[#allocation21_spill] sm:$0xff] }
 0x2bd   : > { %1475 = vrot.lane.b32.xlu1 %v2749_v45, %s2846_s20  ;;  %1451 = vrot.lane.b32.xlu0 %v2750_v28, %s2846_s20  ;;  %v1853_v45 = vsel %vm1836_vm9, %v4664_v6, %v4852_v60  ;;  %v1841_v28 = vsel %vm1836_vm9, %v4602_v15, %v4854_v5  ;;  %v2760_v6 = vld [vmem:[%s2923_s28 + $0x88] sm:$0xff] }
 0x2be   : > { %2556 = vmatmul.mubr.msk.f32.gmra.mrb[2].mxu0 %vm2013_vm15, %v1975_v42  ;;  %2574 = vmatmul.mubr.msk.f32.vlgmr.msra.gmra.mrb[0].mxu1 %vm2013_vm15, %v1987_v2  ;;  %v1880_v46 = vsel %vm1863_vm10, %v1853_v45, %v4901_v24  ;;  %v1868_v26 = vsel %vm1863_vm10, %v1841_v28, %v4903_v10  ;;  %v1881_v42 = vsel %vm1863_vm10, %v1854_v43, %v4974_v38 }
 0x2bf   : > { %v5026_v32 = vpop.permute.xlu1 %1309  ;;  %v5028_v14 = vpop.permute.xlu0 %1285  ;;  %v1907_v3 = vsel %vm1890_vm11, %v1880_v46, %v4998_v16  ;;  %v1895_v23 = vsel %vm1890_vm11, %v1868_v26, %v5000_v51  ;;  %v288_v26 = vld [vmem:[%s2923_s28 + $0xeb] sm:$0xff] }
 0x2c1   : > { %1161 = vrot.lane.b32.xlu1 %v2752_v53, %s2842_s11  ;;  %1137 = vrot.lane.b32.xlu0 %v2753_v63, %s2842_s11 }
 0x2c3   : > { %v1388_v4 = vpop.permute.xlu1 %1387  ;;  %v1364_v52 = vpop.permute.xlu0 %1363 }
 0x2c4   : > { %v1934_v15 = vsel %vm1917_vm12, %v1907_v3, %v1388_v4  ;;  %v1922_v60 = vsel %vm1917_vm12, %v1895_v23, %v1364_v52  ;;  %v5779_v4 = vld [vmem:[#allocation17_spill] sm:$0xff] }
 0x2c5   : > { %1239 = vrot.lane.b32.xlu1 %v2754_v20, %s2843_s17  ;;  %1215 = vrot.lane.b32.xlu0 %v2755_v56, %s2843_s17  ;;  %v289_v23 = vld [vmem:[%s2923_s28 + $0xf0] sm:$0xff] }
 0x2c7   : > { %v5038_v1 = vpop.permute.xlu1 %1151  ;;  %v5040_v17 = vpop.permute.xlu0 %1127 }
 0x2c9   : > { %1477 = vrot.lane.b32.xlu1 %v2752_v53, %s2846_s20  ;;  %1453 = vrot.lane.b32.xlu0 %v2753_v63, %s2846_s20  ;;  %v1869_v53 = vsel %vm1863_vm10, %v1842_v7, %v4976_v39  ;;  %v1908_v63 = vsel %vm1890_vm11, %v1881_v42, %v5026_v32  ;;  %v2767_v42 = vld [vmem:[%s2923_s28 + $0x91] sm:$0xff] }
 0x2ca   : > { %v1896_v9 = vsel %vm1890_vm11, %v1869_v53, %v5028_v14  ;;  %v292_v53 = vld [vmem:[%s2923_s28 + $0xf9] sm:$0xff] }
 0x2cb   : > { %v1390_v48 = vpop.permute.xlu1 %1389  ;;  %v1366_v12 = vpop.permute.xlu0 %1365 }
 0x2cc   : > { %v1935_v62 = vsel %vm1917_vm12, %v1908_v63, %v1390_v48  ;;  %v1923_v34 = vsel %vm1917_vm12, %v1896_v9, %v1366_v12 }
 0x2cd   : > { %1555 = vrot.lane.b32.xlu1 %v2754_v20, %s2847_s4  ;;  %1531 = vrot.lane.b32.xlu0 %v2755_v56, %s2847_s4  ;;  %v286_v56 = vld [vmem:[%s2923_s28 + $0xea] sm:$0xff] }
 0x2cf   : > { %v1468_v21 = vpop.permute.xlu1 %1467  ;;  %v1444_v30 = vpop.permute.xlu0 %1443 }
 0x2d0   : > { %v1961_v5 = vsel %vm1944_vm13, %v1934_v15, %v1468_v21  ;;  %v1949_v24 = vsel %vm1944_vm13, %v1922_v60, %v1444_v30  ;;  %v2762_v21 = vld [vmem:[%s2923_s28 + $0x8a] sm:$0xff] }
 0x2d1   : > { %1241 = vrot.lane.b32.xlu1 %v2756_v54, %s2843_s17  ;;  %1217 = vrot.lane.b32.xlu0 %v2757_v18, %s2843_s17  ;;  %v287_v30 = vld [vmem:[%s2923_s28 + $0xe3] sm:$0xff] }
 0x2d3   : > { %v5050_v25 = vpop.permute.xlu1 %1153  ;;  %v5052_v13 = vpop.permute.xlu0 %1129 }
 0x2d5   : > { %1319 = vrot.lane.b32.xlu1 %v5775_v57, %s2844_s19  ;;  %1295 = vrot.lane.b32.xlu0 %v2758_v36, %s2844_s19  ;;  %v2763_v57 = vld [vmem:[%s2923_s28 + $0x83] sm:$0xff] }
 0x2d7   : > { %v5058_v29 = vpop.permute.xlu1 %1231  ;;  %v5060_v8 = vpop.permute.xlu0 %1207 }
 0x2d9   : > { %1557 = vrot.lane.b32.xlu1 %v2756_v54, %s2847_s4  ;;  %1533 = vrot.lane.b32.xlu0 %v2757_v18, %s2847_s4 }
 0x2db   : > { %v1470_v49 = vpop.permute.xlu1 %1469  ;;  %v1446_v19 = vpop.permute.xlu0 %1445 }
 0x2dc   : > { %v1962_v38 = vsel %vm1944_vm13, %v1935_v62, %v1470_v49  ;;  %v1950_v39 = vsel %vm1944_vm13, %v1923_v34, %v1446_v19  ;;  %v293_v62 = vld [vmem:[%s2923_s28 + $0xf2] sm:$0xff]  ;;  %v1856_v34 = vsel %vm1836_vm9, %v4672_v47, %v5050_v25 }
 0x2dd   : > { %1321 = vrot.lane.b32.xlu1 %v2759_v58, %s2844_s19  ;;  %1297 = vrot.lane.b32.xlu0 %v2760_v6, %s2844_s19 }
 0x2df   : > { %v1548_v10 = vpop.permute.xlu1 %1547  ;;  %v1524_v16 = vpop.permute.xlu0 %1523 }
 0x2e0   : > { %v1988_v51 = vsel %vm1971_vm14, %v1961_v5, %v1548_v10  ;;  %v1976_v50 = vsel %vm1971_vm14, %v1949_v24, %v1524_v16  ;;  %v2765_v5 = vld [vmem:[%s2923_s28 + $0x90] sm:$0xff]  ;;  %v1843_v16 = vsel %vm1836_vm9, %v4612_v22, %v5040_v17 }
 0x2e1   : > { %1399 = vrot.lane.b32.xlu1 %v5776_v61, %s2845_s27  ;;  %2576 = vmatprep.mubr.msk.f32.mxu1 %vm2013_vm15, %v1988_v51  ;;  %v291_v17 = vld [vmem:[%s2923_s28 + $0xf1] sm:$0xff] }
 0x2e2   : > { %1375 = vrot.lane.b32.xlu0 %v5777_v11, %s2845_s27  ;;  %2558 = vmatprep.mubr.msk.f32.mxu0 %vm2013_vm15, %v1976_v50  ;;  %v1870_v11 = vsel %vm1863_vm10, %v1843_v16, %v5060_v8 }
 0x2e3   : > { %v5095_v55 = vpop.permute.xlu1 %1233  ;;  %v5097_v59 = vpop.permute.xlu0 %1209 }
 0x2e5   : > { %1163 = vrot.lane.b32.xlu1 %v285_v27, %s2842_s11 }
 0x2e6   : > { %1139 = vrot.lane.b32.xlu0 %v2761_v41, %s2842_s11 }
 0x2e7   : > { %v5108_v37 = vpop.permute.xlu1 %1311  ;;  %v5110_v2 = vpop.permute.xlu0 %1287 }
 0x2e9   : > { %1401 = vrot.lane.b32.xlu1 %v5778_v33, %s2845_s27  ;;  %v2768_v33 = vld [vmem:[%s2923_s28 + $0x99] sm:$0xff] }
 0x2ea   : > { %1377 = vrot.lane.b32.xlu0 %v5779_v4, %s2845_s27  ;;  %v5780_v4 = vld [vmem:[#allocation29_spill] sm:$0xff] }
 0x2eb   : > { %v1550_v32 = vpop.permute.xlu1 %1549  ;;  %v1526_v52 = vpop.permute.xlu0 %1525 }
 0x2ec   : > { %v1989_v14 = vsel %vm1971_vm14, %v1962_v38, %v1550_v32  ;;  %v1977_v20 = vsel %vm1971_vm14, %v1950_v39, %v1526_v52  ;;  %v1844_v38 = vsel %vm1836_vm9, %v5780_v4, %v5052_v13  ;;  %v1883_v52 = vsel %vm1863_vm10, %v1856_v34, %v5095_v55  ;;  %v5781_v13 = vld [vmem:[#allocation24_spill] sm:$0xff]  ;;  %v294_v55 = vld [vmem:[%s2923_s28 + $0xfa] sm:$0xff] }
 0x2ed   : > { %1479 = vrot.lane.b32.xlu1 %v285_v27, %s2846_s20  ;;  %2577 = vmatmul.mubr.msk.f32.gmra.mrb[2].mxu1 %vm2013_vm15, %v1989_v14  ;;  %v1871_v14 = vsel %vm1863_vm10, %v1844_v38, %v5097_v59 }
 0x2ee   : > { %1455 = vrot.lane.b32.xlu0 %v2761_v41, %s2846_s20  ;;  %2559 = vmatmul.mubr.msk.f32.gmra.mrb[4].mxu0 %vm2013_vm15, %v1977_v20  ;;  %v1897_v41 = vsel %vm1890_vm11, %v1870_v11, %v5110_v2 }
 0x2ef   : > { %v5135_v48 = vpop.permute.xlu1 %1313  ;;  %v5137_v12 = vpop.permute.xlu0 %1289 }
 0x2f0   : > { %v1910_v20 = vsel %vm1890_vm11, %v1883_v52, %v5135_v48 }
 0x2f1   : > { %1165 = vrot.lane.b32.xlu1 %v286_v56, %s2842_s11 }
 0x2f2   : > { %1141 = vrot.lane.b32.xlu0 %v2762_v21, %s2842_s11 }
 0x2f3   : > { %v1392_v54 = vpop.permute.xlu1 %1391  ;;  %v1368_v18 = vpop.permute.xlu0 %1367 }
 0x2f4   : > { %v1924_v22 = vsel %vm1917_vm12, %v1897_v41, %v1368_v18  ;;  %v5782_v18 = vld [vmem:[#allocation25_spill] sm:$0xff] }
 0x2f5   : > { %1243 = vrot.lane.b32.xlu1 %v287_v30, %s2843_s17 }
 0x2f6   : > { %1219 = vrot.lane.b32.xlu0 %v2763_v57, %s2843_s17 }
 0x2f7   : > { %v1156_v36 = vpop.permute.xlu1 %1155  ;;  %v1132_v45 = vpop.permute.xlu0 %1131 }
 0x2f8   : > { %v5148_v28 = vsel %vm1836_vm9, %v4688_v40, %v1156_v36  ;;  %v5152_v49 = vsel %vm1836_vm9, %v4622_v35, %v1132_v45  ;;  %v2764_v35 = vld [vmem:[%s2923_s28 + $0x8b] sm:$0xff] }
 0x2f9   : > { %1481 = vrot.lane.b32.xlu1 %v286_v56, %s2846_s20  ;;  %v1898_v56 = vsel %vm1890_vm11, %v1871_v14, %v5137_v12 }
 0x2fa   : > { %1457 = vrot.lane.b32.xlu0 %v2762_v21, %s2846_s20 }
 0x2fb   : > { %v5156_v19 = vpop.permute.xlu1 %1393  ;;  %v5158_v46 = vpop.permute.xlu0 %1369 }
 0x2fc   : > { %v1937_v47 = vsel %vm1917_vm12, %v1910_v20, %v5156_v19  ;;  %v1925_v25 = vsel %vm1917_vm12, %v1898_v56, %v5158_v46  ;;  %v5783_v19 = vld [vmem:[#allocation26_spill] sm:$0xff] }
 0x2fd   : > { %1559 = vrot.lane.b32.xlu1 %v287_v30, %s2847_s4  ;;  %v296_v46 = vld [vmem:[%s2923_s28 + $0xfb] sm:$0xff] }
 0x2fe   : > { %1535 = vrot.lane.b32.xlu0 %v2763_v57, %s2847_s4  ;;  %v295_v57 = vld [vmem:[%s2923_s28 + $0xf3] sm:$0xff] }
 0x2ff   : > { %v1472_v40 = vpop.permute.xlu1 %1471  ;;  %v1448_v3 = vpop.permute.xlu0 %1447 }
 0x300   : > { %v1951_v8 = vsel %vm1944_vm13, %v1924_v22, %v1448_v3  ;;  %v5784_v3 = vld [vmem:[#allocation27_spill] sm:$0xff] }
 0x301   : > { %1245 = vrot.lane.b32.xlu1 %v288_v26, %s2843_s17 }
 0x302   : > { %1221 = vrot.lane.b32.xlu0 %v2764_v35, %s2843_s17 }
 0x303   : > { %v1158_v58 = vpop.permute.xlu1 %1157  ;;  %v1134_v6 = vpop.permute.xlu0 %1133 }
 0x304   : > { %v5169_v15 = vsel %vm1836_vm9, %v4684_v31, %v1158_v58  ;;  %v5173_v60 = vsel %vm1836_vm9, %v4618_v0, %v1134_v6  ;;  %v290_v31 = vld [vmem:[%s2923_s28 + $0xf8] sm:$0xff]  ;;  %v1855_v0 = vsel %vm1836_vm9, %v4676_v44, %v5038_v1  ;;  %v5785_v58 = vld [vmem:[#allocation39_spill] sm:$0xff] }
 0x305   : > { %1323 = vrot.lane.b32.xlu1 %v289_v23, %s2844_s19  ;;  %v1882_v61 = vsel %vm1863_vm10, %v1855_v0, %v5058_v29  ;;  %v2766_v1 = vld [vmem:[%s2923_s28 + $0x98] sm:$0xff]  ;;  %s161_s28 = sand.u32 1, %s2823_s13  }
 0x306   : > { %1299 = vrot.lane.b32.xlu0 %v2765_v5, %s2844_s19  ;;  %v1909_v27 = vsel %vm1890_vm11, %v1882_v61, %v5108_v37  ;;  %v5786_v5 = vld [vmem:[#allocation33_spill] sm:$0xff]  ;;  %s5461_s9 = scalar_lea.sflag [#allocation3], %s161_s28 }
 0x307   : > { %v5178_v24 = vpop.permute.xlu1 %1235  ;;  %v5180_v10 = vpop.permute.xlu0 %1211  ;;  %v1936_v44 = vsel %vm1917_vm12, %v1909_v27, %v1392_v54  ;;  %v5787_v27 = vld [vmem:[#allocation38_spill] sm:$0xff] }
 0x308   : > { %v1963_v29 = vsel %vm1944_vm13, %v1936_v44, %v1472_v40  ;;  %v5788_v44 = vld [vmem:[#allocation30_spill] sm:$0xff] }
 0x309   : > { %1561 = vrot.lane.b32.xlu1 %v288_v26, %s2847_s4 }
 0x30a   : > { %1537 = vrot.lane.b32.xlu0 %v2764_v35, %s2847_s4 }
 0x30b   : > { %v1474_v51 = vpop.permute.xlu1 %1473  ;;  %v1450_v50 = vpop.permute.xlu0 %1449 }
 0x30c   : > { %v1964_v59 = vsel %vm1944_vm13, %v1937_v47, %v1474_v51  ;;  %v1952_v48 = vsel %vm1944_vm13, %v1925_v25, %v1450_v50 }
 0x30d   : > { %1325 = vrot.lane.b32.xlu1 %v290_v31, %s2844_s19 }
 0x30e   : > { %1301 = vrot.lane.b32.xlu0 %v2766_v1, %s2844_s19  ;;  %s2615_s19 = smul.u32 208, %s161_s28 }
 0x30f   : > { %v1552_v43 = vpop.permute.xlu1 %1551  ;;  %v1528_v7 = vpop.permute.xlu0 %1527 }
 0x310   : > { %v1990_v37 = vsel %vm1971_vm14, %v1963_v29, %v1552_v43  ;;  %v1978_v2 = vsel %vm1971_vm14, %v1951_v8, %v1528_v7  ;;  %v1884_v43 = vsel %vm1863_vm10, %v5148_v28, %v5178_v24  ;;  %v1872_v7 = vsel %vm1863_vm10, %v5152_v49, %v5180_v10 }
 0x311   : > { %1403 = vrot.lane.b32.xlu1 %v291_v17, %s2845_s27  ;;  %2579 = vmatprep.mubr.msk.f32.mxu1 %vm2013_vm15, %v1990_v37 }
 0x312   : > { %1379 = vrot.lane.b32.xlu0 %v2767_v42, %s2845_s27  ;;  %2561 = vmatprep.mubr.msk.f32.mxu0 %vm2013_vm15, %v1978_v2 }
 0x313   : > { %v5215_v63 = vpop.permute.xlu1 %1237  ;;  %v5217_v9 = vpop.permute.xlu0 %1213 }
 0x314   : > { %v1873_v52 = vsel %vm1863_vm10, %v5173_v60, %v5217_v9 }
 0x315   : > { %1405 = vrot.lane.b32.xlu1 %v292_v53, %s2845_s27 }
 0x316   : > { %1381 = vrot.lane.b32.xlu0 %v2768_v33, %s2845_s27  ;;  %s5332_s27 = scalar_lea.vmem [#allocation2], %s2615_s19 }
 0x317   : > { %v1316_v39 = vpop.permute.xlu1 %1315  ;;  %v1292_v32 = vpop.permute.xlu0 %1291  ;;  %s2405_s6 = sshll.u32 %s5332_s27, 4  ;;  %s5454_s6 = int_to_ptr.vmem [resolvable:$true] %s2405_s6 }
 0x318   : > { %v1911_v37 = vsel %vm1890_vm11, %v1884_v43, %v1316_v39  ;;  %v1899_v2 = vsel %vm1890_vm11, %v1872_v7, %v1292_v32  ;;  %v1885_v32 = vsel %vm1863_vm10, %v5169_v15, %v5215_v63  ;;  %s2769_s10 = scalar_lea.vmem %s5454_s6, 3328 }
 0x319   : > { %1483 = vrot.lane.b32.xlu1 %v293_v62, %s2846_s20  ;;  %p2770_p11 = scmp.ne.s32.totalorder %s5454_s6, %s2769_s10 }
 0x31a   : > { %1459 = vrot.lane.b32.xlu0 %v5781_v13, %s2846_s20 }
 0x31b   : > { %v1554_v21 = vpop.permute.xlu1 %1553  ;;  %v1530_v12 = vpop.permute.xlu0 %1529  ;;  %p2771_p12 = pnand %p2770_p11, %p2908_p5 }
 0x31c   : > { %v1991_v30 = vsel %vm1971_vm14, %v1964_v59, %v1554_v21  ;;  %v1979_v54 = vsel %vm1971_vm14, %v1952_v48, %v1530_v12 }
 0x31d   : > { %1485 = vrot.lane.b32.xlu1 %v294_v55, %s2846_s20  ;;  %2580 = vmatmul.mubr.msk.f32.gmra.mrb[4].mxu1 %vm2013_vm15, %v1991_v30  ;;  %p2772_p13 = pneg %p2771_p12 }
 0x31e   : > { %1461 = vrot.lane.b32.xlu0 %v5782_v18, %s2846_s20  ;;  %2562 = vmatmul.mubr.msk.f32.gmra.mrb[6].mxu0 %vm2013_vm15, %v1979_v54  ;;  %s2848_s20 = smov [#allocation2]  }
 0x31f   : > { %v1318_v36 = vpop.permute.xlu1 %1317  ;;  %v1294_v45 = vpop.permute.xlu0 %1293  ;;  %s2773_s24 = sshll.u32 %s2848_s20, 4  ;;  %s2774_s24 = int_to_ptr.vmem [resolvable:$false] %s2773_s24 }
 0x320   : > { %v1912_v14 = vsel %vm1890_vm11, %v1885_v32, %v1318_v36  ;;  %v1900_v20 = vsel %vm1890_vm11, %v1873_v52, %v1294_v45  ;;  %v5326_v36 = vld [vmem:[%s5505_s2] ss:$0 sm:$0xff]  ;;  %s2775_s25 = scalar_lea.vmem %s2774_s24, 6656  ;;  %p2776_p0 = scmp.lt.s32.totalorder %s5454_s6, %s2774_s24 }
 0x321   : > { %1563 = vrot.lane.b32.xlu1 %v295_v57, %s2847_s4  ;;  %p2777_p1 = scmp.lt.s32.totalorder %s2775_s25, %s2769_s10 }
 0x322   : > { %1539 = vrot.lane.b32.xlu0 %v5783_v19, %s2847_s4 }
 0x323   : > { %v1396_v26 = vpop.permute.xlu1 %1395  ;;  %v1372_v40 = vpop.permute.xlu0 %1371  ;;  %p2778_p2 = por %p2777_p1, %p2776_p0 }
 0x324   : > { %v1938_v42 = vsel %vm1917_vm12, %v1911_v37, %v1396_v26  ;;  %v1926_v53 = vsel %vm1917_vm12, %v1899_v2, %v1372_v40 }
 0x325   : > { %1565 = vrot.lane.b32.xlu1 %v296_v46, %s2847_s4  ;;  %p2779_p3 = pnand %p2778_p2, %p2772_p13 }
 0x326   : > { %1541 = vrot.lane.b32.xlu0 %v5784_v3, %s2847_s4 }
 0x327   : > { %v1160_v35 = vpop.permute.xlu1 %1159  ;;  %v1136_v23 = vpop.permute.xlu0 %1135 }
 0x328   : > { %v5264_v6 = vsel %vm1836_vm9, %v5785_v58, %v1160_v35  ;;  %v5268_v31 = vsel %vm1836_vm9, %v5786_v5, %v1136_v23 }
 0x32b   : > { %v1398_v0 = vpop.permute.xlu1 %1397  ;;  %v1374_v16 = vpop.permute.xlu0 %1373 }
 0x32c   : > { %v1939_v56 = vsel %vm1917_vm12, %v1912_v14, %v1398_v0  ;;  %v1927_v47 = vsel %vm1917_vm12, %v1900_v20, %v1374_v16 }
 0x32f   : > { %v1476_v51 = vpop.permute.xlu1 %1475  ;;  %v1452_v50 = vpop.permute.xlu0 %1451 }
 0x330   : > { %v1965_v33 = vsel %vm1944_vm13, %v1938_v42, %v1476_v51  ;;  %v1953_v62 = vsel %vm1944_vm13, %v1926_v53, %v1452_v50 }
 0x333   : > { %v1162_v61 = vpop.permute.xlu1 %1161  ;;  %v1138_v11 = vpop.permute.xlu0 %1137 }
 0x334   : > { %v5272_v41 = vsel %vm1836_vm9, %v5787_v27, %v1162_v61  ;;  %v5276_v22 = vsel %vm1836_vm9, %v5788_v44, %v1138_v11 }
 0x337   : > { %v5278_v1 = vpop.permute.xlu1 %1239  ;;  %v5280_v17 = vpop.permute.xlu0 %1215 }
 0x338   : > { %v1886_v61 = vsel %vm1863_vm10, %v5264_v6, %v5278_v1  ;;  %v1874_v27 = vsel %vm1863_vm10, %v5268_v31, %v5280_v17 }
 0x33b   : > { %v1478_v29 = vpop.permute.xlu1 %1477  ;;  %v1454_v8 = vpop.permute.xlu0 %1453 }
 0x33c   : > { %v1966_v25 = vsel %vm1944_vm13, %v1939_v56, %v1478_v29  ;;  %v1954_v13 = vsel %vm1944_vm13, %v1927_v47, %v1454_v8 }
 0x33f   : > { %v1556_v34 = vpop.permute.xlu1 %1555  ;;  %v1532_v4 = vpop.permute.xlu0 %1531 }
 0x340   : > { %v1992_v28 = vsel %vm1971_vm14, %v1965_v33, %v1556_v34  ;;  %v1980_v24 = vsel %vm1971_vm14, %v1953_v62, %v1532_v4 }
 0x341   : > { %2564 = vmatprep.mubr.msk.f32.mxu0 %vm2013_vm15, %v1980_v24  ;;  %2582 = vmatprep.mubr.msk.f32.mxu1 %vm2013_vm15, %v1992_v28 }
 0x343   : > { %v5298_v49 = vpop.permute.xlu1 %1241  ;;  %v5300_v10 = vpop.permute.xlu0 %1217 }
 0x344   : > { %v1887_v33 = vsel %vm1863_vm10, %v5272_v41, %v5298_v49  ;;  %v1875_v34 = vsel %vm1863_vm10, %v5276_v22, %v5300_v10 }
 0x347   : > { %v1320_v38 = vpop.permute.xlu1 %1319  ;;  %v1296_v39 = vpop.permute.xlu0 %1295 }
 0x348   : > { %v1913_v44 = vsel %vm1890_vm11, %v1886_v61, %v1320_v38  ;;  %v1901_v29 = vsel %vm1890_vm11, %v1874_v27, %v1296_v39 }
 0x34b   : > { %v1558_v55 = vpop.permute.xlu1 %1557  ;;  %v1534_v59 = vpop.permute.xlu0 %1533 }
 0x34c   : > { %v1993_v15 = vsel %vm1971_vm14, %v1966_v25, %v1558_v55  ;;  %v1981_v60 = vsel %vm1971_vm14, %v1954_v13, %v1534_v59  ;;  %v5789_v59 = vld [vmem:[#allocation41_spill] sm:$0xff] }
 0x34d   : > { %2565 = vmatmul.mubr.msk.f32.gmra.mrb[8].mxu0 %vm2013_vm15, %v1981_v60  ;;  %2583 = vmatmul.mubr.msk.f32.gmra.mrb[6].mxu1 %vm2013_vm15, %v1993_v15  ;;  %v5790_v60 = vld [vmem:[#allocation37_spill] sm:$0xff] }
 0x34f   : > { %v1322_v63 = vpop.permute.xlu1 %1321  ;;  %v1298_v9 = vpop.permute.xlu0 %1297 }
 0x350   : > { %v1914_v4 = vsel %vm1890_vm11, %v1887_v33, %v1322_v63  ;;  %v1902_v28 = vsel %vm1890_vm11, %v1875_v34, %v1298_v9  ;;  %v5791_v9 = vld [vmem:[#allocation40_spill] sm:$0xff] }
 0x353   : > { %v1400_v48 = vpop.permute.xlu1 %1399 }
 0x354   : > { %v1376_v21 = vpop.permute.xlu0 %1375  ;;  %v1940_v8 = vsel %vm1917_vm12, %v1913_v44, %v1400_v48 }
 0x355   : > { %v1928_v43 = vsel %vm1917_vm12, %v1901_v29, %v1376_v21  ;;  %v5792_v21 = vld [vmem:[#allocation34_spill] sm:$0xff] }
 0x357   : > { %v5318_v12 = vpop.permute.xlu1 %1163 }
 0x358   : > { %v5320_v30 = vpop.permute.xlu0 %1139  ;;  %v1861_v15 = vsel %vm1836_vm9, %v5789_v59, %v5318_v12 }
 0x359   : > { %v1849_v63 = vsel %vm1836_vm9, %v5790_v60, %v5320_v30 }
 0x35b   : > { %v1402_v54 = vpop.permute.xlu1 %1401 }
 0x35c   : > { %v1378_v18 = vpop.permute.xlu0 %1377  ;;  %v1941_v24 = vsel %vm1917_vm12, %v1914_v4, %v1402_v54 }
 0x35d   : > { %v1929_v38 = vsel %vm1917_vm12, %v1902_v28, %v1378_v18 }
 0x35f   : > { %v1480_v57 = vpop.permute.xlu1 %1479 }
 0x360   : > { %v1456_v45 = vpop.permute.xlu0 %1455  ;;  %v1967_v7 = vsel %vm1944_vm13, %v1940_v8, %v1480_v57 }
 0x361   : > { %v2554_v19 = vpop.f32.mrb[0].mxu0  ;;  %v1955_v2 = vsel %vm1944_vm13, %v1928_v43, %v1456_v45 }
 0x362   : > { %v2164_v46 = vadd.f32 %v2554_v19, %v5326_v36  ;;  %v2158_v26 = vpop.f32.mrb[1].mxu0 }
 0x363   : > { %v2159_v40 = vadd.f32 %v5326_v36, %v2158_v26  ;;  %v1166_v3 = vpop.permute.xlu1 %1165 }
 0x364   : > { %vm2288_vm0 = vcmp.ge.f32.partialorder %v2164_v46, 0.0  ;;  %v2314_v35 = vmul.f32 0.2, %v2164_v46  ;;  %v1142_v23 = vpop.permute.xlu0 %1141  ;;  %v1862_v48 = vsel %vm1836_vm9, %v5791_v9, %v1166_v3 }
 0x365   : > { %vm2287_vm1 = vcmp.ge.f32.partialorder %v2159_v40, 0.0  ;;  %v2313_v58 = vmul.f32 0.2, %v2159_v40  ;;  %v1850_v54 = vsel %vm1836_vm9, %v5792_v21, %v1142_v23 }
 0x366   : > { %v2340_v5 = vsel %vm2288_vm0, %v2164_v46, %v2314_v35 }
 0x367   : > { %2366 = vst [vmem:[%s5332_s27 + $0x8] sm:$0xff] %v2340_v5  ;;  %v2339_v0 = vsel %vm2287_vm1, %v2159_v40, %v2313_v58  ;;  %v1244_v16 = vpop.permute.xlu1 %1243 }
 0x368   : > { %2365 = vst [vmem:[%s5332_s27] sm:$0xff] %v2339_v0  ;;  %v1220_v51 = vpop.permute.xlu0 %1219  ;;  %v1888_v18 = vsel %vm1863_vm10, %v1861_v15, %v1244_v16 }
 0x369   : > { %v1876_v57 = vsel %vm1863_vm10, %v1849_v63, %v1220_v51 }
 0x36b   : > { %v1482_v50 = vpop.permute.xlu1 %1481 }
 0x36c   : > { %v1458_v11 = vpop.permute.xlu0 %1457  ;;  %v1968_v39 = vsel %vm1944_vm13, %v1941_v24, %v1482_v50 }
 0x36d   : > { %v1956_v52 = vsel %vm1944_vm13, %v1929_v38, %v1458_v11 }
 0x36f   : > { %v1560_v37 = vpop.permute.xlu1 %1559 }
 0x370   : > { %v1994_v6 = vsel %vm1971_vm14, %v1967_v7, %v1560_v37  ;;  %v1536_v1 = vpop.permute.xlu0 %1535 }
 0x371   : > { %v1982_v42 = vsel %vm1971_vm14, %v1955_v2, %v1536_v1  ;;  %2585 = vmatprep.mubr.msk.f32.mxu1 %vm2013_vm15, %v1994_v6 }
 0x372   : > { %2567 = vmatprep.mubr.msk.f32.mxu0 %vm2013_vm15, %v1982_v42 }
 0x373   : > { %v1246_v31 = vpop.permute.xlu1 %1245 }
 0x374   : > { %v1222_v17 = vpop.permute.xlu0 %1221  ;;  %v1889_v19 = vsel %vm1863_vm10, %v1862_v48, %v1246_v31 }
 0x375   : > { %v1877_v46 = vsel %vm1863_vm10, %v1850_v54, %v1222_v17 }
 0x377   : > { %v1324_v53 = vpop.permute.xlu1 %1323 }
 0x378   : > { %v1300_v62 = vpop.permute.xlu0 %1299  ;;  %v1915_v12 = vsel %vm1890_vm11, %v1888_v18, %v1324_v53 }
 0x379   : > { %v1903_v26 = vsel %vm1890_vm11, %v1876_v57, %v1300_v62 }
 0x37b   : > { %v1562_v32 = vpop.permute.xlu1 %1561 }
 0x37c   : > { %v1995_v41 = vsel %vm1971_vm14, %v1968_v39, %v1562_v32  ;;  %v1538_v49 = vpop.permute.xlu0 %1537 }
 0x37d   : > { %v1983_v14 = vsel %vm1971_vm14, %v1956_v52, %v1538_v49  ;;  %2586 = vmatmul.mubr.msk.f32.gmra.mrb[8].mxu1 %vm2013_vm15, %v1995_v41 }
 0x37e   : > { %2568 = vmatmul.mubr.msk.f32.gmra.mrb[10].mxu0 %vm2013_vm15, %v1983_v14 }
 0x37f   : > { %v1326_v22 = vpop.permute.xlu1 %1325 }
 0x380   : > { %v1302_v10 = vpop.permute.xlu0 %1301  ;;  %v1916_v40 = vsel %vm1890_vm11, %v1889_v19, %v1326_v22 }
 0x381   : > { %v1904_v3 = vsel %vm1890_vm11, %v1877_v46, %v1302_v10 }
 0x383   : > { %v1404_v20 = vpop.permute.xlu1 %1403 }
 0x384   : > { %v1380_v56 = vpop.permute.xlu0 %1379  ;;  %v1942_v35 = vsel %vm1917_vm12, %v1915_v12, %v1404_v20 }
 0x385   : > { %v1930_v23 = vsel %vm1917_vm12, %v1903_v26, %v1380_v56 }
 0x387   : > { %v1406_v47 = vpop.permute.xlu1 %1405 }
 0x388   : > { %v1382_v25 = vpop.permute.xlu0 %1381  ;;  %v1943_v0 = vsel %vm1917_vm12, %v1916_v40, %v1406_v47 }
 0x389   : > { %v1931_v16 = vsel %vm1917_vm12, %v1904_v3, %v1382_v25 }
 0x38b   : > { %v1484_v13 = vpop.permute.xlu1 %1483 }
 0x38c   : > { %v1460_v55 = vpop.permute.xlu0 %1459  ;;  %v1969_v27 = vsel %vm1944_vm13, %v1942_v35, %v1484_v13 }
 0x38d   : > { %v1957_v44 = vsel %vm1944_vm13, %v1930_v23, %v1460_v55 }
 0x38f   : > { %v1486_v45 = vpop.permute.xlu1 %1485 }
 0x390   : > { %v1462_v30 = vpop.permute.xlu0 %1461  ;;  %v1970_v33 = vsel %vm1944_vm13, %v1943_v0, %v1486_v45 }
 0x391   : > { %v2557_v58 = vpop.f32.mrb[2].mxu0  ;;  %v2575_v5 = vpop.f32.mrb[0].mxu1  ;;  %v1958_v28 = vsel %vm1944_vm13, %v1931_v16, %v1462_v30 }
 0x392   : > { %v2174_v51 = vadd.f32 %v2557_v58, %v5326_v36  ;;  %v2234_v50 = vadd.f32 %v2575_v5, %v5326_v36  ;;  %v2168_v61 = vpop.f32.mrb[3].mxu0  ;;  %v2228_v11 = vpop.f32.mrb[1].mxu1 }
 0x393   : > { %v2169_v29 = vadd.f32 %v5326_v36, %v2168_v61  ;;  %v2229_v8 = vadd.f32 %v5326_v36, %v2228_v11  ;;  %v1564_v43 = vpop.permute.xlu1 %1563 }
 0x394   : > { %vm2290_vm2 = vcmp.ge.f32.partialorder %v2174_v51, 0.0  ;;  %v2316_v7 = vmul.f32 0.2, %v2174_v51  ;;  %vm2302_vm3 = vcmp.ge.f32.partialorder %v2234_v50, 0.0  ;;  %v2328_v37 = vmul.f32 0.2, %v2234_v50  ;;  %v1540_v2 = vpop.permute.xlu0 %1539 }
 0x395   : > { %vm2289_vm4 = vcmp.ge.f32.partialorder %v2169_v29, 0.0  ;;  %v2315_v6 = vmul.f32 0.2, %v2169_v29  ;;  %vm2301_vm5 = vcmp.ge.f32.partialorder %v2229_v8, 0.0  ;;  %v2327_v1 = vmul.f32 0.2, %v2229_v8 }
 0x396   : > { %v2342_v42 = vsel %vm2290_vm2, %v2174_v51, %v2316_v7  ;;  %v2354_v31 = vsel %vm2302_vm3, %v2234_v50, %v2328_v37  ;;  %v1996_v17 = vsel %vm1971_vm14, %v1969_v27, %v1564_v43  ;;  %v1984_v53 = vsel %vm1971_vm14, %v1957_v44, %v1540_v2 }
 0x397   : > { %2368 = vst [vmem:[%s5332_s27 + $0x18] sm:$0xff] %v2342_v42  ;;  %2380 = vst [vmem:[%s5332_s27 + $0x78] sm:$0xff] %v2354_v31  ;;  %v2341_v62 = vsel %vm2289_vm4, %v2169_v29, %v2315_v6  ;;  %v2353_v34 = vsel %vm2301_vm5, %v2229_v8, %v2327_v1  ;;  %2570 = vmatprep.mubr.msk.f32.mxu0 %vm2013_vm15, %v1984_v53  ;;  %2588 = vmatprep.mubr.msk.f32.mxu1 %vm2013_vm15, %v1996_v17  ;;  %v1566_v4 = vpop.permute.xlu1 %1565 }
 0x398   : > { %2367 = vst [vmem:[%s5332_s27 + $0x10] sm:$0xff] %v2341_v62  ;;  %2379 = vst [vmem:[%s5332_s27 + $0x70] sm:$0xff] %v2353_v34  ;;  %v1997_v24 = vsel %vm1971_vm14, %v1970_v33, %v1566_v4  ;;  %v1542_v38 = vpop.permute.xlu0 %1541 }
 0x399   : > { %v1985_v39 = vsel %vm1971_vm14, %v1958_v28, %v1542_v38  ;;  %2589 = vmatmul.mubr.msk.f32.gmra.mrb[10].mxu1 %vm2013_vm15, %v1997_v24 }
 0x39a   : > { %2571 = vmatmul.mubr.msk.f32.gmra.mrb[12].mxu0 %vm2013_vm15, %v1985_v39 }
 0x3c0   : > { %v2578_v32 = vpop.f32.mrb[2].mxu1 }
 0x3c1   : > { %v2560_v52 = vpop.f32.mrb[4].mxu0  ;;  %v2244_v41 = vadd.f32 %v2578_v32, %v5326_v36  ;;  %v2238_v49 = vpop.f32.mrb[3].mxu1 }
 0x3c2   : > { %v2184_v14 = vadd.f32 %v2560_v52, %v5326_v36  ;;  %v2178_v22 = vpop.f32.mrb[5].mxu0  ;;  %v2239_v10 = vadd.f32 %v5326_v36, %v2238_v49 }
 0x3c3   : > { %vm2304_vm6 = vcmp.ge.f32.partialorder %v2244_v41, 0.0  ;;  %v2330_v20 = vmul.f32 0.2, %v2244_v41  ;;  %v2179_v56 = vadd.f32 %v5326_v36, %v2178_v22 }
 0x3c4   : > { %vm2292_vm7 = vcmp.ge.f32.partialorder %v2184_v14, 0.0  ;;  %v2318_v47 = vmul.f32 0.2, %v2184_v14  ;;  %vm2303_vm8 = vcmp.ge.f32.partialorder %v2239_v10, 0.0  ;;  %v2329_v25 = vmul.f32 0.2, %v2239_v10 }
 0x3c5   : > { %v2356_v13 = vsel %vm2304_vm6, %v2244_v41, %v2330_v20  ;;  %vm2291_vm9 = vcmp.ge.f32.partialorder %v2179_v56, 0.0  ;;  %v2317_v55 = vmul.f32 0.2, %v2179_v56 }
 0x3c6   : > { %v2344_v59 = vsel %vm2292_vm7, %v2184_v14, %v2318_v47  ;;  %2382 = vst [vmem:[%s5332_s27 + $0x88] sm:$0xff] %v2356_v13  ;;  %v2355_v15 = vsel %vm2303_vm8, %v2239_v10, %v2329_v25 }
 0x3c7   : > { %2370 = vst [vmem:[%s5332_s27 + $0x28] sm:$0xff] %v2344_v59  ;;  %v2343_v60 = vsel %vm2291_vm9, %v2179_v56, %v2317_v55  ;;  %2381 = vst [vmem:[%s5332_s27 + $0x80] sm:$0xff] %v2355_v15 }
 0x3c8   : > { %2369 = vst [vmem:[%s5332_s27 + $0x20] sm:$0xff] %v2343_v60 }
 0x3f0   : > { %v2581_v63 = vpop.f32.mrb[4].mxu1 }
 0x3f1   : > { %v2563_v9 = vpop.f32.mrb[6].mxu0  ;;  %v2254_v48 = vadd.f32 %v2581_v63, %v5326_v36  ;;  %v2248_v21 = vpop.f32.mrb[5].mxu1 }
 0x3f2   : > { %v2194_v54 = vadd.f32 %v2563_v9, %v5326_v36  ;;  %v2188_v18 = vpop.f32.mrb[7].mxu0  ;;  %v2249_v57 = vadd.f32 %v5326_v36, %v2248_v21 }
 0x3f3   : > { %vm2306_vm10 = vcmp.ge.f32.partialorder %v2254_v48, 0.0  ;;  %v2332_v45 = vmul.f32 0.2, %v2254_v48  ;;  %v2189_v19 = vadd.f32 %v5326_v36, %v2188_v18 }
 0x3f4   : > { %vm2294_vm11 = vcmp.ge.f32.partialorder %v2194_v54, 0.0  ;;  %v2320_v46 = vmul.f32 0.2, %v2194_v54  ;;  %vm2305_vm12 = vcmp.ge.f32.partialorder %v2249_v57, 0.0  ;;  %v2331_v12 = vmul.f32 0.2, %v2249_v57 }
 0x3f5   : > { %v2358_v26 = vsel %vm2306_vm10, %v2254_v48, %v2332_v45  ;;  %vm2293_vm13 = vcmp.ge.f32.partialorder %v2189_v19, 0.0  ;;  %v2319_v30 = vmul.f32 0.2, %v2189_v19 }
 0x3f6   : > { %v2346_v40 = vsel %vm2294_vm11, %v2194_v54, %v2320_v46  ;;  %2384 = vst [vmem:[%s5332_s27 + $0x98] sm:$0xff] %v2358_v26  ;;  %v2357_v3 = vsel %vm2305_vm12, %v2249_v57, %v2331_v12 }
 0x3f7   : > { %2372 = vst [vmem:[%s5332_s27 + $0x38] sm:$0xff] %v2346_v40  ;;  %v2345_v35 = vsel %vm2293_vm13, %v2189_v19, %v2319_v30  ;;  %2383 = vst [vmem:[%s5332_s27 + $0x90] sm:$0xff] %v2357_v3 }
 0x3f8   : > { %2371 = vst [vmem:[%s5332_s27 + $0x30] sm:$0xff] %v2345_v35 }
 0x420   : > { %v2566_v23 = vpop.f32.mrb[8].mxu0  ;;  %v2584_v58 = vpop.f32.mrb[6].mxu1 }
 0x421   : > { %v2204_v5 = vadd.f32 %v2566_v23, %v5326_v36  ;;  %v2264_v0 = vadd.f32 %v2584_v58, %v5326_v36  ;;  %v2198_v16 = vpop.f32.mrb[9].mxu0  ;;  %v2258_v51 = vpop.f32.mrb[7].mxu1 }
 0x422   : > { %v2199_v50 = vadd.f32 %v5326_v36, %v2198_v16  ;;  %v2259_v61 = vadd.f32 %v5326_v36, %v2258_v51 }
 0x423   : > { %vm2296_vm14 = vcmp.ge.f32.partialorder %v2204_v5, 0.0  ;;  %v2322_v11 = vmul.f32 0.2, %v2204_v5  ;;  %vm2308_vm15 = vcmp.ge.f32.partialorder %v2264_v0, 0.0  ;;  %v2334_v27 = vmul.f32 0.2, %v2264_v0 }
 0x424   : > { %vm2295_vm0 = vcmp.ge.f32.partialorder %v2199_v50, 0.0  ;;  %v2321_v44 = vmul.f32 0.2, %v2199_v50  ;;  %vm2307_vm1 = vcmp.ge.f32.partialorder %v2259_v61, 0.0  ;;  %v2333_v29 = vmul.f32 0.2, %v2259_v61 }
 0x425   : > { %v2348_v8 = vsel %vm2296_vm14, %v2204_v5, %v2322_v11  ;;  %v2360_v43 = vsel %vm2308_vm15, %v2264_v0, %v2334_v27 }
 0x426   : > { %2374 = vst [vmem:[%s5332_s27 + $0x48] sm:$0xff] %v2348_v8  ;;  %2386 = vst [vmem:[%s5332_s27 + $0xa8] sm:$0xff] %v2360_v43  ;;  %v2347_v7 = vsel %vm2295_vm0, %v2199_v50, %v2321_v44  ;;  %v2359_v37 = vsel %vm2307_vm1, %v2259_v61, %v2333_v29 }
 0x427   : > { %2373 = vst [vmem:[%s5332_s27 + $0x40] sm:$0xff] %v2347_v7  ;;  %2385 = vst [vmem:[%s5332_s27 + $0xa0] sm:$0xff] %v2359_v37 }
 0x450   : > { %v2587_v2 = vpop.f32.mrb[8].mxu1 }
 0x451   : > { %v2569_v6 = vpop.f32.mrb[10].mxu0  ;;  %v2274_v1 = vadd.f32 %v2587_v2, %v5326_v36  ;;  %v2268_v42 = vpop.f32.mrb[9].mxu1 }
 0x452   : > { %v2214_v31 = vadd.f32 %v2569_v6, %v5326_v36  ;;  %v2208_v17 = vpop.f32.mrb[11].mxu0  ;;  %v2269_v53 = vadd.f32 %v5326_v36, %v2268_v42 }
 0x453   : > { %vm2310_vm2 = vcmp.ge.f32.partialorder %v2274_v1, 0.0  ;;  %v2336_v33 = vmul.f32 0.2, %v2274_v1  ;;  %v2209_v62 = vadd.f32 %v5326_v36, %v2208_v17 }
 0x454   : > { %vm2298_vm3 = vcmp.ge.f32.partialorder %v2214_v31, 0.0  ;;  %v2324_v34 = vmul.f32 0.2, %v2214_v31  ;;  %vm2309_vm4 = vcmp.ge.f32.partialorder %v2269_v53, 0.0  ;;  %v2335_v4 = vmul.f32 0.2, %v2269_v53 }
 0x455   : > { %v2362_v28 = vsel %vm2310_vm2, %v2274_v1, %v2336_v33  ;;  %vm2297_vm5 = vcmp.ge.f32.partialorder %v2209_v62, 0.0  ;;  %v2323_v24 = vmul.f32 0.2, %v2209_v62 }
 0x456   : > { %v2350_v38 = vsel %vm2298_vm3, %v2214_v31, %v2324_v34  ;;  %2388 = vst [vmem:[%s5332_s27 + $0xb8] sm:$0xff] %v2362_v28  ;;  %v2361_v39 = vsel %vm2309_vm4, %v2269_v53, %v2335_v4 }
 0x457   : > { %2376 = vst [vmem:[%s5332_s27 + $0x58] sm:$0xff] %v2350_v38  ;;  %v2349_v32 = vsel %vm2297_vm5, %v2209_v62, %v2323_v24  ;;  %2387 = vst [vmem:[%s5332_s27 + $0xb0] sm:$0xff] %v2361_v39 }
 0x458   : > { %2375 = vst [vmem:[%s5332_s27 + $0x50] sm:$0xff] %v2349_v32 }
 0x46c   : > { %v2590_v52 = vpop.f32.mrb[10].mxu1 }
 0x46d   : > { %v2572_v41 = vpop.f32.mrb[12].mxu0  ;;  %v2284_v49 = vadd.f32 %v2590_v52, %v5326_v36  ;;  %v2278_v14 = vpop.f32.mrb[11].mxu1 }
 0x46e   : > { %v2224_v22 = vadd.f32 %v2572_v41, %v5326_v36  ;;  %v2218_v10 = vpop.f32.mrb[13].mxu0  ;;  %v2279_v20 = vadd.f32 %v5326_v36, %v2278_v14 }
 0x46f   : > { %vm2312_vm6 = vcmp.ge.f32.partialorder %v2284_v49, 0.0  ;;  %v2338_v56 = vmul.f32 0.2, %v2284_v49  ;;  %v2219_v47 = vadd.f32 %v5326_v36, %v2218_v10 }
 0x470   : > { %vm2300_vm7 = vcmp.ge.f32.partialorder %v2224_v22, 0.0  ;;  %v2326_v25 = vmul.f32 0.2, %v2224_v22  ;;  %vm2311_vm8 = vcmp.ge.f32.partialorder %v2279_v20, 0.0  ;;  %v2337_v13 = vmul.f32 0.2, %v2279_v20 }
 0x471   : > { %v2364_v55 = vsel %vm2312_vm6, %v2284_v49, %v2338_v56  ;;  %vm2299_vm9 = vcmp.ge.f32.partialorder %v2219_v47, 0.0  ;;  %v2325_v59 = vmul.f32 0.2, %v2219_v47 }
 0x472   : > { %v2352_v15 = vsel %vm2300_vm7, %v2224_v22, %v2326_v25  ;;  %2390 = vst [vmem:[%s5332_s27 + $0xc8] sm:$0xff] %v2364_v55  ;;  %v2363_v36 = vsel %vm2311_vm8, %v2279_v20, %v2337_v13 }
 0x473   : > { %2378 = vst [vmem:[%s5332_s27 + $0x68] sm:$0xff] %v2352_v15  ;;  %v2351_v60 = vsel %vm2299_vm9, %v2219_v47, %v2325_v59  ;;  %2389 = vst [vmem:[%s5332_s27 + $0xc0] sm:$0xff] %v2363_v36 }
 0x474   : > { %2377 = vst [vmem:[%s5332_s27 + $0x60] sm:$0xff] %v2351_v60 }
 0x475   : > { %2782 = shalt.err (!%p2779_p3)
}
 0x476   : > { %s2783_s26 = scalar_lea.hbm %s5451_s8, 3328  ;;  %s2787_s28 = scalar_lea.hbm %s5506_s3, 6656 }
 0x477   : > { %p2784_p4 = scmp.ne.s32.totalorder %s5451_s8, %s2783_s26  ;;  %p2788_p9 = scmp.lt.u32.totalorder %s5451_s8, %s5506_s3 }
 0x478   : > { %p2789_p10 = scmp.lt.u32.totalorder %s2787_s28, %s2783_s26  ;;  %p2791_p12 = scmp.lt.u32.totalorder %s2783_s26, %s5451_s8 }
 0x479   : > { %p2785_p7 = pnand %p2784_p4, %p2908_p5 }
 0x47a   : > { %p2790_p11 = por %p2789_p10, %p2788_p9 }
 0x47b   : > { %p2786_p8 = pneg %p2785_p7 }
 0x47c   : > { %p2792_p13 = por %p2791_p12, %p2790_p11 }
 0x47e   : > { %p2793_p0 = pnand %p2792_p13, %p2786_p8 }
 0x480   : > { %2796 = shalt.err (!%p2793_p0)
}
 0x481   : > { %s2849_s19 = smov 128  }
 0x482   : > { %2618 = dma.vmem_to_hbm [thread:$0]  (%p2908_p5), %s5454_s6, 3328, %s5451_s8, %s5461_s9, %s2849_s19, %s2849_s19, %s2834_s30  }
 0x483 PF: > { %p2624_p1 = scmp.ge.s32.totalorder %s2831_s15, 2  ;;  %s2420_s27 = sand.u32 1, %s2819_s12  }
 0x484   : > { %s2421_s5 = scalar_lea.sflag [#allocation3], %s2420_s27 }
 0x485   : > { %p2621_p2 = pnand %p2624_p1, %p2912_p6 }
 0x487   : > { %2814 = dma.done.wait (!%p2621_p2), %s2421_s5, 3328  }
 0x488   : > { %2816 = vsyncadd (!%p2621_p2), %s2421_s5, 4294963968  ;;  %p13_p3 = scmp.ge.s32.totalorder %s2895_s18, 4   ;;  %s5793_s12 = smov %s2823_s13 }
 0x489   : > { %s5794_s13 = smov %s2827_s14  ;;  %s5795_s14 = smov %s2906_s21 }
 0x48a   : > { %s5796_s15 = smov %s2895_s18  ;;  %15 = sbr.rel (!%p13_p3) target bundleno = 3 (0x3), region = 67 }
 0x491   :  { %2426 = vsyncpa [#allocation3], 1 }
 0x492   :  { %2428 = vsyncpa [#allocation3 + $0x1], 1 }

// kernel: tpu_custom_call.1
= control target key start
LH: loop header
LB: loop body
LE: loop exit
PB: predicated region body
PF: predicated region fallthrough
CT: control target
= control target key end

     0   :  { %8 = vsyncpa [#allocation3], 0  ;;  %s5503_s0 = inlined_call_operand.vmem [shape: f32[2,264,4], index: 0, kind: input, shape index: {}]   ;;  %s5504_s1 = inlined_call_operand.vmem [shape: f32[64,128], index: 1, kind: input, shape index: {}]   ;;  %s5505_s2 = inlined_call_operand.vmem [shape: f32[1,128], index: 2, kind: input, shape index: {}]   ;;  %s5506_s3 = inlined_call_operand.hbm [shape: f32[2,208,128], index: 3, kind: output, shape index: {}]  }
   0x1   :  { %10 = vsyncpa [#allocation3 + $0x1], 0  ;;  %s2870_s12 = smov 0   ;;  %s2872_s13 = smov 0  }
   0x2   :  { %s2874_s14 = smov 0   ;;  %s2876_s15 = smov 0  }
   0x3 LB: > { %s2891_s16 = sadd.s32 4294967295, %s2831_s15   ;;  %s2467_s17 = sadd.s32 4294967294, %s2831_s15   ;;  %s2831_s15 = sphi %s2876_s15, %s5796_s15   ;;  %s2827_s14 = sphi %s2874_s14, %s5795_s14   ;;  %s2823_s13 = sphi %s2872_s13, %s5794_s13   ;;  %s2819_s12 = sphi %s2870_s12, %s5793_s12  }
   0x4   : > { %s2895_s18 = sadd.s32 1, %s2831_s15   ;;  %s91_s19 = sadd.s32 1, %s2827_s14 }
   0x5   : > { %s88_s20 = ssub.s32 %s2831_s15, %s2895_s18  ;;  %p101_p0 = scmp.ne.s32.totalorder %s2827_s14, %s2823_s13 }
   0x6   : > { %p89_p1 = scmp.eq.s32.totalorder %s88_s20, 0  ;;  %p102_p2 = scmp.eq.s32.totalorder %s2891_s16, 1 }
   0x7   : > { %p107_p3 = scmp.ne.s32.totalorder %s2823_s13, %s2819_s12  ;;  %p108_p4 = scmp.eq.s32.totalorder %s2467_s17, 1 }
   0x8   : > { %s2906_s21 = scalar_select %p89_p1, %s2827_s14, %s91_s19  }
   0x9   : > { %p2908_p5 = por %p102_p2, %p101_p0  ;;  %p2912_p6 = por %p108_p4, %p107_p3 }
   0xa   : > { %p2470_p7 = scmp.ge.s32.totalorder %s2831_s15, 1  ;;  %p140_p8 = scmp.lt.s32.totalorder %s2831_s15, 3 }
   0xc   : > { %p141_p9 = pnand %p2470_p7, %p140_p8 }
   0xe   : > { %144 = sbr.rel (%p141_p9) target bundleno = 1155 (0x483), region = 32 }
  0x15   : > { %p164_p10 = scmp.lt.s32.totalorder %s2891_s16, 1  ;;  %s2833_s29 = smov 4   ;;  %vm1593_vm0 = vcmask 31744   ;;  %vm1620_vm1 = vcmask 64512   ;;  %vm1647_vm2 = vcmask 97280   ;;  %vm1674_vm3 = vcmask 130048  }
  0x16   : > { %s2834_s30 = smov 8   ;;  %s2835_s4 = smov 12   ;;  %vm1701_vm4 = vcmask 162816   ;;  %vm1728_vm5 = vcmask 195584   ;;  %vm1755_vm6 = vcmask 228352   ;;  %vm1782_vm7 = vcmask 261120  }
  0x17   : > { %s165_s24 = scalar_select %p164_p10, %s2891_s16, 1  ;;  %vm1809_vm8 = vcmask 293888   ;;  %vm1836_vm9 = vcmask 326656   ;;  %vm1863_vm10 = vcmask 359424   ;;  %vm1890_vm11 = vcmask 392192  }
  0x18   : > { %s2836_s5 = smov 16   ;;  %s2837_s6 = smov 20   ;;  %vm1917_vm12 = vcmask 424960   ;;  %vm1944_vm13 = vcmask 457728   ;;  %vm1971_vm14 = vcmask 490496   ;;  %vm2013_vm15 = vcmask 523264  }
  0x19   : > { %s2616_s25 = smul.u32 264, %s165_s24  ;;  %s2838_s7 = smov 24  }
  0x1a   : > { %s2839_s8 = smov 28   ;;  %s2840_s9 = smov 32  }
  0x1b   : > { %s2923_s28 = scalar_lea.vmem %s5503_s0, %s2616_s25  ;;  %s2841_s10 = smov 36  }
  0x1c   : > { %v2926_v0 = vld [vmem:[%s2923_s28 + $0x11] sm:$0xff]  ;;  %v195_v1 = vld [vmem:[%s2923_s28 + $0x1] sm:$0xff]  ;;  %v2933_v2 = vld [vmem:[%s2923_s28 + $0x19] sm:$0xff]  ;;  %s2842_s11 = smov 40   ;;  %s2843_s17 = smov 44  }
  0x1d   : > { %327 = vrot.lane.b32.xlu1 %v2926_v0, %s2833_s29  ;;  %323 = vrot.lane.b32.xlu0 %v195_v1, %s2833_s29  ;;  %v196_v3 = vld [vmem:[%s2923_s28 + $0x9] sm:$0xff]  ;;  %v2943_v5 = vld [vmem:[%s2923_s28 + $0x21] sm:$0xff]  ;;  %s2844_s19 = smov 48   ;;  %s2845_s27 = smov 52  }
  0x1e   : > { %v2940_v4 = vld [vmem:[%s2923_s28 + $0x29] sm:$0xff]  ;;  %v2950_v6 = vld [vmem:[%s2923_s28 + $0x39] sm:$0xff]  ;;  %v2953_v7 = vld [vmem:[%s2923_s28 + $0x31] sm:$0xff]  ;;  %s2846_s20 = smov 56  }
  0x1f   : > { %v2960_v8 = vld [vmem:[%s2923_s28 + $0x49] sm:$0xff]  ;;  %v2963_v9 = vld [vmem:[%s2923_s28 + $0x41] sm:$0xff]  ;;  %v2970_v10 = vld [vmem:[%s2923_s28 + $0x59] sm:$0xff] }
  0x20   : > { %v2973_v11 = vld [vmem:[%s2923_s28 + $0x51] sm:$0xff]  ;;  %v2980_v12 = vld [vmem:[%s2923_s28 + $0x69] sm:$0xff]  ;;  %v2983_v13 = vld [vmem:[%s2923_s28 + $0x61] sm:$0xff] }
  0x21   : > { %329 = vrot.lane.b32.xlu1 %v2933_v2, %s2833_s29  ;;  %325 = vrot.lane.b32.xlu0 %v196_v3, %s2833_s29  ;;  %v2990_v14 = vld [vmem:[%s2923_s28 + $0x79] sm:$0xff]  ;;  %v2993_v15 = vld [vmem:[%s2923_s28 + $0x71] sm:$0xff] }
  0x22   : > { %v3000_v16 = vld [vmem:[%s2923_s28 + $0x89] sm:$0xff]  ;;  %v3003_v17 = vld [vmem:[%s2923_s28 + $0x81] sm:$0xff]  ;;  %v3010_v18 = vld [vmem:[%s2923_s28 + $0x99] sm:$0xff] }
  0x23   : > { %v3013_v19 = vld [vmem:[%s2923_s28 + $0x91] sm:$0xff]  ;;  %v3020_v20 = vld [vmem:[%s2923_s28 + $0xa9] sm:$0xff]  ;;  %v3023_v21 = vld [vmem:[%s2923_s28 + $0xa1] sm:$0xff] }
  0x24   : > { %v3030_v22 = vld [vmem:[%s2923_s28 + $0xb9] sm:$0xff]  ;;  %v3033_v23 = vld [vmem:[%s2923_s28 + $0xb1] sm:$0xff]  ;;  %v3040_v24 = vld [vmem:[%s2923_s28 + $0xc9] sm:$0xff] }
  0x25   : > { %333 = vrot.lane.b32.xlu1 %v2940_v4, %s2833_s29  ;;  %331 = vrot.lane.b32.xlu0 %v2943_v5, %s2833_s29  ;;  %v3043_v25 = vld [vmem:[%s2923_s28 + $0xc1] sm:$0xff]  ;;  %v222_v26 = vld [vmem:[%s2923_s28 + $0xa] sm:$0xff] }
  0x26   : > { %v221_v27 = vld [vmem:[%s2923_s28 + $0x2] sm:$0xff]  ;;  %v3054_v28 = vld [vmem:[%s2923_s28 + $0x1a] sm:$0xff]  ;;  %v3057_v29 = vld [vmem:[%s2923_s28 + $0x12] sm:$0xff] }
  0x27   : > { %v3064_v30 = vld [vmem:[%s2923_s28 + $0x2a] sm:$0xff]  ;;  %v3067_v31 = vld [vmem:[%s2923_s28 + $0x22] sm:$0xff]  ;;  %v3074_v32 = vld [vmem:[%s2923_s28 + $0x3a] sm:$0xff] }
  0x28   : > { %5581 = vst [vmem:[#allocation5_spill] sm:$0xff] %v3074_v32  ;;  %v3077_v33 = vld [vmem:[%s2923_s28 + $0x32] sm:$0xff]  ;;  %v3084_v34 = vld [vmem:[%s2923_s28 + $0x4a] sm:$0xff]  ;;  %v3087_v35 = vld [vmem:[%s2923_s28 + $0x42] sm:$0xff] }
  0x29   : > { %337 = vrot.lane.b32.xlu1 %v2950_v6, %s2833_s29  ;;  %335 = vrot.lane.b32.xlu0 %v2953_v7, %s2833_s29  ;;  %5582 = vst [vmem:[#allocation6_spill] sm:$0xff] %v3077_v33  ;;  %5583 = vst [vmem:[#allocation7_spill] sm:$0xff] %v3084_v34  ;;  %v3094_v36 = vld [vmem:[%s2923_s28 + $0x5a] sm:$0xff]  ;;  %v3097_v37 = vld [vmem:[%s2923_s28 + $0x52] sm:$0xff] }
  0x2a   : > { %5584 = vst [vmem:[#allocation8_spill] sm:$0xff] %v3087_v35  ;;  %5585 = vst [vmem:[#allocation9_spill] sm:$0xff] %v3094_v36  ;;  %v3104_v38 = vld [vmem:[%s2923_s28 + $0x6a] sm:$0xff]  ;;  %v3107_v39 = vld [vmem:[%s2923_s28 + $0x62] sm:$0xff] }
  0x2b   : > { %5586 = vst [vmem:[#allocation10_spill] sm:$0xff] %v3097_v37  ;;  %5587 = vst [vmem:[#allocation11_spill] sm:$0xff] %v3104_v38  ;;  %v3114_v40 = vld [vmem:[%s2923_s28 + $0x7a] sm:$0xff]  ;;  %v3117_v41 = vld [vmem:[%s2923_s28 + $0x72] sm:$0xff] }
  0x2c   : > { %5588 = vst [vmem:[#allocation12_spill] sm:$0xff] %v3107_v39  ;;  %5589 = vst [vmem:[#allocation13_spill] sm:$0xff] %v3114_v40  ;;  %v3124_v42 = vld [vmem:[%s2923_s28 + $0x8a] sm:$0xff]  ;;  %v3127_v43 = vld [vmem:[%s2923_s28 + $0x82] sm:$0xff] }
  0x2d   : > { %341 = vrot.lane.b32.xlu1 %v2960_v8, %s2833_s29  ;;  %339 = vrot.lane.b32.xlu0 %v2963_v9, %s2833_s29  ;;  %5590 = vst [vmem:[#allocation14_spill] sm:$0xff] %v3117_v41  ;;  %5591 = vst [vmem:[#allocation15_spill] sm:$0xff] %v3124_v42  ;;  %v3134_v44 = vld [vmem:[%s2923_s28 + $0x9a] sm:$0xff]  ;;  %v3137_v45 = vld [vmem:[%s2923_s28 + $0x92] sm:$0xff] }
  0x2e   : > { %5592 = vst [vmem:[#allocation16_spill] sm:$0xff] %v3127_v43  ;;  %5593 = vst [vmem:[#allocation17_spill] sm:$0xff] %v3134_v44  ;;  %v3144_v46 = vld [vmem:[%s2923_s28 + $0xaa] sm:$0xff]  ;;  %v3147_v47 = vld [vmem:[%s2923_s28 + $0xa2] sm:$0xff] }
  0x2f   : > { %5594 = vst [vmem:[#allocation18_spill] sm:$0xff] %v3137_v45  ;;  %5595 = vst [vmem:[#allocation19_spill] sm:$0xff] %v3144_v46  ;;  %v3154_v48 = vld [vmem:[%s2923_s28 + $0xba] sm:$0xff]  ;;  %v3157_v49 = vld [vmem:[%s2923_s28 + $0xb2] sm:$0xff] }
  0x30   : > { %5596 = vst [vmem:[#allocation20_spill] sm:$0xff] %v3147_v47  ;;  %5597 = vst [vmem:[#allocation21_spill] sm:$0xff] %v3154_v48  ;;  %v3164_v50 = vld [vmem:[%s2923_s28 + $0xca] sm:$0xff]  ;;  %v3167_v51 = vld [vmem:[%s2923_s28 + $0xc2] sm:$0xff] }
  0x31   : > { %345 = vrot.lane.b32.xlu1 %v2970_v10, %s2833_s29  ;;  %343 = vrot.lane.b32.xlu0 %v2973_v11, %s2833_s29  ;;  %5598 = vst [vmem:[#allocation22_spill] sm:$0xff] %v3157_v49  ;;  %5599 = vst [vmem:[#allocation23_spill] sm:$0xff] %v3164_v50  ;;  %v248_v52 = vld [vmem:[%s2923_s28 + $0xb] sm:$0xff]  ;;  %v247_v53 = vld [vmem:[%s2923_s28 + $0x3] sm:$0xff] }
  0x32   : > { %5600 = vst [vmem:[#allocation24_spill] sm:$0xff] %v3167_v51  ;;  %v3178_v54 = vld [vmem:[%s2923_s28 + $0x1b] sm:$0xff]  ;;  %v3181_v55 = vld [vmem:[%s2923_s28 + $0x13] sm:$0xff]  ;;  %v3188_v56 = vld [vmem:[%s2923_s28 + $0x2b] sm:$0xff] }
  0x33   : > { %5601 = vst [vmem:[#allocation25_spill] sm:$0xff] %v3178_v54  ;;  %5602 = vst [vmem:[#allocation26_spill] sm:$0xff] %v3181_v55  ;;  %v3191_v57 = vld [vmem:[%s2923_s28 + $0x23] sm:$0xff]  ;;  %v3198_v58 = vld [vmem:[%s2923_s28 + $0x3b] sm:$0xff] }
  0x34   : > { %5603 = vst [vmem:[#allocation27_spill] sm:$0xff] %v3188_v56  ;;  %5604 = vst [vmem:[#allocation28_spill] sm:$0xff] %v3191_v57  ;;  %v3201_v59 = vld [vmem:[%s2923_s28 + $0x33] sm:$0xff]  ;;  %v3212_v62 = vld [vmem:[%s2923_s28 + $0x4b] sm:$0xff] }
  0x35   : > { %349 = vrot.lane.b32.xlu1 %v2980_v12, %s2833_s29  ;;  %347 = vrot.lane.b32.xlu0 %v2983_v13, %s2833_s29  ;;  %5605 = vst [vmem:[#allocation29_spill] sm:$0xff] %v3198_v58  ;;  %5606 = vst [vmem:[#allocation30_spill] sm:$0xff] %v3201_v59  ;;  %v3215_v63 = vld [vmem:[%s2923_s28 + $0x43] sm:$0xff] }
  0x36   : > { %5609 = vst [vmem:[#allocation33_spill] sm:$0xff] %v3212_v62  ;;  %5610 = vst [vmem:[#allocation34_spill] sm:$0xff] %v3215_v63 }
  0x39   : > { %353 = vrot.lane.b32.xlu1 %v2990_v14, %s2833_s29  ;;  %351 = vrot.lane.b32.xlu0 %v2993_v15, %s2833_s29 }
  0x3d   : > { %357 = vrot.lane.b32.xlu1 %v3000_v16, %s2833_s29  ;;  %355 = vrot.lane.b32.xlu0 %v3003_v17, %s2833_s29 }
  0x41   : > { %361 = vrot.lane.b32.xlu1 %v3010_v18, %s2833_s29  ;;  %359 = vrot.lane.b32.xlu0 %v3013_v19, %s2833_s29 }
  0x45   : > { %365 = vrot.lane.b32.xlu1 %v3020_v20, %s2833_s29  ;;  %363 = vrot.lane.b32.xlu0 %v3023_v21, %s2833_s29 }
  0x49   : > { %369 = vrot.lane.b32.xlu1 %v3030_v22, %s2833_s29  ;;  %367 = vrot.lane.b32.xlu0 %v3033_v23, %s2833_s29 }
  0x4d   : > { %373 = vrot.lane.b32.xlu1 %v3040_v24, %s2833_s29  ;;  %371 = vrot.lane.b32.xlu0 %v3043_v25, %s2833_s29 }
  0x51   : > { %429 = vrot.lane.b32.xlu1 %v222_v26, %s2834_s30  ;;  %427 = vrot.lane.b32.xlu0 %v221_v27, %s2834_s30  ;;  %v3226_v26 = vld [vmem:[%s2923_s28 + $0x5b] sm:$0xff]  ;;  %v3229_v27 = vld [vmem:[%s2923_s28 + $0x53] sm:$0xff] }
  0x52   : > { %5613 = vst [vmem:[#allocation37_spill] sm:$0xff] %v3226_v26  ;;  %5614 = vst [vmem:[#allocation38_spill] sm:$0xff] %v3229_v27 }
  0x55   : > { %433 = vrot.lane.b32.xlu1 %v3054_v28, %s2834_s30  ;;  %431 = vrot.lane.b32.xlu0 %v3057_v29, %s2834_s30 }
  0x59   : > { %437 = vrot.lane.b32.xlu1 %v3064_v30, %s2834_s30  ;;  %435 = vrot.lane.b32.xlu0 %v3067_v31, %s2834_s30 }
  0x5d   : > { %441 = vrot.lane.b32.xlu1 %v3074_v32, %s2834_s30  ;;  %439 = vrot.lane.b32.xlu0 %v3077_v33, %s2834_s30 }
  0x61   : > { %445 = vrot.lane.b32.xlu1 %v3084_v34, %s2834_s30  ;;  %443 = vrot.lane.b32.xlu0 %v3087_v35, %s2834_s30  ;;  %v3408_v35 = vld [vmem:[%s2923_s28 + $0x68] sm:$0xff]  ;;  %v3411_v34 = vld [vmem:[%s2923_s28 + $0x60] sm:$0xff] }
  0x62   : > { %5643 = vst [vmem:[#allocation67_spill] sm:$0xff] %v3408_v35  ;;  %5644 = vst [vmem:[#allocation68_spill] sm:$0xff] %v3411_v34 }
  0x65   : > { %449 = vrot.lane.b32.xlu1 %v3094_v36, %s2834_s30  ;;  %447 = vrot.lane.b32.xlu0 %v3097_v37, %s2834_s30  ;;  %v3392_v37 = vld [vmem:[%s2923_s28 + $0x58] sm:$0xff] }
  0x66   : > { %5641 = vst [vmem:[#allocation65_spill] sm:$0xff] %v3392_v37 }
  0x69   : > { %453 = vrot.lane.b32.xlu1 %v3104_v38, %s2834_s30  ;;  %451 = vrot.lane.b32.xlu0 %v3107_v39, %s2834_s30 }
  0x6d   : > { %457 = vrot.lane.b32.xlu1 %v3114_v40, %s2834_s30  ;;  %455 = vrot.lane.b32.xlu0 %v3117_v41, %s2834_s30  ;;  %v3378_v41 = vld [vmem:[%s2923_s28 + $0x48] sm:$0xff]  ;;  %v3381_v40 = vld [vmem:[%s2923_s28 + $0x40] sm:$0xff] }
  0x6e   : > { %5637 = vst [vmem:[#allocation61_spill] sm:$0xff] %v3378_v41  ;;  %5638 = vst [vmem:[#allocation62_spill] sm:$0xff] %v3381_v40 }
  0x71   : > { %461 = vrot.lane.b32.xlu1 %v3124_v42, %s2834_s30  ;;  %459 = vrot.lane.b32.xlu0 %v3127_v43, %s2834_s30 }
  0x75   : > { %465 = vrot.lane.b32.xlu1 %v3134_v44, %s2834_s30  ;;  %463 = vrot.lane.b32.xlu0 %v3137_v45, %s2834_s30  ;;  %v3364_v45 = vld [vmem:[%s2923_s28 + $0x38] sm:$0xff]  ;;  %v3367_v44 = vld [vmem:[%s2923_s28 + $0x30] sm:$0xff] }
  0x76   : > { %5633 = vst [vmem:[#allocation57_spill] sm:$0xff] %v3364_v45  ;;  %5634 = vst [vmem:[#allocation58_spill] sm:$0xff] %v3367_v44 }
  0x79   : > { %469 = vrot.lane.b32.xlu1 %v3144_v46, %s2834_s30  ;;  %467 = vrot.lane.b32.xlu0 %v3147_v47, %s2834_s30  ;;  %v3353_v46 = vld [vmem:[%s2923_s28 + $0x20] sm:$0xff] }
  0x7a   : > { %5632 = vst [vmem:[#allocation56_spill] sm:$0xff] %v3353_v46 }
  0x7d   : > { %473 = vrot.lane.b32.xlu1 %v3154_v48, %s2834_s30  ;;  %471 = vrot.lane.b32.xlu0 %v3157_v49, %s2834_s30  ;;  %v171_v49 = vld [vmem:[%s2923_s28 + $0x10] sm:$0xff]  ;;  %v172_v48 = vld [vmem:[%s2923_s28 + $0x18] sm:$0xff] }
  0x81   : > { %477 = vrot.lane.b32.xlu1 %v3164_v50, %s2834_s30  ;;  %475 = vrot.lane.b32.xlu0 %v3167_v51, %s2834_s30  ;;  %v3313_v51 = vld [vmem:[%s2923_s28 + $0xb3] sm:$0xff] }
  0x82   : > { %5628 = vst [vmem:[#allocation52_spill] sm:$0xff] %v3313_v51 }
  0x85   : > { %533 = vrot.lane.b32.xlu1 %v248_v52, %s2835_s4  ;;  %531 = vrot.lane.b32.xlu0 %v247_v53, %s2835_s4 }
  0x89   : > { %537 = vrot.lane.b32.xlu1 %v3178_v54, %s2835_s4  ;;  %535 = vrot.lane.b32.xlu0 %v3181_v55, %s2835_s4  ;;  %v3299_v55 = vld [vmem:[%s2923_s28 + $0xa3] sm:$0xff] }
  0x8a   : > { %5624 = vst [vmem:[#allocation48_spill] sm:$0xff] %v3299_v55 }
  0x8d   : > { %541 = vrot.lane.b32.xlu1 %v3188_v56, %s2835_s4  ;;  %539 = vrot.lane.b32.xlu0 %v3191_v57, %s2835_s4  ;;  %v3285_v57 = vld [vmem:[%s2923_s28 + $0x93] sm:$0xff] }
  0x8e   : > { %5622 = vst [vmem:[#allocation46_spill] sm:$0xff] %v3285_v57 }
  0x8f   : > { %v3203_v60 = vpop.permute.xlu1 %327  ;;  %v3205_v61 = vpop.permute.xlu0 %323 }
  0x90   : > { %5607 = vst [vmem:[#allocation31_spill] sm:$0xff] %v3203_v60  ;;  %5608 = vst [vmem:[#allocation32_spill] sm:$0xff] %v3205_v61  ;;  %v3243_v60 = vld [vmem:[%s2923_s28 + $0x63] sm:$0xff] }
  0x91   : > { %545 = vrot.lane.b32.xlu1 %v3198_v58, %s2835_s4  ;;  %543 = vrot.lane.b32.xlu0 %v3201_v59, %s2835_s4  ;;  %5616 = vst [vmem:[#allocation40_spill] sm:$0xff] %v3243_v60  ;;  %v3271_v59 = vld [vmem:[%s2923_s28 + $0x83] sm:$0xff] }
  0x92   : > { %5620 = vst [vmem:[#allocation44_spill] sm:$0xff] %v3271_v59 }
  0x93   : > { %v3217_v1 = vpop.permute.xlu1 %329  ;;  %v3219_v3 = vpop.permute.xlu0 %325 }
  0x94   : > { %5611 = vst [vmem:[#allocation35_spill] sm:$0xff] %v3217_v1  ;;  %5612 = vst [vmem:[#allocation36_spill] sm:$0xff] %v3219_v3  ;;  %v3240_v1 = vld [vmem:[%s2923_s28 + $0x6b] sm:$0xff] }
  0x95   : > { %549 = vrot.lane.b32.xlu1 %v3212_v62, %s2835_s4  ;;  %547 = vrot.lane.b32.xlu0 %v3215_v63, %s2835_s4  ;;  %5615 = vst [vmem:[#allocation39_spill] sm:$0xff] %v3240_v1  ;;  %v3257_v63 = vld [vmem:[%s2923_s28 + $0x73] sm:$0xff] }
  0x96   : > { %5618 = vst [vmem:[#allocation42_spill] sm:$0xff] %v3257_v63 }
  0x97   : > { %v3231_v52 = vpop.permute.xlu1 %333  ;;  %v3233_v53 = vpop.permute.xlu0 %331 }
  0x99   : > { %553 = vrot.lane.b32.xlu1 %v3226_v26, %s2835_s4  ;;  %551 = vrot.lane.b32.xlu0 %v3229_v27, %s2835_s4  ;;  %v3254_v26 = vld [vmem:[%s2923_s28 + $0x7b] sm:$0xff] }
  0x9a   : > { %5617 = vst [vmem:[#allocation41_spill] sm:$0xff] %v3254_v26 }
  0x9b   : > { %v3245_v3 = vpop.permute.xlu1 %337  ;;  %v3247_v61 = vpop.permute.xlu0 %335 }
  0x9d   : > { %557 = vrot.lane.b32.xlu1 %v3240_v1, %s2835_s4  ;;  %555 = vrot.lane.b32.xlu0 %v3243_v60, %s2835_s4  ;;  %v3268_v1 = vld [vmem:[%s2923_s28 + $0x8b] sm:$0xff] }
  0x9e   : > { %5619 = vst [vmem:[#allocation43_spill] sm:$0xff] %v3268_v1 }
  0x9f   : > { %v3259_v27 = vpop.permute.xlu1 %341  ;;  %v3261_v62 = vpop.permute.xlu0 %339 }
  0xa1   : > { %561 = vrot.lane.b32.xlu1 %v3254_v26, %s2835_s4  ;;  %559 = vrot.lane.b32.xlu0 %v3257_v63, %s2835_s4  ;;  %v3282_v26 = vld [vmem:[%s2923_s28 + $0x9b] sm:$0xff] }
  0xa2   : > { %5621 = vst [vmem:[#allocation45_spill] sm:$0xff] %v3282_v26 }
  0xa3   : > { %v3273_v60 = vpop.permute.xlu1 %345  ;;  %v3275_v58 = vpop.permute.xlu0 %343 }
  0xa5   : > { %565 = vrot.lane.b32.xlu1 %v3268_v1, %s2835_s4  ;;  %563 = vrot.lane.b32.xlu0 %v3271_v59, %s2835_s4  ;;  %v3296_v1 = vld [vmem:[%s2923_s28 + $0xab] sm:$0xff] }
  0xa6   : > { %5623 = vst [vmem:[#allocation47_spill] sm:$0xff] %v3296_v1 }
  0xa7   : > { %v3287_v63 = vpop.permute.xlu1 %349  ;;  %v3289_v56 = vpop.permute.xlu0 %347 }
  0xa9   : > { %569 = vrot.lane.b32.xlu1 %v3282_v26, %s2835_s4  ;;  %567 = vrot.lane.b32.xlu0 %v3285_v57, %s2835_s4  ;;  %v3310_v26 = vld [vmem:[%s2923_s28 + $0xbb] sm:$0xff] }
  0xaa   : > { %5627 = vst [vmem:[#allocation51_spill] sm:$0xff] %v3310_v26 }
  0xab   : > { %v3301_v59 = vpop.permute.xlu1 %353  ;;  %v3303_v54 = vpop.permute.xlu0 %351 }
  0xac   : > { %5625 = vst [vmem:[#allocation49_spill] sm:$0xff] %v3301_v59  ;;  %5626 = vst [vmem:[#allocation50_spill] sm:$0xff] %v3303_v54  ;;  %v3324_v59 = vld [vmem:[%s2923_s28 + $0xcb] sm:$0xff]  ;;  %v3327_v54 = vld [vmem:[%s2923_s28 + $0xc3] sm:$0xff] }
  0xad   : > { %573 = vrot.lane.b32.xlu1 %v3296_v1, %s2835_s4  ;;  %571 = vrot.lane.b32.xlu0 %v3299_v55, %s2835_s4  ;;  %5629 = vst [vmem:[#allocation53_spill] sm:$0xff] %v3324_v59  ;;  %5630 = vst [vmem:[#allocation54_spill] sm:$0xff] %v3327_v54 }
  0xaf   : > { %v3315_v57 = vpop.permute.xlu1 %357  ;;  %v3317_v50 = vpop.permute.xlu0 %355 }
  0xb1   : > { %577 = vrot.lane.b32.xlu1 %v3310_v26, %s2835_s4  ;;  %575 = vrot.lane.b32.xlu0 %v3313_v51, %s2835_s4 }
  0xb3   : > { %v3329_v55 = vpop.permute.xlu1 %361  ;;  %v3331_v1 = vpop.permute.xlu0 %359 }
  0xb5   : > { %581 = vrot.lane.b32.xlu1 %v3324_v59, %s2835_s4  ;;  %579 = vrot.lane.b32.xlu0 %v3327_v54, %s2835_s4  ;;  %v3350_v54 = vld [vmem:[%s2923_s28 + $0x28] sm:$0xff]  ;;  %s2847_s4 = smov 60  }
  0xb6   : > { %5631 = vst [vmem:[#allocation55_spill] sm:$0xff] %v3350_v54 }
  0xb7   : > { %v3337_v26 = vpop.permute.xlu1 %365  ;;  %v3339_v51 = vpop.permute.xlu0 %363 }
  0xb9   : > { %637 = vrot.lane.b32.xlu1 %v172_v48, %s2836_s5  ;;  %635 = vrot.lane.b32.xlu0 %v171_v49, %s2836_s5 }
  0xbb   : > { %v3345_v47 = vpop.permute.xlu1 %369  ;;  %v3347_v59 = vpop.permute.xlu0 %367 }
  0xbd   : > { %641 = vrot.lane.b32.xlu1 %v3350_v54, %s2836_s5  ;;  %639 = vrot.lane.b32.xlu0 %v3353_v46, %s2836_s5 }
  0xbf   : > { %v3359_v48 = vpop.permute.xlu1 %373  ;;  %v3361_v49 = vpop.permute.xlu0 %371 }
  0xc1   : > { %645 = vrot.lane.b32.xlu1 %v3364_v45, %s2836_s5  ;;  %643 = vrot.lane.b32.xlu0 %v3367_v44, %s2836_s5 }
  0xc3   : > { %v3373_v43 = vpop.permute.xlu1 %429  ;;  %v3375_v42 = vpop.permute.xlu0 %427 }
  0xc4   : > { %5635 = vst [vmem:[#allocation59_spill] sm:$0xff] %v3373_v43  ;;  %5636 = vst [vmem:[#allocation60_spill] sm:$0xff] %v3375_v42  ;;  %v3395_v43 = vld [vmem:[%s2923_s28 + $0x50] sm:$0xff]  ;;  %v1599_v42 = vsel %vm1593_vm0, %v3350_v54, %v3231_v52  ;;  %v1601_v52 = vsel %vm1593_vm0, %v3364_v45, %v3245_v3  ;;  %v1602_v3 = vsel %vm1593_vm0, %v3381_v40, %v3261_v62 }
  0xc5   : > { %649 = vrot.lane.b32.xlu1 %v3378_v41, %s2836_s5  ;;  %647 = vrot.lane.b32.xlu0 %v3381_v40, %s2836_s5  ;;  %5642 = vst [vmem:[#allocation66_spill] sm:$0xff] %v3395_v43  ;;  %v1605_v62 = vsel %vm1593_vm0, %v3392_v37, %v3273_v60  ;;  %v1606_v60 = vsel %vm1593_vm0, %v3411_v34, %v3289_v56 }
  0xc7   : > { %v3387_v39 = vpop.permute.xlu1 %433  ;;  %v3389_v38 = vpop.permute.xlu0 %431 }
  0xc8   : > { %5639 = vst [vmem:[#allocation63_spill] sm:$0xff] %v3387_v39  ;;  %5640 = vst [vmem:[#allocation64_spill] sm:$0xff] %v3389_v38  ;;  %v1598_v39 = vsel %vm1593_vm0, %v3353_v46, %v3233_v53 }
  0xc9   : > { %653 = vrot.lane.b32.xlu1 %v3392_v37, %s2836_s5  ;;  %651 = vrot.lane.b32.xlu0 %v3395_v43, %s2836_s5 }
  0xcb   : > { %v438_v38 = vpop.permute.xlu1 %437  ;;  %v436_v36 = vpop.permute.xlu0 %435 }
  0xcc   : > { %v3414_v33 = vsel %vm1620_vm1, %v1599_v42, %v438_v38  ;;  %v3417_v32 = vsel %vm1620_vm1, %v1598_v39, %v436_v36  ;;  %v1600_v38 = vsel %vm1593_vm0, %v3367_v44, %v3247_v61  ;;  %v3430_v36 = vld [vmem:[%s2923_s28 + $0x78] sm:$0xff]  ;;  %v3433_v39 = vld [vmem:[%s2923_s28 + $0x70] sm:$0xff]  ;;  %v1603_v61 = vsel %vm1593_vm0, %v3378_v41, %v3259_v27 }
  0xcd   : > { %657 = vrot.lane.b32.xlu1 %v3408_v35, %s2836_s5  ;;  %655 = vrot.lane.b32.xlu0 %v3411_v34, %s2836_s5  ;;  %5645 = vst [vmem:[#allocation69_spill] sm:$0xff] %v3430_v36  ;;  %5646 = vst [vmem:[#allocation70_spill] sm:$0xff] %v3433_v39  ;;  %v1604_v27 = vsel %vm1593_vm0, %v3395_v43, %v3275_v58  ;;  %v1607_v58 = vsel %vm1593_vm0, %v3408_v35, %v3287_v63  ;;  %v3496_v43 = vld [vmem:[%s2923_s28 + $0xa8] sm:$0xff]  ;;  %v3516_v34 = vld [vmem:[%s2923_s28 + $0xb8] sm:$0xff] }
  0xce   : > { %v3519_v35 = vld [vmem:[%s2923_s28 + $0xb0] sm:$0xff] }
  0xcf   : > { %v442_v42 = vpop.permute.xlu1 %441  ;;  %v440_v53 = vpop.permute.xlu0 %439 }
  0xd0   : > { %v3436_v46 = vsel %vm1620_vm1, %v1601_v52, %v442_v42  ;;  %v3439_v54 = vsel %vm1620_vm1, %v1600_v38, %v440_v53  ;;  %v3452_v38 = vld [vmem:[%s2923_s28 + $0x88] sm:$0xff]  ;;  %v3455_v53 = vld [vmem:[%s2923_s28 + $0x80] sm:$0xff] }
  0xd1   : > { %661 = vrot.lane.b32.xlu1 %v3430_v36, %s2836_s5  ;;  %659 = vrot.lane.b32.xlu0 %v3433_v39, %s2836_s5  ;;  %5647 = vst [vmem:[#allocation71_spill] sm:$0xff] %v3452_v38  ;;  %5648 = vst [vmem:[#allocation72_spill] sm:$0xff] %v3455_v53 }
  0xd3   : > { %v446_v52 = vpop.permute.xlu1 %445  ;;  %v444_v42 = vpop.permute.xlu0 %443 }
  0xd4   : > { %v3458_v36 = vsel %vm1620_vm1, %v1603_v61, %v446_v52  ;;  %v3461_v39 = vsel %vm1620_vm1, %v1602_v3, %v444_v42  ;;  %v3474_v3 = vld [vmem:[%s2923_s28 + $0x98] sm:$0xff]  ;;  %v3477_v42 = vld [vmem:[%s2923_s28 + $0x90] sm:$0xff] }
  0xd5   : > { %665 = vrot.lane.b32.xlu1 %v3452_v38, %s2836_s5  ;;  %663 = vrot.lane.b32.xlu0 %v3455_v53, %s2836_s5  ;;  %5649 = vst [vmem:[#allocation73_spill] sm:$0xff] %v3477_v42 }
  0xd7   : > { %v450_v61 = vpop.permute.xlu1 %449  ;;  %v448_v52 = vpop.permute.xlu0 %447 }
  0xd8   : > { %v3480_v40 = vsel %vm1620_vm1, %v1605_v62, %v450_v61  ;;  %v3483_v41 = vsel %vm1620_vm1, %v1604_v27, %v448_v52  ;;  %v3499_v27 = vld [vmem:[%s2923_s28 + $0xa0] sm:$0xff] }
  0xd9   : > { %669 = vrot.lane.b32.xlu1 %v3474_v3, %s2836_s5  ;;  %667 = vrot.lane.b32.xlu0 %v3477_v42, %s2836_s5 }
  0xdb   : > { %v454_v62 = vpop.permute.xlu1 %453  ;;  %v452_v61 = vpop.permute.xlu0 %451 }
  0xdc   : > { %v3502_v52 = vsel %vm1620_vm1, %v1607_v58, %v454_v62  ;;  %v3505_v37 = vsel %vm1620_vm1, %v1606_v60, %v452_v61  ;;  %v1611_v58 = vsel %vm1593_vm0, %v3452_v38, %v3315_v57  ;;  %v1610_v60 = vsel %vm1593_vm0, %v3455_v53, %v3317_v50  ;;  %v3548_v57 = vld [vmem:[%s2923_s28 + $0xd8] sm:$0xff]  ;;  %v3551_v50 = vld [vmem:[%s2923_s28 + $0xd0] sm:$0xff] }
  0xdd   : > { %673 = vrot.lane.b32.xlu1 %v3496_v43, %s2836_s5  ;;  %671 = vrot.lane.b32.xlu0 %v3499_v27, %s2836_s5  ;;  %v1613_v53 = vsel %vm1593_vm0, %v3474_v3, %v3329_v55  ;;  %v1615_v55 = vsel %vm1593_vm0, %v3496_v43, %v3337_v26  ;;  %v1617_v26 = vsel %vm1593_vm0, %v3516_v34, %v3345_v47 }
  0xdf   : > { %v3511_v56 = vpop.permute.xlu1 %457  ;;  %v3513_v63 = vpop.permute.xlu0 %455 }
  0xe0   : > { %5650 = vst [vmem:[#allocation74_spill] sm:$0xff] %v3511_v56  ;;  %5651 = vst [vmem:[#allocation75_spill] sm:$0xff] %v3513_v63  ;;  %v3532_v56 = vld [vmem:[%s2923_s28 + $0xc8] sm:$0xff]  ;;  %v3535_v63 = vld [vmem:[%s2923_s28 + $0xc0] sm:$0xff] }
  0xe1   : > { %677 = vrot.lane.b32.xlu1 %v3516_v34, %s2836_s5  ;;  %675 = vrot.lane.b32.xlu0 %v3519_v35, %s2836_s5 }
  0xe3   : > { %v462_v62 = vpop.permute.xlu1 %461  ;;  %v460_v61 = vpop.permute.xlu0 %459 }
  0xe4   : > { %v3538_v44 = vsel %vm1620_vm1, %v1611_v58, %v462_v62  ;;  %v3541_v45 = vsel %vm1620_vm1, %v1610_v60, %v460_v61  ;;  %v1612_v58 = vsel %vm1593_vm0, %v3477_v42, %v3331_v1  ;;  %v1614_v1 = vsel %vm1593_vm0, %v3499_v27, %v3339_v51 }
  0xe5   : > { %681 = vrot.lane.b32.xlu1 %v3532_v56, %s2836_s5  ;;  %679 = vrot.lane.b32.xlu0 %v3535_v63, %s2836_s5  ;;  %v1616_v51 = vsel %vm1593_vm0, %v3519_v35, %v3347_v59 }
  0xe7   : > { %v466_v60 = vpop.permute.xlu1 %465  ;;  %v464_v62 = vpop.permute.xlu0 %463 }
  0xe8   : > { %v3560_v61 = vsel %vm1620_vm1, %v1613_v53, %v466_v60  ;;  %v3563_v38 = vsel %vm1620_vm1, %v1612_v58, %v464_v62 }
  0xe9   : > { %685 = vrot.lane.b32.xlu1 %v3548_v57, %s2836_s5  ;;  %683 = vrot.lane.b32.xlu0 %v3551_v50, %s2836_s5  ;;  %s2617_s5 = smul.u32 3328, %s2891_s16 }
  0xeb   : > { %v470_v42 = vpop.permute.xlu1 %469  ;;  %v468_v53 = vpop.permute.xlu0 %467 }
  0xec   : > { %v3576_v60 = vsel %vm1620_vm1, %v1615_v55, %v470_v42  ;;  %v3579_v58 = vsel %vm1620_vm1, %v1614_v1, %v468_v53 }
  0xed   : > { %717 = vrot.lane.b32.xlu1 %v2933_v2, %s2837_s6  ;;  %715 = vrot.lane.b32.xlu0 %v2926_v0, %s2837_s6  ;;  %v1619_v0 = vsel %vm1593_vm0, %v3532_v56, %v3359_v48  ;;  %v1618_v2 = vsel %vm1593_vm0, %v3535_v63, %v3361_v49 }
  0xef   : > { %v474_v42 = vpop.permute.xlu1 %473  ;;  %v472_v62 = vpop.permute.xlu0 %471 }
  0xf0   : > { %v3592_v55 = vsel %vm1620_vm1, %v1617_v26, %v474_v42  ;;  %v3595_v1 = vsel %vm1620_vm1, %v1616_v51, %v472_v62 }
  0xf1   : > { %721 = vrot.lane.b32.xlu1 %v2940_v4, %s2837_s6  ;;  %719 = vrot.lane.b32.xlu0 %v2943_v5, %s2837_s6 }
  0xf3   : > { %v478_v47 = vpop.permute.xlu1 %477  ;;  %v476_v59 = vpop.permute.xlu0 %475 }
  0xf4   : > { %v3608_v53 = vsel %vm1620_vm1, %v1619_v0, %v478_v47  ;;  %v3611_v26 = vsel %vm1620_vm1, %v1618_v2, %v476_v59  ;;  %v5654_v47 = vld [vmem:[#allocation5_spill] sm:$0xff] }
  0xf5   : > { %725 = vrot.lane.b32.xlu1 %v2950_v6, %s2837_s6  ;;  %723 = vrot.lane.b32.xlu0 %v2953_v7, %s2837_s6 }
  0xf7   : > { %v3617_v4 = vpop.permute.xlu1 %533  ;;  %v3619_v5 = vpop.permute.xlu0 %531 }
  0xf9   : > { %729 = vrot.lane.b32.xlu1 %v2960_v8, %s2837_s6  ;;  %727 = vrot.lane.b32.xlu0 %v2963_v9, %s2837_s6 }
  0xfb   : > { %v3625_v48 = vpop.permute.xlu1 %537  ;;  %v3627_v49 = vpop.permute.xlu0 %535 }
  0xfc   : > { %5652 = vst [vmem:[#allocation76_spill] sm:$0xff] %v3625_v48  ;;  %v4353_v48 = vld [vmem:[%s2923_s28 + $0xe9] sm:$0xff] }
  0xfd   : > { %733 = vrot.lane.b32.xlu1 %v2970_v10, %s2837_s6  ;;  %731 = vrot.lane.b32.xlu0 %v2973_v11, %s2837_s6 }
  0xff   : > { %v542_v6 = vpop.permute.xlu1 %541  ;;  %v540_v7 = vpop.permute.xlu0 %539 }
 0x100   : > { %v3635_v51 = vsel %vm1647_vm2, %v3414_v33, %v542_v6  ;;  %v3639_v8 = vsel %vm1647_vm2, %v3417_v32, %v540_v7  ;;  %v5659_v7 = vld [vmem:[#allocation9_spill] sm:$0xff] }
 0x101   : > { %737 = vrot.lane.b32.xlu1 %v2980_v12, %s2837_s6  ;;  %735 = vrot.lane.b32.xlu0 %v2983_v13, %s2837_s6 }
 0x103   : > { %v546_v9 = vpop.permute.xlu1 %545  ;;  %v544_v10 = vpop.permute.xlu0 %543 }
 0x104   : > { %v3647_v11 = vsel %vm1647_vm2, %v3436_v46, %v546_v9  ;;  %v3651_v33 = vsel %vm1647_vm2, %v3439_v54, %v544_v10  ;;  %v5660_v9 = vld [vmem:[#allocation10_spill] sm:$0xff] }
 0x105   : > { %741 = vrot.lane.b32.xlu1 %v2990_v14, %s2837_s6  ;;  %739 = vrot.lane.b32.xlu0 %v2993_v15, %s2837_s6 }
 0x107   : > { %v550_v12 = vpop.permute.xlu1 %549  ;;  %v548_v32 = vpop.permute.xlu0 %547 }
 0x108   : > { %v3659_v13 = vsel %vm1647_vm2, %v3458_v36, %v550_v12  ;;  %v3663_v46 = vsel %vm1647_vm2, %v3461_v39, %v548_v32 }
 0x109   : > { %745 = vrot.lane.b32.xlu1 %v3000_v16, %s2837_s6  ;;  %743 = vrot.lane.b32.xlu0 %v3003_v17, %s2837_s6 }
 0x10b   : > { %v554_v14 = vpop.permute.xlu1 %553  ;;  %v552_v54 = vpop.permute.xlu0 %551 }
 0x10c   : > { %v3671_v15 = vsel %vm1647_vm2, %v3480_v40, %v554_v14  ;;  %v3675_v36 = vsel %vm1647_vm2, %v3483_v41, %v552_v54  ;;  %v5661_v54 = vld [vmem:[#allocation11_spill] sm:$0xff] }
 0x10d   : > { %749 = vrot.lane.b32.xlu1 %v3010_v18, %s2837_s6  ;;  %747 = vrot.lane.b32.xlu0 %v3013_v19, %s2837_s6 }
 0x10f   : > { %v558_v16 = vpop.permute.xlu1 %557  ;;  %v556_v39 = vpop.permute.xlu0 %555 }
 0x110   : > { %v3683_v17 = vsel %vm1647_vm2, %v3502_v52, %v558_v16  ;;  %v3687_v40 = vsel %vm1647_vm2, %v3505_v37, %v556_v39  ;;  %v5662_v16 = vld [vmem:[#allocation12_spill] sm:$0xff] }
 0x111   : > { %753 = vrot.lane.b32.xlu1 %v3020_v20, %s2837_s6  ;;  %751 = vrot.lane.b32.xlu0 %v3023_v21, %s2837_s6  ;;  %v3714_v21 = vld [vmem:[%s2923_s28 + $0xd9] sm:$0xff] }
 0x113   : > { %v3693_v18 = vpop.permute.xlu1 %561  ;;  %v3695_v19 = vpop.permute.xlu0 %559 }
 0x114   : > { %5653 = vst [vmem:[#allocation77_spill] sm:$0xff] %v3693_v18 }
 0x115   : > { %757 = vrot.lane.b32.xlu1 %v3030_v22, %s2837_s6  ;;  %755 = vrot.lane.b32.xlu0 %v3033_v23, %s2837_s6  ;;  %v3717_v22 = vld [vmem:[%s2923_s28 + $0xd1] sm:$0xff] }
 0x117   : > { %v566_v41 = vpop.permute.xlu1 %565  ;;  %v564_v52 = vpop.permute.xlu0 %563 }
 0x118   : > { %v3703_v37 = vsel %vm1647_vm2, %v3538_v44, %v566_v41  ;;  %v3707_v20 = vsel %vm1647_vm2, %v3541_v45, %v564_v52 }
 0x119   : > { %761 = vrot.lane.b32.xlu1 %v3040_v24, %s2837_s6  ;;  %759 = vrot.lane.b32.xlu0 %v3043_v25, %s2837_s6 }
 0x11b   : > { %v570_v23 = vpop.permute.xlu1 %569  ;;  %v568_v42 = vpop.permute.xlu0 %567 }
 0x11c   : > { %v3721_v44 = vsel %vm1647_vm2, %v3560_v61, %v570_v23  ;;  %v3725_v45 = vsel %vm1647_vm2, %v3563_v38, %v568_v42  ;;  %v5663_v23 = vld [vmem:[#allocation13_spill] sm:$0xff] }
 0x11d   : > { %765 = vrot.lane.b32.xlu1 %v3714_v21, %s2837_s6  ;;  %763 = vrot.lane.b32.xlu0 %v3717_v22, %s2837_s6 }
 0x11f   : > { %v574_v24 = vpop.permute.xlu1 %573  ;;  %v572_v25 = vpop.permute.xlu0 %571 }
 0x120   : > { %v3733_v62 = vsel %vm1647_vm2, %v3576_v60, %v574_v24  ;;  %v3737_v61 = vsel %vm1647_vm2, %v3579_v58, %v572_v25 }
 0x121   : > { %797 = vrot.lane.b32.xlu1 %v3054_v28, %s2838_s7  ;;  %795 = vrot.lane.b32.xlu0 %v3057_v29, %s2838_s7 }
 0x123   : > { %v578_v38 = vpop.permute.xlu1 %577  ;;  %v576_v0 = vpop.permute.xlu0 %575 }
 0x124   : > { %v3745_v2 = vsel %vm1647_vm2, %v3592_v55, %v578_v38  ;;  %v3749_v60 = vsel %vm1647_vm2, %v3595_v1, %v576_v0  ;;  %v5655_v1 = vld [vmem:[#allocation6_spill] sm:$0xff]  ;;  %v5665_v38 = vld [vmem:[#allocation15_spill] sm:$0xff] }
 0x125   : > { %801 = vrot.lane.b32.xlu1 %v3064_v30, %s2838_s7  ;;  %799 = vrot.lane.b32.xlu0 %v3067_v31, %s2838_s7  ;;  %v5656_v31 = vld [vmem:[#allocation7_spill] sm:$0xff] }
 0x127   : > { %v582_v28 = vpop.permute.xlu1 %581  ;;  %v580_v58 = vpop.permute.xlu0 %579 }
 0x128   : > { %v3757_v29 = vsel %vm1647_vm2, %v3608_v53, %v582_v28  ;;  %v3761_v55 = vsel %vm1647_vm2, %v3611_v26, %v580_v58  ;;  %v5657_v53 = vld [vmem:[#allocation8_spill] sm:$0xff] }
 0x129   : > { %805 = vrot.lane.b32.xlu1 %v5654_v47, %s2838_s7  ;;  %803 = vrot.lane.b32.xlu0 %v5655_v1, %s2838_s7  ;;  %v5667_v47 = vld [vmem:[#allocation17_spill] sm:$0xff] }
 0x12b   : > { %v3767_v30 = vpop.permute.xlu1 %637  ;;  %v3769_v59 = vpop.permute.xlu0 %635 }
 0x12d   : > { %809 = vrot.lane.b32.xlu1 %v5656_v31, %s2838_s7  ;;  %807 = vrot.lane.b32.xlu0 %v5657_v53, %s2838_s7 }
 0x12f   : > { %v3775_v6 = vpop.permute.xlu1 %641  ;;  %v3777_v26 = vpop.permute.xlu0 %639 }
 0x130   : > { %5658 = vst [vmem:[#allocation5_spill] sm:$0xff] %v3775_v6 }
 0x131   : > { %813 = vrot.lane.b32.xlu1 %v5659_v7, %s2838_s7  ;;  %811 = vrot.lane.b32.xlu0 %v5660_v9, %s2838_s7  ;;  %v5670_v7 = vld [vmem:[#allocation20_spill] sm:$0xff] }
 0x133   : > { %v646_v10 = vpop.permute.xlu1 %645  ;;  %v644_v12 = vpop.permute.xlu0 %643 }
 0x134   : > { %v3785_v32 = vsel %vm1674_vm3, %v3635_v51, %v646_v10  ;;  %v3789_v14 = vsel %vm1674_vm3, %v3639_v8, %v644_v12  ;;  %v5664_v8 = vld [vmem:[#allocation14_spill] sm:$0xff]  ;;  %v5672_v12 = vld [vmem:[#allocation21_spill] sm:$0xff] }
 0x135   : > { %817 = vrot.lane.b32.xlu1 %v5661_v54, %s2838_s7  ;;  %815 = vrot.lane.b32.xlu0 %v5662_v16, %s2838_s7  ;;  %5729 = vst [vmem:[#allocation21_spill] sm:$0xff] %v4353_v48 }
 0x137   : > { %v650_v39 = vpop.permute.xlu1 %649  ;;  %v648_v41 = vpop.permute.xlu0 %647 }
 0x138   : > { %v3797_v52 = vsel %vm1674_vm3, %v3647_v11, %v650_v39  ;;  %v3801_v51 = vsel %vm1674_vm3, %v3651_v33, %v648_v41  ;;  %v5666_v33 = vld [vmem:[#allocation16_spill] sm:$0xff]  ;;  %v5674_v41 = vld [vmem:[#allocation23_spill] sm:$0xff] }
 0x139   : > { %821 = vrot.lane.b32.xlu1 %v5663_v23, %s2838_s7  ;;  %819 = vrot.lane.b32.xlu0 %v5664_v8, %s2838_s7  ;;  %v5675_v23 = vld [vmem:[#allocation24_spill] sm:$0xff]  ;;  %v278_v8 = vld [vmem:[%s2923_s28 + $0xda] sm:$0xff] }
 0x13b   : > { %v654_v42 = vpop.permute.xlu1 %653  ;;  %v652_v24 = vpop.permute.xlu0 %651 }
 0x13c   : > { %v3809_v25 = vsel %vm1674_vm3, %v3659_v13, %v654_v42  ;;  %v3813_v11 = vsel %vm1674_vm3, %v3663_v46, %v652_v24  ;;  %v5668_v46 = vld [vmem:[#allocation18_spill] sm:$0xff] }
 0x13d   : > { %825 = vrot.lane.b32.xlu1 %v5665_v38, %s2838_s7  ;;  %823 = vrot.lane.b32.xlu0 %v5666_v33, %s2838_s7  ;;  %v277_v42 = vld [vmem:[%s2923_s28 + $0xd2] sm:$0xff] }
 0x13f   : > { %v658_v0 = vpop.permute.xlu1 %657  ;;  %v656_v28 = vpop.permute.xlu0 %655 }
 0x140   : > { %v3821_v58 = vsel %vm1674_vm3, %v3671_v15, %v658_v0  ;;  %v3825_v13 = vsel %vm1674_vm3, %v3675_v36, %v656_v28  ;;  %v5669_v36 = vld [vmem:[#allocation19_spill] sm:$0xff] }
 0x141   : > { %829 = vrot.lane.b32.xlu1 %v5667_v47, %s2838_s7  ;;  %827 = vrot.lane.b32.xlu0 %v5668_v46, %s2838_s7 }
 0x143   : > { %v662_v1 = vpop.permute.xlu1 %661  ;;  %v660_v31 = vpop.permute.xlu0 %659 }
 0x144   : > { %v3833_v53 = vsel %vm1674_vm3, %v3683_v17, %v662_v1  ;;  %v3837_v15 = vsel %vm1674_vm3, %v3687_v40, %v660_v31  ;;  %v5673_v17 = vld [vmem:[#allocation22_spill] sm:$0xff] }
 0x145   : > { %833 = vrot.lane.b32.xlu1 %v5669_v36, %s2838_s7  ;;  %831 = vrot.lane.b32.xlu0 %v5670_v7, %s2838_s7  ;;  %v5679_v36 = vld [vmem:[#allocation28_spill] sm:$0xff] }
 0x147   : > { %v3843_v9 = vpop.permute.xlu1 %665  ;;  %v3845_v10 = vpop.permute.xlu0 %663 }
 0x148   : > { %5671 = vst [vmem:[#allocation6_spill] sm:$0xff] %v3843_v9 }
 0x149   : > { %837 = vrot.lane.b32.xlu1 %v5672_v12, %s2838_s7  ;;  %835 = vrot.lane.b32.xlu0 %v5673_v17, %s2838_s7 }
 0x14b   : > { %v670_v54 = vpop.permute.xlu1 %669  ;;  %v668_v16 = vpop.permute.xlu0 %667 }
 0x14c   : > { %v3853_v40 = vsel %vm1674_vm3, %v3703_v37, %v670_v54  ;;  %v3857_v39 = vsel %vm1674_vm3, %v3707_v20, %v668_v16  ;;  %v5680_v54 = vld [vmem:[#allocation29_spill] sm:$0xff] }
 0x14d   : > { %841 = vrot.lane.b32.xlu1 %v5674_v41, %s2838_s7  ;;  %839 = vrot.lane.b32.xlu0 %v5675_v23, %s2838_s7  ;;  %v5682_v23 = vld [vmem:[#allocation33_spill] sm:$0xff] }
 0x14f   : > { %v674_v24 = vpop.permute.xlu1 %673  ;;  %v672_v38 = vpop.permute.xlu0 %671 }
 0x150   : > { %v3867_v33 = vsel %vm1674_vm3, %v3721_v44, %v674_v24  ;;  %v3871_v37 = vsel %vm1674_vm3, %v3725_v45, %v672_v38  ;;  %v5676_v44 = vld [vmem:[#allocation25_spill] sm:$0xff]  ;;  %v5677_v45 = vld [vmem:[#allocation26_spill] sm:$0xff] }
 0x151   : > { %845 = vrot.lane.b32.xlu1 %v278_v8, %s2838_s7  ;;  %843 = vrot.lane.b32.xlu0 %v277_v42, %s2838_s7  ;;  %v5685_v42 = vld [vmem:[#allocation37_spill] sm:$0xff]  ;;  %v5686_v24 = vld [vmem:[#allocation38_spill] sm:$0xff] }
 0x153   : > { %v678_v20 = vpop.permute.xlu1 %677  ;;  %v676_v0 = vpop.permute.xlu0 %675 }
 0x154   : > { %v3877_v28 = vsel %vm1674_vm3, %v3733_v62, %v678_v20  ;;  %v3881_v47 = vsel %vm1674_vm3, %v3737_v61, %v676_v0  ;;  %v5678_v61 = vld [vmem:[#allocation27_spill] sm:$0xff] }
 0x155   : > { %877 = vrot.lane.b32.xlu1 %v5676_v44, %s2839_s8  ;;  %875 = vrot.lane.b32.xlu0 %v5677_v45, %s2839_s8  ;;  %v5687_v45 = vld [vmem:[#allocation39_spill] sm:$0xff] }
 0x157   : > { %v682_v46 = vpop.permute.xlu1 %681  ;;  %v680_v1 = vpop.permute.xlu0 %679 }
 0x158   : > { %v3889_v31 = vsel %vm1674_vm3, %v3745_v2, %v682_v46  ;;  %v3893_v62 = vsel %vm1674_vm3, %v3749_v60, %v680_v1  ;;  %v5681_v60 = vld [vmem:[#allocation30_spill] sm:$0xff]  ;;  %v5688_v46 = vld [vmem:[#allocation40_spill] sm:$0xff] }
 0x159   : > { %881 = vrot.lane.b32.xlu1 %v5678_v61, %s2839_s8  ;;  %879 = vrot.lane.b32.xlu0 %v5679_v36, %s2839_s8 }
 0x15b   : > { %v686_v7 = vpop.permute.xlu1 %685  ;;  %v684_v12 = vpop.permute.xlu0 %683 }
 0x15c   : > { %v3901_v17 = vsel %vm1674_vm3, %v3757_v29, %v686_v7  ;;  %v3905_v2 = vsel %vm1674_vm3, %v3761_v55, %v684_v12  ;;  %v5683_v29 = vld [vmem:[#allocation34_spill] sm:$0xff]  ;;  %v5689_v7 = vld [vmem:[#allocation41_spill] sm:$0xff] }
 0x15d   : > { %885 = vrot.lane.b32.xlu1 %v5680_v54, %s2839_s8  ;;  %883 = vrot.lane.b32.xlu0 %v5681_v60, %s2839_s8 }
 0x15f   : > { %v3911_v16 = vpop.permute.xlu1 %717  ;;  %v3913_v41 = vpop.permute.xlu0 %715 }
 0x161   : > { %889 = vrot.lane.b32.xlu1 %v5682_v23, %s2839_s8  ;;  %887 = vrot.lane.b32.xlu0 %v5683_v29, %s2839_s8  ;;  %v5691_v23 = vld [vmem:[#allocation43_spill] sm:$0xff] }
 0x163   : > { %v3919_v8 = vpop.permute.xlu1 %721  ;;  %v3921_v55 = vpop.permute.xlu0 %719 }
 0x164   : > { %5684 = vst [vmem:[#allocation7_spill] sm:$0xff] %v3919_v8 }
 0x165   : > { %893 = vrot.lane.b32.xlu1 %v5685_v42, %s2839_s8  ;;  %891 = vrot.lane.b32.xlu0 %v5686_v24, %s2839_s8 }
 0x167   : > { %v726_v38 = vpop.permute.xlu1 %725  ;;  %v724_v20 = vpop.permute.xlu0 %723 }
 0x168   : > { %v3929_v0 = vsel %vm1701_vm4, %v3785_v32, %v726_v38  ;;  %v3933_v44 = vsel %vm1701_vm4, %v3789_v14, %v724_v20  ;;  %v5690_v14 = vld [vmem:[#allocation42_spill] sm:$0xff]  ;;  %v5693_v38 = vld [vmem:[#allocation45_spill] sm:$0xff] }
 0x169   : > { %897 = vrot.lane.b32.xlu1 %v5687_v45, %s2839_s8  ;;  %895 = vrot.lane.b32.xlu0 %v5688_v46, %s2839_s8 }
 0x16b   : > { %v730_v1 = vpop.permute.xlu1 %729  ;;  %v728_v61 = vpop.permute.xlu0 %727 }
 0x16c   : > { %v3941_v36 = vsel %vm1701_vm4, %v3797_v52, %v730_v1  ;;  %v3945_v32 = vsel %vm1701_vm4, %v3801_v51, %v728_v61  ;;  %v5692_v51 = vld [vmem:[#allocation44_spill] sm:$0xff] }
 0x16d   : > { %901 = vrot.lane.b32.xlu1 %v5689_v7, %s2839_s8  ;;  %899 = vrot.lane.b32.xlu0 %v5690_v14, %s2839_s8  ;;  %v5696_v1 = vld [vmem:[#allocation48_spill] sm:$0xff]  ;;  %v5698_v14 = vld [vmem:[#allocation51_spill] sm:$0xff] }
 0x16f   : > { %v734_v12 = vpop.permute.xlu1 %733  ;;  %v732_v54 = vpop.permute.xlu0 %731 }
 0x170   : > { %v3953_v60 = vsel %vm1701_vm4, %v3809_v25, %v734_v12  ;;  %v3957_v52 = vsel %vm1701_vm4, %v3813_v11, %v732_v54  ;;  %v5694_v11 = vld [vmem:[#allocation46_spill] sm:$0xff] }
 0x171   : > { %905 = vrot.lane.b32.xlu1 %v5691_v23, %s2839_s8  ;;  %903 = vrot.lane.b32.xlu0 %v5692_v51, %s2839_s8  ;;  %v5700_v51 = vld [vmem:[#allocation53_spill] sm:$0xff] }
 0x173   : > { %v738_v29 = vpop.permute.xlu1 %737  ;;  %v736_v42 = vpop.permute.xlu0 %735 }
 0x174   : > { %v3965_v24 = vsel %vm1701_vm4, %v3821_v58, %v738_v29  ;;  %v3969_v25 = vsel %vm1701_vm4, %v3825_v13, %v736_v42  ;;  %v5695_v13 = vld [vmem:[#allocation47_spill] sm:$0xff]  ;;  %v5701_v29 = vld [vmem:[#allocation54_spill] sm:$0xff] }
 0x175   : > { %909 = vrot.lane.b32.xlu1 %v5693_v38, %s2839_s8  ;;  %907 = vrot.lane.b32.xlu0 %v5694_v11, %s2839_s8  ;;  %v280_v42 = vld [vmem:[%s2923_s28 + $0xdb] sm:$0xff]  ;;  %v279_v38 = vld [vmem:[%s2923_s28 + $0xd3] sm:$0xff] }
 0x177   : > { %v742_v20 = vpop.permute.xlu1 %741  ;;  %v740_v45 = vpop.permute.xlu0 %739 }
 0x178   : > { %v3977_v46 = vsel %vm1701_vm4, %v3833_v53, %v742_v20  ;;  %v3981_v58 = vsel %vm1701_vm4, %v3837_v15, %v740_v45  ;;  %v5699_v53 = vld [vmem:[#allocation52_spill] sm:$0xff] }
 0x179   : > { %913 = vrot.lane.b32.xlu1 %v5695_v13, %s2839_s8  ;;  %911 = vrot.lane.b32.xlu0 %v5696_v1, %s2839_s8 }
 0x17b   : > { %v3987_v61 = vpop.permute.xlu1 %745  ;;  %v3989_v7 = vpop.permute.xlu0 %743 }
 0x17c   : > { %5697 = vst [vmem:[#allocation8_spill] sm:$0xff] %v3987_v61 }
 0x17d   : > { %917 = vrot.lane.b32.xlu1 %v5698_v14, %s2839_s8  ;;  %915 = vrot.lane.b32.xlu0 %v5699_v53, %s2839_s8 }
 0x17f   : > { %v750_v12 = vpop.permute.xlu1 %749  ;;  %v748_v54 = vpop.permute.xlu0 %747 }
 0x180   : > { %v3997_v15 = vsel %vm1701_vm4, %v3853_v40, %v750_v12  ;;  %v4001_v23 = vsel %vm1701_vm4, %v3857_v39, %v748_v54 }
 0x181   : > { %921 = vrot.lane.b32.xlu1 %v5700_v51, %s2839_s8  ;;  %919 = vrot.lane.b32.xlu0 %v5701_v29, %s2839_s8  ;;  %v5705_v51 = vld [vmem:[#allocation58_spill] sm:$0xff] }
 0x183   : > { %v754_v11 = vpop.permute.xlu1 %753  ;;  %v752_v20 = vpop.permute.xlu0 %751 }
 0x184   : > { %v4011_v45 = vsel %vm1701_vm4, %v3867_v33, %v754_v11  ;;  %v4015_v40 = vsel %vm1701_vm4, %v3871_v37, %v752_v20  ;;  %v5702_v33 = vld [vmem:[#allocation55_spill] sm:$0xff]  ;;  %v5703_v37 = vld [vmem:[#allocation56_spill] sm:$0xff]  ;;  %v5706_v11 = vld [vmem:[#allocation61_spill] sm:$0xff] }
 0x185   : > { %925 = vrot.lane.b32.xlu1 %v280_v42, %s2839_s8  ;;  %923 = vrot.lane.b32.xlu0 %v279_v38, %s2839_s8  ;;  %s5451_s8 = scalar_lea.hbm %s5506_s3, %s2617_s5 }
 0x187   : > { %v758_v39 = vpop.permute.xlu1 %757  ;;  %v756_v13 = vpop.permute.xlu0 %755 }
 0x188   : > { %v4021_v1 = vsel %vm1701_vm4, %v3877_v28, %v758_v39  ;;  %v4025_v14 = vsel %vm1701_vm4, %v3881_v47, %v756_v13  ;;  %v5704_v47 = vld [vmem:[#allocation57_spill] sm:$0xff] }
 0x189   : > { %957 = vrot.lane.b32.xlu1 %v5702_v33, %s2840_s9  ;;  %955 = vrot.lane.b32.xlu0 %v5703_v37, %s2840_s9  ;;  %v5708_v13 = vld [vmem:[#allocation65_spill] sm:$0xff]  ;;  %v5711_v37 = vld [vmem:[#allocation67_spill] sm:$0xff] }
 0x18b   : > { %v762_v53 = vpop.permute.xlu1 %761  ;;  %v760_v12 = vpop.permute.xlu0 %759 }
 0x18c   : > { %v4033_v54 = vsel %vm1701_vm4, %v3889_v31, %v762_v53  ;;  %v4037_v28 = vsel %vm1701_vm4, %v3893_v62, %v760_v12  ;;  %v5707_v62 = vld [vmem:[#allocation62_spill] sm:$0xff]  ;;  %v5712_v53 = vld [vmem:[#allocation68_spill] sm:$0xff] }
 0x18d   : > { %961 = vrot.lane.b32.xlu1 %v5704_v47, %s2840_s9  ;;  %959 = vrot.lane.b32.xlu0 %v5705_v51, %s2840_s9 }
 0x18f   : > { %v766_v29 = vpop.permute.xlu1 %765  ;;  %v764_v42 = vpop.permute.xlu0 %763 }
 0x190   : > { %v4045_v38 = vsel %vm1701_vm4, %v3901_v17, %v766_v29  ;;  %v4049_v31 = vsel %vm1701_vm4, %v3905_v2, %v764_v42  ;;  %v5709_v17 = vld [vmem:[#allocation66_spill] sm:$0xff] }
 0x191   : > { %965 = vrot.lane.b32.xlu1 %v5706_v11, %s2840_s9  ;;  %963 = vrot.lane.b32.xlu0 %v5707_v62, %s2840_s9  ;;  %v5713_v62 = vld [vmem:[#allocation69_spill] sm:$0xff] }
 0x193   : > { %v4055_v20 = vpop.permute.xlu1 %797  ;;  %v4057_v39 = vpop.permute.xlu0 %795 }
 0x195   : > { %969 = vrot.lane.b32.xlu1 %v5708_v13, %s2840_s9  ;;  %967 = vrot.lane.b32.xlu0 %v5709_v17, %s2840_s9  ;;  %v5714_v13 = vld [vmem:[#allocation70_spill] sm:$0xff] }
 0x197   : > { %v4063_v33 = vpop.permute.xlu1 %801  ;;  %v4065_v2 = vpop.permute.xlu0 %799 }
 0x198   : > { %5710 = vst [vmem:[#allocation9_spill] sm:$0xff] %v4063_v33  ;;  %v4256_v33 = vld [vmem:[%s2923_s28 + $0x71] sm:$0xff] }
 0x199   : > { %973 = vrot.lane.b32.xlu1 %v5711_v37, %s2840_s9  ;;  %971 = vrot.lane.b32.xlu0 %v5712_v53, %s2840_s9  ;;  %5724 = vst [vmem:[#allocation16_spill] sm:$0xff] %v4256_v33 }
 0x19b   : > { %v806_v12 = vpop.permute.xlu1 %805  ;;  %v804_v29 = vpop.permute.xlu0 %803 }
 0x19c   : > { %v4073_v42 = vsel %vm1728_vm5, %v3929_v0, %v806_v12  ;;  %v4077_v11 = vsel %vm1728_vm5, %v3933_v44, %v804_v29  ;;  %v5715_v12 = vld [vmem:[#allocation71_spill] sm:$0xff]  ;;  %v5716_v44 = vld [vmem:[#allocation72_spill] sm:$0xff] }
 0x19d   : > { %977 = vrot.lane.b32.xlu1 %v5713_v62, %s2840_s9  ;;  %975 = vrot.lane.b32.xlu0 %v5714_v13, %s2840_s9 }
 0x19f   : > { %v810_v17 = vpop.permute.xlu1 %809  ;;  %v808_v37 = vpop.permute.xlu0 %807 }
 0x1a0   : > { %v4085_v53 = vsel %vm1728_vm5, %v3941_v36, %v810_v17  ;;  %v4089_v0 = vsel %vm1728_vm5, %v3945_v32, %v808_v37  ;;  %v5717_v32 = vld [vmem:[#allocation73_spill] sm:$0xff] }
 0x1a1   : > { %981 = vrot.lane.b32.xlu1 %v5715_v12, %s2840_s9  ;;  %979 = vrot.lane.b32.xlu0 %v5716_v44, %s2840_s9 }
 0x1a3   : > { %v814_v29 = vpop.permute.xlu1 %813  ;;  %v812_v62 = vpop.permute.xlu0 %811 }
 0x1a4   : > { %v4097_v13 = vsel %vm1728_vm5, %v3953_v60, %v814_v29  ;;  %v4101_v36 = vsel %vm1728_vm5, %v3957_v52, %v812_v62 }
 0x1a5   : > { %985 = vrot.lane.b32.xlu1 %v3474_v3, %s2840_s9  ;;  %983 = vrot.lane.b32.xlu0 %v5717_v32, %s2840_s9 }
 0x1a7   : > { %v818_v17 = vpop.permute.xlu1 %817  ;;  %v816_v37 = vpop.permute.xlu0 %815 }
 0x1a8   : > { %v4109_v12 = vsel %vm1728_vm5, %v3965_v24, %v818_v17  ;;  %v4113_v60 = vsel %vm1728_vm5, %v3969_v25, %v816_v37  ;;  %v2673_v17 = vld [vmem:[%s2923_s28 + $0x29] sm:$0xff] }
 0x1a9   : > { %989 = vrot.lane.b32.xlu1 %v3496_v43, %s2840_s9  ;;  %987 = vrot.lane.b32.xlu0 %v3499_v27, %s2840_s9 }
 0x1ab   : > { %v822_v3 = vpop.permute.xlu1 %821  ;;  %v820_v52 = vpop.permute.xlu0 %819 }
 0x1ac   : > { %v4121_v44 = vsel %vm1728_vm5, %v3977_v46, %v822_v3  ;;  %v4125_v24 = vsel %vm1728_vm5, %v3981_v58, %v820_v52 }
 0x1ad   : > { %993 = vrot.lane.b32.xlu1 %v3516_v34, %s2840_s9  ;;  %991 = vrot.lane.b32.xlu0 %v3519_v35, %s2840_s9  ;;  %v282_v35 = vld [vmem:[%s2923_s28 + $0xe8] sm:$0xff] }
 0x1af   : > { %v4131_v43 = vpop.permute.xlu1 %825  ;;  %v4133_v25 = vpop.permute.xlu0 %823 }
 0x1b0   : > { %5718 = vst [vmem:[#allocation10_spill] sm:$0xff] %v4131_v43  ;;  %5719 = vst [vmem:[#allocation11_spill] sm:$0xff] %v4133_v25  ;;  %v4251_v43 = vld [vmem:[%s2923_s28 + $0x79] sm:$0xff] }
 0x1b1   : > { %997 = vrot.lane.b32.xlu1 %v3532_v56, %s2840_s9  ;;  %995 = vrot.lane.b32.xlu0 %v3535_v63, %s2840_s9  ;;  %v4153_v56 = vld [vmem:[%s2923_s28 + $0xe0] sm:$0xff]  ;;  %5723 = vst [vmem:[#allocation15_spill] sm:$0xff] %v4251_v43 }
 0x1b2   : > { %5720 = vst [vmem:[#allocation12_spill] sm:$0xff] %v4153_v56 }
 0x1b3   : > { %v830_v46 = vpop.permute.xlu1 %829  ;;  %v828_v29 = vpop.permute.xlu0 %827 }
 0x1b4   : > { %v4141_v58 = vsel %vm1728_vm5, %v3997_v15, %v830_v46  ;;  %v4145_v34 = vsel %vm1728_vm5, %v4001_v23, %v828_v29  ;;  %v4192_v46 = vld [vmem:[%s2923_s28 + $0x31] sm:$0xff] }
 0x1b5   : > { %1001 = vrot.lane.b32.xlu1 %v3548_v57, %s2840_s9  ;;  %999 = vrot.lane.b32.xlu0 %v3551_v50, %s2840_s9 }
 0x1b7   : > { %v834_v63 = vpop.permute.xlu1 %833  ;;  %v832_v62 = vpop.permute.xlu0 %831 }
 0x1b8   : > { %v4157_v15 = vsel %vm1728_vm5, %v4011_v45, %v834_v63  ;;  %v4161_v23 = vsel %vm1728_vm5, %v4015_v40, %v832_v62  ;;  %v2674_v40 = vld [vmem:[%s2923_s28 + $0x21] sm:$0xff]  ;;  %v4205_v63 = vld [vmem:[%s2923_s28 + $0x49] sm:$0xff] }
 0x1b9   : > { %1005 = vrot.lane.b32.xlu1 %v282_v35, %s2840_s9  ;;  %1003 = vrot.lane.b32.xlu0 %v4153_v56, %s2840_s9  ;;  %v4210_v62 = vld [vmem:[%s2923_s28 + $0x41] sm:$0xff] }
 0x1bb   : > { %v838_v57 = vpop.permute.xlu1 %837  ;;  %v836_v50 = vpop.permute.xlu0 %835 }
 0x1bc   : > { %v4168_v32 = vsel %vm1728_vm5, %v4021_v1, %v838_v57  ;;  %v4172_v45 = vsel %vm1728_vm5, %v4025_v14, %v836_v50  ;;  %v4187_v14 = vld [vmem:[%s2923_s28 + $0x39] sm:$0xff] }
 0x1bd   : > { %1037 = vrot.lane.b32.xlu1 %v2673_v17, %s2841_s10  ;;  %1035 = vrot.lane.b32.xlu0 %v2674_v40, %s2841_s10 }
 0x1bf   : > { %v842_v37 = vpop.permute.xlu1 %841  ;;  %v840_v3 = vpop.permute.xlu0 %839 }
 0x1c0   : > { %v4180_v52 = vsel %vm1728_vm5, %v4033_v54, %v842_v37  ;;  %v4184_v1 = vsel %vm1728_vm5, %v4037_v28, %v840_v3  ;;  %v4233_v37 = vld [vmem:[%s2923_s28 + $0x69] sm:$0xff]  ;;  %v4238_v3 = vld [vmem:[%s2923_s28 + $0x61] sm:$0xff] }
 0x1c1   : > { %1041 = vrot.lane.b32.xlu1 %v4187_v14, %s2841_s10  ;;  %1039 = vrot.lane.b32.xlu0 %v4192_v46, %s2841_s10 }
 0x1c3   : > { %v846_v29 = vpop.permute.xlu1 %845  ;;  %v844_v54 = vpop.permute.xlu0 %843 }
 0x1c4   : > { %v4198_v35 = vsel %vm1728_vm5, %v4045_v38, %v846_v29  ;;  %v4202_v28 = vsel %vm1728_vm5, %v4049_v31, %v844_v54  ;;  %v4219_v38 = vld [vmem:[%s2923_s28 + $0x59] sm:$0xff]  ;;  %v4224_v31 = vld [vmem:[%s2923_s28 + $0x51] sm:$0xff] }
 0x1c5   : > { %1045 = vrot.lane.b32.xlu1 %v4205_v63, %s2841_s10  ;;  %1043 = vrot.lane.b32.xlu0 %v4210_v62, %s2841_s10 }
 0x1c7   : > { %v4214_v57 = vpop.permute.xlu1 %877  ;;  %v4216_v50 = vpop.permute.xlu0 %875 }
 0x1c9   : > { %1049 = vrot.lane.b32.xlu1 %v4219_v38, %s2841_s10  ;;  %1047 = vrot.lane.b32.xlu0 %v4224_v31, %s2841_s10 }
 0x1cb   : > { %v4228_v17 = vpop.permute.xlu1 %881  ;;  %v4230_v40 = vpop.permute.xlu0 %879 }
 0x1cc   : > { %5721 = vst [vmem:[#allocation13_spill] sm:$0xff] %v4228_v17  ;;  %5722 = vst [vmem:[#allocation14_spill] sm:$0xff] %v4230_v40 }
 0x1cd   : > { %1053 = vrot.lane.b32.xlu1 %v4233_v37, %s2841_s10  ;;  %1051 = vrot.lane.b32.xlu0 %v4238_v3, %s2841_s10 }
 0x1cf   : > { %v886_v29 = vpop.permute.xlu1 %885  ;;  %v884_v54 = vpop.permute.xlu0 %883 }
 0x1d0   : > { %v4244_v56 = vsel %vm1755_vm6, %v4073_v42, %v886_v29  ;;  %v4248_v17 = vsel %vm1755_vm6, %v4077_v11, %v884_v54  ;;  %v4269_v29 = vld [vmem:[%s2923_s28 + $0x89] sm:$0xff]  ;;  %v4274_v54 = vld [vmem:[%s2923_s28 + $0x81] sm:$0xff] }
 0x1d1   : > { %1057 = vrot.lane.b32.xlu1 %v4251_v43, %s2841_s10  ;;  %1055 = vrot.lane.b32.xlu0 %v4256_v33, %s2841_s10  ;;  %5725 = vst [vmem:[#allocation17_spill] sm:$0xff] %v4269_v29  ;;  %5726 = vst [vmem:[#allocation18_spill] sm:$0xff] %v4274_v54 }
 0x1d3   : > { %v890_v61 = vpop.permute.xlu1 %889  ;;  %v888_v8 = vpop.permute.xlu0 %887 }
 0x1d4   : > { %v4262_v42 = vsel %vm1755_vm6, %v4085_v53, %v890_v61  ;;  %v4266_v11 = vsel %vm1755_vm6, %v4089_v0, %v888_v8  ;;  %v2687_v53 = vld [vmem:[%s2923_s28 + $0x99] sm:$0xff]  ;;  %v2688_v0 = vld [vmem:[%s2923_s28 + $0x91] sm:$0xff] }
 0x1d5   : > { %1061 = vrot.lane.b32.xlu1 %v4269_v29, %s2841_s10  ;;  %1059 = vrot.lane.b32.xlu0 %v4274_v54, %s2841_s10 }
 0x1d7   : > { %v894_v43 = vpop.permute.xlu1 %893  ;;  %v892_v33 = vpop.permute.xlu0 %891 }
 0x1d8   : > { %v4280_v61 = vsel %vm1755_vm6, %v4097_v13, %v894_v43  ;;  %v4284_v8 = vsel %vm1755_vm6, %v4101_v36, %v892_v33  ;;  %v4299_v33 = vld [vmem:[%s2923_s28 + $0xa9] sm:$0xff]  ;;  %v4304_v36 = vld [vmem:[%s2923_s28 + $0xa1] sm:$0xff] }
 0x1d9   : > { %1065 = vrot.lane.b32.xlu1 %v2687_v53, %s2841_s10  ;;  %1063 = vrot.lane.b32.xlu0 %v2688_v0, %s2841_s10 }
 0x1db   : > { %v898_v29 = vpop.permute.xlu1 %897  ;;  %v896_v54 = vpop.permute.xlu0 %895 }
 0x1dc   : > { %v4292_v9 = vsel %vm1755_vm6, %v4109_v12, %v898_v29  ;;  %v4296_v13 = vsel %vm1755_vm6, %v4113_v60, %v896_v54  ;;  %v4317_v29 = vld [vmem:[%s2923_s28 + $0xb9] sm:$0xff]  ;;  %v4322_v54 = vld [vmem:[%s2923_s28 + $0xb1] sm:$0xff] }
 0x1dd   : > { %1069 = vrot.lane.b32.xlu1 %v4299_v33, %s2841_s10  ;;  %1067 = vrot.lane.b32.xlu0 %v4304_v36, %s2841_s10 }
 0x1df   : > { %v902_v43 = vpop.permute.xlu1 %901  ;;  %v900_v53 = vpop.permute.xlu0 %899 }
 0x1e0   : > { %v4310_v12 = vsel %vm1755_vm6, %v4121_v44, %v902_v43  ;;  %v4314_v60 = vsel %vm1755_vm6, %v4125_v24, %v900_v53  ;;  %v4331_v43 = vld [vmem:[%s2923_s28 + $0xc9] sm:$0xff]  ;;  %v4336_v24 = vld [vmem:[%s2923_s28 + $0xc1] sm:$0xff] }
 0x1e1   : > { %1073 = vrot.lane.b32.xlu1 %v4317_v29, %s2841_s10  ;;  %1071 = vrot.lane.b32.xlu0 %v4322_v54, %s2841_s10 }
 0x1e3   : > { %v4326_v0 = vpop.permute.xlu1 %905  ;;  %v4328_v44 = vpop.permute.xlu0 %903 }
 0x1e4   : > { %5727 = vst [vmem:[#allocation19_spill] sm:$0xff] %v4326_v0  ;;  %5728 = vst [vmem:[#allocation20_spill] sm:$0xff] %v4328_v44  ;;  %v4356_v44 = vld [vmem:[%s2923_s28 + $0xe1] sm:$0xff] }
 0x1e5   : > { %1077 = vrot.lane.b32.xlu1 %v4331_v43, %s2841_s10  ;;  %1075 = vrot.lane.b32.xlu0 %v4336_v24, %s2841_s10  ;;  %5730 = vst [vmem:[#allocation22_spill] sm:$0xff] %v4356_v44 }
 0x1e7   : > { %v910_v53 = vpop.permute.xlu1 %909  ;;  %v908_v6 = vpop.permute.xlu0 %907 }
 0x1e8   : > { %v4342_v18 = vsel %vm1755_vm6, %v4141_v58, %v910_v53  ;;  %v4346_v0 = vsel %vm1755_vm6, %v4145_v34, %v908_v6 }
 0x1e9   : > { %1081 = vrot.lane.b32.xlu1 %v3714_v21, %s2841_s10  ;;  %1079 = vrot.lane.b32.xlu0 %v3717_v22, %s2841_s10 }
 0x1eb   : > { %v914_v40 = vpop.permute.xlu1 %913  ;;  %v912_v25 = vpop.permute.xlu0 %911 }
 0x1ec   : > { %v4360_v58 = vsel %vm1755_vm6, %v4157_v15, %v914_v40  ;;  %v4364_v6 = vsel %vm1755_vm6, %v4161_v23, %v912_v25  ;;  %v2695_v25 = vld [vmem:[%s2923_s28 + $0x2a] sm:$0xff]  ;;  %v2696_v23 = vld [vmem:[%s2923_s28 + $0x22] sm:$0xff] }
 0x1ed   : > { %1085 = vrot.lane.b32.xlu1 %v4353_v48, %s2841_s10  ;;  %1083 = vrot.lane.b32.xlu0 %v4356_v44, %s2841_s10  ;;  %v2701_v44 = vld [vmem:[%s2923_s28 + $0x3a] sm:$0xff] }
 0x1ef   : > { %v918_v21 = vpop.permute.xlu1 %917  ;;  %v916_v22 = vpop.permute.xlu0 %915 }
 0x1f0   : > { %v4372_v34 = vsel %vm1755_vm6, %v4168_v32, %v918_v21  ;;  %v4376_v15 = vsel %vm1755_vm6, %v4172_v45, %v916_v22  ;;  %v2697_v45 = vld [vmem:[%s2923_s28 + $0x23] sm:$0xff]  ;;  %v2698_v21 = vld [vmem:[%s2923_s28 + $0x32] sm:$0xff] }
 0x1f1   : > { %1117 = vrot.lane.b32.xlu1 %v2695_v25, %s2842_s11  ;;  %1115 = vrot.lane.b32.xlu0 %v2696_v23, %s2842_s11 }
 0x1f3   : > { %v922_v40 = vpop.permute.xlu1 %921  ;;  %v920_v53 = vpop.permute.xlu0 %919 }
 0x1f4   : > { %v4384_v48 = vsel %vm1755_vm6, %v4180_v52, %v922_v40  ;;  %v4388_v32 = vsel %vm1755_vm6, %v4184_v1, %v920_v53  ;;  %v2699_v1 = vld [vmem:[%s2923_s28 + $0x2b] sm:$0xff]  ;;  %v1998_v40 = vld [vmem:[%s5504_s1] sm:$0xff] }
 0x1f5   : > { %1195 = vrot.lane.b32.xlu1 %v2697_v45, %s2843_s17  ;;  %1119 = vrot.lane.b32.xlu0 %v2698_v21, %s2842_s11 }
 0x1f7   : > { %v926_v22 = vpop.permute.xlu1 %925  ;;  %v924_v25 = vpop.permute.xlu0 %923 }
 0x1f8   : > { %v4396_v23 = vsel %vm1755_vm6, %v4198_v35, %v926_v22  ;;  %v4400_v52 = vsel %vm1755_vm6, %v4202_v28, %v924_v25  ;;  %v1999_v35 = vld [vmem:[%s5504_s1 + $0x8] sm:$0xff]  ;;  %v2001_v22 = vld [vmem:[%s5504_s1 + $0x18] sm:$0xff] }
 0x1f9   : > { %1275 = vrot.lane.b32.xlu1 %v5705_v51, %s2844_s19  ;;  %1197 = vrot.lane.b32.xlu0 %v2699_v1, %s2843_s17  ;;  %v2591_v45 = vpack.c.bf16 %v1999_v35, %v1998_v40  ;;  %v2000_v51 = vld [vmem:[%s5504_s1 + $0x10] sm:$0xff]  ;;  %v2003_v35 = vld [vmem:[%s5504_s1 + $0x28] sm:$0xff] }
 0x1fa   : > { %v2595_v40 = vpack.c.bf16 %v2001_v22, %v2000_v51 }
 0x1fb   : > { %v4412_v53 = vpop.permute.xlu1 %957  ;;  %v4414_v28 = vpop.permute.xlu0 %955  ;;  %2592 = vmatprep.subr.bf16.mxu0 %v2591_v45  ;;  %2607 = vmatprep.subr.bf16.mxu1 %v2591_v45 }
 0x1fc   : > { %2594 = vmatpush3.bf16.msra.mxu0 %v2591_v45  ;;  %2611 = vmatpush3.bf16.msra.mxu1 %v2591_v45 }
 0x1fd   : > { %1355 = vrot.lane.b32.xlu1 %v4192_v46, %s2845_s27  ;;  %1277 = vrot.lane.b32.xlu0 %v5704_v47, %s2844_s19  ;;  %v4433_v47 = vld [vmem:[%s2923_s28 + $0x92] sm:$0xff]  ;;  %v2002_v46 = vld [vmem:[%s5504_s1 + $0x20] sm:$0xff] }
 0x1fe   : > { %5732 = vst [vmem:[#allocation24_spill] sm:$0xff] %v4433_v47  ;;  %2596 = vmatprep.subr.bf16.mxu0 %v2595_v40  ;;  %2608 = vmatprep.subr.bf16.mxu1 %v2595_v40 }
 0x1ff   : > { %v4426_v25 = vpop.permute.xlu1 %961  ;;  %v4428_v1 = vpop.permute.xlu0 %959 }
 0x200   : > { %5731 = vst [vmem:[#allocation23_spill] sm:$0xff] %v4426_v25  ;;  %2598 = vmatpush3.bf16.msra.mxu0 %v2595_v40  ;;  %2612 = vmatpush3.bf16.msra.mxu1 %v2595_v40  ;;  %v4471_v25 = vld [vmem:[%s2923_s28 + $0x9a] sm:$0xff] }
 0x201   : > { %1357 = vrot.lane.b32.xlu1 %v4187_v14, %s2845_s27  ;;  %1143 = vrot.lane.b32.xlu0 %v4433_v47, %s2842_s11  ;;  %v2599_v14 = vpack.c.bf16 %v2003_v35, %v2002_v46  ;;  %5733 = vst [vmem:[#allocation25_spill] sm:$0xff] %v4471_v25 }
 0x203   : > { %v966_v45 = vpop.permute.xlu1 %965  ;;  %v964_v51 = vpop.permute.xlu0 %963  ;;  %2600 = vmatprep.subr.bf16.mxu0 %v2599_v14  ;;  %2609 = vmatprep.subr.bf16.mxu1 %v2599_v14 }
 0x204   : > { %v4445_v22 = vsel %vm1782_vm7, %v4244_v56, %v966_v45  ;;  %v4449_v47 = vsel %vm1782_vm7, %v4248_v17, %v964_v51  ;;  %2602 = vmatpush3.bf16.msra.mxu0 %v2599_v14  ;;  %v2004_v56 = vld [vmem:[%s5504_s1 + $0x30] sm:$0xff]  ;;  %v2005_v17 = vld [vmem:[%s5504_s1 + $0x38] sm:$0xff]  ;;  %2613 = vmatpush3.bf16.msra.mxu1 %v2599_v14 }
 0x205   : > { %1121 = vrot.lane.b32.xlu1 %v2701_v44, %s2842_s11  ;;  %1435 = vrot.lane.b32.xlu0 %v2698_v21, %s2846_s20  ;;  %v2603_v45 = vpack.c.bf16 %v2005_v17, %v2004_v56  ;;  %v2702_v51 = vld [vmem:[%s2923_s28 + $0x33] sm:$0xff] }
 0x207   : > { %v970_v46 = vpop.permute.xlu1 %969  ;;  %v968_v40 = vpop.permute.xlu0 %967  ;;  %2604 = vmatprep.subr.bf16.mxu0 %v2603_v45  ;;  %2610 = vmatprep.subr.bf16.mxu1 %v2603_v45 }
 0x208   : > { %v4462_v35 = vsel %vm1782_vm7, %v4262_v42, %v970_v46  ;;  %v4466_v21 = vsel %vm1782_vm7, %v4266_v11, %v968_v40  ;;  %2606 = vmatpush3.bf16.msra.mxu0 %v2603_v45  ;;  %2614 = vmatpush3.bf16.msra.mxu1 %v2603_v45  ;;  %v4485_v40 = vld [vmem:[%s2923_s28 + $0x93] sm:$0xff] }
 0x209   : > { %1199 = vrot.lane.b32.xlu1 %v2702_v51, %s2843_s17  ;;  %1145 = vrot.lane.b32.xlu0 %v4471_v25, %s2842_s11  ;;  %5734 = vst [vmem:[#allocation26_spill] sm:$0xff] %v4485_v40 }
 0x20b   : > { %v974_v14 = vpop.permute.xlu1 %973  ;;  %v972_v42 = vpop.permute.xlu0 %971 }
 0x20c   : > { %v4477_v11 = vsel %vm1782_vm7, %v4280_v61, %v974_v14  ;;  %v4481_v46 = vsel %vm1782_vm7, %v4284_v8, %v972_v42  ;;  %v2705_v8 = vld [vmem:[%s2923_s28 + $0x3b] sm:$0xff] }
 0x20d   : > { %1437 = vrot.lane.b32.xlu1 %v2701_v44, %s2846_s20  ;;  %1223 = vrot.lane.b32.xlu0 %v4485_v40, %s2843_s17 }
 0x20f   : > { %v978_v56 = vpop.permute.xlu1 %977  ;;  %v976_v17 = vpop.permute.xlu0 %975 }
 0x210   : > { %v4491_v45 = vsel %vm1782_vm7, %v4292_v9, %v978_v56  ;;  %v4495_v61 = vsel %vm1782_vm7, %v4296_v13, %v976_v17  ;;  %v2706_v13 = vld [vmem:[%s2923_s28 + $0x40] sm:$0xff] }
 0x211   : > { %1201 = vrot.lane.b32.xlu1 %v2705_v8, %s2843_s17  ;;  %1515 = vrot.lane.b32.xlu0 %v2702_v51, %s2847_s4  ;;  %v4511_v56 = vld [vmem:[%s2923_s28 + $0x9b] sm:$0xff] }
 0x212   : > { %5735 = vst [vmem:[#allocation27_spill] sm:$0xff] %v4511_v56 }
 0x213   : > { %v982_v44 = vpop.permute.xlu1 %981  ;;  %v980_v14 = vpop.permute.xlu0 %979 }
 0x214   : > { %v4502_v42 = vsel %vm1782_vm7, %v4310_v12, %v982_v44  ;;  %v4506_v9 = vsel %vm1782_vm7, %v4314_v60, %v980_v14 }
 0x215   : > { %1279 = vrot.lane.b32.xlu1 %v2706_v13, %s2844_s19  ;;  %1225 = vrot.lane.b32.xlu0 %v4511_v56, %s2843_s17  ;;  %v2708_v13 = vld [vmem:[%s2923_s28 + $0xa8] sm:$0xff] }
 0x216   : > { %v2709_v56 = vld [vmem:[%s2923_s28 + $0x48] sm:$0xff] }
 0x217   : > { %v4515_v51 = vpop.permute.xlu1 %985  ;;  %v4517_v17 = vpop.permute.xlu0 %983 }
 0x219   : > { %1517 = vrot.lane.b32.xlu1 %v2705_v8, %s2847_s4  ;;  %1303 = vrot.lane.b32.xlu0 %v3499_v27, %s2844_s19 }
 0x21b   : > { %v990_v12 = vpop.permute.xlu1 %989  ;;  %v988_v60 = vpop.permute.xlu0 %987 }
 0x21c   : > { %v4524_v44 = vsel %vm1782_vm7, %v4342_v18, %v990_v12  ;;  %v4528_v14 = vsel %vm1782_vm7, %v4346_v0, %v988_v60  ;;  %v2710_v60 = vld [vmem:[%s2923_s28 + $0xa2] sm:$0xff] }
 0x21d   : > { %1305 = vrot.lane.b32.xlu1 %v2708_v13, %s2844_s19  ;;  %1281 = vrot.lane.b32.xlu0 %v2709_v56, %s2844_s19 }
 0x21f   : > { %v994_v8 = vpop.permute.xlu1 %993  ;;  %v992_v27 = vpop.permute.xlu0 %991 }
 0x220   : > { %v4536_v40 = vsel %vm1782_vm7, %v4360_v58, %v994_v8  ;;  %v4540_v18 = vsel %vm1782_vm7, %v4364_v6, %v992_v27  ;;  %v2711_v6 = vld [vmem:[%s2923_s28 + $0x42] sm:$0xff] }
 0x221   : > { %1383 = vrot.lane.b32.xlu1 %v4304_v36, %s2845_s27  ;;  %1359 = vrot.lane.b32.xlu0 %v4210_v62, %s2845_s27 }
 0x223   : > { %v998_v0 = vpop.permute.xlu1 %997  ;;  %v996_v12 = vpop.permute.xlu0 %995 }
 0x224   : > { %v4548_v56 = vsel %vm1782_vm7, %v4372_v34, %v998_v0  ;;  %v4552_v58 = vsel %vm1782_vm7, %v4376_v15, %v996_v12  ;;  %v2713_v0 = vld [vmem:[%s2923_s28 + $0x4a] sm:$0xff] }
 0x225   : > { %1147 = vrot.lane.b32.xlu1 %v2710_v60, %s2842_s11  ;;  %1123 = vrot.lane.b32.xlu0 %v2711_v6, %s2842_s11 }
 0x227   : > { %v1002_v36 = vpop.permute.xlu1 %1001  ;;  %v1000_v62 = vpop.permute.xlu0 %999 }
 0x228   : > { %v4560_v13 = vsel %vm1782_vm7, %v4384_v48, %v1002_v36  ;;  %v4564_v34 = vsel %vm1782_vm7, %v4388_v32, %v1000_v62 }
 0x229   : > { %1385 = vrot.lane.b32.xlu1 %v4299_v33, %s2845_s27  ;;  %1361 = vrot.lane.b32.xlu0 %v4205_v63, %s2845_s27  ;;  %v2712_v63 = vld [vmem:[%s2923_s28 + $0xaa] sm:$0xff] }
 0x22b   : > { %v1006_v15 = vpop.permute.xlu1 %1005  ;;  %v1004_v8 = vpop.permute.xlu0 %1003 }
 0x22c   : > { %v4572_v27 = vsel %vm1782_vm7, %v4396_v23, %v1006_v15  ;;  %v4576_v48 = vsel %vm1782_vm7, %v4400_v52, %v1004_v8  ;;  %v2714_v52 = vld [vmem:[%s2923_s28 + $0xa3] sm:$0xff] }
 0x22d   : > { %1463 = vrot.lane.b32.xlu1 %v2710_v60, %s2846_s20  ;;  %1439 = vrot.lane.b32.xlu0 %v2711_v6, %s2846_s20  ;;  %v2715_v60 = vld [vmem:[%s2923_s28 + $0x43] sm:$0xff] }
 0x22f   : > { %v4580_v33 = vpop.permute.xlu1 %1037  ;;  %v4582_v32 = vpop.permute.xlu0 %1035 }
 0x231   : > { %1149 = vrot.lane.b32.xlu1 %v2712_v63, %s2842_s11  ;;  %1125 = vrot.lane.b32.xlu0 %v2713_v0, %s2842_s11 }
 0x233   : > { %v4588_v23 = vpop.permute.xlu1 %1041  ;;  %v4590_v12 = vpop.permute.xlu0 %1039 }
 0x234   : > { %5736 = vst [vmem:[#allocation28_spill] sm:$0xff] %v4588_v23 }
 0x235   : > { %1227 = vrot.lane.b32.xlu1 %v2714_v52, %s2843_s17  ;;  %1203 = vrot.lane.b32.xlu0 %v2715_v60, %s2843_s17 }
 0x237   : > { %v1046_v6 = vpop.permute.xlu1 %1045  ;;  %v1044_v36 = vpop.permute.xlu0 %1043 }
 0x238   : > { %v4598_v62 = vsel %vm1809_vm8, %v4445_v22, %v1046_v6  ;;  %v4602_v15 = vsel %vm1809_vm8, %v4449_v47, %v1044_v36  ;;  %v2716_v6 = vld [vmem:[%s2923_s28 + $0xab] sm:$0xff] }
 0x239   : > { %1465 = vrot.lane.b32.xlu1 %v2712_v63, %s2846_s20  ;;  %1441 = vrot.lane.b32.xlu0 %v2713_v0, %s2846_s20  ;;  %v2719_v36 = vld [vmem:[%s2923_s28 + $0x50] sm:$0xff] }
 0x23b   : > { %v1050_v8 = vpop.permute.xlu1 %1049  ;;  %v1048_v25 = vpop.permute.xlu0 %1047 }
 0x23c   : > { %v4608_v23 = vsel %vm1809_vm8, %v4462_v35, %v1050_v8  ;;  %v4612_v22 = vsel %vm1809_vm8, %v4466_v21, %v1048_v25  ;;  %v2717_v25 = vld [vmem:[%s2923_s28 + $0x4b] sm:$0xff] }
 0x23d   : > { %5737 = vst [vmem:[#allocation29_spill] sm:$0xff] %v4608_v23  ;;  %1543 = vrot.lane.b32.xlu1 %v2714_v52, %s2847_s4  ;;  %1519 = vrot.lane.b32.xlu0 %v2715_v60, %s2847_s4 }
 0x23f   : > { %v1054_v47 = vpop.permute.xlu1 %1053  ;;  %v1052_v63 = vpop.permute.xlu0 %1051 }
 0x240   : > { %v4618_v0 = vsel %vm1809_vm8, %v4477_v11, %v1054_v47  ;;  %v4622_v35 = vsel %vm1809_vm8, %v4481_v46, %v1052_v63  ;;  %v2718_v46 = vld [vmem:[%s2923_s28 + $0xb0] sm:$0xff] }
 0x241   : > { %1229 = vrot.lane.b32.xlu1 %v2716_v6, %s2843_s17  ;;  %1205 = vrot.lane.b32.xlu0 %v2717_v25, %s2843_s17 }
 0x243   : > { %v1058_v21 = vpop.permute.xlu1 %1057  ;;  %v1056_v52 = vpop.permute.xlu0 %1055 }
 0x244   : > { %v4630_v60 = vsel %vm1809_vm8, %v4491_v45, %v1058_v21  ;;  %v4634_v11 = vsel %vm1809_vm8, %v4495_v61, %v1056_v52  ;;  %v2720_v52 = vld [vmem:[%s2923_s28 + $0xb8] sm:$0xff] }
 0x245   : > { %5738 = vst [vmem:[#allocation30_spill] sm:$0xff] %v4630_v60  ;;  %5739 = vst [vmem:[#allocation33_spill] sm:$0xff] %v4634_v11  ;;  %1307 = vrot.lane.b32.xlu1 %v2718_v46, %s2844_s19  ;;  %1283 = vrot.lane.b32.xlu0 %v2719_v36, %s2844_s19  ;;  %v2721_v46 = vld [vmem:[%s2923_s28 + $0x58] sm:$0xff]  ;;  %v5747_v60 = vld [vmem:[#allocation60_spill] sm:$0xff] }
 0x247   : > { %v1062_v8 = vpop.permute.xlu1 %1061  ;;  %v1060_v47 = vpop.permute.xlu0 %1059 }
 0x248   : > { %v4642_v63 = vsel %vm1809_vm8, %v4502_v42, %v1062_v8  ;;  %v4646_v45 = vsel %vm1809_vm8, %v4506_v9, %v1060_v47 }
 0x249   : > { %5740 = vst [vmem:[#allocation34_spill] sm:$0xff] %v4642_v63  ;;  %5741 = vst [vmem:[#allocation37_spill] sm:$0xff] %v4646_v45  ;;  %1545 = vrot.lane.b32.xlu1 %v2716_v6, %s2847_s4  ;;  %1521 = vrot.lane.b32.xlu0 %v2717_v25, %s2847_s4  ;;  %v2729_v63 = vld [vmem:[%s2923_s28 + $0x5b] sm:$0xff] }
 0x24a   : > { %v2730_v45 = vld [vmem:[%s2923_s28 + $0xc0] sm:$0xff] }
 0x24b   : > { %v4650_v61 = vpop.permute.xlu1 %1065  ;;  %v4652_v21 = vpop.permute.xlu0 %1063 }
 0x24d   : > { %1309 = vrot.lane.b32.xlu1 %v2720_v52, %s2844_s19  ;;  %1285 = vrot.lane.b32.xlu0 %v2721_v46, %s2844_s19  ;;  %v2722_v52 = vld [vmem:[%s2923_s28 + $0xb2] sm:$0xff] }
 0x24f   : > { %v1070_v42 = vpop.permute.xlu1 %1069  ;;  %v1068_v36 = vpop.permute.xlu0 %1067 }
 0x250   : > { %v4660_v9 = vsel %vm1809_vm8, %v4524_v44, %v1070_v42  ;;  %v4664_v6 = vsel %vm1809_vm8, %v4528_v14, %v1068_v36  ;;  %v2723_v14 = vld [vmem:[%s2923_s28 + $0x52] sm:$0xff] }
 0x251   : > { %1387 = vrot.lane.b32.xlu1 %v4322_v54, %s2845_s27  ;;  %1363 = vrot.lane.b32.xlu0 %v4224_v31, %s2845_s27 }
 0x253   : > { %v1074_v25 = vpop.permute.xlu1 %1073  ;;  %v1072_v8 = vpop.permute.xlu0 %1071 }
 0x254   : > { %v4672_v47 = vsel %vm1809_vm8, %v4536_v40, %v1074_v25  ;;  %v4676_v44 = vsel %vm1809_vm8, %v4540_v18, %v1072_v8  ;;  %v2725_v8 = vld [vmem:[%s2923_s28 + $0x5a] sm:$0xff] }
 0x255   : > { %1151 = vrot.lane.b32.xlu1 %v2722_v52, %s2842_s11  ;;  %1127 = vrot.lane.b32.xlu0 %v2723_v14, %s2842_s11 }
 0x257   : > { %v1078_v54 = vpop.permute.xlu1 %1077  ;;  %v1076_v46 = vpop.permute.xlu0 %1075 }
 0x258   : > { %v4684_v31 = vsel %vm1809_vm8, %v4548_v56, %v1078_v54  ;;  %v4688_v40 = vsel %vm1809_vm8, %v4552_v58, %v1076_v46 }
 0x259   : > { %1389 = vrot.lane.b32.xlu1 %v4317_v29, %s2845_s27  ;;  %1365 = vrot.lane.b32.xlu0 %v4219_v38, %s2845_s27 }
 0x25b   : > { %v1082_v18 = vpop.permute.xlu1 %1081  ;;  %v1080_v42 = vpop.permute.xlu0 %1079 }
 0x25c   : > { %v4696_v36 = vsel %vm1809_vm8, %v4560_v13, %v1082_v18  ;;  %v4700_v56 = vsel %vm1809_vm8, %v4564_v34, %v1080_v42  ;;  %v2724_v13 = vld [vmem:[%s2923_s28 + $0xba] sm:$0xff] }
 0x25d   : > { %5742 = vst [vmem:[#allocation38_spill] sm:$0xff] %v4696_v36  ;;  %5743 = vst [vmem:[#allocation39_spill] sm:$0xff] %v4700_v56  ;;  %1467 = vrot.lane.b32.xlu1 %v2722_v52, %s2846_s20  ;;  %1443 = vrot.lane.b32.xlu0 %v2723_v14, %s2846_s20  ;;  %v2726_v14 = vld [vmem:[%s2923_s28 + $0xb3] sm:$0xff] }
 0x25f   : > { %v1086_v29 = vpop.permute.xlu1 %1085  ;;  %v1084_v58 = vpop.permute.xlu0 %1083 }
 0x260   : > { %v4706_v38 = vsel %vm1809_vm8, %v4572_v27, %v1086_v29  ;;  %v4710_v25 = vsel %vm1809_vm8, %v4576_v48, %v1084_v58  ;;  %v2727_v27 = vld [vmem:[%s2923_s28 + $0x53] sm:$0xff]  ;;  %v2728_v58 = vld [vmem:[%s2923_s28 + $0xbb] sm:$0xff] }
 0x261   : > { %5744 = vst [vmem:[#allocation40_spill] sm:$0xff] %v4706_v38  ;;  %5745 = vst [vmem:[#allocation41_spill] sm:$0xff] %v4710_v25  ;;  %1153 = vrot.lane.b32.xlu1 %v2724_v13, %s2842_s11  ;;  %1129 = vrot.lane.b32.xlu0 %v2725_v8, %s2842_s11 }
 0x263   : > { %v4716_v34 = vpop.permute.xlu1 %1117  ;;  %v1116_v52 = vpop.permute.xlu0 %1115 }
 0x265   : > { %1231 = vrot.lane.b32.xlu1 %v2726_v14, %s2843_s17  ;;  %1207 = vrot.lane.b32.xlu0 %v2727_v27, %s2843_s17 }
 0x267   : > { %v1196_v48 = vpop.permute.xlu1 %1195  ;;  %v4722_v54 = vpop.permute.xlu0 %1119 }
 0x269   : > { %1469 = vrot.lane.b32.xlu1 %v2724_v13, %s2846_s20  ;;  %1445 = vrot.lane.b32.xlu0 %v2725_v8, %s2846_s20  ;;  %v169_v13 = vld [vmem:[%s2923_s28] sm:$0xff] }
 0x26b   : > { %v1276_v46 = vpop.permute.xlu1 %1275  ;;  %v4726_v18 = vpop.permute.xlu0 %1197 }
 0x26d   : > { %1547 = vrot.lane.b32.xlu1 %v2726_v14, %s2847_s4  ;;  %1523 = vrot.lane.b32.xlu0 %v2727_v27, %s2847_s4  ;;  %v2731_v14 = vld [vmem:[%s2923_s28 + $0x60] sm:$0xff]  ;;  %v5746_v27 = vld [vmem:[#allocation32_spill] sm:$0xff] }
 0x26e   : > { %v1594_v25 = vsel %vm1593_vm0, %v169_v13, %v5746_v27 }
 0x26f   : > { %v1356_v42 = vpop.permute.xlu1 %1355  ;;  %v4730_v29 = vpop.permute.xlu0 %1277  ;;  %v1621_v36 = vsel %vm1620_vm1, %v1594_v25, %v5747_v60 }
 0x270   : > { %v1648_v23 = vsel %vm1647_vm2, %v1621_v36, %v3619_v5 }
 0x271   : > { %1233 = vrot.lane.b32.xlu1 %v2728_v58, %s2843_s17  ;;  %1209 = vrot.lane.b32.xlu0 %v2729_v63, %s2843_s17 }
 0x273   : > { %v4737_v8 = vpop.permute.xlu1 %1357  ;;  %v4739_v38 = vpop.permute.xlu0 %1143 }
 0x275   : > { %1311 = vrot.lane.b32.xlu1 %v2730_v45, %s2844_s19  ;;  %1287 = vrot.lane.b32.xlu0 %v2731_v14, %s2844_s19  ;;  %v1675_v45 = vsel %vm1674_vm3, %v1648_v23, %v3769_v59  ;;  %v170_v14 = vld [vmem:[%s2923_s28 + $0x8] sm:$0xff] }
 0x276   : > { %v1702_v13 = vsel %vm1701_vm4, %v1675_v45, %v3913_v41  ;;  %v2732_v23 = vld [vmem:[%s2923_s28 + $0xc8] sm:$0xff] }
 0x277   : > { %v4749_v11 = vpop.permute.xlu1 %1121  ;;  %v1436_v56 = vpop.permute.xlu0 %1435  ;;  %v1729_v60 = vsel %vm1728_vm5, %v1702_v13, %v4057_v39  ;;  %v2733_v41 = vld [vmem:[%s2923_s28 + $0x68] sm:$0xff] }
 0x278   : > { %v1756_v5 = vsel %vm1755_vm6, %v1729_v60, %v4216_v50 }
 0x279   : > { %1549 = vrot.lane.b32.xlu1 %v2728_v58, %s2847_s4  ;;  %1525 = vrot.lane.b32.xlu0 %v2729_v63, %s2847_s4  ;;  %v1783_v59 = vsel %vm1782_vm7, %v1756_v5, %v4414_v28  ;;  %v5748_v63 = vld [vmem:[#allocation36_spill] sm:$0xff]  ;;  %v5749_v58 = vld [vmem:[#allocation59_spill] sm:$0xff] }
 0x27a   : > { %v1595_v39 = vsel %vm1593_vm0, %v170_v14, %v5748_v63  ;;  %v1810_v36 = vsel %vm1809_vm8, %v1783_v59, %v4582_v32 }
 0x27b   : > { %v4762_v25 = vpop.permute.xlu1 %1199  ;;  %v4764_v27 = vpop.permute.xlu0 %1145  ;;  %v1622_v50 = vsel %vm1620_vm1, %v1595_v39, %v5749_v58  ;;  %v1837_v45 = vsel %vm1836_vm9, %v1810_v36, %v1116_v52 }
 0x27c   : > { %v1649_v60 = vsel %vm1647_vm2, %v1622_v50, %v3617_v4  ;;  %v1864_v5 = vsel %vm1863_vm10, %v1837_v45, %v1196_v48  ;;  %v2738_v45 = vld [vmem:[%s2923_s28 + $0xc3] sm:$0xff] }
 0x27d   : > { %1313 = vrot.lane.b32.xlu1 %v2732_v23, %s2844_s19  ;;  %1289 = vrot.lane.b32.xlu0 %v2733_v41, %s2844_s19  ;;  %v1676_v32 = vsel %vm1674_vm3, %v1649_v60, %v3767_v30  ;;  %v1891_v14 = vsel %vm1890_vm11, %v1864_v5, %v1276_v46 }
 0x27e   : > { %v1703_v4 = vsel %vm1701_vm4, %v1676_v32, %v3911_v16  ;;  %v1918_v52 = vsel %vm1917_vm12, %v1891_v14, %v1356_v42  ;;  %v2734_v16 = vld [vmem:[%s2923_s28 + $0xc2] sm:$0xff] }
 0x27f   : > { %v1438_v28 = vpop.permute.xlu1 %1437  ;;  %v4781_v13 = vpop.permute.xlu0 %1223  ;;  %v1730_v48 = vsel %vm1728_vm5, %v1703_v4, %v4055_v20  ;;  %v1945_v30 = vsel %vm1944_vm13, %v1918_v52, %v1436_v56  ;;  %v2735_v42 = vld [vmem:[%s2923_s28 + $0x62] sm:$0xff] }
 0x281   : > { %1391 = vrot.lane.b32.xlu1 %v4336_v24, %s2845_s27  ;;  %1367 = vrot.lane.b32.xlu0 %v4238_v3, %s2845_s27  ;;  %v1757_v24 = vsel %vm1755_vm6, %v1730_v48, %v4214_v57  ;;  %v2740_v48 = vld [vmem:[%s2923_s28 + $0xcb] sm:$0xff] }
 0x282   : > { %v1784_v23 = vsel %vm1782_vm7, %v1757_v24, %v4412_v53  ;;  %v5750_v24 = vld [vmem:[#allocation31_spill] sm:$0xff] }
 0x283   : > { %v4799_v59 = vpop.permute.xlu1 %1201  ;;  %v1516_v46 = vpop.permute.xlu0 %1515  ;;  %v1811_v20 = vsel %vm1809_vm8, %v1784_v23, %v4580_v33  ;;  %v2743_v23 = vld [vmem:[%s2923_s28 + $0x70] sm:$0xff] }
 0x284   : > { %v1972_v3 = vsel %vm1971_vm14, %v1945_v30, %v1516_v46  ;;  %v1838_v56 = vsel %vm1836_vm9, %v1811_v20, %v4716_v34  ;;  %v2741_v30 = vld [vmem:[%s2923_s28 + $0x6b] sm:$0xff] }
 0x285   : > { %1155 = vrot.lane.b32.xlu1 %v2734_v16, %s2842_s11  ;;  %1131 = vrot.lane.b32.xlu0 %v2735_v42, %s2842_s11  ;;  %v1865_v53 = vsel %vm1863_vm10, %v1838_v56, %v4726_v18  ;;  %v2742_v46 = vld [vmem:[%s2923_s28 + $0x10] sm:$0xff]  ;;  %v5752_v20 = vld [vmem:[#allocation64_spill] sm:$0xff] }
 0x286   : > { %2552 = vmatprep.mubr.msk.f32.mxu0 %vm2013_vm15, %v1972_v3  ;;  %v1892_v63 = vsel %vm1890_vm11, %v1865_v53, %v4730_v29  ;;  %v2736_v29 = vld [vmem:[%s2923_s28 + $0xca] sm:$0xff]  ;;  %v1596_v3 = vsel %vm1593_vm0, %v2742_v46, %v5750_v24  ;;  %v5753_v53 = vld [vmem:[#allocation75_spill] sm:$0xff] }
 0x287   : > { %v4815_v57 = vpop.permute.xlu1 %1279  ;;  %v4817_v41 = vpop.permute.xlu0 %1225  ;;  %v1919_v33 = vsel %vm1917_vm12, %v1892_v63, %v4737_v8  ;;  %v2737_v8 = vld [vmem:[%s2923_s28 + $0x6a] sm:$0xff]  ;;  %v1623_v56 = vsel %vm1620_vm1, %v1596_v3, %v5752_v20  ;;  %v5754_v46 = vld [vmem:[#allocation11_spill] sm:$0xff]  ;;  %v5755_v3 = vld [vmem:[#allocation14_spill] sm:$0xff] }
 0x288   : > { %v1946_v34 = vsel %vm1944_vm13, %v1919_v33, %v1438_v28  ;;  %v2739_v28 = vld [vmem:[%s2923_s28 + $0x63] sm:$0xff] }
 0x289   : > { %1393 = vrot.lane.b32.xlu1 %v4331_v43, %s2845_s27  ;;  %1369 = vrot.lane.b32.xlu0 %v4233_v37, %s2845_s27 }
 0x28b   : > { %v1518_v39 = vpop.permute.xlu1 %1517  ;;  %v4830_v36 = vpop.permute.xlu0 %1303 }
 0x28c   : > { %v1973_v18 = vsel %vm1971_vm14, %v1946_v34, %v1518_v39  ;;  %v1650_v39 = vsel %vm1647_vm2, %v1623_v56, %v3627_v49 }
 0x28d   : > { %1471 = vrot.lane.b32.xlu1 %v2734_v16, %s2846_s20  ;;  %1447 = vrot.lane.b32.xlu0 %v2735_v42, %s2846_s20  ;;  %v5751_v16 = vld [vmem:[#allocation50_spill] sm:$0xff] }
 0x28e   : > { %2553 = vmatmul.mubr.msk.f32.vlgmr.msra.gmra.mrb[0].mxu0 %vm2013_vm15, %v1973_v18  ;;  %v1608_v42 = vsel %vm1593_vm0, %v2743_v23, %v5751_v16 }
 0x28f   : > { %v4836_v43 = vpop.permute.xlu1 %1305  ;;  %v4838_v37 = vpop.permute.xlu0 %1281  ;;  %v1635_v63 = vsel %vm1620_vm1, %v1608_v42, %v5753_v53 }
 0x290   : > { %v1662_v18 = vsel %vm1647_vm2, %v1635_v63, %v3695_v19 }
 0x291   : > { %1157 = vrot.lane.b32.xlu1 %v2736_v29, %s2842_s11  ;;  %1133 = vrot.lane.b32.xlu0 %v2737_v8, %s2842_s11 }
 0x293   : > { %v4844_v58 = vpop.permute.xlu1 %1383  ;;  %v4846_v50 = vpop.permute.xlu0 %1359 }
 0x295   : > { %1235 = vrot.lane.b32.xlu1 %v2738_v45, %s2843_s17  ;;  %1211 = vrot.lane.b32.xlu0 %v2739_v28, %s2843_s17 }
 0x297   : > { %v4852_v60 = vpop.permute.xlu1 %1147  ;;  %v4854_v5 = vpop.permute.xlu0 %1123 }
 0x299   : > { %1473 = vrot.lane.b32.xlu1 %v2736_v29, %s2846_s20  ;;  %1449 = vrot.lane.b32.xlu0 %v2737_v8, %s2846_s20  ;;  %v1677_v29 = vsel %vm1674_vm3, %v1650_v39, %v3777_v26  ;;  %v1689_v8 = vsel %vm1674_vm3, %v1662_v18, %v3845_v10  ;;  %v5757_v39 = vld [vmem:[#allocation35_spill] sm:$0xff] }
 0x29a   : > { %v1716_v49 = vsel %vm1701_vm4, %v1689_v8, %v3989_v7 }
 0x29b   : > { %v4858_v32 = vpop.permute.xlu1 %1385  ;;  %v4860_v14 = vpop.permute.xlu0 %1361  ;;  %v1743_v26 = vsel %vm1728_vm5, %v1716_v49, %v5754_v46 }
 0x29d   : > { %1551 = vrot.lane.b32.xlu1 %v2738_v45, %s2847_s4  ;;  %1527 = vrot.lane.b32.xlu0 %v2739_v28, %s2847_s4  ;;  %v2744_v45 = vld [vmem:[%s2923_s28 + $0xd0] sm:$0xff]  ;;  %v1704_v28 = vsel %vm1701_vm4, %v1677_v29, %v3921_v55  ;;  %v5759_v29 = vld [vmem:[#allocation63_spill] sm:$0xff] }
 0x29e   : > { %v1731_v19 = vsel %vm1728_vm5, %v1704_v28, %v4065_v2 }
 0x29f   : > { %v1464_v4 = vpop.permute.xlu1 %1463  ;;  %v1440_v52 = vpop.permute.xlu0 %1439  ;;  %v1758_v16 = vsel %vm1755_vm6, %v1731_v19, %v5755_v3  ;;  %v5761_v3 = vld [vmem:[#allocation76_spill] sm:$0xff] }
 0x2a0   : > { %v1785_v7 = vsel %vm1782_vm7, %v1758_v16, %v4428_v1 }
 0x2a1   : > { %1237 = vrot.lane.b32.xlu1 %v2740_v48, %s2843_s17  ;;  %1213 = vrot.lane.b32.xlu0 %v2741_v30, %s2843_s17  ;;  %v1812_v42 = vsel %vm1809_vm8, %v1785_v7, %v4590_v12  ;;  %v5763_v7 = vld [vmem:[#allocation5_spill] sm:$0xff] }
 0x2a2   : > { %v1839_v56 = vsel %vm1836_vm9, %v1812_v42, %v4722_v54  ;;  %v2746_v54 = vld [vmem:[%s2923_s28 + $0x78] sm:$0xff] }
 0x2a3   : > { %v4878_v33 = vpop.permute.xlu1 %1149  ;;  %v4880_v34 = vpop.permute.xlu0 %1125  ;;  %v5764_v42 = vld [vmem:[#allocation6_spill] sm:$0xff] }
 0x2a5   : > { %1315 = vrot.lane.b32.xlu1 %v2744_v45, %s2844_s19  ;;  %1291 = vrot.lane.b32.xlu0 %v2743_v23, %s2844_s19  ;;  %v5756_v23 = vld [vmem:[#allocation20_spill] sm:$0xff]  ;;  %v5760_v45 = vld [vmem:[#allocation74_spill] sm:$0xff] }
 0x2a6   : > { %v1770_v55 = vsel %vm1755_vm6, %v1743_v26, %v5756_v23  ;;  %v5762_v23 = vld [vmem:[#allocation77_spill] sm:$0xff] }
 0x2a7   : > { %v4901_v24 = vpop.permute.xlu1 %1227  ;;  %v4903_v10 = vpop.permute.xlu0 %1203  ;;  %v1797_v2 = vsel %vm1782_vm7, %v1770_v55, %v4517_v17  ;;  %v1866_v17 = vsel %vm1863_vm10, %v1839_v56, %v4762_v25  ;;  %v5758_v25 = vld [vmem:[#allocation49_spill] sm:$0xff]  ;;  %v5766_v56 = vld [vmem:[#allocation7_spill] sm:$0xff] }
 0x2a8   : > { %v1824_v20 = vsel %vm1809_vm8, %v1797_v2, %v4652_v21  ;;  %v1893_v12 = vsel %vm1890_vm11, %v1866_v17, %v4815_v57  ;;  %v5767_v17 = vld [vmem:[#allocation8_spill] sm:$0xff] }
 0x2a9   : > { %1553 = vrot.lane.b32.xlu1 %v2740_v48, %s2847_s4  ;;  %1529 = vrot.lane.b32.xlu0 %v2741_v30, %s2847_s4  ;;  %v1851_v1 = vsel %vm1836_vm9, %v1824_v20, %v4739_v38  ;;  %v2745_v30 = vld [vmem:[%s2923_s28 + $0xd8] sm:$0xff]  ;;  %v5765_v20 = vld [vmem:[#allocation16_spill] sm:$0xff] }
 0x2aa   : > { %v1878_v48 = vsel %vm1863_vm10, %v1851_v1, %v4781_v13  ;;  %v2747_v38 = vld [vmem:[%s2923_s28 + $0x18] sm:$0xff]  ;;  %v1609_v13 = vsel %vm1593_vm0, %v2746_v54, %v5758_v25 }
 0x2ab   : > { %v1466_v53 = vpop.permute.xlu1 %1465  ;;  %v1442_v63 = vpop.permute.xlu0 %1441  ;;  %v1905_v21 = vsel %vm1890_vm11, %v1878_v48, %v4830_v36  ;;  %v1597_v18 = vsel %vm1593_vm0, %v2747_v38, %v5757_v39  ;;  %v1920_v36 = vsel %vm1917_vm12, %v1893_v12, %v4846_v50  ;;  %v1636_v28 = vsel %vm1620_vm1, %v1609_v13, %v5760_v45  ;;  %v5768_v12 = vld [vmem:[#allocation9_spill] sm:$0xff]  ;;  %v5771_v13 = vld [vmem:[#allocation19_spill] sm:$0xff] }
 0x2ac   : > { %v1932_v57 = vsel %vm1917_vm12, %v1905_v21, %v4844_v58  ;;  %v1624_v8 = vsel %vm1620_vm1, %v1597_v18, %v5759_v29  ;;  %v1947_v19 = vsel %vm1944_vm13, %v1920_v36, %v1440_v52  ;;  %v1663_v58 = vsel %vm1647_vm2, %v1636_v28, %v5762_v23  ;;  %v2748_v52 = vld [vmem:[%s2923_s28 + $0xd1] sm:$0xff]  ;;  %v5772_v36 = vld [vmem:[#allocation23_spill] sm:$0xff] }
 0x2ad   : > { %1317 = vrot.lane.b32.xlu1 %v2745_v30, %s2844_s19  ;;  %1293 = vrot.lane.b32.xlu0 %v2746_v54, %s2844_s19  ;;  %v1959_v49 = vsel %vm1944_vm13, %v1932_v57, %v1464_v4  ;;  %v1651_v16 = vsel %vm1647_vm2, %v1624_v8, %v5761_v3  ;;  %v1690_v4 = vsel %vm1674_vm3, %v1663_v58, %v5764_v42  ;;  %v5769_v30 = vld [vmem:[#allocation10_spill] sm:$0xff]  ;;  %v5770_v18 = vld [vmem:[#allocation13_spill] sm:$0xff] }
 0x2ae   : > { %v1678_v2 = vsel %vm1674_vm3, %v1651_v16, %v5763_v7  ;;  %v1717_v48 = vsel %vm1701_vm4, %v1690_v4, %v5767_v17  ;;  %v2749_v45 = vld [vmem:[%s2923_s28 + $0xd2] sm:$0xff] }
 0x2af   : > { %v1544_v46 = vpop.permute.xlu1 %1543  ;;  %v1520_v26 = vpop.permute.xlu0 %1519  ;;  %v1705_v1 = vsel %vm1701_vm4, %v1678_v2, %v5766_v56  ;;  %v1744_v54 = vsel %vm1728_vm5, %v1717_v48, %v5769_v30  ;;  %v2750_v28 = vld [vmem:[%s2923_s28 + $0x72] sm:$0xff] }
 0x2b0   : > { %v1974_v50 = vsel %vm1971_vm14, %v1947_v19, %v1520_v26  ;;  %v1986_v55 = vsel %vm1971_vm14, %v1959_v49, %v1544_v46  ;;  %v1732_v21 = vsel %vm1728_vm5, %v1705_v1, %v5768_v12  ;;  %v1771_v57 = vsel %vm1755_vm6, %v1744_v54, %v5771_v13  ;;  %v5773_v49 = vld [vmem:[#allocation28_spill] sm:$0xff]  ;;  %v2755_v56 = vld [vmem:[%s2923_s28 + $0x73] sm:$0xff]  ;;  %v2756_v54 = vld [vmem:[%s2923_s28 + $0xdb] sm:$0xff] }
 0x2b1   : > { %1395 = vrot.lane.b32.xlu1 %v2748_v52, %s2845_s27  ;;  %1371 = vrot.lane.b32.xlu0 %v5765_v20, %s2845_s27  ;;  %v1759_v25 = vsel %vm1755_vm6, %v1732_v21, %v5770_v18  ;;  %v1798_v8 = vsel %vm1782_vm7, %v1771_v57, %v4515_v51  ;;  %v2754_v20 = vld [vmem:[%s2923_s28 + $0xd3] sm:$0xff]  ;;  %v2757_v18 = vld [vmem:[%s2923_s28 + $0x7b] sm:$0xff]  ;;  %v5775_v57 = vld [vmem:[#allocation12_spill] sm:$0xff] }
 0x2b2   : > { %2555 = vmatprep.mubr.msk.f32.mxu0 %vm2013_vm15, %v1974_v50  ;;  %2573 = vmatprep.mubr.msk.f32.mxu1 %vm2013_vm15, %v1986_v55  ;;  %v1786_v29 = vsel %vm1782_vm7, %v1759_v25, %v5772_v36  ;;  %v1825_v46 = vsel %vm1809_vm8, %v1798_v8, %v4650_v61  ;;  %v2758_v36 = vld [vmem:[%s2923_s28 + $0x80] sm:$0xff] }
 0x2b3   : > { %v4974_v38 = vpop.permute.xlu1 %1229  ;;  %v4976_v39 = vpop.permute.xlu0 %1205  ;;  %v1813_v19 = vsel %vm1809_vm8, %v1786_v29, %v5773_v49  ;;  %v1852_v3 = vsel %vm1836_vm9, %v1825_v46, %v4764_v27  ;;  %v5774_v27 = vld [vmem:[#allocation15_spill] sm:$0xff] }
 0x2b4   : > { %v1840_v26 = vsel %vm1836_vm9, %v1813_v19, %v4749_v11  ;;  %v1879_v58 = vsel %vm1863_vm10, %v1852_v3, %v4817_v41  ;;  %v2751_v11 = vld [vmem:[%s2923_s28 + $0xd9] sm:$0xff] }
 0x2b5   : > { %1159 = vrot.lane.b32.xlu1 %v2749_v45, %s2842_s11  ;;  %1135 = vrot.lane.b32.xlu0 %v2750_v28, %s2842_s11  ;;  %v1867_v23 = vsel %vm1863_vm10, %v1840_v26, %v4799_v59  ;;  %v1906_v50 = vsel %vm1890_vm11, %v1879_v58, %v4836_v43  ;;  %v2759_v58 = vld [vmem:[%s2923_s28 + $0xe8] sm:$0xff] }
 0x2b6   : > { %v1894_v61 = vsel %vm1890_vm11, %v1867_v23, %v4838_v37  ;;  %v1933_v55 = vsel %vm1917_vm12, %v1906_v50, %v4858_v32 }
 0x2b7   : > { %v4998_v16 = vpop.permute.xlu1 %1307  ;;  %v5000_v51 = vpop.permute.xlu0 %1283  ;;  %v1921_v59 = vsel %vm1917_vm12, %v1894_v61, %v4860_v14  ;;  %v1960_v41 = vsel %vm1944_vm13, %v1933_v55, %v1466_v53  ;;  %v2752_v53 = vld [vmem:[%s2923_s28 + $0xda] sm:$0xff] }
 0x2b8   : > { %v1948_v43 = vsel %vm1944_vm13, %v1921_v59, %v1442_v63  ;;  %v2753_v63 = vld [vmem:[%s2923_s28 + $0x7a] sm:$0xff] }
 0x2b9   : > { %1397 = vrot.lane.b32.xlu1 %v2751_v11, %s2845_s27  ;;  %1373 = vrot.lane.b32.xlu0 %v5774_v27, %s2845_s27  ;;  %v5776_v61 = vld [vmem:[#allocation22_spill] sm:$0xff]  ;;  %v285_v27 = vld [vmem:[%s2923_s28 + $0xe2] sm:$0xff] }
 0x2ba   : > { %v5777_v11 = vld [vmem:[#allocation18_spill] sm:$0xff] }
 0x2bb   : > { %v1546_v7 = vpop.permute.xlu1 %1545  ;;  %v1522_v37 = vpop.permute.xlu0 %1521 }
 0x2bc   : > { %v1987_v2 = vsel %vm1971_vm14, %v1960_v41, %v1546_v7  ;;  %v1975_v42 = vsel %vm1971_vm14, %v1948_v43, %v1522_v37  ;;  %v2761_v41 = vld [vmem:[%s2923_s28 + $0x82] sm:$0xff]  ;;  %v1854_v43 = vsel %vm1836_vm9, %v4660_v9, %v4878_v33  ;;  %v1842_v7 = vsel %vm1836_vm9, %v4598_v62, %v4880_v34  ;;  %v5778_v33 = vld [vmem:[#allocation21_spill] sm:$0xff] }
 0x2bd   : > { %1475 = vrot.lane.b32.xlu1 %v2749_v45, %s2846_s20  ;;  %1451 = vrot.lane.b32.xlu0 %v2750_v28, %s2846_s20  ;;  %v1853_v45 = vsel %vm1836_vm9, %v4664_v6, %v4852_v60  ;;  %v1841_v28 = vsel %vm1836_vm9, %v4602_v15, %v4854_v5  ;;  %v2760_v6 = vld [vmem:[%s2923_s28 + $0x88] sm:$0xff] }
 0x2be   : > { %2556 = vmatmul.mubr.msk.f32.gmra.mrb[2].mxu0 %vm2013_vm15, %v1975_v42  ;;  %2574 = vmatmul.mubr.msk.f32.vlgmr.msra.gmra.mrb[0].mxu1 %vm2013_vm15, %v1987_v2  ;;  %v1880_v46 = vsel %vm1863_vm10, %v1853_v45, %v4901_v24  ;;  %v1868_v26 = vsel %vm1863_vm10, %v1841_v28, %v4903_v10  ;;  %v1881_v42 = vsel %vm1863_vm10, %v1854_v43, %v4974_v38 }
 0x2bf   : > { %v5026_v32 = vpop.permute.xlu1 %1309  ;;  %v5028_v14 = vpop.permute.xlu0 %1285  ;;  %v1907_v3 = vsel %vm1890_vm11, %v1880_v46, %v4998_v16  ;;  %v1895_v23 = vsel %vm1890_vm11, %v1868_v26, %v5000_v51  ;;  %v288_v26 = vld [vmem:[%s2923_s28 + $0xeb] sm:$0xff] }
 0x2c1   : > { %1161 = vrot.lane.b32.xlu1 %v2752_v53, %s2842_s11  ;;  %1137 = vrot.lane.b32.xlu0 %v2753_v63, %s2842_s11 }
 0x2c3   : > { %v1388_v4 = vpop.permute.xlu1 %1387  ;;  %v1364_v52 = vpop.permute.xlu0 %1363 }
 0x2c4   : > { %v1934_v15 = vsel %vm1917_vm12, %v1907_v3, %v1388_v4  ;;  %v1922_v60 = vsel %vm1917_vm12, %v1895_v23, %v1364_v52  ;;  %v5779_v4 = vld [vmem:[#allocation17_spill] sm:$0xff] }
 0x2c5   : > { %1239 = vrot.lane.b32.xlu1 %v2754_v20, %s2843_s17  ;;  %1215 = vrot.lane.b32.xlu0 %v2755_v56, %s2843_s17  ;;  %v289_v23 = vld [vmem:[%s2923_s28 + $0xf0] sm:$0xff] }
 0x2c7   : > { %v5038_v1 = vpop.permute.xlu1 %1151  ;;  %v5040_v17 = vpop.permute.xlu0 %1127 }
 0x2c9   : > { %1477 = vrot.lane.b32.xlu1 %v2752_v53, %s2846_s20  ;;  %1453 = vrot.lane.b32.xlu0 %v2753_v63, %s2846_s20  ;;  %v1869_v53 = vsel %vm1863_vm10, %v1842_v7, %v4976_v39  ;;  %v1908_v63 = vsel %vm1890_vm11, %v1881_v42, %v5026_v32  ;;  %v2767_v42 = vld [vmem:[%s2923_s28 + $0x91] sm:$0xff] }
 0x2ca   : > { %v1896_v9 = vsel %vm1890_vm11, %v1869_v53, %v5028_v14  ;;  %v292_v53 = vld [vmem:[%s2923_s28 + $0xf9] sm:$0xff] }
 0x2cb   : > { %v1390_v48 = vpop.permute.xlu1 %1389  ;;  %v1366_v12 = vpop.permute.xlu0 %1365 }
 0x2cc   : > { %v1935_v62 = vsel %vm1917_vm12, %v1908_v63, %v1390_v48  ;;  %v1923_v34 = vsel %vm1917_vm12, %v1896_v9, %v1366_v12 }
 0x2cd   : > { %1555 = vrot.lane.b32.xlu1 %v2754_v20, %s2847_s4  ;;  %1531 = vrot.lane.b32.xlu0 %v2755_v56, %s2847_s4  ;;  %v286_v56 = vld [vmem:[%s2923_s28 + $0xea] sm:$0xff] }
 0x2cf   : > { %v1468_v21 = vpop.permute.xlu1 %1467  ;;  %v1444_v30 = vpop.permute.xlu0 %1443 }
 0x2d0   : > { %v1961_v5 = vsel %vm1944_vm13, %v1934_v15, %v1468_v21  ;;  %v1949_v24 = vsel %vm1944_vm13, %v1922_v60, %v1444_v30  ;;  %v2762_v21 = vld [vmem:[%s2923_s28 + $0x8a] sm:$0xff] }
 0x2d1   : > { %1241 = vrot.lane.b32.xlu1 %v2756_v54, %s2843_s17  ;;  %1217 = vrot.lane.b32.xlu0 %v2757_v18, %s2843_s17  ;;  %v287_v30 = vld [vmem:[%s2923_s28 + $0xe3] sm:$0xff] }
 0x2d3   : > { %v5050_v25 = vpop.permute.xlu1 %1153  ;;  %v5052_v13 = vpop.permute.xlu0 %1129 }
 0x2d5   : > { %1319 = vrot.lane.b32.xlu1 %v5775_v57, %s2844_s19  ;;  %1295 = vrot.lane.b32.xlu0 %v2758_v36, %s2844_s19  ;;  %v2763_v57 = vld [vmem:[%s2923_s28 + $0x83] sm:$0xff] }
 0x2d7   : > { %v5058_v29 = vpop.permute.xlu1 %1231  ;;  %v5060_v8 = vpop.permute.xlu0 %1207 }
 0x2d9   : > { %1557 = vrot.lane.b32.xlu1 %v2756_v54, %s2847_s4  ;;  %1533 = vrot.lane.b32.xlu0 %v2757_v18, %s2847_s4 }
 0x2db   : > { %v1470_v49 = vpop.permute.xlu1 %1469  ;;  %v1446_v19 = vpop.permute.xlu0 %1445 }
 0x2dc   : > { %v1962_v38 = vsel %vm1944_vm13, %v1935_v62, %v1470_v49  ;;  %v1950_v39 = vsel %vm1944_vm13, %v1923_v34, %v1446_v19  ;;  %v293_v62 = vld [vmem:[%s2923_s28 + $0xf2] sm:$0xff]  ;;  %v1856_v34 = vsel %vm1836_vm9, %v4672_v47, %v5050_v25 }
 0x2dd   : > { %1321 = vrot.lane.b32.xlu1 %v2759_v58, %s2844_s19  ;;  %1297 = vrot.lane.b32.xlu0 %v2760_v6, %s2844_s19 }
 0x2df   : > { %v1548_v10 = vpop.permute.xlu1 %1547  ;;  %v1524_v16 = vpop.permute.xlu0 %1523 }
 0x2e0   : > { %v1988_v51 = vsel %vm1971_vm14, %v1961_v5, %v1548_v10  ;;  %v1976_v50 = vsel %vm1971_vm14, %v1949_v24, %v1524_v16  ;;  %v2765_v5 = vld [vmem:[%s2923_s28 + $0x90] sm:$0xff]  ;;  %v1843_v16 = vsel %vm1836_vm9, %v4612_v22, %v5040_v17 }
 0x2e1   : > { %1399 = vrot.lane.b32.xlu1 %v5776_v61, %s2845_s27  ;;  %2576 = vmatprep.mubr.msk.f32.mxu1 %vm2013_vm15, %v1988_v51  ;;  %v291_v17 = vld [vmem:[%s2923_s28 + $0xf1] sm:$0xff] }
 0x2e2   : > { %1375 = vrot.lane.b32.xlu0 %v5777_v11, %s2845_s27  ;;  %2558 = vmatprep.mubr.msk.f32.mxu0 %vm2013_vm15, %v1976_v50  ;;  %v1870_v11 = vsel %vm1863_vm10, %v1843_v16, %v5060_v8 }
 0x2e3   : > { %v5095_v55 = vpop.permute.xlu1 %1233  ;;  %v5097_v59 = vpop.permute.xlu0 %1209 }
 0x2e5   : > { %1163 = vrot.lane.b32.xlu1 %v285_v27, %s2842_s11 }
 0x2e6   : > { %1139 = vrot.lane.b32.xlu0 %v2761_v41, %s2842_s11 }
 0x2e7   : > { %v5108_v37 = vpop.permute.xlu1 %1311  ;;  %v5110_v2 = vpop.permute.xlu0 %1287 }
 0x2e9   : > { %1401 = vrot.lane.b32.xlu1 %v5778_v33, %s2845_s27  ;;  %v2768_v33 = vld [vmem:[%s2923_s28 + $0x99] sm:$0xff] }
 0x2ea   : > { %1377 = vrot.lane.b32.xlu0 %v5779_v4, %s2845_s27  ;;  %v5780_v4 = vld [vmem:[#allocation29_spill] sm:$0xff] }
 0x2eb   : > { %v1550_v32 = vpop.permute.xlu1 %1549  ;;  %v1526_v52 = vpop.permute.xlu0 %1525 }
 0x2ec   : > { %v1989_v14 = vsel %vm1971_vm14, %v1962_v38, %v1550_v32  ;;  %v1977_v20 = vsel %vm1971_vm14, %v1950_v39, %v1526_v52  ;;  %v1844_v38 = vsel %vm1836_vm9, %v5780_v4, %v5052_v13  ;;  %v1883_v52 = vsel %vm1863_vm10, %v1856_v34, %v5095_v55  ;;  %v5781_v13 = vld [vmem:[#allocation24_spill] sm:$0xff]  ;;  %v294_v55 = vld [vmem:[%s2923_s28 + $0xfa] sm:$0xff] }
 0x2ed   : > { %1479 = vrot.lane.b32.xlu1 %v285_v27, %s2846_s20  ;;  %2577 = vmatmul.mubr.msk.f32.gmra.mrb[2].mxu1 %vm2013_vm15, %v1989_v14  ;;  %v1871_v14 = vsel %vm1863_vm10, %v1844_v38, %v5097_v59 }
 0x2ee   : > { %1455 = vrot.lane.b32.xlu0 %v2761_v41, %s2846_s20  ;;  %2559 = vmatmul.mubr.msk.f32.gmra.mrb[4].mxu0 %vm2013_vm15, %v1977_v20  ;;  %v1897_v41 = vsel %vm1890_vm11, %v1870_v11, %v5110_v2 }
 0x2ef   : > { %v5135_v48 = vpop.permute.xlu1 %1313  ;;  %v5137_v12 = vpop.permute.xlu0 %1289 }
 0x2f0   : > { %v1910_v20 = vsel %vm1890_vm11, %v1883_v52, %v5135_v48 }
 0x2f1   : > { %1165 = vrot.lane.b32.xlu1 %v286_v56, %s2842_s11 }
 0x2f2   : > { %1141 = vrot.lane.b32.xlu0 %v2762_v21, %s2842_s11 }
 0x2f3   : > { %v1392_v54 = vpop.permute.xlu1 %1391  ;;  %v1368_v18 = vpop.permute.xlu0 %1367 }
 0x2f4   : > { %v1924_v22 = vsel %vm1917_vm12, %v1897_v41, %v1368_v18  ;;  %v5782_v18 = vld [vmem:[#allocation25_spill] sm:$0xff] }
 0x2f5   : > { %1243 = vrot.lane.b32.xlu1 %v287_v30, %s2843_s17 }
 0x2f6   : > { %1219 = vrot.lane.b32.xlu0 %v2763_v57, %s2843_s17 }
 0x2f7   : > { %v1156_v36 = vpop.permute.xlu1 %1155  ;;  %v1132_v45 = vpop.permute.xlu0 %1131 }
 0x2f8   : > { %v5148_v28 = vsel %vm1836_vm9, %v4688_v40, %v1156_v36  ;;  %v5152_v49 = vsel %vm1836_vm9, %v4622_v35, %v1132_v45  ;;  %v2764_v35 = vld [vmem:[%s2923_s28 + $0x8b] sm:$0xff] }
 0x2f9   : > { %1481 = vrot.lane.b32.xlu1 %v286_v56, %s2846_s20  ;;  %v1898_v56 = vsel %vm1890_vm11, %v1871_v14, %v5137_v12 }
 0x2fa   : > { %1457 = vrot.lane.b32.xlu0 %v2762_v21, %s2846_s20 }
 0x2fb   : > { %v5156_v19 = vpop.permute.xlu1 %1393  ;;  %v5158_v46 = vpop.permute.xlu0 %1369 }
 0x2fc   : > { %v1937_v47 = vsel %vm1917_vm12, %v1910_v20, %v5156_v19  ;;  %v1925_v25 = vsel %vm1917_vm12, %v1898_v56, %v5158_v46  ;;  %v5783_v19 = vld [vmem:[#allocation26_spill] sm:$0xff] }
 0x2fd   : > { %1559 = vrot.lane.b32.xlu1 %v287_v30, %s2847_s4  ;;  %v296_v46 = vld [vmem:[%s2923_s28 + $0xfb] sm:$0xff] }
 0x2fe   : > { %1535 = vrot.lane.b32.xlu0 %v2763_v57, %s2847_s4  ;;  %v295_v57 = vld [vmem:[%s2923_s28 + $0xf3] sm:$0xff] }
 0x2ff   : > { %v1472_v40 = vpop.permute.xlu1 %1471  ;;  %v1448_v3 = vpop.permute.xlu0 %1447 }
 0x300   : > { %v1951_v8 = vsel %vm1944_vm13, %v1924_v22, %v1448_v3  ;;  %v5784_v3 = vld [vmem:[#allocation27_spill] sm:$0xff] }
 0x301   : > { %1245 = vrot.lane.b32.xlu1 %v288_v26, %s2843_s17 }
 0x302   : > { %1221 = vrot.lane.b32.xlu0 %v2764_v35, %s2843_s17 }
 0x303   : > { %v1158_v58 = vpop.permute.xlu1 %1157  ;;  %v1134_v6 = vpop.permute.xlu0 %1133 }
 0x304   : > { %v5169_v15 = vsel %vm1836_vm9, %v4684_v31, %v1158_v58  ;;  %v5173_v60 = vsel %vm1836_vm9, %v4618_v0, %v1134_v6  ;;  %v290_v31 = vld [vmem:[%s2923_s28 + $0xf8] sm:$0xff]  ;;  %v1855_v0 = vsel %vm1836_vm9, %v4676_v44, %v5038_v1  ;;  %v5785_v58 = vld [vmem:[#allocation39_spill] sm:$0xff] }
 0x305   : > { %1323 = vrot.lane.b32.xlu1 %v289_v23, %s2844_s19  ;;  %v1882_v61 = vsel %vm1863_vm10, %v1855_v0, %v5058_v29  ;;  %v2766_v1 = vld [vmem:[%s2923_s28 + $0x98] sm:$0xff]  ;;  %s161_s28 = sand.u32 1, %s2823_s13  }
 0x306   : > { %1299 = vrot.lane.b32.xlu0 %v2765_v5, %s2844_s19  ;;  %v1909_v27 = vsel %vm1890_vm11, %v1882_v61, %v5108_v37  ;;  %v5786_v5 = vld [vmem:[#allocation33_spill] sm:$0xff]  ;;  %s5461_s9 = scalar_lea.sflag [#allocation3], %s161_s28 }
 0x307   : > { %v5178_v24 = vpop.permute.xlu1 %1235  ;;  %v5180_v10 = vpop.permute.xlu0 %1211  ;;  %v1936_v44 = vsel %vm1917_vm12, %v1909_v27, %v1392_v54  ;;  %v5787_v27 = vld [vmem:[#allocation38_spill] sm:$0xff] }
 0x308   : > { %v1963_v29 = vsel %vm1944_vm13, %v1936_v44, %v1472_v40  ;;  %v5788_v44 = vld [vmem:[#allocation30_spill] sm:$0xff] }
 0x309   : > { %1561 = vrot.lane.b32.xlu1 %v288_v26, %s2847_s4 }
 0x30a   : > { %1537 = vrot.lane.b32.xlu0 %v2764_v35, %s2847_s4 }
 0x30b   : > { %v1474_v51 = vpop.permute.xlu1 %1473  ;;  %v1450_v50 = vpop.permute.xlu0 %1449 }
 0x30c   : > { %v1964_v59 = vsel %vm1944_vm13, %v1937_v47, %v1474_v51  ;;  %v1952_v48 = vsel %vm1944_vm13, %v1925_v25, %v1450_v50 }
 0x30d   : > { %1325 = vrot.lane.b32.xlu1 %v290_v31, %s2844_s19 }
 0x30e   : > { %1301 = vrot.lane.b32.xlu0 %v2766_v1, %s2844_s19  ;;  %s2615_s19 = smul.u32 208, %s161_s28 }
 0x30f   : > { %v1552_v43 = vpop.permute.xlu1 %1551  ;;  %v1528_v7 = vpop.permute.xlu0 %1527 }
 0x310   : > { %v1990_v37 = vsel %vm1971_vm14, %v1963_v29, %v1552_v43  ;;  %v1978_v2 = vsel %vm1971_vm14, %v1951_v8, %v1528_v7  ;;  %v1884_v43 = vsel %vm1863_vm10, %v5148_v28, %v5178_v24  ;;  %v1872_v7 = vsel %vm1863_vm10, %v5152_v49, %v5180_v10 }
 0x311   : > { %1403 = vrot.lane.b32.xlu1 %v291_v17, %s2845_s27  ;;  %2579 = vmatprep.mubr.msk.f32.mxu1 %vm2013_vm15, %v1990_v37 }
 0x312   : > { %1379 = vrot.lane.b32.xlu0 %v2767_v42, %s2845_s27  ;;  %2561 = vmatprep.mubr.msk.f32.mxu0 %vm2013_vm15, %v1978_v2 }
 0x313   : > { %v5215_v63 = vpop.permute.xlu1 %1237  ;;  %v5217_v9 = vpop.permute.xlu0 %1213 }
 0x314   : > { %v1873_v52 = vsel %vm1863_vm10, %v5173_v60, %v5217_v9 }
 0x315   : > { %1405 = vrot.lane.b32.xlu1 %v292_v53, %s2845_s27 }
 0x316   : > { %1381 = vrot.lane.b32.xlu0 %v2768_v33, %s2845_s27  ;;  %s5332_s27 = scalar_lea.vmem [#allocation2], %s2615_s19 }
 0x317   : > { %v1316_v39 = vpop.permute.xlu1 %1315  ;;  %v1292_v32 = vpop.permute.xlu0 %1291  ;;  %s2405_s6 = sshll.u32 %s5332_s27, 4  ;;  %s5454_s6 = int_to_ptr.vmem [resolvable:$true] %s2405_s6 }
 0x318   : > { %v1911_v37 = vsel %vm1890_vm11, %v1884_v43, %v1316_v39  ;;  %v1899_v2 = vsel %vm1890_vm11, %v1872_v7, %v1292_v32  ;;  %v1885_v32 = vsel %vm1863_vm10, %v5169_v15, %v5215_v63  ;;  %s2769_s10 = scalar_lea.vmem %s5454_s6, 3328 }
 0x319   : > { %1483 = vrot.lane.b32.xlu1 %v293_v62, %s2846_s20  ;;  %p2770_p11 = scmp.ne.s32.totalorder %s5454_s6, %s2769_s10 }
 0x31a   : > { %1459 = vrot.lane.b32.xlu0 %v5781_v13, %s2846_s20 }
 0x31b   : > { %v1554_v21 = vpop.permute.xlu1 %1553  ;;  %v1530_v12 = vpop.permute.xlu0 %1529  ;;  %p2771_p12 = pnand %p2770_p11, %p2908_p5 }
 0x31c   : > { %v1991_v30 = vsel %vm1971_vm14, %v1964_v59, %v1554_v21  ;;  %v1979_v54 = vsel %vm1971_vm14, %v1952_v48, %v1530_v12 }
 0x31d   : > { %1485 = vrot.lane.b32.xlu1 %v294_v55, %s2846_s20  ;;  %2580 = vmatmul.mubr.msk.f32.gmra.mrb[4].mxu1 %vm2013_vm15, %v1991_v30  ;;  %p2772_p13 = pneg %p2771_p12 }
 0x31e   : > { %1461 = vrot.lane.b32.xlu0 %v5782_v18, %s2846_s20  ;;  %2562 = vmatmul.mubr.msk.f32.gmra.mrb[6].mxu0 %vm2013_vm15, %v1979_v54  ;;  %s2848_s20 = smov [#allocation2]  }
 0x31f   : > { %v1318_v36 = vpop.permute.xlu1 %1317  ;;  %v1294_v45 = vpop.permute.xlu0 %1293  ;;  %s2773_s24 = sshll.u32 %s2848_s20, 4  ;;  %s2774_s24 = int_to_ptr.vmem [resolvable:$false] %s2773_s24 }
 0x320   : > { %v1912_v14 = vsel %vm1890_vm11, %v1885_v32, %v1318_v36  ;;  %v1900_v20 = vsel %vm1890_vm11, %v1873_v52, %v1294_v45  ;;  %v5326_v36 = vld [vmem:[%s5505_s2] ss:$0 sm:$0xff]  ;;  %s2775_s25 = scalar_lea.vmem %s2774_s24, 6656  ;;  %p2776_p0 = scmp.lt.s32.totalorder %s5454_s6, %s2774_s24 }
 0x321   : > { %1563 = vrot.lane.b32.xlu1 %v295_v57, %s2847_s4  ;;  %p2777_p1 = scmp.lt.s32.totalorder %s2775_s25, %s2769_s10 }
 0x322   : > { %1539 = vrot.lane.b32.xlu0 %v5783_v19, %s2847_s4 }
 0x323   : > { %v1396_v26 = vpop.permute.xlu1 %1395  ;;  %v1372_v40 = vpop.permute.xlu0 %1371  ;;  %p2778_p2 = por %p2777_p1, %p2776_p0 }
 0x324   : > { %v1938_v42 = vsel %vm1917_vm12, %v1911_v37, %v1396_v26  ;;  %v1926_v53 = vsel %vm1917_vm12, %v1899_v2, %v1372_v40 }
 0x325   : > { %1565 = vrot.lane.b32.xlu1 %v296_v46, %s2847_s4  ;;  %p2779_p3 = pnand %p2778_p2, %p2772_p13 }
 0x326   : > { %1541 = vrot.lane.b32.xlu0 %v5784_v3, %s2847_s4 }
 0x327   : > { %v1160_v35 = vpop.permute.xlu1 %1159  ;;  %v1136_v23 = vpop.permute.xlu0 %1135 }
 0x328   : > { %v5264_v6 = vsel %vm1836_vm9, %v5785_v58, %v1160_v35  ;;  %v5268_v31 = vsel %vm1836_vm9, %v5786_v5, %v1136_v23 }
 0x32b   : > { %v1398_v0 = vpop.permute.xlu1 %1397  ;;  %v1374_v16 = vpop.permute.xlu0 %1373 }
 0x32c   : > { %v1939_v56 = vsel %vm1917_vm12, %v1912_v14, %v1398_v0  ;;  %v1927_v47 = vsel %vm1917_vm12, %v1900_v20, %v1374_v16 }
 0x32f   : > { %v1476_v51 = vpop.permute.xlu1 %1475  ;;  %v1452_v50 = vpop.permute.xlu0 %1451 }
 0x330   : > { %v1965_v33 = vsel %vm1944_vm13, %v1938_v42, %v1476_v51  ;;  %v1953_v62 = vsel %vm1944_vm13, %v1926_v53, %v1452_v50 }
 0x333   : > { %v1162_v61 = vpop.permute.xlu1 %1161  ;;  %v1138_v11 = vpop.permute.xlu0 %1137 }
 0x334   : > { %v5272_v41 = vsel %vm1836_vm9, %v5787_v27, %v1162_v61  ;;  %v5276_v22 = vsel %vm1836_vm9, %v5788_v44, %v1138_v11 }
 0x337   : > { %v5278_v1 = vpop.permute.xlu1 %1239  ;;  %v5280_v17 = vpop.permute.xlu0 %1215 }
 0x338   : > { %v1886_v61 = vsel %vm1863_vm10, %v5264_v6, %v5278_v1  ;;  %v1874_v27 = vsel %vm1863_vm10, %v5268_v31, %v5280_v17 }
 0x33b   : > { %v1478_v29 = vpop.permute.xlu1 %1477  ;;  %v1454_v8 = vpop.permute.xlu0 %1453 }
 0x33c   : > { %v1966_v25 = vsel %vm1944_vm13, %v1939_v56, %v1478_v29  ;;  %v1954_v13 = vsel %vm1944_vm13, %v1927_v47, %v1454_v8 }
 0x33f   : > { %v1556_v34 = vpop.permute.xlu1 %1555  ;;  %v1532_v4 = vpop.permute.xlu0 %1531 }
 0x340   : > { %v1992_v28 = vsel %vm1971_vm14, %v1965_v33, %v1556_v34  ;;  %v1980_v24 = vsel %vm1971_vm14, %v1953_v62, %v1532_v4 }
 0x341   : > { %2564 = vmatprep.mubr.msk.f32.mxu0 %vm2013_vm15, %v1980_v24  ;;  %2582 = vmatprep.mubr.msk.f32.mxu1 %vm2013_vm15, %v1992_v28 }
 0x343   : > { %v5298_v49 = vpop.permute.xlu1 %1241  ;;  %v5300_v10 = vpop.permute.xlu0 %1217 }
 0x344   : > { %v1887_v33 = vsel %vm1863_vm10, %v5272_v41, %v5298_v49  ;;  %v1875_v34 = vsel %vm1863_vm10, %v5276_v22, %v5300_v10 }
 0x347   : > { %v1320_v38 = vpop.permute.xlu1 %1319  ;;  %v1296_v39 = vpop.permute.xlu0 %1295 }
 0x348   : > { %v1913_v44 = vsel %vm1890_vm11, %v1886_v61, %v1320_v38  ;;  %v1901_v29 = vsel %vm1890_vm11, %v1874_v27, %v1296_v39 }
 0x34b   : > { %v1558_v55 = vpop.permute.xlu1 %1557  ;;  %v1534_v59 = vpop.permute.xlu0 %1533 }
 0x34c   : > { %v1993_v15 = vsel %vm1971_vm14, %v1966_v25, %v1558_v55  ;;  %v1981_v60 = vsel %vm1971_vm14, %v1954_v13, %v1534_v59  ;;  %v5789_v59 = vld [vmem:[#allocation41_spill] sm:$0xff] }
 0x34d   : > { %2565 = vmatmul.mubr.msk.f32.gmra.mrb[8].mxu0 %vm2013_vm15, %v1981_v60  ;;  %2583 = vmatmul.mubr.msk.f32.gmra.mrb[6].mxu1 %vm2013_vm15, %v1993_v15  ;;  %v5790_v60 = vld [vmem:[#allocation37_spill] sm:$0xff] }
 0x34f   : > { %v1322_v63 = vpop.permute.xlu1 %1321  ;;  %v1298_v9 = vpop.permute.xlu0 %1297 }
 0x350   : > { %v1914_v4 = vsel %vm1890_vm11, %v1887_v33, %v1322_v63  ;;  %v1902_v28 = vsel %vm1890_vm11, %v1875_v34, %v1298_v9  ;;  %v5791_v9 = vld [vmem:[#allocation40_spill] sm:$0xff] }
 0x353   : > { %v1400_v48 = vpop.permute.xlu1 %1399 }
 0x354   : > { %v1376_v21 = vpop.permute.xlu0 %1375  ;;  %v1940_v8 = vsel %vm1917_vm12, %v1913_v44, %v1400_v48 }
 0x355   : > { %v1928_v43 = vsel %vm1917_vm12, %v1901_v29, %v1376_v21  ;;  %v5792_v21 = vld [vmem:[#allocation34_spill] sm:$0xff] }
 0x357   : > { %v5318_v12 = vpop.permute.xlu1 %1163 }
 0x358   : > { %v5320_v30 = vpop.permute.xlu0 %1139  ;;  %v1861_v15 = vsel %vm1836_vm9, %v5789_v59, %v5318_v12 }
 0x359   : > { %v1849_v63 = vsel %vm1836_vm9, %v5790_v60, %v5320_v30 }
 0x35b   : > { %v1402_v54 = vpop.permute.xlu1 %1401 }
 0x35c   : > { %v1378_v18 = vpop.permute.xlu0 %1377  ;;  %v1941_v24 = vsel %vm1917_vm12, %v1914_v4, %v1402_v54 }
 0x35d   : > { %v1929_v38 = vsel %vm1917_vm12, %v1902_v28, %v1378_v18 }
 0x35f   : > { %v1480_v57 = vpop.permute.xlu1 %1479 }
 0x360   : > { %v1456_v45 = vpop.permute.xlu0 %1455  ;;  %v1967_v7 = vsel %vm1944_vm13, %v1940_v8, %v1480_v57 }
 0x361   : > { %v2554_v19 = vpop.f32.mrb[0].mxu0  ;;  %v1955_v2 = vsel %vm1944_vm13, %v1928_v43, %v1456_v45 }
 0x362   : > { %v2164_v46 = vadd.f32 %v2554_v19, %v5326_v36  ;;  %v2158_v26 = vpop.f32.mrb[1].mxu0 }
 0x363   : > { %v2159_v40 = vadd.f32 %v5326_v36, %v2158_v26  ;;  %v1166_v3 = vpop.permute.xlu1 %1165 }
 0x364   : > { %vm2288_vm0 = vcmp.ge.f32.partialorder %v2164_v46, 0.0  ;;  %v2314_v35 = vmul.f32 0.2, %v2164_v46  ;;  %v1142_v23 = vpop.permute.xlu0 %1141  ;;  %v1862_v48 = vsel %vm1836_vm9, %v5791_v9, %v1166_v3 }
 0x365   : > { %vm2287_vm1 = vcmp.ge.f32.partialorder %v2159_v40, 0.0  ;;  %v2313_v58 = vmul.f32 0.2, %v2159_v40  ;;  %v1850_v54 = vsel %vm1836_vm9, %v5792_v21, %v1142_v23 }
 0x366   : > { %v2340_v5 = vsel %vm2288_vm0, %v2164_v46, %v2314_v35 }
 0x367   : > { %2366 = vst [vmem:[%s5332_s27 + $0x8] sm:$0xff] %v2340_v5  ;;  %v2339_v0 = vsel %vm2287_vm1, %v2159_v40, %v2313_v58  ;;  %v1244_v16 = vpop.permute.xlu1 %1243 }
 0x368   : > { %2365 = vst [vmem:[%s5332_s27] sm:$0xff] %v2339_v0  ;;  %v1220_v51 = vpop.permute.xlu0 %1219  ;;  %v1888_v18 = vsel %vm1863_vm10, %v1861_v15, %v1244_v16 }
 0x369   : > { %v1876_v57 = vsel %vm1863_vm10, %v1849_v63, %v1220_v51 }
 0x36b   : > { %v1482_v50 = vpop.permute.xlu1 %1481 }
 0x36c   : > { %v1458_v11 = vpop.permute.xlu0 %1457  ;;  %v1968_v39 = vsel %vm1944_vm13, %v1941_v24, %v1482_v50 }
 0x36d   : > { %v1956_v52 = vsel %vm1944_vm13, %v1929_v38, %v1458_v11 }
 0x36f   : > { %v1560_v37 = vpop.permute.xlu1 %1559 }
 0x370   : > { %v1994_v6 = vsel %vm1971_vm14, %v1967_v7, %v1560_v37  ;;  %v1536_v1 = vpop.permute.xlu0 %1535 }
 0x371   : > { %v1982_v42 = vsel %vm1971_vm14, %v1955_v2, %v1536_v1  ;;  %2585 = vmatprep.mubr.msk.f32.mxu1 %vm2013_vm15, %v1994_v6 }
 0x372   : > { %2567 = vmatprep.mubr.msk.f32.mxu0 %vm2013_vm15, %v1982_v42 }
 0x373   : > { %v1246_v31 = vpop.permute.xlu1 %1245 }
 0x374   : > { %v1222_v17 = vpop.permute.xlu0 %1221  ;;  %v1889_v19 = vsel %vm1863_vm10, %v1862_v48, %v1246_v31 }
 0x375   : > { %v1877_v46 = vsel %vm1863_vm10, %v1850_v54, %v1222_v17 }
 0x377   : > { %v1324_v53 = vpop.permute.xlu1 %1323 }
 0x378   : > { %v1300_v62 = vpop.permute.xlu0 %1299  ;;  %v1915_v12 = vsel %vm1890_vm11, %v1888_v18, %v1324_v53 }
 0x379   : > { %v1903_v26 = vsel %vm1890_vm11, %v1876_v57, %v1300_v62 }
 0x37b   : > { %v1562_v32 = vpop.permute.xlu1 %1561 }
 0x37c   : > { %v1995_v41 = vsel %vm1971_vm14, %v1968_v39, %v1562_v32  ;;  %v1538_v49 = vpop.permute.xlu0 %1537 }
 0x37d   : > { %v1983_v14 = vsel %vm1971_vm14, %v1956_v52, %v1538_v49  ;;  %2586 = vmatmul.mubr.msk.f32.gmra.mrb[8].mxu1 %vm2013_vm15, %v1995_v41 }
 0x37e   : > { %2568 = vmatmul.mubr.msk.f32.gmra.mrb[10].mxu0 %vm2013_vm15, %v1983_v14 }
 0x37f   : > { %v1326_v22 = vpop.permute.xlu1 %1325 }
 0x380   : > { %v1302_v10 = vpop.permute.xlu0 %1301  ;;  %v1916_v40 = vsel %vm1890_vm11, %v1889_v19, %v1326_v22 }
 0x381   : > { %v1904_v3 = vsel %vm1890_vm11, %v1877_v46, %v1302_v10 }
 0x383   : > { %v1404_v20 = vpop.permute.xlu1 %1403 }
 0x384   : > { %v1380_v56 = vpop.permute.xlu0 %1379  ;;  %v1942_v35 = vsel %vm1917_vm12, %v1915_v12, %v1404_v20 }
 0x385   : > { %v1930_v23 = vsel %vm1917_vm12, %v1903_v26, %v1380_v56 }
 0x387   : > { %v1406_v47 = vpop.permute.xlu1 %1405 }
 0x388   : > { %v1382_v25 = vpop.permute.xlu0 %1381  ;;  %v1943_v0 = vsel %vm1917_vm12, %v1916_v40, %v1406_v47 }
 0x389   : > { %v1931_v16 = vsel %vm1917_vm12, %v1904_v3, %v1382_v25 }
 0x38b   : > { %v1484_v13 = vpop.permute.xlu1 %1483 }
 0x38c   : > { %v1460_v55 = vpop.permute.xlu0 %1459  ;;  %v1969_v27 = vsel %vm1944_vm13, %v1942_v35, %v1484_v13 }
 0x38d   : > { %v1957_v44 = vsel %vm1944_vm13, %v1930_v23, %v1460_v55 }
 0x38f   : > { %v1486_v45 = vpop.permute.xlu1 %1485 }
 0x390   : > { %v1462_v30 = vpop.permute.xlu0 %1461  ;;  %v1970_v33 = vsel %vm1944_vm13, %v1943_v0, %v1486_v45 }
 0x391   : > { %v2557_v58 = vpop.f32.mrb[2].mxu0  ;;  %v2575_v5 = vpop.f32.mrb[0].mxu1  ;;  %v1958_v28 = vsel %vm1944_vm13, %v1931_v16, %v1462_v30 }
 0x392   : > { %v2174_v51 = vadd.f32 %v2557_v58, %v5326_v36  ;;  %v2234_v50 = vadd.f32 %v2575_v5, %v5326_v36  ;;  %v2168_v61 = vpop.f32.mrb[3].mxu0  ;;  %v2228_v11 = vpop.f32.mrb[1].mxu1 }
 0x393   : > { %v2169_v29 = vadd.f32 %v5326_v36, %v2168_v61  ;;  %v2229_v8 = vadd.f32 %v5326_v36, %v2228_v11  ;;  %v1564_v43 = vpop.permute.xlu1 %1563 }
 0x394   : > { %vm2290_vm2 = vcmp.ge.f32.partialorder %v2174_v51, 0.0  ;;  %v2316_v7 = vmul.f32 0.2, %v2174_v51  ;;  %vm2302_vm3 = vcmp.ge.f32.partialorder %v2234_v50, 0.0  ;;  %v2328_v37 = vmul.f32 0.2, %v2234_v50  ;;  %v1540_v2 = vpop.permute.xlu0 %1539 }
 0x395   : > { %vm2289_vm4 = vcmp.ge.f32.partialorder %v2169_v29, 0.0  ;;  %v2315_v6 = vmul.f32 0.2, %v2169_v29  ;;  %vm2301_vm5 = vcmp.ge.f32.partialorder %v2229_v8, 0.0  ;;  %v2327_v1 = vmul.f32 0.2, %v2229_v8 }
 0x396   : > { %v2342_v42 = vsel %vm2290_vm2, %v2174_v51, %v2316_v7  ;;  %v2354_v31 = vsel %vm2302_vm3, %v2234_v50, %v2328_v37  ;;  %v1996_v17 = vsel %vm1971_vm14, %v1969_v27, %v1564_v43  ;;  %v1984_v53 = vsel %vm1971_vm14, %v1957_v44, %v1540_v2 }
 0x397   : > { %2368 = vst [vmem:[%s5332_s27 + $0x18] sm:$0xff] %v2342_v42  ;;  %2380 = vst [vmem:[%s5332_s27 + $0x78] sm:$0xff] %v2354_v31  ;;  %v2341_v62 = vsel %vm2289_vm4, %v2169_v29, %v2315_v6  ;;  %v2353_v34 = vsel %vm2301_vm5, %v2229_v8, %v2327_v1  ;;  %2570 = vmatprep.mubr.msk.f32.mxu0 %vm2013_vm15, %v1984_v53  ;;  %2588 = vmatprep.mubr.msk.f32.mxu1 %vm2013_vm15, %v1996_v17  ;;  %v1566_v4 = vpop.permute.xlu1 %1565 }
 0x398   : > { %2367 = vst [vmem:[%s5332_s27 + $0x10] sm:$0xff] %v2341_v62  ;;  %2379 = vst [vmem:[%s5332_s27 + $0x70] sm:$0xff] %v2353_v34  ;;  %v1997_v24 = vsel %vm1971_vm14, %v1970_v33, %v1566_v4  ;;  %v1542_v38 = vpop.permute.xlu0 %1541 }
 0x399   : > { %v1985_v39 = vsel %vm1971_vm14, %v1958_v28, %v1542_v38  ;;  %2589 = vmatmul.mubr.msk.f32.gmra.mrb[10].mxu1 %vm2013_vm15, %v1997_v24 }
 0x39a   : > { %2571 = vmatmul.mubr.msk.f32.gmra.mrb[12].mxu0 %vm2013_vm15, %v1985_v39 }
 0x3c0   : > { %v2578_v32 = vpop.f32.mrb[2].mxu1 }
 0x3c1   : > { %v2560_v52 = vpop.f32.mrb[4].mxu0  ;;  %v2244_v41 = vadd.f32 %v2578_v32, %v5326_v36  ;;  %v2238_v49 = vpop.f32.mrb[3].mxu1 }
 0x3c2   : > { %v2184_v14 = vadd.f32 %v2560_v52, %v5326_v36  ;;  %v2178_v22 = vpop.f32.mrb[5].mxu0  ;;  %v2239_v10 = vadd.f32 %v5326_v36, %v2238_v49 }
 0x3c3   : > { %vm2304_vm6 = vcmp.ge.f32.partialorder %v2244_v41, 0.0  ;;  %v2330_v20 = vmul.f32 0.2, %v2244_v41  ;;  %v2179_v56 = vadd.f32 %v5326_v36, %v2178_v22 }
 0x3c4   : > { %vm2292_vm7 = vcmp.ge.f32.partialorder %v2184_v14, 0.0  ;;  %v2318_v47 = vmul.f32 0.2, %v2184_v14  ;;  %vm2303_vm8 = vcmp.ge.f32.partialorder %v2239_v10, 0.0  ;;  %v2329_v25 = vmul.f32 0.2, %v2239_v10 }
 0x3c5   : > { %v2356_v13 = vsel %vm2304_vm6, %v2244_v41, %v2330_v20  ;;  %vm2291_vm9 = vcmp.ge.f32.partialorder %v2179_v56, 0.0  ;;  %v2317_v55 = vmul.f32 0.2, %v2179_v56 }
 0x3c6   : > { %v2344_v59 = vsel %vm2292_vm7, %v2184_v14, %v2318_v47  ;;  %2382 = vst [vmem:[%s5332_s27 + $0x88] sm:$0xff] %v2356_v13  ;;  %v2355_v15 = vsel %vm2303_vm8, %v2239_v10, %v2329_v25 }
 0x3c7   : > { %2370 = vst [vmem:[%s5332_s27 + $0x28] sm:$0xff] %v2344_v59  ;;  %v2343_v60 = vsel %vm2291_vm9, %v2179_v56, %v2317_v55  ;;  %2381 = vst [vmem:[%s5332_s27 + $0x80] sm:$0xff] %v2355_v15 }
 0x3c8   : > { %2369 = vst [vmem:[%s5332_s27 + $0x20] sm:$0xff] %v2343_v60 }
 0x3f0   : > { %v2581_v63 = vpop.f32.mrb[4].mxu1 }
 0x3f1   : > { %v2563_v9 = vpop.f32.mrb[6].mxu0  ;;  %v2254_v48 = vadd.f32 %v2581_v63, %v5326_v36  ;;  %v2248_v21 = vpop.f32.mrb[5].mxu1 }
 0x3f2   : > { %v2194_v54 = vadd.f32 %v2563_v9, %v5326_v36  ;;  %v2188_v18 = vpop.f32.mrb[7].mxu0  ;;  %v2249_v57 = vadd.f32 %v5326_v36, %v2248_v21 }
 0x3f3   : > { %vm2306_vm10 = vcmp.ge.f32.partialorder %v2254_v48, 0.0  ;;  %v2332_v45 = vmul.f32 0.2, %v2254_v48  ;;  %v2189_v19 = vadd.f32 %v5326_v36, %v2188_v18 }
 0x3f4   : > { %vm2294_vm11 = vcmp.ge.f32.partialorder %v2194_v54, 0.0  ;;  %v2320_v46 = vmul.f32 0.2, %v2194_v54  ;;  %vm2305_vm12 = vcmp.ge.f32.partialorder %v2249_v57, 0.0  ;;  %v2331_v12 = vmul.f32 0.2, %v2249_v57 }
 0x3f5   : > { %v2358_v26 = vsel %vm2306_vm10, %v2254_v48, %v2332_v45  ;;  %vm2293_vm13 = vcmp.ge.f32.partialorder %v2189_v19, 0.0  ;;  %v2319_v30 = vmul.f32 0.2, %v2189_v19 }
 0x3f6   : > { %v2346_v40 = vsel %vm2294_vm11, %v2194_v54, %v2320_v46  ;;  %2384 = vst [vmem:[%s5332_s27 + $0x98] sm:$0xff] %v2358_v26  ;;  %v2357_v3 = vsel %vm2305_vm12, %v2249_v57, %v2331_v12 }
 0x3f7   : > { %2372 = vst [vmem:[%s5332_s27 + $0x38] sm:$0xff] %v2346_v40  ;;  %v2345_v35 = vsel %vm2293_vm13, %v2189_v19, %v2319_v30  ;;  %2383 = vst [vmem:[%s5332_s27 + $0x90] sm:$0xff] %v2357_v3 }
 0x3f8   : > { %2371 = vst [vmem:[%s5332_s27 + $0x30] sm:$0xff] %v2345_v35 }
 0x420   : > { %v2566_v23 = vpop.f32.mrb[8].mxu0  ;;  %v2584_v58 = vpop.f32.mrb[6].mxu1 }
 0x421   : > { %v2204_v5 = vadd.f32 %v2566_v23, %v5326_v36  ;;  %v2264_v0 = vadd.f32 %v2584_v58, %v5326_v36  ;;  %v2198_v16 = vpop.f32.mrb[9].mxu0  ;;  %v2258_v51 = vpop.f32.mrb[7].mxu1 }
 0x422   : > { %v2199_v50 = vadd.f32 %v5326_v36, %v2198_v16  ;;  %v2259_v61 = vadd.f32 %v5326_v36, %v2258_v51 }
 0x423   : > { %vm2296_vm14 = vcmp.ge.f32.partialorder %v2204_v5, 0.0  ;;  %v2322_v11 = vmul.f32 0.2, %v2204_v5  ;;  %vm2308_vm15 = vcmp.ge.f32.partialorder %v2264_v0, 0.0  ;;  %v2334_v27 = vmul.f32 0.2, %v2264_v0 }
 0x424   : > { %vm2295_vm0 = vcmp.ge.f32.partialorder %v2199_v50, 0.0  ;;  %v2321_v44 = vmul.f32 0.2, %v2199_v50  ;;  %vm2307_vm1 = vcmp.ge.f32.partialorder %v2259_v61, 0.0  ;;  %v2333_v29 = vmul.f32 0.2, %v2259_v61 }
 0x425   : > { %v2348_v8 = vsel %vm2296_vm14, %v2204_v5, %v2322_v11  ;;  %v2360_v43 = vsel %vm2308_vm15, %v2264_v0, %v2334_v27 }
 0x426   : > { %2374 = vst [vmem:[%s5332_s27 + $0x48] sm:$0xff] %v2348_v8  ;;  %2386 = vst [vmem:[%s5332_s27 + $0xa8] sm:$0xff] %v2360_v43  ;;  %v2347_v7 = vsel %vm2295_vm0, %v2199_v50, %v2321_v44  ;;  %v2359_v37 = vsel %vm2307_vm1, %v2259_v61, %v2333_v29 }
 0x427   : > { %2373 = vst [vmem:[%s5332_s27 + $0x40] sm:$0xff] %v2347_v7  ;;  %2385 = vst [vmem:[%s5332_s27 + $0xa0] sm:$0xff] %v2359_v37 }
 0x450   : > { %v2587_v2 = vpop.f32.mrb[8].mxu1 }
 0x451   : > { %v2569_v6 = vpop.f32.mrb[10].mxu0  ;;  %v2274_v1 = vadd.f32 %v2587_v2, %v5326_v36  ;;  %v2268_v42 = vpop.f32.mrb[9].mxu1 }
 0x452   : > { %v2214_v31 = vadd.f32 %v2569_v6, %v5326_v36  ;;  %v2208_v17 = vpop.f32.mrb[11].mxu0  ;;  %v2269_v53 = vadd.f32 %v5326_v36, %v2268_v42 }
 0x453   : > { %vm2310_vm2 = vcmp.ge.f32.partialorder %v2274_v1, 0.0  ;;  %v2336_v33 = vmul.f32 0.2, %v2274_v1  ;;  %v2209_v62 = vadd.f32 %v5326_v36, %v2208_v17 }
 0x454   : > { %vm2298_vm3 = vcmp.ge.f32.partialorder %v2214_v31, 0.0  ;;  %v2324_v34 = vmul.f32 0.2, %v2214_v31  ;;  %vm2309_vm4 = vcmp.ge.f32.partialorder %v2269_v53, 0.0  ;;  %v2335_v4 = vmul.f32 0.2, %v2269_v53 }
 0x455   : > { %v2362_v28 = vsel %vm2310_vm2, %v2274_v1, %v2336_v33  ;;  %vm2297_vm5 = vcmp.ge.f32.partialorder %v2209_v62, 0.0  ;;  %v2323_v24 = vmul.f32 0.2, %v2209_v62 }
 0x456   : > { %v2350_v38 = vsel %vm2298_vm3, %v2214_v31, %v2324_v34  ;;  %2388 = vst [vmem:[%s5332_s27 + $0xb8] sm:$0xff] %v2362_v28  ;;  %v2361_v39 = vsel %vm2309_vm4, %v2269_v53, %v2335_v4 }
 0x457   : > { %2376 = vst [vmem:[%s5332_s27 + $0x58] sm:$0xff] %v2350_v38  ;;  %v2349_v32 = vsel %vm2297_vm5, %v2209_v62, %v2323_v24  ;;  %2387 = vst [vmem:[%s5332_s27 + $0xb0] sm:$0xff] %v2361_v39 }
 0x458   : > { %2375 = vst [vmem:[%s5332_s27 + $0x50] sm:$0xff] %v2349_v32 }
 0x46c   : > { %v2590_v52 = vpop.f32.mrb[10].mxu1 }
 0x46d   : > { %v2572_v41 = vpop.f32.mrb[12].mxu0  ;;  %v2284_v49 = vadd.f32 %v2590_v52, %v5326_v36  ;;  %v2278_v14 = vpop.f32.mrb[11].mxu1 }
 0x46e   : > { %v2224_v22 = vadd.f32 %v2572_v41, %v5326_v36  ;;  %v2218_v10 = vpop.f32.mrb[13].mxu0  ;;  %v2279_v20 = vadd.f32 %v5326_v36, %v2278_v14 }
 0x46f   : > { %vm2312_vm6 = vcmp.ge.f32.partialorder %v2284_v49, 0.0  ;;  %v2338_v56 = vmul.f32 0.2, %v2284_v49  ;;  %v2219_v47 = vadd.f32 %v5326_v36, %v2218_v10 }
 0x470   : > { %vm2300_vm7 = vcmp.ge.f32.partialorder %v2224_v22, 0.0  ;;  %v2326_v25 = vmul.f32 0.2, %v2224_v22  ;;  %vm2311_vm8 = vcmp.ge.f32.partialorder %v2279_v20, 0.0  ;;  %v2337_v13 = vmul.f32 0.2, %v2279_v20 }
 0x471   : > { %v2364_v55 = vsel %vm2312_vm6, %v2284_v49, %v2338_v56  ;;  %vm2299_vm9 = vcmp.ge.f32.partialorder %v2219_v47, 0.0  ;;  %v2325_v59 = vmul.f32 0.2, %v2219_v47 }
 0x472   : > { %v2352_v15 = vsel %vm2300_vm7, %v2224_v22, %v2326_v25  ;;  %2390 = vst [vmem:[%s5332_s27 + $0xc8] sm:$0xff] %v2364_v55  ;;  %v2363_v36 = vsel %vm2311_vm8, %v2279_v20, %v2337_v13 }
 0x473   : > { %2378 = vst [vmem:[%s5332_s27 + $0x68] sm:$0xff] %v2352_v15  ;;  %v2351_v60 = vsel %vm2299_vm9, %v2219_v47, %v2325_v59  ;;  %2389 = vst [vmem:[%s5332_s27 + $0xc0] sm:$0xff] %v2363_v36 }
 0x474   : > { %2377 = vst [vmem:[%s5332_s27 + $0x60] sm:$0xff] %v2351_v60 }
 0x475   : > { %2782 = shalt.err (!%p2779_p3)
}
 0x476   : > { %s2783_s26 = scalar_lea.hbm %s5451_s8, 3328  ;;  %s2787_s28 = scalar_lea.hbm %s5506_s3, 6656 }
 0x477   : > { %p2784_p4 = scmp.ne.s32.totalorder %s5451_s8, %s2783_s26  ;;  %p2788_p9 = scmp.lt.u32.totalorder %s5451_s8, %s5506_s3 }
 0x478   : > { %p2789_p10 = scmp.lt.u32.totalorder %s2787_s28, %s2783_s26  ;;  %p2791_p12 = scmp.lt.u32.totalorder %s2783_s26, %s5451_s8 }
 0x479   : > { %p2785_p7 = pnand %p2784_p4, %p2908_p5 }
 0x47a   : > { %p2790_p11 = por %p2789_p10, %p2788_p9 }
 0x47b   : > { %p2786_p8 = pneg %p2785_p7 }
 0x47c   : > { %p2792_p13 = por %p2791_p12, %p2790_p11 }
 0x47e   : > { %p2793_p0 = pnand %p2792_p13, %p2786_p8 }
 0x480   : > { %2796 = shalt.err (!%p2793_p0)
}
 0x481   : > { %s2849_s19 = smov 128  }
 0x482   : > { %2618 = dma.vmem_to_hbm [thread:$0]  (%p2908_p5), %s5454_s6, 3328, %s5451_s8, %s5461_s9, %s2849_s19, %s2849_s19, %s2834_s30  }
 0x483 PF: > { %p2624_p1 = scmp.ge.s32.totalorder %s2831_s15, 2  ;;  %s2420_s27 = sand.u32 1, %s2819_s12  }
 0x484   : > { %s2421_s5 = scalar_lea.sflag [#allocation3], %s2420_s27 }
 0x485   : > { %p2621_p2 = pnand %p2624_p1, %p2912_p6 }
 0x487   : > { %2814 = dma.done.wait (!%p2621_p2), %s2421_s5, 3328  }
 0x488   : > { %2816 = vsyncadd (!%p2621_p2), %s2421_s5, 4294963968  ;;  %p13_p3 = scmp.ge.s32.totalorder %s2895_s18, 4   ;;  %s5793_s12 = smov %s2823_s13 }
 0x489   : > { %s5794_s13 = smov %s2827_s14  ;;  %s5795_s14 = smov %s2906_s21 }
 0x48a   : > { %s5796_s15 = smov %s2895_s18  ;;  %15 = sbr.rel (!%p13_p3) target bundleno = 3 (0x3), region = 67 }
 0x491   :  { %2426 = vsyncpa [#allocation3], 1 }
 0x492   :  { %2428 = vsyncpa [#allocation3 + $0x1], 1 }

</bundles_post_ra>
